<compile_context>
chip_gen: v5e
topology: v5e:2x2
jax: 0.10.0
libtpu: 0.0.40
codegen_flags: <defaults>
</compile_context>

<pallas_src>
import functools

import jax
import jax.numpy as jnp
from jax.experimental import pallas as pl
from jax.experimental.pallas import tpu as pltpu


def _make_kernel(TB, H, W, Cin, C1, C2):
    HW = H * W

    def kernel(x_ref, w1_ref, b1_ref, w2_ref, b2_ref, pool_ref, o_ref,
               xp_ref, h1p_ref):
        # ---- stage padded conv1 input: zero 1-pixel border strips, write interior ----
        xp_ref[:, 0:1, :, :] = jnp.zeros((TB, 1, W + 2, Cin), jnp.float32)
        xp_ref[:, H + 1:H + 2, :, :] = jnp.zeros((TB, 1, W + 2, Cin), jnp.float32)
        xp_ref[:, :, 0:1, :] = jnp.zeros((TB, H + 2, 1, Cin), jnp.float32)
        xp_ref[:, :, W + 1:W + 2, :] = jnp.zeros((TB, H + 2, 1, Cin), jnp.float32)
        xp_ref[:, 1:H + 1, 1:W + 1, :] = x_ref[...]

        # ---- conv1: single im2col matmul (TB*HW, 9*Cin) @ (9*Cin, C1) ----
        p1 = jnp.concatenate(
            [xp_ref[:, kh:kh + H, kw:kw + W, :]
             for kh in range(3) for kw in range(3)],
            axis=-1).reshape(TB * HW, 9 * Cin).astype(jnp.bfloat16)
        acc1 = jnp.dot(p1, w1_ref[...], preferred_element_type=jnp.float32)
        h1 = jnp.maximum(acc1 + b1_ref[...], 0.0)            # (TB*HW, C1) f32

        # ---- stage padded conv2 input ----
        h1p_ref[:, 0:1, :, :] = jnp.zeros((TB, 1, W + 2, C1), jnp.float32)
        h1p_ref[:, H + 1:H + 2, :, :] = jnp.zeros((TB, 1, W + 2, C1), jnp.float32)
        h1p_ref[:, :, 0:1, :] = jnp.zeros((TB, H + 2, 1, C1), jnp.float32)
        h1p_ref[:, :, W + 1:W + 2, :] = jnp.zeros((TB, H + 2, 1, C1), jnp.float32)
        h1p_ref[:, 1:H + 1, 1:W + 1, :] = h1.reshape(TB, H, W, C1)

        # ---- conv2: single im2col matmul (TB*HW, 9*C1) @ (9*C1, C2) ----
        p2 = jnp.concatenate(
            [h1p_ref[:, kh:kh + H, kw:kw + W, :]
             for kh in range(3) for kw in range(3)],
            axis=-1).reshape(TB * HW, 9 * C1).astype(jnp.bfloat16)
        acc2 = jnp.dot(p2, w2_ref[...], preferred_element_type=jnp.float32)
        h2 = jnp.maximum(acc2 + b2_ref[...], 0.0)            # (TB*HW, C2) f32

        # ---- global average pool as an MXU matmul (block-diag ones, scaled by 1/HW) ----
        pooled = jnp.dot(pool_ref[...], h2, preferred_element_type=jnp.float32)
        o_ref[...] = pooled * (1.0 / HW)

    return kernel


@functools.partial(jax.jit, static_argnames=("block_batch",))
def feature_extractor(x_nchw, w1, b1, w2, b2, *, block_batch=8):
    """x_nchw: (N, Cin, H, W) f32; w*: OIHW conv weights; returns (N, C2, 1, 1) f32."""
    N, Cin, H, W = x_nchw.shape
    C1 = w1.shape[0]
    C2 = w2.shape[0]
    TB = min(block_batch, N)
    n_blocks = pl.cdiv(N, TB)
    Npad = n_blocks * TB

    # Layout conversion only (transpose + cast fuse into one XLA op); no HBM pad pass.
    x_nhwc = jnp.transpose(x_nchw, (0, 2, 3, 1)).astype(jnp.float32)
    if Npad != N:
        x_nhwc = jnp.pad(x_nhwc, ((0, Npad - N), (0, 0), (0, 0), (0, 0)))

    # im2col weight layout: row index = (kh*3 + kw)*Cin + cin, matching kernel concat order.
    w1_k = jnp.transpose(w1, (2, 3, 1, 0)).reshape(9 * Cin, C1).astype(jnp.bfloat16)
    w2_k = jnp.transpose(w2, (2, 3, 1, 0)).reshape(9 * C1, C2).astype(jnp.bfloat16)
    b1_k = b1.reshape(1, C1).astype(jnp.float32)
    b2_k = b2.reshape(1, C2).astype(jnp.float32)
    # Block-diagonal "sum pixels of image b" matrix; kernel scales by 1/(H*W).
    pool = jnp.repeat(jnp.eye(TB, dtype=jnp.float32), H * W, axis=1)   # (TB, TB*H*W)

    out = pl.pallas_call(
        _make_kernel(TB, H, W, Cin, C1, C2),
        out_shape=jax.ShapeDtypeStruct((Npad, C2), jnp.float32),
        grid=(n_blocks,),
        in_specs=[
            pl.BlockSpec((TB, H, W, Cin), lambda n: (n, 0, 0, 0)),
            pl.BlockSpec((9 * Cin, C1), lambda n: (0, 0)),
            pl.BlockSpec((1, C1), lambda n: (0, 0)),
            pl.BlockSpec((9 * C1, C2), lambda n: (0, 0)),
            pl.BlockSpec((1, C2), lambda n: (0, 0)),
            pl.BlockSpec((TB, TB * H * W), lambda n: (0, 0)),
        ],
        out_specs=pl.BlockSpec((TB, C2), lambda n: (n, 0)),
        scratch_shapes=[
            pltpu.VMEM((TB, H + 2, W + 2, Cin), jnp.float32),
            pltpu.VMEM((TB, H + 2, W + 2, C1), jnp.float32),
        ],
        compiler_params=pltpu.CompilerParams(
            dimension_semantics=("parallel",)),
    )(x_nhwc, w1_k, b1_k, w2_k, b2_k, pool)

    # (Npad, C2) -> (N, C2, 1, 1)  (matches AdaptiveAvgPool2d(1) NCHW output)
    return out[:N].reshape(N, C2, 1, 1)


def _reference(x, w1, b1, w2, b2):
    # Same precision policy as the kernel: bf16 matmul operands, f32 accumulation.
    dn = ("NCHW", "OIHW", "NCHW")
    h = jax.lax.conv_general_dilated(
        x.astype(jnp.bfloat16), w1.astype(jnp.bfloat16), (1, 1), "SAME",
        dimension_numbers=dn, preferred_element_type=jnp.float32)
    h = jax.nn.relu(h + b1[None, :, None, None])
    h = jax.lax.conv_general_dilated(
        h.astype(jnp.bfloat16), w2.astype(jnp.bfloat16), (1, 1), "SAME",
        dimension_numbers=dn, preferred_element_type=jnp.float32)
    h = jax.nn.relu(h + b2[None, :, None, None])
    return jnp.mean(h, axis=(2, 3), keepdims=True)


if __name__ == "__main__":
    N, Cin, H, W = 2, 4, 16, 16
    C1, C2 = 32, 32

    key = jax.random.PRNGKey(0)
    kx, kw1, kb1, kw2, kb2 = jax.random.split(key, 5)
    x = jax.random.normal(kx, (N, Cin, H, W), jnp.float32)
    w1 = jax.random.normal(kw1, (C1, Cin, 3, 3), jnp.float32) * 0.1
    b1 = jax.random.normal(kb1, (C1,), jnp.float32) * 0.1
    w2 = jax.random.normal(kw2, (C2, C1, 3, 3), jnp.float32) * 0.1
    b2 = jax.random.normal(kb2, (C2,), jnp.float32) * 0.1

    out = feature_extractor(x, w1, b1, w2, b2)
    jax.block_until_ready(out)

    ref = _reference(x, w1, b1, w2, b2)
    assert out.shape == (N, C2, 1, 1), out.shape
    assert jnp.allclose(out, ref, atol=1e-3, rtol=1e-3), float(
        jnp.max(jnp.abs(out - ref))
    )
    print("KERNEL_OK")
</pallas_src>

<mosaic_0001>
module attributes {stable_mosaic.version = 11 : i64} {
  func.func @kernel(%arg0: i32, %arg1: memref<2x16x16x4xf32, #tpu.memory_space<vmem>>, %arg2: memref<36x32xbf16, #tpu.memory_space<vmem>>, %arg3: memref<1x32xf32, #tpu.memory_space<vmem>>, %arg4: memref<288x32xbf16, #tpu.memory_space<vmem>>, %arg5: memref<1x32xf32, #tpu.memory_space<vmem>>, %arg6: memref<2x512xf32, #tpu.memory_space<vmem>>, %arg7: memref<2x32xf32, #tpu.memory_space<vmem>>, %arg8: memref<2x18x18x4xf32, #tpu.memory_space<vmem>>, %arg9: memref<2x18x18x32xf32, #tpu.memory_space<vmem>>) attributes {dimension_semantics = [#tpu.dimension_semantics<parallel>], iteration_bounds = array<i64: 1>, scalar_prefetch = 0 : i64, scratch_operands = 2 : i64, tpu.core_type = #tpu.core_type<tc>, window_params = [{transform_indices = @transform_0, window_bounds = array<i64: 2, 16, 16, 4>}, {pipeline_mode = #tpu.pipeline_mode<synchronous>, transform_indices = @transform_1, window_bounds = array<i64: 36, 32>}, {pipeline_mode = #tpu.pipeline_mode<synchronous>, transform_indices = @transform_2, window_bounds = array<i64: 1, 32>}, {pipeline_mode = #tpu.pipeline_mode<synchronous>, transform_indices = @transform_3, window_bounds = array<i64: 288, 32>}, {pipeline_mode = #tpu.pipeline_mode<synchronous>, transform_indices = @transform_4, window_bounds = array<i64: 1, 32>}, {pipeline_mode = #tpu.pipeline_mode<synchronous>, transform_indices = @transform_5, window_bounds = array<i64: 2, 512>}, {transform_indices = @transform_6, window_bounds = array<i64: 2, 32>}]} {
    %cst = arith.constant 0.000000e+00 : f32
    %0 = vector.broadcast %cst : f32 to vector<2x1x18x4xf32>
    %c0 = arith.constant 0 : index
    %c0_0 = arith.constant 0 : index
    %c0_1 = arith.constant 0 : index
    %c0_2 = arith.constant 0 : index
    %1 = vector.load %arg8[%c0, %c0_0, %c0_1, %c0_2] : memref<2x18x18x4xf32, #tpu.memory_space<vmem>>, vector<2x1x18x4xf32>
    tpu.vector_store %arg8[%c0, %c0_0, %c0_1, %c0_2], %0 {strides = array<i32>} : memref<2x18x18x4xf32, #tpu.memory_space<vmem>>, vector<2x1x18x4xf32>,
    %cst_3 = arith.constant 0.000000e+00 : f32
    %2 = vector.broadcast %cst_3 : f32 to vector<2x1x18x4xf32>
    %c0_4 = arith.constant 0 : index
    %c17 = arith.constant 17 : index
    %c0_5 = arith.constant 0 : index
    %c0_6 = arith.constant 0 : index
    %3 = vector.load %arg8[%c0_4, %c17, %c0_5, %c0_6] : memref<2x18x18x4xf32, #tpu.memory_space<vmem>>, vector<2x1x18x4xf32>
    tpu.vector_store %arg8[%c0_4, %c17, %c0_5, %c0_6], %2 {strides = array<i32>} : memref<2x18x18x4xf32, #tpu.memory_space<vmem>>, vector<2x1x18x4xf32>,
    %cst_7 = arith.constant 0.000000e+00 : f32
    %4 = vector.broadcast %cst_7 : f32 to vector<2x18x1x4xf32>
    %c0_8 = arith.constant 0 : index
    %c0_9 = arith.constant 0 : index
    %c0_10 = arith.constant 0 : index
    %c0_11 = arith.constant 0 : index
    %5 = vector.load %arg8[%c0_8, %c0_9, %c0_10, %c0_11] : memref<2x18x18x4xf32, #tpu.memory_space<vmem>>, vector<2x18x1x4xf32>
    tpu.vector_store %arg8[%c0_8, %c0_9, %c0_10, %c0_11], %4 {strides = array<i32>} : memref<2x18x18x4xf32, #tpu.memory_space<vmem>>, vector<2x18x1x4xf32>,
    %cst_12 = arith.constant 0.000000e+00 : f32
    %6 = vector.broadcast %cst_12 : f32 to vector<2x18x1x4xf32>
    %c0_13 = arith.constant 0 : index
    %c0_14 = arith.constant 0 : index
    %c17_15 = arith.constant 17 : index
    %c0_16 = arith.constant 0 : index
    %7 = vector.load %arg8[%c0_13, %c0_14, %c17_15, %c0_16] : memref<2x18x18x4xf32, #tpu.memory_space<vmem>>, vector<2x18x1x4xf32>
    tpu.vector_store %arg8[%c0_13, %c0_14, %c17_15, %c0_16], %6 {strides = array<i32>} : memref<2x18x18x4xf32, #tpu.memory_space<vmem>>, vector<2x18x1x4xf32>,
    %c0_17 = arith.constant 0 : index
    %c0_18 = arith.constant 0 : index
    %c0_19 = arith.constant 0 : index
    %c0_20 = arith.constant 0 : index
    %8 = vector.load %arg1[%c0_17, %c0_18, %c0_19, %c0_20] : memref<2x16x16x4xf32, #tpu.memory_space<vmem>>, vector<2x16x16x4xf32>
    %c0_21 = arith.constant 0 : index
    %c1 = arith.constant 1 : index
    %c1_22 = arith.constant 1 : index
    %c0_23 = arith.constant 0 : index
    %9 = vector.load %arg8[%c0_21, %c1, %c1_22, %c0_23] : memref<2x18x18x4xf32, #tpu.memory_space<vmem>>, vector<2x16x16x4xf32>
    tpu.vector_store %arg8[%c0_21, %c1, %c1_22, %c0_23], %8 {strides = array<i32>} : memref<2x18x18x4xf32, #tpu.memory_space<vmem>>, vector<2x16x16x4xf32>,
    %c0_24 = arith.constant 0 : index
    %c0_25 = arith.constant 0 : index
    %c0_26 = arith.constant 0 : index
    %c0_27 = arith.constant 0 : index
    %10 = vector.load %arg8[%c0_24, %c0_25, %c0_26, %c0_27] : memref<2x18x18x4xf32, #tpu.memory_space<vmem>>, vector<2x16x16x4xf32>
    %c0_28 = arith.constant 0 : index
    %c0_29 = arith.constant 0 : index
    %c1_30 = arith.constant 1 : index
    %c0_31 = arith.constant 0 : index
    %11 = vector.load %arg8[%c0_28, %c0_29, %c1_30, %c0_31] : memref<2x18x18x4xf32, #tpu.memory_space<vmem>>, vector<2x16x16x4xf32>
    %c0_32 = arith.constant 0 : index
    %c0_33 = arith.constant 0 : index
    %c2 = arith.constant 2 : index
    %c0_34 = arith.constant 0 : index
    %12 = vector.load %arg8[%c0_32, %c0_33, %c2, %c0_34] : memref<2x18x18x4xf32, #tpu.memory_space<vmem>>, vector<2x16x16x4xf32>
    %c0_35 = arith.constant 0 : index
    %c1_36 = arith.constant 1 : index
    %c0_37 = arith.constant 0 : index
    %c0_38 = arith.constant 0 : index
    %13 = vector.load %arg8[%c0_35, %c1_36, %c0_37, %c0_38] : memref<2x18x18x4xf32, #tpu.memory_space<vmem>>, vector<2x16x16x4xf32>
    %c0_39 = arith.constant 0 : index
    %c1_40 = arith.constant 1 : index
    %c1_41 = arith.constant 1 : index
    %c0_42 = arith.constant 0 : index
    %14 = vector.load %arg8[%c0_39, %c1_40, %c1_41, %c0_42] : memref<2x18x18x4xf32, #tpu.memory_space<vmem>>, vector<2x16x16x4xf32>
    %c0_43 = arith.constant 0 : index
    %c1_44 = arith.constant 1 : index
    %c2_45 = arith.constant 2 : index
    %c0_46 = arith.constant 0 : index
    %15 = vector.load %arg8[%c0_43, %c1_44, %c2_45, %c0_46] : memref<2x18x18x4xf32, #tpu.memory_space<vmem>>, vector<2x16x16x4xf32>
    %c0_47 = arith.constant 0 : index
    %c2_48 = arith.constant 2 : index
    %c0_49 = arith.constant 0 : index
    %c0_50 = arith.constant 0 : index
    %16 = vector.load %arg8[%c0_47, %c2_48, %c0_49, %c0_50] : memref<2x18x18x4xf32, #tpu.memory_space<vmem>>, vector<2x16x16x4xf32>
    %c0_51 = arith.constant 0 : index
    %c2_52 = arith.constant 2 : index
    %c1_53 = arith.constant 1 : index
    %c0_54 = arith.constant 0 : index
    %17 = vector.load %arg8[%c0_51, %c2_52, %c1_53, %c0_54] : memref<2x18x18x4xf32, #tpu.memory_space<vmem>>, vector<2x16x16x4xf32>
    %c0_55 = arith.constant 0 : index
    %c2_56 = arith.constant 2 : index
    %c2_57 = arith.constant 2 : index
    %c0_58 = arith.constant 0 : index
    %18 = vector.load %arg8[%c0_55, %c2_56, %c2_57, %c0_58] : memref<2x18x18x4xf32, #tpu.memory_space<vmem>>, vector<2x16x16x4xf32>
    %19 = tpu.concatenate %10, %11, %12, %13, %14, %15, %16, %17, %18 in 3 : vector<2x16x16x4xf32>, vector<2x16x16x4xf32>, vector<2x16x16x4xf32>, vector<2x16x16x4xf32>, vector<2x16x16x4xf32>, vector<2x16x16x4xf32>, vector<2x16x16x4xf32>, vector<2x16x16x4xf32>, vector<2x16x16x4xf32> -> vector<2x16x16x36xf32>
    %20 = vector.shape_cast %19 : vector<2x16x16x36xf32> to vector<512x36xf32>
    %21 = arith.truncf %20 : vector<512x36xf32> to vector<512x36xbf16>
    %c0_59 = arith.constant 0 : index
    %c0_60 = arith.constant 0 : index
    %22 = vector.load %arg2[%c0_59, %c0_60] : memref<36x32xbf16, #tpu.memory_space<vmem>>, vector<36x32xbf16>
    %cst_61 = arith.constant dense<0.000000e+00> : vector<512x32xf32>
    %23 = tpu.matmul %21, %22, %cst_61 {dimension_numbers = #tpu.dot_dimension_numbers<[1], [0], [0], [1], [0, 0, 1, 1], [], []>} : vector<512x36xbf16>, vector<36x32xbf16>, vector<512x32xf32> -> vector<512x32xf32>
    %c0_62 = arith.constant 0 : index
    %c0_63 = arith.constant 0 : index
    %24 = vector.load %arg3[%c0_62, %c0_63] : memref<1x32xf32, #tpu.memory_space<vmem>>, vector<1x32xf32>
    %25 = vector.broadcast %24 : vector<1x32xf32> to vector<512x32xf32>
    %26 = arith.addf %23, %25 : vector<512x32xf32>
    %cst_64 = arith.constant 0.000000e+00 : f32
    %27 = vector.broadcast %cst_64 : f32 to vector<512x32xf32>
    %28 = arith.maximumf %26, %27 : vector<512x32xf32>
    %cst_65 = arith.constant 0.000000e+00 : f32
    %29 = vector.broadcast %cst_65 : f32 to vector<2x1x18x32xf32>
    %c0_66 = arith.constant 0 : index
    %c0_67 = arith.constant 0 : index
    %c0_68 = arith.constant 0 : index
    %c0_69 = arith.constant 0 : index
    %30 = vector.load %arg9[%c0_66, %c0_67, %c0_68, %c0_69] : memref<2x18x18x32xf32, #tpu.memory_space<vmem>>, vector<2x1x18x32xf32>
    tpu.vector_store %arg9[%c0_66, %c0_67, %c0_68, %c0_69], %29 {strides = array<i32>} : memref<2x18x18x32xf32, #tpu.memory_space<vmem>>, vector<2x1x18x32xf32>,
    %cst_70 = arith.constant 0.000000e+00 : f32
    %31 = vector.broadcast %cst_70 : f32 to vector<2x1x18x32xf32>
    %c0_71 = arith.constant 0 : index
    %c17_72 = arith.constant 17 : index
    %c0_73 = arith.constant 0 : index
    %c0_74 = arith.constant 0 : index
    %32 = vector.load %arg9[%c0_71, %c17_72, %c0_73, %c0_74] : memref<2x18x18x32xf32, #tpu.memory_space<vmem>>, vector<2x1x18x32xf32>
    tpu.vector_store %arg9[%c0_71, %c17_72, %c0_73, %c0_74], %31 {strides = array<i32>} : memref<2x18x18x32xf32, #tpu.memory_space<vmem>>, vector<2x1x18x32xf32>,
    %cst_75 = arith.constant 0.000000e+00 : f32
    %33 = vector.broadcast %cst_75 : f32 to vector<2x18x1x32xf32>
    %c0_76 = arith.constant 0 : index
    %c0_77 = arith.constant 0 : index
    %c0_78 = arith.constant 0 : index
    %c0_79 = arith.constant 0 : index
    %34 = vector.load %arg9[%c0_76, %c0_77, %c0_78, %c0_79] : memref<2x18x18x32xf32, #tpu.memory_space<vmem>>, vector<2x18x1x32xf32>
    tpu.vector_store %arg9[%c0_76, %c0_77, %c0_78, %c0_79], %33 {strides = array<i32>} : memref<2x18x18x32xf32, #tpu.memory_space<vmem>>, vector<2x18x1x32xf32>,
    %cst_80 = arith.constant 0.000000e+00 : f32
    %35 = vector.broadcast %cst_80 : f32 to vector<2x18x1x32xf32>
    %c0_81 = arith.constant 0 : index
    %c0_82 = arith.constant 0 : index
    %c17_83 = arith.constant 17 : index
    %c0_84 = arith.constant 0 : index
    %36 = vector.load %arg9[%c0_81, %c0_82, %c17_83, %c0_84] : memref<2x18x18x32xf32, #tpu.memory_space<vmem>>, vector<2x18x1x32xf32>
    tpu.vector_store %arg9[%c0_81, %c0_82, %c17_83, %c0_84], %35 {strides = array<i32>} : memref<2x18x18x32xf32, #tpu.memory_space<vmem>>, vector<2x18x1x32xf32>,
    %37 = vector.shape_cast %28 : vector<512x32xf32> to vector<2x16x16x32xf32>
    %c0_85 = arith.constant 0 : index
    %c1_86 = arith.constant 1 : index
    %c1_87 = arith.constant 1 : index
    %c0_88 = arith.constant 0 : index
    %38 = vector.load %arg9[%c0_85, %c1_86, %c1_87, %c0_88] : memref<2x18x18x32xf32, #tpu.memory_space<vmem>>, vector<2x16x16x32xf32>
    tpu.vector_store %arg9[%c0_85, %c1_86, %c1_87, %c0_88], %37 {strides = array<i32>} : memref<2x18x18x32xf32, #tpu.memory_space<vmem>>, vector<2x16x16x32xf32>,
    %c0_89 = arith.constant 0 : index
    %c0_90 = arith.constant 0 : index
    %c0_91 = arith.constant 0 : index
    %c0_92 = arith.constant 0 : index
    %39 = vector.load %arg9[%c0_89, %c0_90, %c0_91, %c0_92] : memref<2x18x18x32xf32, #tpu.memory_space<vmem>>, vector<2x16x16x32xf32>
    %c0_93 = arith.constant 0 : index
    %c0_94 = arith.constant 0 : index
    %c1_95 = arith.constant 1 : index
    %c0_96 = arith.constant 0 : index
    %40 = vector.load %arg9[%c0_93, %c0_94, %c1_95, %c0_96] : memref<2x18x18x32xf32, #tpu.memory_space<vmem>>, vector<2x16x16x32xf32>
    %c0_97 = arith.constant 0 : index
    %c0_98 = arith.constant 0 : index
    %c2_99 = arith.constant 2 : index
    %c0_100 = arith.constant 0 : index
    %41 = vector.load %arg9[%c0_97, %c0_98, %c2_99, %c0_100] : memref<2x18x18x32xf32, #tpu.memory_space<vmem>>, vector<2x16x16x32xf32>
    %c0_101 = arith.constant 0 : index
    %c1_102 = arith.constant 1 : index
    %c0_103 = arith.constant 0 : index
    %c0_104 = arith.constant 0 : index
    %42 = vector.load %arg9[%c0_101, %c1_102, %c0_103, %c0_104] : memref<2x18x18x32xf32, #tpu.memory_space<vmem>>, vector<2x16x16x32xf32>
    %c0_105 = arith.constant 0 : index
    %c1_106 = arith.constant 1 : index
    %c1_107 = arith.constant 1 : index
    %c0_108 = arith.constant 0 : index
    %43 = vector.load %arg9[%c0_105, %c1_106, %c1_107, %c0_108] : memref<2x18x18x32xf32, #tpu.memory_space<vmem>>, vector<2x16x16x32xf32>
    %c0_109 = arith.constant 0 : index
    %c1_110 = arith.constant 1 : index
    %c2_111 = arith.constant 2 : index
    %c0_112 = arith.constant 0 : index
    %44 = vector.load %arg9[%c0_109, %c1_110, %c2_111, %c0_112] : memref<2x18x18x32xf32, #tpu.memory_space<vmem>>, vector<2x16x16x32xf32>
    %c0_113 = arith.constant 0 : index
    %c2_114 = arith.constant 2 : index
    %c0_115 = arith.constant 0 : index
    %c0_116 = arith.constant 0 : index
    %45 = vector.load %arg9[%c0_113, %c2_114, %c0_115, %c0_116] : memref<2x18x18x32xf32, #tpu.memory_space<vmem>>, vector<2x16x16x32xf32>
    %c0_117 = arith.constant 0 : index
    %c2_118 = arith.constant 2 : index
    %c1_119 = arith.constant 1 : index
    %c0_120 = arith.constant 0 : index
    %46 = vector.load %arg9[%c0_117, %c2_118, %c1_119, %c0_120] : memref<2x18x18x32xf32, #tpu.memory_space<vmem>>, vector<2x16x16x32xf32>
    %c0_121 = arith.constant 0 : index
    %c2_122 = arith.constant 2 : index
    %c2_123 = arith.constant 2 : index
    %c0_124 = arith.constant 0 : index
    %47 = vector.load %arg9[%c0_121, %c2_122, %c2_123, %c0_124] : memref<2x18x18x32xf32, #tpu.memory_space<vmem>>, vector<2x16x16x32xf32>
    %48 = tpu.concatenate %39, %40, %41, %42, %43, %44, %45, %46, %47 in 3 : vector<2x16x16x32xf32>, vector<2x16x16x32xf32>, vector<2x16x16x32xf32>, vector<2x16x16x32xf32>, vector<2x16x16x32xf32>, vector<2x16x16x32xf32>, vector<2x16x16x32xf32>, vector<2x16x16x32xf32>, vector<2x16x16x32xf32> -> vector<2x16x16x288xf32>
    %49 = vector.shape_cast %48 : vector<2x16x16x288xf32> to vector<512x288xf32>
    %50 = arith.truncf %49 : vector<512x288xf32> to vector<512x288xbf16>
    %c0_125 = arith.constant 0 : index
    %c0_126 = arith.constant 0 : index
    %51 = vector.load %arg4[%c0_125, %c0_126] : memref<288x32xbf16, #tpu.memory_space<vmem>>, vector<288x32xbf16>
    %cst_127 = arith.constant dense<0.000000e+00> : vector<512x32xf32>
    %52 = tpu.matmul %50, %51, %cst_127 {dimension_numbers = #tpu.dot_dimension_numbers<[1], [0], [0], [1], [0, 0, 1, 1], [], []>} : vector<512x288xbf16>, vector<288x32xbf16>, vector<512x32xf32> -> vector<512x32xf32>
    %c0_128 = arith.constant 0 : index
    %c0_129 = arith.constant 0 : index
    %53 = vector.load %arg5[%c0_128, %c0_129] : memref<1x32xf32, #tpu.memory_space<vmem>>, vector<1x32xf32>
    %54 = vector.broadcast %53 : vector<1x32xf32> to vector<512x32xf32>
    %55 = arith.addf %52, %54 : vector<512x32xf32>
    %cst_130 = arith.constant 0.000000e+00 : f32
    %56 = vector.broadcast %cst_130 : f32 to vector<512x32xf32>
    %57 = arith.maximumf %55, %56 : vector<512x32xf32>
    %c0_131 = arith.constant 0 : index
    %c0_132 = arith.constant 0 : index
    %58 = vector.load %arg6[%c0_131, %c0_132] : memref<2x512xf32, #tpu.memory_space<vmem>>, vector<2x512xf32>
    %cst_133 = arith.constant dense<0.000000e+00> : vector<2x32xf32>
    %59 = tpu.matmul %58, %57, %cst_133 {dimension_numbers = #tpu.dot_dimension_numbers<[1], [0], [0], [1], [0, 0, 1, 1], [], []>} : vector<2x512xf32>, vector<512x32xf32>, vector<2x32xf32> -> vector<2x32xf32>
    %cst_134 = arith.constant 3.906250e-03 : f32
    %60 = vector.broadcast %cst_134 : f32 to vector<2x32xf32>
    %61 = arith.mulf %59, %60 : vector<2x32xf32>
    %c0_135 = arith.constant 0 : index
    %c0_136 = arith.constant 0 : index
    %62 = vector.load %arg7[%c0_135, %c0_136] : memref<2x32xf32, #tpu.memory_space<vmem>>, vector<2x32xf32>
    tpu.vector_store %arg7[%c0_135, %c0_136], %61 {strides = array<i32>} : memref<2x32xf32, #tpu.memory_space<vmem>>, vector<2x32xf32>,
    return
  }
  func.func @transform_0(%arg0: i32) -> (i32, i32, i32, i32) {
    %c0_i32 = arith.constant 0 : i32
    %c0_i32_0 = arith.constant 0 : i32
    %c0_i32_1 = arith.constant 0 : i32
    %c0_i32_2 = arith.constant 0 : i32
    return %arg0, %c0_i32, %c0_i32_0, %c0_i32_1 : i32, i32, i32, i32
  }
  func.func @transform_1(%arg0: i32) -> (i32, i32) {
    %c0_i32 = arith.constant 0 : i32
    %c0_i32_0 = arith.constant 0 : i32
    %c0_i32_1 = arith.constant 0 : i32
    return %c0_i32, %c0_i32_0 : i32, i32
  }
  func.func @transform_2(%arg0: i32) -> (i32, i32) {
    %c0_i32 = arith.constant 0 : i32
    %c0_i32_0 = arith.constant 0 : i32
    %c0_i32_1 = arith.constant 0 : i32
    return %c0_i32, %c0_i32_0 : i32, i32
  }
  func.func @transform_3(%arg0: i32) -> (i32, i32) {
    %c0_i32 = arith.constant 0 : i32
    %c0_i32_0 = arith.constant 0 : i32
    %c0_i32_1 = arith.constant 0 : i32
    return %c0_i32, %c0_i32_0 : i32, i32
  }
  func.func @transform_4(%arg0: i32) -> (i32, i32) {
    %c0_i32 = arith.constant 0 : i32
    %c0_i32_0 = arith.constant 0 : i32
    %c0_i32_1 = arith.constant 0 : i32
    return %c0_i32, %c0_i32_0 : i32, i32
  }
  func.func @transform_5(%arg0: i32) -> (i32, i32) {
    %c0_i32 = arith.constant 0 : i32
    %c0_i32_0 = arith.constant 0 : i32
    %c0_i32_1 = arith.constant 0 : i32
    return %c0_i32, %c0_i32_0 : i32, i32
  }
  func.func @transform_6(%arg0: i32) -> (i32, i32) {
    %c0_i32 = arith.constant 0 : i32
    %c0_i32_0 = arith.constant 0 : i32
    return %arg0, %c0_i32 : i32, i32
  }
}

</mosaic_0001>

<bundles_post_ra>
// kernel: feature_extractor.1
= control target key start
LH: loop header
LB: loop body
LE: loop exit
PB: predicated region body
PF: predicated region fallthrough
CT: control target
= control target key end

     0   :  { %vm25_vm0 = vcmask 31744   ;;  %s15261_s0 = inlined_call_operand.vmem [shape: f32[2,16,16,4], index: 0, kind: input, shape index: {}]   ;;  %s15262_s1 = inlined_call_operand.vmem [shape: bf16[36,32], index: 1, kind: input, shape index: {}]   ;;  %s15263_s2 = inlined_call_operand.vmem [shape: f32[1,32], index: 2, kind: input, shape index: {}]   ;;  %s15264_s3 = inlined_call_operand.vmem [shape: bf16[288,32], index: 3, kind: input, shape index: {}]   ;;  %s15265_s4 = inlined_call_operand.vmem [shape: f32[1,32], index: 4, kind: input, shape index: {}]   ;;  %s15266_s5 = inlined_call_operand.vmem [shape: f32[2,512], index: 5, kind: input, shape index: {}]   ;;  %s15267_s6 = inlined_call_operand.hbm [shape: f32[2,32], index: 6, kind: output, shape index: {}]  }
   0x1   :  { %v119_v0 = vld [vmem:[%s15261_s0 + $0x30] sm:$0xff]  ;;  %v120_v1 = vld [vmem:[%s15261_s0 + $0x38] sm:$0xff] }
   0x2   :  { %v115_v2 = vld [vmem:[%s15261_s0 + $0x10] sm:$0xff]  ;;  %184 = vst.msk [vmem:[#allocation2 + $0x61] sm:$0xff] %vm25_vm0, %v119_v0  ;;  %v116_v3 = vld [vmem:[%s15261_s0 + $0x18] sm:$0xff] }
   0x3   :  { %185 = vst.msk [vmem:[#allocation2 + $0x69] sm:$0xff] %vm25_vm0, %v120_v1 }
   0x4   :  { %180 = vst.msk [vmem:[#allocation2 + $0x31] sm:$0xff] %vm25_vm0, %v115_v2 }
   0x5   :  { %11 = vsyncpa [#allocation5], 0  ;;  %181 = vst.msk [vmem:[#allocation2 + $0x39] sm:$0xff] %vm25_vm0, %v116_v3  ;;  %vm28_vm1 = vcmask 25600   ;;  %v15268_v4 = vmov 0.0   ;;  %vm40_vm2 = vcmask 24576  }
   0x6   :  { %26 = vst.msk [vmem:[#allocation2] sm:$0xff] %vm25_vm0, %v15268_v4  ;;  %s9983_s29 = smov 4   ;;  %v121_v14 = vld [vmem:[%s15261_s0 + $0x40] sm:$0xff]  ;;  %v122_v15 = vld [vmem:[%s15261_s0 + $0x48] sm:$0xff]  ;;  %v127_v23 = vld [vmem:[%s15261_s0 + $0x70] sm:$0xff]  ;;  %s9984_s26 = smov 8  }
   0x7   :  { %27 = vst.msk [vmem:[#allocation2 + $0x8] sm:$0xff] %vm25_vm0, %v15268_v4  ;;  %v117_v16 = vld [vmem:[%s15261_s0 + $0x20] sm:$0xff]  ;;  %v118_v17 = vld [vmem:[%s15261_s0 + $0x28] sm:$0xff]  ;;  %v128_v24 = vld [vmem:[%s15261_s0 + $0x78] sm:$0xff]  ;;  %s9987_s12 = smov 20   ;;  %s9988_s13 = smov 24  }
   0x8   :  { %29 = vst.msk [vmem:[#allocation2 + $0x10] sm:$0x3] %vm28_vm1, %v15268_v4  ;;  %v113_v19 = vld [vmem:[%s15261_s0] sm:$0xff]  ;;  %v114_v21 = vld [vmem:[%s15261_s0 + $0x8] sm:$0xff]  ;;  %v123_v27 = vld [vmem:[%s15261_s0 + $0x50] sm:$0xff]  ;;  %s9989_s14 = smov 28  }
   0x9   :  { %v314_v5 = vld [vmem:[#allocation2 + $0x61] sm:$0xff]  ;;  %77 = vst.msk [vmem:[#allocation2 + $0x11] sm:$0x1] %vm40_vm2, %v15268_v4  ;;  %v125_v25 = vld [vmem:[%s15261_s0 + $0x60] sm:$0xff]  ;;  %v124_v28 = vld [vmem:[%s15261_s0 + $0x58] sm:$0xff]  ;;  %vm2931_vm3 = vcmask 64512  }
   0xa   :  { %v315_v6 = vld [vmem:[#allocation2 + $0x69] sm:$0xff]  ;;  %41 = vst.msk [vmem:[#allocation2] sm:$0x1] %vm40_vm2, %v15268_v4  ;;  %v126_v26 = vld [vmem:[%s15261_s0 + $0x68] sm:$0xff]  ;;  %v133_v30 = vld [vmem:[%s15261_s0 + $0xa0] sm:$0xff]  ;;  %vm2996_vm4 = vcmask 97280  }
   0xb   :  { %v7643_v7 = vpack.i.bf16 %v315_v6, %v314_v5  ;;  %v310_v8 = vld [vmem:[#allocation2 + $0x31] sm:$0xff]  ;;  %30 = vst.msk [vmem:[#allocation2 + $0x1b0] sm:$0xff] %vm25_vm0, %v15268_v4  ;;  %v134_v32 = vld [vmem:[%s15261_s0 + $0xa8] sm:$0xff]  ;;  %v131_v35 = vld [vmem:[%s15261_s0 + $0x90] sm:$0xff]  ;;  %s9990_s15 = smov 32   ;;  %vm3061_vm5 = vcmask 130048  }
   0xc   :  { %v311_v9 = vld [vmem:[#allocation2 + $0x39] sm:$0xff]  ;;  %31 = vst.msk [vmem:[#allocation2 + $0x1b8] sm:$0xff] %vm25_vm0, %v15268_v4  ;;  %v132_v37 = vld [vmem:[%s15261_s0 + $0x98] sm:$0xff]  ;;  %v139_v45 = vld [vmem:[%s15261_s0 + $0xd0] sm:$0xff]  ;;  %vm3126_vm6 = vcmask 162816   ;;  %vm3539_vm7 = vcmask 1041408  }
   0xd   :  { %7644 = vrot.lane.b32.xlu2 %v7643_v7, %s9983_s29  ;;  %v7633_v10 = vpack.i.bf16 %v311_v9, %v310_v8  ;;  %32 = vst.msk [vmem:[#allocation2 + $0x1c0] sm:$0x3] %vm28_vm1, %v15268_v4  ;;  %v129_v40 = vld [vmem:[%s15261_s0 + $0x80] sm:$0xff]  ;;  %v130_v42 = vld [vmem:[%s15261_s0 + $0x88] sm:$0xff]  ;;  %v140_v47 = vld [vmem:[%s15261_s0 + $0xd8] sm:$0xff]  ;;  %vm3321_vm8 = vcmask 261120  }
   0xe   :  { %v306_v11 = vld [vmem:[#allocation2 + $0x1] sm:$0xff]  ;;  %34 = vst.msk [vmem:[#allocation2 + $0x198] sm:$0xff] %vm25_vm0, %v15268_v4  ;;  %v137_v50 = vld [vmem:[%s15261_s0 + $0xc0] sm:$0xff]  ;;  %v136_v57 = vld [vmem:[%s15261_s0 + $0xb8] sm:$0xff]  ;;  %vm3191_vm9 = vcmask 195584   ;;  %vm3256_vm10 = vcmask 228352  }
   0xf   :  { %7634 = vrot.lane.b32.xlu1 %v7633_v10, %s9983_s29  ;;  %v307_v12 = vld [vmem:[#allocation2 + $0x9] sm:$0xff]  ;;  %35 = vst.msk [vmem:[#allocation2 + $0x1a0] sm:$0xff] %vm25_vm0, %v15268_v4  ;;  %v138_v52 = vld [vmem:[%s15261_s0 + $0xc8] sm:$0xff]  ;;  %v145_v59 = vld [vmem:[%s15261_s0 + $0x100] sm:$0xff]  ;;  %vm3442_vm11 = vcmask 293888   ;;  %vm3790_vm12 = vcmask 253952  }
  0x10   :  { %v7623_v13 = vpack.i.bf16 %v307_v12, %v306_v11  ;;  %36 = vst.msk [vmem:[#allocation2 + $0x1a8] sm:$0x3] %vm28_vm1, %v15268_v4  ;;  %v135_v55 = vld [vmem:[%s15261_s0 + $0xb0] sm:$0xff]  ;;  %v146_v62 = vld [vmem:[%s15261_s0 + $0x108] sm:$0xff]  ;;  %v141_v63 = vld [vmem:[%s15261_s0 + $0xe0] sm:$0xff]  ;;  %vm3778_vm13 = vcmask 254976  }
  0x11   :  { %37 = vst.msk [vmem:[#allocation2 + $0x348] sm:$0xff] %vm25_vm0, %v15268_v4  ;;  %v142_v2 = vld [vmem:[%s15261_s0 + $0xe8] sm:$0xff]  ;;  %v151_v5 = vld [vmem:[%s15261_s0 + $0x130] sm:$0xff]  ;;  %v152_v8 = vld [vmem:[%s15261_s0 + $0x138] sm:$0xff]  ;;  %s9992_s28 = smov 96   ;;  %vm6105_vm14 = vcmask 523264  }
  0x12   :  { %7624 = vrot.lane.b32.xlu0 %v7623_v13, %s9983_s29  ;;  %38 = vst.msk [vmem:[#allocation2 + $0x350] sm:$0xff] %vm25_vm0, %v15268_v4  ;;  %v149_v10 = vld [vmem:[%s15261_s0 + $0x120] sm:$0xff]  ;;  %v150_v11 = vld [vmem:[%s15261_s0 + $0x128] sm:$0xff]  ;;  %v147_v13 = vld [vmem:[%s15261_s0 + $0x110] sm:$0xff]  ;;  %vm6170_vm15 = vcmask 785408   ;;  %s7438_s20 = sshll.u32 %s15267_s6, 4  ;;  %s7439_s20 = int_to_ptr.hbm [resolvable:$true] %s7438_s20 }
  0x13   :  { %39 = vst.msk [vmem:[#allocation2 + $0x358] sm:$0x3] %vm28_vm1, %v15268_v4 }
  0x14   :  { %42 = vst.msk [vmem:[#allocation2 + $0x18] sm:$0x1] %vm40_vm2, %v15268_v4 }
  0x15   :  { %43 = vst.msk [vmem:[#allocation2 + $0x30] sm:$0x1] %vm40_vm2, %v15268_v4 }
  0x16   :  { %44 = vst.msk [vmem:[#allocation2 + $0x48] sm:$0x1] %vm40_vm2, %v15268_v4 }
  0x17   :  { %45 = vst.msk [vmem:[#allocation2 + $0x60] sm:$0x1] %vm40_vm2, %v15268_v4 }
  0x18   :  { %46 = vst.msk [vmem:[#allocation2 + $0x78] sm:$0x1] %vm40_vm2, %v15268_v4 }
  0x19   :  { %47 = vst.msk [vmem:[#allocation2 + $0x90] sm:$0x1] %vm40_vm2, %v15268_v4 }
  0x1a   :  { %48 = vst.msk [vmem:[#allocation2 + $0xa8] sm:$0x1] %vm40_vm2, %v15268_v4 }
  0x1b   :  { %49 = vst.msk [vmem:[#allocation2 + $0xc0] sm:$0x1] %vm40_vm2, %v15268_v4 }
  0x1c   :  { %50 = vst.msk [vmem:[#allocation2 + $0xd8] sm:$0x1] %vm40_vm2, %v15268_v4 }
  0x1d   :  { %51 = vst.msk [vmem:[#allocation2 + $0xf0] sm:$0x1] %vm40_vm2, %v15268_v4 }
  0x1e   :  { %52 = vst.msk [vmem:[#allocation2 + $0x108] sm:$0x1] %vm40_vm2, %v15268_v4 }
  0x1f   :  { %53 = vst.msk [vmem:[#allocation2 + $0x120] sm:$0x1] %vm40_vm2, %v15268_v4 }
  0x20   :  { %54 = vst.msk [vmem:[#allocation2 + $0x138] sm:$0x1] %vm40_vm2, %v15268_v4 }
  0x21   :  { %55 = vst.msk [vmem:[#allocation2 + $0x150] sm:$0x1] %vm40_vm2, %v15268_v4 }
  0x22   :  { %56 = vst.msk [vmem:[#allocation2 + $0x168] sm:$0x1] %vm40_vm2, %v15268_v4 }
  0x23   :  { %57 = vst.msk [vmem:[#allocation2 + $0x180] sm:$0x1] %vm40_vm2, %v15268_v4 }
  0x24   :  { %60 = vst.msk [vmem:[#allocation2 + $0x1c8] sm:$0x1] %vm40_vm2, %v15268_v4 }
  0x25   :  { %61 = vst.msk [vmem:[#allocation2 + $0x1e0] sm:$0x1] %vm40_vm2, %v15268_v4 }
  0x26   :  { %62 = vst.msk [vmem:[#allocation2 + $0x1f8] sm:$0x1] %vm40_vm2, %v15268_v4 }
  0x27   :  { %63 = vst.msk [vmem:[#allocation2 + $0x210] sm:$0x1] %vm40_vm2, %v15268_v4 }
  0x28   :  { %64 = vst.msk [vmem:[#allocation2 + $0x228] sm:$0x1] %vm40_vm2, %v15268_v4 }
  0x29   :  { %65 = vst.msk [vmem:[#allocation2 + $0x240] sm:$0x1] %vm40_vm2, %v15268_v4 }
  0x2a   :  { %66 = vst.msk [vmem:[#allocation2 + $0x258] sm:$0x1] %vm40_vm2, %v15268_v4 }
  0x2b   :  { %67 = vst.msk [vmem:[#allocation2 + $0x270] sm:$0x1] %vm40_vm2, %v15268_v4 }
  0x2c   :  { %68 = vst.msk [vmem:[#allocation2 + $0x288] sm:$0x1] %vm40_vm2, %v15268_v4 }
  0x2d   :  { %69 = vst.msk [vmem:[#allocation2 + $0x2a0] sm:$0x1] %vm40_vm2, %v15268_v4 }
  0x2e   :  { %70 = vst.msk [vmem:[#allocation2 + $0x2b8] sm:$0x1] %vm40_vm2, %v15268_v4 }
  0x2f   :  { %71 = vst.msk [vmem:[#allocation2 + $0x2d0] sm:$0x1] %vm40_vm2, %v15268_v4 }
  0x30   :  { %72 = vst.msk [vmem:[#allocation2 + $0x2e8] sm:$0x1] %vm40_vm2, %v15268_v4 }
  0x31   :  { %73 = vst.msk [vmem:[#allocation2 + $0x300] sm:$0x1] %vm40_vm2, %v15268_v4 }
  0x32   :  { %74 = vst.msk [vmem:[#allocation2 + $0x318] sm:$0x1] %vm40_vm2, %v15268_v4 }
  0x33   :  { %75 = vst.msk [vmem:[#allocation2 + $0x330] sm:$0x1] %vm40_vm2, %v15268_v4 }
  0x34   :  { %78 = vst.msk [vmem:[#allocation2 + $0x29] sm:$0x1] %vm40_vm2, %v15268_v4 }
  0x35   :  { %79 = vst.msk [vmem:[#allocation2 + $0x41] sm:$0x1] %vm40_vm2, %v15268_v4 }
  0x36   :  { %80 = vst.msk [vmem:[#allocation2 + $0x59] sm:$0x1] %vm40_vm2, %v15268_v4 }
  0x37   :  { %81 = vst.msk [vmem:[#allocation2 + $0x71] sm:$0x1] %vm40_vm2, %v15268_v4 }
  0x38   :  { %82 = vst.msk [vmem:[#allocation2 + $0x89] sm:$0x1] %vm40_vm2, %v15268_v4 }
  0x39   :  { %83 = vst.msk [vmem:[#allocation2 + $0xa1] sm:$0x1] %vm40_vm2, %v15268_v4 }
  0x3a   :  { %84 = vst.msk [vmem:[#allocation2 + $0xb9] sm:$0x1] %vm40_vm2, %v15268_v4 }
  0x3b   :  { %85 = vst.msk [vmem:[#allocation2 + $0xd1] sm:$0x1] %vm40_vm2, %v15268_v4 }
  0x3c   :  { %86 = vst.msk [vmem:[#allocation2 + $0xe9] sm:$0x1] %vm40_vm2, %v15268_v4 }
  0x3d   :  { %87 = vst.msk [vmem:[#allocation2 + $0x101] sm:$0x1] %vm40_vm2, %v15268_v4 }
  0x3e   :  { %88 = vst.msk [vmem:[#allocation2 + $0x119] sm:$0x1] %vm40_vm2, %v15268_v4 }
  0x3f   :  { %89 = vst.msk [vmem:[#allocation2 + $0x131] sm:$0x1] %vm40_vm2, %v15268_v4 }
  0x40   :  { %90 = vst.msk [vmem:[#allocation2 + $0x149] sm:$0x1] %vm40_vm2, %v15268_v4 }
  0x41   :  { %91 = vst.msk [vmem:[#allocation2 + $0x161] sm:$0x1] %vm40_vm2, %v15268_v4 }
  0x42   :  { %92 = vst.msk [vmem:[#allocation2 + $0x179] sm:$0x1] %vm40_vm2, %v15268_v4 }
  0x43   :  { %93 = vst.msk [vmem:[#allocation2 + $0x191] sm:$0x1] %vm40_vm2, %v15268_v4 }
  0x44   :  { %96 = vst.msk [vmem:[#allocation2 + $0x1d9] sm:$0x1] %vm40_vm2, %v15268_v4 }
  0x45   :  { %97 = vst.msk [vmem:[#allocation2 + $0x1f1] sm:$0x1] %vm40_vm2, %v15268_v4 }
  0x46   :  { %98 = vst.msk [vmem:[#allocation2 + $0x209] sm:$0x1] %vm40_vm2, %v15268_v4 }
  0x47   :  { %99 = vst.msk [vmem:[#allocation2 + $0x221] sm:$0x1] %vm40_vm2, %v15268_v4 }
  0x48   :  { %100 = vst.msk [vmem:[#allocation2 + $0x239] sm:$0x1] %vm40_vm2, %v15268_v4 }
  0x49   :  { %101 = vst.msk [vmem:[#allocation2 + $0x251] sm:$0x1] %vm40_vm2, %v15268_v4 }
  0x4a   :  { %102 = vst.msk [vmem:[#allocation2 + $0x269] sm:$0x1] %vm40_vm2, %v15268_v4 }
  0x4b   :  { %103 = vst.msk [vmem:[#allocation2 + $0x281] sm:$0x1] %vm40_vm2, %v15268_v4 }
  0x4c   :  { %104 = vst.msk [vmem:[#allocation2 + $0x299] sm:$0x1] %vm40_vm2, %v15268_v4 }
  0x4d   :  { %105 = vst.msk [vmem:[#allocation2 + $0x2b1] sm:$0x1] %vm40_vm2, %v15268_v4 }
  0x4e   :  { %106 = vst.msk [vmem:[#allocation2 + $0x2c9] sm:$0x1] %vm40_vm2, %v15268_v4 }
  0x4f   :  { %107 = vst.msk [vmem:[#allocation2 + $0x2e1] sm:$0x1] %vm40_vm2, %v15268_v4 }
  0x50   :  { %108 = vst.msk [vmem:[#allocation2 + $0x2f9] sm:$0x1] %vm40_vm2, %v15268_v4 }
  0x51   :  { %109 = vst.msk [vmem:[#allocation2 + $0x311] sm:$0x1] %vm40_vm2, %v15268_v4 }
  0x52   :  { %110 = vst.msk [vmem:[#allocation2 + $0x329] sm:$0x1] %vm40_vm2, %v15268_v4 }
  0x53   :  { %111 = vst.msk [vmem:[#allocation2 + $0x341] sm:$0x1] %vm40_vm2, %v15268_v4 }
  0x54   :  { %186 = vst.msk [vmem:[#allocation2 + $0x79] sm:$0xff] %vm25_vm0, %v121_v14 }
  0x55   :  { %187 = vst.msk [vmem:[#allocation2 + $0x81] sm:$0xff] %vm25_vm0, %v122_v15 }
  0x56   :  { %58 = vst.msk [vmem:[#allocation2 + $0x198] sm:$0x1] %vm40_vm2, %v15268_v4 }
  0x57   :  { %59 = vst.msk [vmem:[#allocation2 + $0x1b0] sm:$0x1] %vm40_vm2, %v15268_v4 }
  0x58   :  { %76 = vst.msk [vmem:[#allocation2 + $0x348] sm:$0x1] %vm40_vm2, %v15268_v4 }
  0x59   :  { %94 = vst.msk [vmem:[#allocation2 + $0x1a9] sm:$0x1] %vm40_vm2, %v15268_v4 }
  0x5a   :  { %95 = vst.msk [vmem:[#allocation2 + $0x1c1] sm:$0x1] %vm40_vm2, %v15268_v4 }
  0x5b   :  { %v316_v18 = vld [vmem:[#allocation2 + $0x79] sm:$0xff]  ;;  %112 = vst.msk [vmem:[#allocation2 + $0x359] sm:$0x1] %vm40_vm2, %v15268_v4 }
  0x5c   :  { %v317_v20 = vld [vmem:[#allocation2 + $0x81] sm:$0xff]  ;;  %182 = vst.msk [vmem:[#allocation2 + $0x49] sm:$0xff] %vm25_vm0, %v117_v16  ;;  %v148_v16 = vld [vmem:[%s15261_s0 + $0x118] sm:$0xff] }
  0x5d   :  { %v7648_v22 = vpack.i.bf16 %v317_v20, %v316_v18  ;;  %183 = vst.msk [vmem:[#allocation2 + $0x51] sm:$0xff] %vm25_vm0, %v118_v17  ;;  %v157_v17 = vld [vmem:[%s15261_s0 + $0x160] sm:$0xff]  ;;  %v158_v20 = vld [vmem:[%s15261_s0 + $0x168] sm:$0xff] }
  0x5e   :  { %178 = vst.msk [vmem:[#allocation2 + $0x19] sm:$0xff] %vm25_vm0, %v113_v19 }
  0x5f   :  { %7649 = vrot.lane.b32.xlu2 %v7648_v22, %s9983_s29  ;;  %179 = vst.msk [vmem:[#allocation2 + $0x21] sm:$0xff] %vm25_vm0, %v114_v21  ;;  %v155_v22 = vld [vmem:[%s15261_s0 + $0x150] sm:$0xff] }
  0x60   :  { %192 = vst.msk [vmem:[#allocation2 + $0xc1] sm:$0xff] %vm25_vm0, %v127_v23 }
  0x61   :  { %193 = vst.msk [vmem:[#allocation2 + $0xc9] sm:$0xff] %vm25_vm0, %v128_v24 }
  0x62   :  { %190 = vst.msk [vmem:[#allocation2 + $0xa9] sm:$0xff] %vm25_vm0, %v125_v25  ;;  %v156_v25 = vld [vmem:[%s15261_s0 + $0x158] sm:$0xff] }
  0x63   :  { %v312_v29 = vld [vmem:[#allocation2 + $0x49] sm:$0xff]  ;;  %191 = vst.msk [vmem:[#allocation2 + $0xb1] sm:$0xff] %vm25_vm0, %v126_v26 }
  0x64   :  { %v313_v31 = vld [vmem:[#allocation2 + $0x51] sm:$0xff]  ;;  %188 = vst.msk [vmem:[#allocation2 + $0x91] sm:$0xff] %vm25_vm0, %v123_v27 }
  0x65   :  { %v7638_v33 = vpack.i.bf16 %v313_v31, %v312_v29  ;;  %v308_v34 = vld [vmem:[#allocation2 + $0x19] sm:$0xff]  ;;  %189 = vst.msk [vmem:[#allocation2 + $0x99] sm:$0xff] %vm25_vm0, %v124_v28  ;;  %v338_v31 = vld [vmem:[#allocation2 + $0x1b1] sm:$0xff] }
  0x66   :  { %v309_v36 = vld [vmem:[#allocation2 + $0x21] sm:$0xff]  ;;  %198 = vst.msk [vmem:[#allocation2 + $0x109] sm:$0xff] %vm25_vm0, %v133_v30  ;;  %v153_v27 = vld [vmem:[%s15261_s0 + $0x140] sm:$0xff] }
  0x67   :  { %7639 = vrot.lane.b32.xlu1 %v7638_v33, %s9983_s29  ;;  %v7628_v38 = vpack.i.bf16 %v309_v36, %v308_v34  ;;  %v322_v39 = vld [vmem:[#allocation2 + $0xc1] sm:$0xff]  ;;  %199 = vst.msk [vmem:[#allocation2 + $0x111] sm:$0xff] %vm25_vm0, %v134_v32  ;;  %v339_v32 = vld [vmem:[#allocation2 + $0x1b9] sm:$0xff]  ;;  %v164_v33 = vld [vmem:[%s15261_s0 + $0x198] sm:$0xff] }
  0x68   :  { %v323_v41 = vld [vmem:[#allocation2 + $0xc9] sm:$0xff]  ;;  %196 = vst.msk [vmem:[#allocation2 + $0xf1] sm:$0xff] %vm25_vm0, %v131_v35  ;;  %v154_v28 = vld [vmem:[%s15261_s0 + $0x148] sm:$0xff]  ;;  %v161_v34 = vld [vmem:[%s15261_s0 + $0x180] sm:$0xff] }
  0x69   :  { %7629 = vrot.lane.b32.xlu0 %v7628_v38, %s9983_s29  ;;  %v7663_v43 = vpack.i.bf16 %v323_v41, %v322_v39  ;;  %v320_v44 = vld [vmem:[#allocation2 + $0xa9] sm:$0xff]  ;;  %197 = vst.msk [vmem:[#allocation2 + $0xf9] sm:$0xff] %vm25_vm0, %v132_v37  ;;  %v162_v37 = vld [vmem:[%s15261_s0 + $0x188] sm:$0xff]  ;;  %v7703_v38 = vpack.i.bf16 %v339_v32, %v338_v31 }
  0x6a   :  { %v321_v46 = vld [vmem:[#allocation2 + $0xb1] sm:$0xff]  ;;  %194 = vst.msk [vmem:[#allocation2 + $0xd9] sm:$0xff] %vm25_vm0, %v129_v40  ;;  %v163_v30 = vld [vmem:[%s15261_s0 + $0x190] sm:$0xff] }
  0x6b   :  { %7664 = vrot.lane.b32.xlu2 %v7663_v43, %s9983_s29  ;;  %v7658_v48 = vpack.i.bf16 %v321_v46, %v320_v44  ;;  %v318_v49 = vld [vmem:[#allocation2 + $0x91] sm:$0xff]  ;;  %195 = vst.msk [vmem:[#allocation2 + $0xe1] sm:$0xff] %vm25_vm0, %v130_v42  ;;  %v159_v39 = vld [vmem:[%s15261_s0 + $0x170] sm:$0xff] }
  0x6c   :  { %v319_v51 = vld [vmem:[#allocation2 + $0x99] sm:$0xff]  ;;  %204 = vst.msk [vmem:[#allocation2 + $0x151] sm:$0xff] %vm25_vm0, %v139_v45  ;;  %v160_v42 = vld [vmem:[%s15261_s0 + $0x178] sm:$0xff] }
  0x6d   :  { %v7653_v53 = vpack.i.bf16 %v319_v51, %v318_v49  ;;  %v328_v54 = vld [vmem:[#allocation2 + $0x109] sm:$0xff]  ;;  %205 = vst.msk [vmem:[#allocation2 + $0x159] sm:$0xff] %vm25_vm0, %v140_v47  ;;  %v169_v44 = vld [vmem:[%s15261_s0 + $0x1c0] sm:$0xff]  ;;  %v170_v45 = vld [vmem:[%s15261_s0 + $0x1c8] sm:$0xff] }
  0x6e   :  { %v329_v56 = vld [vmem:[#allocation2 + $0x111] sm:$0xff]  ;;  %202 = vst.msk [vmem:[#allocation2 + $0x139] sm:$0xff] %vm25_vm0, %v137_v50  ;;  %v167_v47 = vld [vmem:[%s15261_s0 + $0x1b0] sm:$0xff] }
  0x6f   :  { %7659 = vrot.lane.b32.xlu1 %v7658_v48, %s9983_s29  ;;  %v7678_v58 = vpack.i.bf16 %v329_v56, %v328_v54  ;;  %203 = vst.msk [vmem:[#allocation2 + $0x141] sm:$0xff] %vm25_vm0, %v138_v52  ;;  %v326_v60 = vld [vmem:[#allocation2 + $0xf1] sm:$0xff]  ;;  %v166_v54 = vld [vmem:[%s15261_s0 + $0x1a8] sm:$0xff] }
  0x70   :  { %v327_v61 = vld [vmem:[#allocation2 + $0xf9] sm:$0xff]  ;;  %200 = vst.msk [vmem:[#allocation2 + $0x121] sm:$0xff] %vm25_vm0, %v135_v55  ;;  %v168_v50 = vld [vmem:[%s15261_s0 + $0x1b8] sm:$0xff] }
  0x71   :  { %7654 = vrot.lane.b32.xlu0 %v7653_v53, %s9983_s29  ;;  %201 = vst.msk [vmem:[#allocation2 + $0x129] sm:$0xff] %vm25_vm0, %v136_v57  ;;  %v324_v0 = vld [vmem:[#allocation2 + $0xd9] sm:$0xff]  ;;  %v7673_v3 = vpack.i.bf16 %v327_v61, %v326_v60  ;;  %v171_v61 = vld [vmem:[%s15261_s0 + $0x1d0] sm:$0xff] }
  0x72   :  { %v325_v1 = vld [vmem:[#allocation2 + $0xe1] sm:$0xff]  ;;  %210 = vst.msk [vmem:[#allocation2 + $0x1c9] sm:$0xff] %vm25_vm0, %v145_v59  ;;  %v165_v51 = vld [vmem:[%s15261_s0 + $0x1a0] sm:$0xff] }
  0x73   :  { %7679 = vrot.lane.b32.xlu2 %v7678_v58, %s9983_s29  ;;  %211 = vst.msk [vmem:[#allocation2 + $0x1d1] sm:$0xff] %vm25_vm0, %v146_v62  ;;  %v334_v6 = vld [vmem:[#allocation2 + $0x151] sm:$0xff]  ;;  %v7668_v9 = vpack.i.bf16 %v325_v1, %v324_v0  ;;  %v174_v59 = vld [vmem:[%s15261_s0 + $0x1e8] sm:$0xff] }
  0x74   :  { %v335_v7 = vld [vmem:[#allocation2 + $0x159] sm:$0xff]  ;;  %206 = vst.msk [vmem:[#allocation2 + $0x169] sm:$0xff] %vm25_vm0, %v141_v63  ;;  %v172_v62 = vld [vmem:[%s15261_s0 + $0x1d8] sm:$0xff] }
  0x75   :  { %207 = vst.msk [vmem:[#allocation2 + $0x171] sm:$0xff] %vm25_vm0, %v142_v2  ;;  %v7693_v12 = vpack.i.bf16 %v335_v7, %v334_v6  ;;  %v332_v14 = vld [vmem:[#allocation2 + $0x139] sm:$0xff] }
  0x76   :  { %216 = vst.msk [vmem:[#allocation2 + $0x211] sm:$0xff] %vm25_vm0, %v151_v5  ;;  %v333_v15 = vld [vmem:[#allocation2 + $0x141] sm:$0xff]  ;;  %v173_v56 = vld [vmem:[%s15261_s0 + $0x1e0] sm:$0xff] }
  0x77   :  { %7674 = vrot.lane.b32.xlu1 %v7673_v3, %s9983_s29  ;;  %217 = vst.msk [vmem:[#allocation2 + $0x219] sm:$0xff] %vm25_vm0, %v152_v8  ;;  %v330_v18 = vld [vmem:[#allocation2 + $0x121] sm:$0xff]  ;;  %v7688_v21 = vpack.i.bf16 %v333_v15, %v332_v14 }
  0x78   :  { %214 = vst.msk [vmem:[#allocation2 + $0x1f9] sm:$0xff] %vm25_vm0, %v149_v10  ;;  %v331_v19 = vld [vmem:[#allocation2 + $0x129] sm:$0xff] }
  0x79   :  { %7669 = vrot.lane.b32.xlu0 %v7668_v9, %s9983_s29  ;;  %215 = vst.msk [vmem:[#allocation2 + $0x201] sm:$0xff] %vm25_vm0, %v150_v11  ;;  %v340_v23 = vld [vmem:[#allocation2 + $0x1c9] sm:$0xff]  ;;  %v7683_v26 = vpack.i.bf16 %v331_v19, %v330_v18 }
  0x7a   :  { %212 = vst.msk [vmem:[#allocation2 + $0x1e1] sm:$0xff] %vm25_vm0, %v147_v13  ;;  %v341_v24 = vld [vmem:[#allocation2 + $0x1d1] sm:$0xff] }
  0x7b   :  { %7694 = vrot.lane.b32.xlu2 %v7693_v12, %s9983_s29  ;;  %213 = vst.msk [vmem:[#allocation2 + $0x1e9] sm:$0xff] %vm25_vm0, %v148_v16  ;;  %v7708_v29 = vpack.i.bf16 %v341_v24, %v340_v23  ;;  %v336_v35 = vld [vmem:[#allocation2 + $0x169] sm:$0xff] }
  0x7c   :  { %222 = vst.msk [vmem:[#allocation2 + $0x259] sm:$0xff] %vm25_vm0, %v157_v17  ;;  %v337_v36 = vld [vmem:[#allocation2 + $0x171] sm:$0xff]  ;;  %v370_v24 = vld [vmem:[#allocation2 + $0x2] sm:$0xff] }
  0x7d   :  { %223 = vst.msk [vmem:[#allocation2 + $0x261] sm:$0xff] %vm25_vm0, %v158_v20  ;;  %v346_v40 = vld [vmem:[#allocation2 + $0x211] sm:$0xff]  ;;  %v7698_v43 = vpack.i.bf16 %v337_v36, %v336_v35 }
  0x7e   :  { %220 = vst.msk [vmem:[#allocation2 + $0x241] sm:$0xff] %vm25_vm0, %v155_v22  ;;  %v347_v41 = vld [vmem:[#allocation2 + $0x219] sm:$0xff] }
  0x7f   :  { %7689 = vrot.lane.b32.xlu1 %v7688_v21, %s9983_s29  ;;  %221 = vst.msk [vmem:[#allocation2 + $0x249] sm:$0xff] %vm25_vm0, %v156_v25  ;;  %v7723_v46 = vpack.i.bf16 %v347_v41, %v346_v40  ;;  %v344_v48 = vld [vmem:[#allocation2 + $0x1f9] sm:$0xff]  ;;  %v371_v25 = vld [vmem:[#allocation2 + $0xa] sm:$0xff]  ;;  %v373_v41 = vld [vmem:[#allocation2 + $0x22] sm:$0xff] }
  0x80   :  { %218 = vst.msk [vmem:[#allocation2 + $0x229] sm:$0xff] %vm25_vm0, %v153_v27  ;;  %v345_v49 = vld [vmem:[#allocation2 + $0x201] sm:$0xff]  ;;  %v7783_v27 = vpack.i.bf16 %v371_v25, %v370_v24 }
  0x81   :  { %7684 = vrot.lane.b32.xlu0 %v7683_v26, %s9983_s29  ;;  %219 = vst.msk [vmem:[#allocation2 + $0x231] sm:$0xff] %vm25_vm0, %v154_v28  ;;  %v342_v52 = vld [vmem:[#allocation2 + $0x1e1] sm:$0xff]  ;;  %v7718_v55 = vpack.i.bf16 %v345_v49, %v344_v48 }
  0x82   :  { %228 = vst.msk [vmem:[#allocation2 + $0x2a1] sm:$0xff] %vm25_vm0, %v163_v30  ;;  %v343_v53 = vld [vmem:[#allocation2 + $0x1e9] sm:$0xff]  ;;  %v372_v40 = vld [vmem:[#allocation2 + $0x1a] sm:$0xff] }
  0x83   :  { %7709 = vrot.lane.b32.xlu2 %v7708_v29, %s9983_s29  ;;  %229 = vst.msk [vmem:[#allocation2 + $0x2a9] sm:$0xff] %vm25_vm0, %v164_v33  ;;  %v352_v57 = vld [vmem:[#allocation2 + $0x259] sm:$0xff]  ;;  %v7713_v60 = vpack.i.bf16 %v343_v53, %v342_v52  ;;  %v376_v33 = vld [vmem:[#allocation2 + $0x4a] sm:$0xff]  ;;  %v381_v48 = vld [vmem:[#allocation2 + $0x82] sm:$0xff] }
  0x84   :  { %226 = vst.msk [vmem:[#allocation2 + $0x289] sm:$0xff] %vm25_vm0, %v161_v34  ;;  %v353_v58 = vld [vmem:[#allocation2 + $0x261] sm:$0xff]  ;;  %v377_v34 = vld [vmem:[#allocation2 + $0x52] sm:$0xff] }
  0x85   :  { %227 = vst.msk [vmem:[#allocation2 + $0x291] sm:$0xff] %vm25_vm0, %v162_v37  ;;  %v7738_v63 = vpack.i.bf16 %v353_v58, %v352_v57  ;;  %v350_v0 = vld [vmem:[#allocation2 + $0x241] sm:$0xff]  ;;  %v7798_v36 = vpack.i.bf16 %v377_v34, %v376_v33  ;;  %v374_v37 = vld [vmem:[#allocation2 + $0x32] sm:$0xff]  ;;  %v387_v58 = vld [vmem:[#allocation2 + $0xca] sm:$0xff] }
  0x86   :  { %224 = vst.msk [vmem:[#allocation2 + $0x271] sm:$0xff] %vm25_vm0, %v159_v39  ;;  %v351_v1 = vld [vmem:[#allocation2 + $0x249] sm:$0xff]  ;;  %v10470_v39 = vpop.permute.xlu2 %7644  ;;  %v388_v53 = vld [vmem:[#allocation2 + $0xda] sm:$0xff] }
  0x87   :  { %7704 = vrot.lane.b32.xlu1 %v7703_v38, %s9983_s29  ;;  %225 = vst.msk [vmem:[#allocation2 + $0x279] sm:$0xff] %vm25_vm0, %v160_v42  ;;  %v348_v2 = vld [vmem:[#allocation2 + $0x229] sm:$0xff]  ;;  %v7733_v5 = vpack.i.bf16 %v351_v1, %v350_v0  ;;  %v375_v38 = vld [vmem:[#allocation2 + $0x3a] sm:$0xff] }
  0x88   :  { %234 = vst.msk [vmem:[#allocation2 + $0x2e9] sm:$0xff] %vm25_vm0, %v169_v44  ;;  %v349_v3 = vld [vmem:[#allocation2 + $0x231] sm:$0xff]  ;;  %v7793_v42 = vpack.i.bf16 %v375_v38, %v374_v37  ;;  %v383_v44 = vld [vmem:[#allocation2 + $0x9a] sm:$0xff]  ;;  %v378_v49 = vld [vmem:[#allocation2 + $0x62] sm:$0xff] }
  0x89   :  { %7699 = vrot.lane.b32.xlu0 %v7698_v43, %s9983_s29  ;;  %235 = vst.msk [vmem:[#allocation2 + $0x2f1] sm:$0xff] %vm25_vm0, %v170_v45  ;;  %v358_v6 = vld [vmem:[#allocation2 + $0x2a1] sm:$0xff]  ;;  %v7728_v8 = vpack.i.bf16 %v349_v3, %v348_v2  ;;  %v382_v43 = vld [vmem:[#allocation2 + $0x92] sm:$0xff]  ;;  %v7788_v45 = vpack.i.bf16 %v373_v41, %v372_v40  ;;  %v392_v3 = vld [vmem:[#allocation2 + $0x10a] sm:$0xff] }
  0x8a   :  { %232 = vst.msk [vmem:[#allocation2 + $0x2d1] sm:$0xff] %vm25_vm0, %v167_v47  ;;  %v359_v7 = vld [vmem:[#allocation2 + $0x2a9] sm:$0xff]  ;;  %v380_v47 = vld [vmem:[#allocation2 + $0x7a] sm:$0xff]  ;;  %v413_v34 = vld [vmem:[#allocation2 + $0x232] sm:$0xff] }
  0x8b   :  { %7724 = vrot.lane.b32.xlu2 %v7723_v46, %s9983_s29  ;;  %233 = vst.msk [vmem:[#allocation2 + $0x2d9] sm:$0xff] %vm25_vm0, %v168_v50  ;;  %v7753_v9 = vpack.i.bf16 %v359_v7, %v358_v6  ;;  %v356_v10 = vld [vmem:[#allocation2 + $0x289] sm:$0xff]  ;;  %v7813_v46 = vpack.i.bf16 %v383_v44, %v382_v43  ;;  %v390_v6 = vld [vmem:[#allocation2 + $0xf2] sm:$0xff]  ;;  %v391_v7 = vld [vmem:[#allocation2 + $0xfa] sm:$0xff] }
  0x8c   :  { %230 = vst.msk [vmem:[#allocation2 + $0x2b9] sm:$0xff] %vm25_vm0, %v165_v51  ;;  %v357_v11 = vld [vmem:[#allocation2 + $0x291] sm:$0xff]  ;;  %v7808_v51 = vpack.i.bf16 %v381_v48, %v380_v47  ;;  %v386_v57 = vld [vmem:[#allocation2 + $0xc2] sm:$0xff]  ;;  %v411_v40 = vld [vmem:[#allocation2 + $0x21a] sm:$0xff] }
  0x8d   :  { %231 = vst.msk [vmem:[#allocation2 + $0x2c1] sm:$0xff] %vm25_vm0, %v166_v54  ;;  %v354_v12 = vld [vmem:[#allocation2 + $0x271] sm:$0xff]  ;;  %v7748_v14 = vpack.i.bf16 %v357_v11, %v356_v10  ;;  %v389_v54 = vld [vmem:[#allocation2 + $0xe2] sm:$0xff]  ;;  %v7833_v11 = vpack.i.bf16 %v391_v7, %v390_v6 }
  0x8e   :  { %238 = vst.msk [vmem:[#allocation2 + $0x319] sm:$0xff] %vm25_vm0, %v173_v56  ;;  %v355_v13 = vld [vmem:[#allocation2 + $0x279] sm:$0xff]  ;;  %v379_v50 = vld [vmem:[#allocation2 + $0x6a] sm:$0xff]  ;;  %v7828_v56 = vpack.i.bf16 %v389_v54, %v388_v53  ;;  %v409_v43 = vld [vmem:[#allocation2 + $0x202] sm:$0xff] }
  0x8f   :  { %7719 = vrot.lane.b32.xlu1 %v7718_v55, %s9983_s29  ;;  %239 = vst.msk [vmem:[#allocation2 + $0x321] sm:$0xff] %vm25_vm0, %v174_v59  ;;  %v364_v15 = vld [vmem:[#allocation2 + $0x2e9] sm:$0xff]  ;;  %v7743_v17 = vpack.i.bf16 %v355_v13, %v354_v12  ;;  %v7803_v55 = vpack.i.bf16 %v379_v50, %v378_v49  ;;  %v401_v10 = vld [vmem:[#allocation2 + $0x172] sm:$0xff]  ;;  %v10489_v13 = vpop.permute.xlu1 %7634  ;;  %v419_v47 = vld [vmem:[#allocation2 + $0x27a] sm:$0xff] }
  0x90   :  { %236 = vst.msk [vmem:[#allocation2 + $0x301] sm:$0xff] %vm25_vm0, %v171_v61  ;;  %v365_v16 = vld [vmem:[#allocation2 + $0x2f1] sm:$0xff]  ;;  %v7823_v61 = vpack.i.bf16 %v387_v58, %v386_v57  ;;  %v417_v53 = vld [vmem:[#allocation2 + $0x262] sm:$0xff] }
  0x91   :  { %7714 = vrot.lane.b32.xlu0 %v7713_v60, %s9983_s29  ;;  %237 = vst.msk [vmem:[#allocation2 + $0x309] sm:$0xff] %vm25_vm0, %v172_v62  ;;  %v7768_v18 = vpack.i.bf16 %v365_v16, %v364_v15  ;;  %v362_v19 = vld [vmem:[#allocation2 + $0x2d1] sm:$0xff]  ;;  %v394_v62 = vld [vmem:[#allocation2 + $0x122] sm:$0xff]  ;;  %v399_v16 = vld [vmem:[#allocation2 + $0x15a] sm:$0xff] }
  0x92   :  { %v363_v20 = vld [vmem:[#allocation2 + $0x2d9] sm:$0xff]  ;;  %v384_v59 = vld [vmem:[#allocation2 + $0xaa] sm:$0xff] }
  0x93   :  { %7739 = vrot.lane.b32.xlu2 %v7738_v63, %s9983_s29  ;;  %v360_v21 = vld [vmem:[#allocation2 + $0x2b9] sm:$0xff]  ;;  %v7763_v23 = vpack.i.bf16 %v363_v20, %v362_v19  ;;  %v395_v63 = vld [vmem:[#allocation2 + $0x12a] sm:$0xff]  ;;  %v397_v19 = vld [vmem:[#allocation2 + $0x142] sm:$0xff] }
  0x94   :  { %v361_v22 = vld [vmem:[#allocation2 + $0x2c1] sm:$0xff]  ;;  %v385_v60 = vld [vmem:[#allocation2 + $0xb2] sm:$0xff]  ;;  %v7843_v2 = vpack.i.bf16 %v395_v63, %v394_v62  ;;  %v412_v33 = vld [vmem:[#allocation2 + $0x22a] sm:$0xff] }
  0x95   :  { %v7758_v26 = vpack.i.bf16 %v361_v22, %v360_v21  ;;  %v368_v28 = vld [vmem:[#allocation2 + $0x319] sm:$0xff]  ;;  %v7818_v0 = vpack.i.bf16 %v385_v60, %v384_v59  ;;  %v406_v21 = vld [vmem:[#allocation2 + $0x1e2] sm:$0xff]  ;;  %v407_v22 = vld [vmem:[#allocation2 + $0x1ea] sm:$0xff]  ;;  %v7888_v37 = vpack.i.bf16 %v413_v34, %v412_v33 }
  0x96   :  { %v369_v29 = vld [vmem:[#allocation2 + $0x321] sm:$0xff]  ;;  %v398_v15 = vld [vmem:[#allocation2 + $0x152] sm:$0xff]  ;;  %v7873_v25 = vpack.i.bf16 %v407_v22, %v406_v21 }
  0x97   :  { %7734 = vrot.lane.b32.xlu1 %v7733_v5, %s9983_s29  ;;  %v366_v30 = vld [vmem:[#allocation2 + $0x301] sm:$0xff]  ;;  %v7778_v32 = vpack.i.bf16 %v369_v29, %v368_v28  ;;  %v393_v5 = vld [vmem:[#allocation2 + $0x112] sm:$0xff]  ;;  %v7853_v20 = vpack.i.bf16 %v399_v16, %v398_v15  ;;  %v428_v16 = vld [vmem:[#allocation2 + $0x2ea] sm:$0xff] }
  0x98   :  { %v367_v31 = vld [vmem:[#allocation2 + $0x309] sm:$0xff]  ;;  %v402_v29 = vld [vmem:[#allocation2 + $0x1b2] sm:$0xff]  ;;  %v424_v59 = vld [vmem:[#allocation2 + $0x2ba] sm:$0xff] }
  0x99   :  { %7729 = vrot.lane.b32.xlu0 %v7728_v8, %s9983_s29  ;;  %v7773_v35 = vpack.i.bf16 %v367_v31, %v366_v30  ;;  %v7838_v8 = vpack.i.bf16 %v393_v5, %v392_v3  ;;  %v403_v30 = vld [vmem:[#allocation2 + $0x1ba] sm:$0xff]  ;;  %v410_v38 = vld [vmem:[#allocation2 + $0x212] sm:$0xff]  ;;  %v425_v60 = vld [vmem:[#allocation2 + $0x2c2] sm:$0xff] }
  0x9a   :  { %v7918_v63 = vpack.i.bf16 %v425_v60, %v424_v59  ;;  %v420_v5 = vld [vmem:[#allocation2 + $0x28a] sm:$0xff]  ;;  %v421_v6 = vld [vmem:[#allocation2 + $0x292] sm:$0xff]  ;;  %v427_v21 = vld [vmem:[#allocation2 + $0x2da] sm:$0xff] }
  0x9b   :  { %7754 = vrot.lane.b32.xlu2 %v7753_v9, %s9983_s29  ;;  %v400_v9 = vld [vmem:[#allocation2 + $0x16a] sm:$0xff]  ;;  %v245_v34 = vld [vmem:[#allocation2 + $0x20] sm:$0xff] }
  0x9c   :  { %v248_v59 = vld [vmem:[#allocation2 + $0x48] sm:$0xff]  ;;  %v249_v60 = vld [vmem:[#allocation2 + $0x50] sm:$0xff] }
  0x9f   :  { %7749 = vrot.lane.b32.xlu1 %v7748_v14, %s9983_s29  ;;  %v7858_v14 = vpack.i.bf16 %v401_v10, %v400_v9  ;;  %v430_v9 = vld [vmem:[#allocation2 + $0x302] sm:$0xff]  ;;  %v431_v10 = vld [vmem:[#allocation2 + $0x30a] sm:$0xff] }
  0xa0   :  { %v7933_v15 = vpack.i.bf16 %v431_v10, %v430_v9  ;;  %v257_v9 = vld [vmem:[#allocation2 + $0xb0] sm:$0xff] }
  0xa1   :  { %7744 = vrot.lane.b32.xlu0 %v7743_v17, %s9983_s29  ;;  %v10492_v17 = vpop.permute.xlu0 %7624 }
  0xa3   :  { %7769 = vrot.lane.b32.xlu2 %v7768_v18, %s9983_s29  ;;  %v396_v18 = vld [vmem:[#allocation2 + $0x13a] sm:$0xff] }
  0xa7   :  { %7764 = vrot.lane.b32.xlu1 %v7763_v23, %s9983_s29  ;;  %v7848_v23 = vpack.i.bf16 %v397_v19, %v396_v18  ;;  %v429_v18 = vld [vmem:[#allocation2 + $0x2f2] sm:$0xff] }
  0xa9   :  { %7759 = vrot.lane.b32.xlu0 %v7758_v26, %s9983_s29  ;;  %v404_v26 = vld [vmem:[#allocation2 + $0x1ca] sm:$0xff] }
  0xab   :  { %7784 = vrot.lane.b32.xlu2 %v7783_v27, %s9984_s26  ;;  %v405_v27 = vld [vmem:[#allocation2 + $0x1d2] sm:$0xff] }
  0xaf   :  { %7779 = vrot.lane.b32.xlu1 %v7778_v32, %s9983_s29  ;;  %v7868_v32 = vpack.i.bf16 %v405_v27, %v404_v26  ;;  %v246_v27 = vld [vmem:[#allocation2 + $0x30] sm:$0xff] }
  0xb1   :  { %7774 = vrot.lane.b32.xlu0 %v7773_v35, %s9983_s29  ;;  %v7863_v35 = vpack.i.bf16 %v403_v30, %v402_v29  ;;  %v247_v29 = vld [vmem:[#allocation2 + $0x38] sm:$0xff]  ;;  %s9985_s29 = smov 12  }
  0xb2   :  { %v7948_v30 = vpack.i.bf16 %v247_v29, %v246_v27  ;;  %v262_v29 = vld [vmem:[#allocation2 + $0xf0] sm:$0xff] }
  0xb3   :  { %7799 = vrot.lane.b32.xlu2 %v7798_v36, %s9984_s26 }
  0xb7   :  { %7794 = vrot.lane.b32.xlu1 %v7793_v42, %s9984_s26  ;;  %v408_v42 = vld [vmem:[#allocation2 + $0x1fa] sm:$0xff] }
  0xb8   :  { %v7878_v48 = vpack.i.bf16 %v409_v43, %v408_v42  ;;  %v252_v42 = vld [vmem:[#allocation2 + $0x78] sm:$0xff] }
  0xb9   :  { %7789 = vrot.lane.b32.xlu0 %v7788_v45, %s9984_s26  ;;  %v10476_v52 = vpop.permute.xlu2 %7649  ;;  %v7883_v45 = vpack.i.bf16 %v411_v40, %v410_v38 }
  0xbb   :  { %7814 = vrot.lane.b32.xlu2 %v7813_v46, %s9984_s26  ;;  %v418_v46 = vld [vmem:[#allocation2 + $0x272] sm:$0xff] }
  0xbc   :  { %v7903_v50 = vpack.i.bf16 %v419_v47, %v418_v46  ;;  %v253_v46 = vld [vmem:[#allocation2 + $0x80] sm:$0xff]  ;;  %v143_v47 = vld [vmem:[%s15261_s0 + $0xf0] sm:$0xff] }
  0xbd   :  { %208 = vst.msk [vmem:[#allocation2 + $0x181] sm:$0xff] %vm25_vm0, %v143_v47 }
  0xbf   :  { %7809 = vrot.lane.b32.xlu1 %v7808_v51, %s9984_s26  ;;  %v416_v51 = vld [vmem:[#allocation2 + $0x25a] sm:$0xff] }
  0xc0   :  { %v7898_v58 = vpack.i.bf16 %v417_v53, %v416_v51  ;;  %v250_v53 = vld [vmem:[#allocation2 + $0x60] sm:$0xff] }
  0xc1   :  { %7804 = vrot.lane.b32.xlu0 %v7803_v55, %s9984_s26  ;;  %v414_v55 = vld [vmem:[#allocation2 + $0x242] sm:$0xff] }
  0xc3   :  { %7829 = vrot.lane.b32.xlu2 %v7828_v56, %s9984_s26  ;;  %v415_v56 = vld [vmem:[#allocation2 + $0x24a] sm:$0xff] }
  0xc5   :  { %v10481_v1 = vpop.permute.xlu2 %7664 }
  0xc7   :  { %7824 = vrot.lane.b32.xlu1 %v7823_v61, %s9984_s26  ;;  %v7893_v61 = vpack.i.bf16 %v415_v56, %v414_v55  ;;  %v251_v55 = vld [vmem:[#allocation2 + $0x68] sm:$0xff] }
  0xc9   :  { %7819 = vrot.lane.b32.xlu0 %v7818_v0, %s9984_s26  ;;  %v422_v0 = vld [vmem:[#allocation2 + $0x2a2] sm:$0xff] }
  0xcb   :  { %7844 = vrot.lane.b32.xlu2 %v7843_v2, %s9984_s26  ;;  %v423_v2 = vld [vmem:[#allocation2 + $0x2aa] sm:$0xff] }
  0xcd   :  { %v10486_v12 = vpop.permute.xlu2 %7679 }
  0xcf   :  { %7839 = vrot.lane.b32.xlu1 %v7838_v8, %s9984_s26  ;;  %v7913_v8 = vpack.i.bf16 %v423_v2, %v422_v0  ;;  %v258_v0 = vld [vmem:[#allocation2 + $0xc0] sm:$0xff]  ;;  %v259_v2 = vld [vmem:[#allocation2 + $0xc8] sm:$0xff] }
  0xd1   :  { %7834 = vrot.lane.b32.xlu0 %v7833_v11, %s9984_s26  ;;  %v7908_v11 = vpack.i.bf16 %v421_v6, %v420_v5  ;;  %v7978_v5 = vpack.i.bf16 %v259_v2, %v258_v0  ;;  %v276_v2 = vld [vmem:[#allocation2 + $0x1c8] sm:$0xff] }
  0xd3   :  { %7859 = vrot.lane.b32.xlu2 %v7858_v14, %s9984_s26 }
  0xd5   :  { %v10495_v24 = vpop.permute.xlu2 %7694 }
  0xd7   :  { %7854 = vrot.lane.b32.xlu1 %v7853_v20, %s9984_s26  ;;  %v426_v20 = vld [vmem:[#allocation2 + $0x2d2] sm:$0xff] }
  0xd9   :  { %7849 = vrot.lane.b32.xlu0 %v7848_v23, %s9984_s26  ;;  %v10499_v28 = vpop.permute.xlu1 %7639  ;;  %v7928_v23 = vpack.i.bf16 %v429_v18, %v428_v16  ;;  %v255_v16 = vld [vmem:[#allocation2 + $0x98] sm:$0xff] }
  0xdb   :  { %v10501_v31 = vpop.permute.xlu0 %7629  ;;  %7874 = vrot.lane.b32.xlu2 %v7873_v25, %s9984_s26  ;;  %v7923_v25 = vpack.i.bf16 %v427_v21, %v426_v20  ;;  %v264_v21 = vld [vmem:[#allocation2 + $0x108] sm:$0xff] }
  0xdd   :  { %v10504_v36 = vpop.permute.xlu2 %7709 }
  0xdf   :  { %7869 = vrot.lane.b32.xlu1 %v7868_v32, %s9984_s26  ;;  %v244_v32 = vld [vmem:[#allocation2 + $0x18] sm:$0xff] }
  0xe0   :  { %v7943_v40 = vpack.i.bf16 %v245_v34, %v244_v32 }
  0xe1   :  { %7864 = vrot.lane.b32.xlu0 %v7863_v35, %s9984_s26  ;;  %v10508_v41 = vpop.permute.xlu1 %7659  ;;  %v432_v35 = vld [vmem:[#allocation2 + $0x31a] sm:$0xff] }
  0xe3   :  { %v10510_v44 = vpop.permute.xlu0 %7654  ;;  %7889 = vrot.lane.b32.xlu2 %v7888_v37, %s9984_s26  ;;  %v433_v37 = vld [vmem:[#allocation2 + $0x322] sm:$0xff] }
  0xe4   :  { %v7938_v43 = vpack.i.bf16 %v433_v37, %v432_v35  ;;  %v260_v35 = vld [vmem:[#allocation2 + $0xd8] sm:$0xff]  ;;  %v261_v37 = vld [vmem:[#allocation2 + $0xe0] sm:$0xff] }
  0xe5   :  { %v10513_v49 = vpop.permute.xlu2 %7724 }
  0xe7   :  { %7884 = vrot.lane.b32.xlu1 %v7883_v45, %s9984_s26 }
  0xe9   :  { %7879 = vrot.lane.b32.xlu0 %v7878_v48, %s9984_s26  ;;  %v10517_v54 = vpop.permute.xlu1 %7674  ;;  %v144_v48 = vld [vmem:[%s15261_s0 + $0xf8] sm:$0xff] }
  0xea   :  { %209 = vst.msk [vmem:[#allocation2 + $0x189] sm:$0xff] %vm25_vm0, %v144_v48 }
  0xeb   :  { %v10519_v57 = vpop.permute.xlu0 %7669  ;;  %7904 = vrot.lane.b32.xlu2 %v7903_v50, %s9984_s26  ;;  %v7963_v50 = vpack.i.bf16 %v253_v46, %v252_v42  ;;  %v271_v46 = vld [vmem:[#allocation2 + $0x158] sm:$0xff] }
  0xed   :  { %v10522_v62 = vpop.permute.xlu2 %7739 }
  0xef   :  { %7899 = vrot.lane.b32.xlu1 %v7898_v58, %s9984_s26  ;;  %v7958_v58 = vpack.i.bf16 %v251_v55, %v250_v53  ;;  %v269_v53 = vld [vmem:[#allocation2 + $0x140] sm:$0xff] }
  0xf1   :  { %7894 = vrot.lane.b32.xlu0 %v7893_v61, %s9984_s26  ;;  %v10526_v3 = vpop.permute.xlu1 %7689  ;;  %v7953_v61 = vpack.i.bf16 %v249_v60, %v248_v59  ;;  %v266_v59 = vld [vmem:[#allocation2 + $0x120] sm:$0xff]  ;;  %v267_v60 = vld [vmem:[#allocation2 + $0x128] sm:$0xff] }
  0xf3   :  { %v10528_v7 = vpop.permute.xlu0 %7684  ;;  %7919 = vrot.lane.b32.xlu2 %v7918_v63, %s9984_s26 }
  0xf5   :  { %v10531_v14 = vpop.permute.xlu2 %7754 }
  0xf7   :  { %7914 = vrot.lane.b32.xlu1 %v7913_v8, %s9984_s26  ;;  %v256_v8 = vld [vmem:[#allocation2 + $0xa8] sm:$0xff] }
  0xf9   :  { %7909 = vrot.lane.b32.xlu0 %v7908_v11, %s9984_s26  ;;  %v10535_v19 = vpop.permute.xlu1 %7704  ;;  %v7973_v11 = vpack.i.bf16 %v257_v9, %v256_v8  ;;  %v464_v9 = vld [vmem:[#allocation2 + $0x180] sm:$0xff] }
  0xfa   :  { %15486 = vst [vmem:[#allocation7_spill] sm:$0xff] %v10535_v19 }
  0xfb   :  { %v10537_v22 = vpop.permute.xlu0 %7699  ;;  %7934 = vrot.lane.b32.xlu2 %v7933_v15, %s9984_s26  ;;  %v254_v15 = vld [vmem:[#allocation2 + $0x90] sm:$0xff] }
  0xfc   :  { %v7968_v18 = vpack.i.bf16 %v255_v16, %v254_v15 }
  0xfd   :  { %v10540_v26 = vpop.permute.xlu2 %7769 }
  0xff   :  { %7929 = vrot.lane.b32.xlu1 %v7928_v23, %s9984_s26  ;;  %v265_v23 = vld [vmem:[#allocation2 + $0x110] sm:$0xff] }
 0x101   :  { %7924 = vrot.lane.b32.xlu0 %v7923_v25, %s9984_s26  ;;  %v10544_v33 = vpop.permute.xlu1 %7719  ;;  %v7993_v25 = vpack.i.bf16 %v265_v23, %v264_v21  ;;  %v272_v21 = vld [vmem:[#allocation2 + $0x168] sm:$0xff]  ;;  %v273_v23 = vld [vmem:[#allocation2 + $0x170] sm:$0xff] }
 0x103   :  { %v10546_v38 = vpop.permute.xlu0 %7714  ;;  %7949 = vrot.lane.b32.xlu2 %v7948_v30, %s9985_s29  ;;  %v263_v30 = vld [vmem:[#allocation2 + $0xf8] sm:$0xff] }
 0x104   :  { %v7988_v34 = vpack.i.bf16 %v263_v30, %v262_v29  ;;  %v8013_v29 = vpack.i.bf16 %v273_v23, %v272_v21 }
 0x105   :  { %v10549_v45 = vpop.permute.xlu2 %7784 }
 0x107   :  { %7944 = vrot.lane.b32.xlu1 %v7943_v40, %s9985_s29  ;;  %v7983_v40 = vpack.i.bf16 %v261_v37, %v260_v35  ;;  %v175_v35 = vld [vmem:[%s15261_s0 + $0x1f0] sm:$0xff]  ;;  %v176_v37 = vld [vmem:[%s15261_s0 + $0x1f8] sm:$0xff]  ;;  %s9986_s0 = smov 16  }
 0x108   :  { %240 = vst.msk [vmem:[#allocation2 + $0x331] sm:$0xff] %vm25_vm0, %v175_v35 }
 0x109   :  { %7939 = vrot.lane.b32.xlu0 %v7938_v43, %s9984_s26  ;;  %v10561_v51 = vpop.permute.xlu1 %7734  ;;  %v270_v43 = vld [vmem:[#allocation2 + $0x150] sm:$0xff]  ;;  %241 = vst.msk [vmem:[#allocation2 + $0x339] sm:$0xff] %vm25_vm0, %v176_v37  ;;  %v294_v37 = vld [vmem:[#allocation2 + $0x2a0] sm:$0xff] }
 0x10a   :  { %v8008_v47 = vpack.i.bf16 %v271_v46, %v270_v43  ;;  %v280_v46 = vld [vmem:[#allocation2 + $0x1f8] sm:$0xff] }
 0x10b   :  { %v10563_v56 = vpop.permute.xlu0 %7729  ;;  %7964 = vrot.lane.b32.xlu2 %v7963_v50, %s9985_s29  ;;  %v268_v50 = vld [vmem:[#allocation2 + $0x138] sm:$0xff] }
 0x10d   :  { %v10566_v63 = vpop.permute.xlu2 %7799 }
 0x10f   :  { %7959 = vrot.lane.b32.xlu1 %v7958_v58, %s9985_s29  ;;  %v8003_v58 = vpack.i.bf16 %v269_v53, %v268_v50 }
 0x111   :  { %7954 = vrot.lane.b32.xlu0 %v7953_v61, %s9985_s29  ;;  %v10570_v6 = vpop.permute.xlu1 %7749  ;;  %v7998_v61 = vpack.i.bf16 %v267_v60, %v266_v59  ;;  %v279_v59 = vld [vmem:[#allocation2 + $0x1e8] sm:$0xff] }
 0x113   :  { %v10572_v10 = vpop.permute.xlu0 %7744  ;;  %7979 = vrot.lane.b32.xlu2 %v7978_v5, %s9985_s29  ;;  %v277_v5 = vld [vmem:[#allocation2 + $0x1d0] sm:$0xff] }
 0x114   :  { %v8023_v8 = vpack.i.bf16 %v277_v5, %v276_v2  ;;  %v288_v2 = vld [vmem:[#allocation2 + $0x258] sm:$0xff]  ;;  %v289_v5 = vld [vmem:[#allocation2 + $0x260] sm:$0xff] }
 0x115   :  { %v10575_v20 = vpop.permute.xlu2 %7814 }
 0x117   :  { %7974 = vrot.lane.b32.xlu1 %v7973_v11, %s9985_s29  ;;  %v465_v11 = vld [vmem:[#allocation2 + $0x188] sm:$0xff] }
 0x119   :  { %7969 = vrot.lane.b32.xlu0 %v7968_v18, %s9985_s29  ;;  %v10579_v27 = vpop.permute.xlu1 %7764  ;;  %v8018_v18 = vpack.i.bf16 %v465_v11, %v464_v9  ;;  %v286_v11 = vld [vmem:[#allocation2 + $0x240] sm:$0xff] }
 0x11b   :  { %v10581_v32 = vpop.permute.xlu0 %7759  ;;  %7994 = vrot.lane.b32.xlu2 %v7993_v25, %s9985_s29  ;;  %v282_v25 = vld [vmem:[#allocation2 + $0x210] sm:$0xff] }
 0x11d   :  { %v10584_v42 = vpop.permute.xlu2 %7829 }
 0x11f   :  { %7989 = vrot.lane.b32.xlu1 %v7988_v34, %s9985_s29  ;;  %v283_v34 = vld [vmem:[#allocation2 + $0x218] sm:$0xff] }
 0x121   :  { %7984 = vrot.lane.b32.xlu0 %v7983_v40, %s9985_s29  ;;  %v10588_v48 = vpop.permute.xlu1 %7779  ;;  %v8038_v40 = vpack.i.bf16 %v283_v34, %v282_v25  ;;  %v284_v25 = vld [vmem:[#allocation2 + $0x228] sm:$0xff] }
 0x122   :  { %15487 = vst [vmem:[#allocation8_spill] sm:$0xff] %v10588_v48 }
 0x123   :  { %v10590_v55 = vpop.permute.xlu0 %7774  ;;  %8009 = vrot.lane.b32.xlu2 %v8008_v47, %s9985_s29  ;;  %v281_v47 = vld [vmem:[#allocation2 + $0x200] sm:$0xff] }
 0x124   :  { %v8033_v53 = vpack.i.bf16 %v281_v47, %v280_v46 }
 0x125   :  { %v10593_v0 = vpop.permute.xlu2 %7844 }
 0x127   :  { %8004 = vrot.lane.b32.xlu1 %v8003_v58, %s9985_s29  ;;  %v278_v58 = vld [vmem:[#allocation2 + $0x1e0] sm:$0xff] }
 0x128   :  { %v8028_v60 = vpack.i.bf16 %v279_v59, %v278_v58  ;;  %v293_v58 = vld [vmem:[#allocation2 + $0x290] sm:$0xff] }
 0x129   :  { %7999 = vrot.lane.b32.xlu0 %v7998_v61, %s9985_s29  ;;  %v10597_v15 = vpop.permute.xlu1 %7794 }
 0x12b   :  { %v10599_v16 = vpop.permute.xlu0 %7789  ;;  %8024 = vrot.lane.b32.xlu2 %v8023_v8, %s9985_s29  ;;  %v8053_v8 = vpack.i.bf16 %v289_v5, %v288_v2  ;;  %v290_v2 = vld [vmem:[#allocation2 + $0x270] sm:$0xff]  ;;  %v291_v5 = vld [vmem:[#allocation2 + $0x278] sm:$0xff] }
 0x12d   :  { %v10602_v30 = vpop.permute.xlu2 %7859 }
 0x12f   :  { %8019 = vrot.lane.b32.xlu1 %v8018_v18, %s9985_s29  ;;  %v287_v18 = vld [vmem:[#allocation2 + $0x248] sm:$0xff] }
 0x130   :  { %v8048_v23 = vpack.i.bf16 %v287_v18, %v286_v11  ;;  %v300_v18 = vld [vmem:[#allocation2 + $0x2e8] sm:$0xff] }
 0x131   :  { %8014 = vrot.lane.b32.xlu0 %v8013_v29, %s9985_s29  ;;  %v10614_v43 = vpop.permute.xlu1 %7809  ;;  %v285_v29 = vld [vmem:[#allocation2 + $0x230] sm:$0xff] }
 0x132   :  { %v8043_v34 = vpack.i.bf16 %v285_v29, %v284_v25  ;;  %v301_v25 = vld [vmem:[#allocation2 + $0x2f0] sm:$0xff] }
 0x133   :  { %v10616_v50 = vpop.permute.xlu0 %7804  ;;  %8039 = vrot.lane.b32.xlu2 %v8038_v40, %s9985_s29  ;;  %v295_v40 = vld [vmem:[#allocation2 + $0x2a8] sm:$0xff] }
 0x134   :  { %v8068_v46 = vpack.i.bf16 %v295_v40, %v294_v37  ;;  %v299_v37 = vld [vmem:[#allocation2 + $0x2d8] sm:$0xff] }
 0x135   :  { %v10619_v61 = vpop.permute.xlu2 %7874  ;;  %v296_v40 = vld [vmem:[#allocation2 + $0x2b8] sm:$0xff] }
 0x136   :  { %15488 = vst [vmem:[#allocation9_spill] sm:$0xff] %v10619_v61  ;;  %v9868_v61 = vld [vmem:[#allocation2 + $0x38] sm:$0xff] }
 0x137   :  { %8034 = vrot.lane.b32.xlu1 %v8033_v53, %s9985_s29  ;;  %v292_v53 = vld [vmem:[#allocation2 + $0x288] sm:$0xff] }
 0x139   :  { %8029 = vrot.lane.b32.xlu0 %v8028_v60, %s9985_s29  ;;  %v10623_v9 = vpop.permute.xlu1 %7824  ;;  %v8063_v60 = vpack.i.bf16 %v293_v58, %v292_v53  ;;  %v297_v58 = vld [vmem:[#allocation2 + $0x2c0] sm:$0xff] }
 0x13a   :  { %15489 = vst [vmem:[#allocation10_spill] sm:$0xff] %v10623_v9  ;;  %v8073_v4 = vpack.i.bf16 %v297_v58, %v296_v40  ;;  %v503_v40 = vld [vmem:[#allocation2 + $0x51] sm:$0xff]  ;;  %v7661_v9 = vunpack.i.l.bf16 %v10508_v41 }
 0x13b   :  { %v10625_v21 = vpop.permute.xlu0 %7819  ;;  %8054 = vrot.lane.b32.xlu2 %v8053_v8, %s9985_s29  ;;  %v8058_v8 = vpack.i.bf16 %v291_v5, %v290_v2  ;;  %v496_v2 = vld [vmem:[#allocation2 + $0x330] sm:$0xff]  ;;  %v497_v5 = vld [vmem:[#allocation2 + $0x338] sm:$0xff] }
 0x13c   :  { %15490 = vst [vmem:[#allocation11_spill] sm:$0xff] %v10625_v21  ;;  %v9867_v21 = vld [vmem:[#allocation2 + $0x30] sm:$0xff] }
 0x13d   :  { %v10628_v35 = vpop.permute.xlu2 %7889 }
 0x13e   :  { %15491 = vst [vmem:[#allocation12_spill] sm:$0xff] %v10628_v35 }
 0x13f   :  { %8049 = vrot.lane.b32.xlu1 %v8048_v23, %s9985_s29  ;;  %v8083_v23 = vpack.i.bf16 %v301_v25, %v300_v18  ;;  %v304_v18 = vld [vmem:[#allocation2 + $0x318] sm:$0xff]  ;;  %v305_v25 = vld [vmem:[#allocation2 + $0x320] sm:$0xff] }
 0x141   :  { %8044 = vrot.lane.b32.xlu0 %v8043_v34, %s9985_s29  ;;  %v10632_v47 = vpop.permute.xlu1 %7839  ;;  %v298_v34 = vld [vmem:[#allocation2 + $0x2d0] sm:$0xff] }
 0x142   :  { %15492 = vst [vmem:[#allocation13_spill] sm:$0xff] %v10632_v47  ;;  %v9866_v47 = vld [vmem:[#allocation2 + $0x68] sm:$0xff] }
 0x143   :  { %v10634_v59 = vpop.permute.xlu0 %7834  ;;  %8069 = vrot.lane.b32.xlu2 %v8068_v46, %s9985_s29  ;;  %v8078_v46 = vpack.i.bf16 %v299_v37, %v298_v34  ;;  %v8093_v34 = vpack.i.bf16 %v305_v25, %v304_v18  ;;  %v502_v37 = vld [vmem:[#allocation2 + $0x49] sm:$0xff]  ;;  %v509_v25 = vld [vmem:[#allocation2 + $0x99] sm:$0xff] }
 0x144   :  { %15493 = vst [vmem:[#allocation14_spill] sm:$0xff] %v10634_v59  ;;  %v9865_v59 = vld [vmem:[#allocation2 + $0x60] sm:$0xff] }
 0x145   :  { %v10637_v11 = vpop.permute.xlu2 %7904 }
 0x146   :  { %15494 = vst [vmem:[#allocation15_spill] sm:$0xff] %v10637_v11  ;;  %v511_v11 = vld [vmem:[#allocation2 + $0xb1] sm:$0xff] }
 0x147   :  { %8064 = vrot.lane.b32.xlu1 %v8063_v60, %s9985_s29  ;;  %v8098_v60 = vpack.i.bf16 %v497_v5, %v496_v2  ;;  %v501_v2 = vld [vmem:[#allocation2 + $0x39] sm:$0xff] }
 0x149   :  { %8059 = vrot.lane.b32.xlu0 %v8058_v8, %s9985_s29  ;;  %v10641_v29 = vpop.permute.xlu1 %7854 }
 0x14a   :  { %15495 = vst [vmem:[#allocation16_spill] sm:$0xff] %v10641_v29  ;;  %v302_v29 = vld [vmem:[#allocation2 + $0x300] sm:$0xff] }
 0x14b   :  { %v10643_v53 = vpop.permute.xlu0 %7849  ;;  %8084 = vrot.lane.b32.xlu2 %v8083_v23, %s9985_s29  ;;  %v303_v23 = vld [vmem:[#allocation2 + $0x308] sm:$0xff] }
 0x14c   :  { %15496 = vst [vmem:[#allocation17_spill] sm:$0xff] %v10643_v53  ;;  %v8088_v58 = vpack.i.bf16 %v303_v23, %v302_v29  ;;  %v508_v29 = vld [vmem:[#allocation2 + $0x91] sm:$0xff] }
 0x14d   :  { %v10646_v19 = vpop.permute.xlu2 %7919 }
 0x14e   :  { %15497 = vst [vmem:[#allocation18_spill] sm:$0xff] %v10646_v19 }
 0x14f   :  { %8079 = vrot.lane.b32.xlu1 %v8078_v46, %s9985_s29  ;;  %v8113_v46 = vpack.i.bf16 %v503_v40, %v502_v37  ;;  %v506_v37 = vld [vmem:[#allocation2 + $0x79] sm:$0xff]  ;;  %v507_v40 = vld [vmem:[#allocation2 + $0x81] sm:$0xff] }
 0x151   :  { %8074 = vrot.lane.b32.xlu0 %v8073_v4, %s9985_s29  ;;  %v10650_v8 = vpop.permute.xlu1 %7869  ;;  %v500_v4 = vld [vmem:[#allocation2 + $0x31] sm:$0xff] }
 0x152   :  { %15498 = vst [vmem:[#allocation19_spill] sm:$0xff] %v10650_v8  ;;  %v498_v8 = vld [vmem:[#allocation2 + $0x19] sm:$0xff] }
 0x153   :  { %v10652_v53 = vpop.permute.xlu0 %7864  ;;  %8099 = vrot.lane.b32.xlu2 %v8098_v60, %s9985_s29  ;;  %v8108_v60 = vpack.i.bf16 %v501_v2, %v500_v4  ;;  %v8123_v2 = vpack.i.bf16 %v507_v40, %v506_v37 }
 0x154   :  { %15499 = vst [vmem:[#allocation20_spill] sm:$0xff] %v10652_v53  ;;  %v499_v53 = vld [vmem:[#allocation2 + $0x21] sm:$0xff] }
 0x155   :  { %v10655_v19 = vpop.permute.xlu2 %7934  ;;  %v8103_v23 = vpack.i.bf16 %v499_v53, %v498_v8  ;;  %v515_v53 = vld [vmem:[#allocation2 + $0xe1] sm:$0xff] }
 0x156   :  { %15500 = vst [vmem:[#allocation21_spill] sm:$0xff] %v10655_v19 }
 0x157   :  { %8094 = vrot.lane.b32.xlu1 %v8093_v34, %s9985_s29  ;;  %v8128_v34 = vpack.i.bf16 %v509_v25, %v508_v29  ;;  %v512_v29 = vld [vmem:[#allocation2 + $0xc1] sm:$0xff]  ;;  %v513_v25 = vld [vmem:[#allocation2 + $0xc9] sm:$0xff] }
 0x158   :  { %v8138_v37 = vpack.i.bf16 %v513_v25, %v512_v29 }
 0x159   :  { %8089 = vrot.lane.b32.xlu0 %v8088_v58, %s9985_s29  ;;  %v10659_v5 = vpop.permute.xlu1 %7884 }
 0x15a   :  { %15501 = vst [vmem:[#allocation22_spill] sm:$0xff] %v10659_v5  ;;  %v504_v5 = vld [vmem:[#allocation2 + $0x61] sm:$0xff] }
 0x15b   :  { %v10661_v18 = vpop.permute.xlu0 %7879  ;;  %8114 = vrot.lane.b32.xlu2 %v8113_v46, %s9986_s0  ;;  %v514_v46 = vld [vmem:[#allocation2 + $0xd9] sm:$0xff] }
 0x15c   :  { %15502 = vst [vmem:[#allocation23_spill] sm:$0xff] %v10661_v18  ;;  %v505_v18 = vld [vmem:[#allocation2 + $0x69] sm:$0xff] }
 0x15d   :  { %v10664_v19 = vpop.permute.xlu2 %7949  ;;  %v8118_v8 = vpack.i.bf16 %v505_v18, %v504_v5  ;;  %v521_v5 = vld [vmem:[#allocation2 + $0x129] sm:$0xff] }
 0x15e   :  { %15503 = vst [vmem:[#allocation24_spill] sm:$0xff] %v10664_v19 }
 0x15f   :  { %8109 = vrot.lane.b32.xlu1 %v8108_v60, %s9986_s0  ;;  %v8143_v60 = vpack.i.bf16 %v515_v53, %v514_v46  ;;  %v518_v46 = vld [vmem:[#allocation2 + $0x109] sm:$0xff]  ;;  %v519_v53 = vld [vmem:[#allocation2 + $0x111] sm:$0xff] }
 0x160   :  { %v8153_v29 = vpack.i.bf16 %v519_v53, %v518_v46 }
 0x161   :  { %8104 = vrot.lane.b32.xlu0 %v8103_v23, %s9986_s0  ;;  %v10668_v58 = vpop.permute.xlu1 %7899 }
 0x162   :  { %15504 = vst [vmem:[#allocation25_spill] sm:$0xff] %v10668_v58  ;;  %v510_v58 = vld [vmem:[#allocation2 + $0xa9] sm:$0xff] }
 0x163   :  { %v10670_v4 = vpop.permute.xlu0 %7894  ;;  %8129 = vrot.lane.b32.xlu2 %v8128_v34, %s9986_s0  ;;  %v520_v34 = vld [vmem:[#allocation2 + $0x121] sm:$0xff]  ;;  %v8133_v18 = vpack.i.bf16 %v511_v11, %v510_v58  ;;  %v527_v11 = vld [vmem:[#allocation2 + $0x171] sm:$0xff] }
 0x164   :  { %15505 = vst [vmem:[#allocation26_spill] sm:$0xff] %v10670_v4 }
 0x165   :  { %v10673_v19 = vpop.permute.xlu2 %7964 }
 0x166   :  { %15506 = vst [vmem:[#allocation27_spill] sm:$0xff] %v10673_v19  ;;  %v517_v19 = vld [vmem:[#allocation2 + $0xf9] sm:$0xff] }
 0x167   :  { %8124 = vrot.lane.b32.xlu1 %v8123_v2, %s9986_s0  ;;  %v8158_v2 = vpack.i.bf16 %v521_v5, %v520_v34  ;;  %v524_v34 = vld [vmem:[#allocation2 + $0x151] sm:$0xff]  ;;  %v525_v5 = vld [vmem:[#allocation2 + $0x159] sm:$0xff] }
 0x168   :  { %v8168_v46 = vpack.i.bf16 %v525_v5, %v524_v34 }
 0x169   :  { %8119 = vrot.lane.b32.xlu0 %v8118_v8, %s9986_s0  ;;  %v10677_v23 = vpop.permute.xlu1 %7914 }
 0x16a   :  { %15507 = vst [vmem:[#allocation28_spill] sm:$0xff] %v10677_v23  ;;  %v516_v23 = vld [vmem:[#allocation2 + $0xf1] sm:$0xff] }
 0x16b   :  { %v10679_v4 = vpop.permute.xlu0 %7909  ;;  %8144 = vrot.lane.b32.xlu2 %v8143_v60, %s9986_s0  ;;  %v526_v60 = vld [vmem:[#allocation2 + $0x169] sm:$0xff]  ;;  %v8148_v58 = vpack.i.bf16 %v517_v19, %v516_v23 }
 0x16c   :  { %15508 = vst [vmem:[#allocation29_spill] sm:$0xff] %v10679_v4  ;;  %v533_v19 = vld [vmem:[#allocation2 + $0x1e9] sm:$0xff] }
 0x16d   :  { %v10682_v40 = vpop.permute.xlu2 %7979 }
 0x16e   :  { %15509 = vst [vmem:[#allocation30_spill] sm:$0xff] %v10682_v40  ;;  %v523_v40 = vld [vmem:[#allocation2 + $0x141] sm:$0xff] }
 0x16f   :  { %8139 = vrot.lane.b32.xlu1 %v8138_v37, %s9986_s0  ;;  %v8173_v37 = vpack.i.bf16 %v527_v11, %v526_v60  ;;  %v530_v60 = vld [vmem:[#allocation2 + $0x1c9] sm:$0xff]  ;;  %v531_v11 = vld [vmem:[#allocation2 + $0x1d1] sm:$0xff] }
 0x170   :  { %v8183_v34 = vpack.i.bf16 %v531_v11, %v530_v60 }
 0x171   :  { %8134 = vrot.lane.b32.xlu0 %v8133_v18, %s9986_s0  ;;  %v10686_v8 = vpop.permute.xlu1 %7929 }
 0x172   :  { %15510 = vst [vmem:[#allocation31_spill] sm:$0xff] %v10686_v8  ;;  %v522_v8 = vld [vmem:[#allocation2 + $0x139] sm:$0xff] }
 0x173   :  { %v10688_v4 = vpop.permute.xlu0 %7924  ;;  %8159 = vrot.lane.b32.xlu2 %v8158_v2, %s9986_s0  ;;  %v532_v2 = vld [vmem:[#allocation2 + $0x1e1] sm:$0xff]  ;;  %v8163_v23 = vpack.i.bf16 %v523_v40, %v522_v8  ;;  %v539_v40 = vld [vmem:[#allocation2 + $0x231] sm:$0xff] }
 0x174   :  { %15511 = vst [vmem:[#allocation32_spill] sm:$0xff] %v10688_v4 }
 0x175   :  { %v10691_v25 = vpop.permute.xlu2 %7994 }
 0x176   :  { %15512 = vst [vmem:[#allocation33_spill] sm:$0xff] %v10691_v25  ;;  %v529_v25 = vld [vmem:[#allocation2 + $0x189] sm:$0xff] }
 0x177   :  { %8154 = vrot.lane.b32.xlu1 %v8153_v29, %s9986_s0  ;;  %v8188_v29 = vpack.i.bf16 %v533_v19, %v532_v2  ;;  %v536_v2 = vld [vmem:[#allocation2 + $0x211] sm:$0xff]  ;;  %v537_v19 = vld [vmem:[#allocation2 + $0x219] sm:$0xff] }
 0x178   :  { %v8198_v60 = vpack.i.bf16 %v537_v19, %v536_v2 }
 0x179   :  { %8149 = vrot.lane.b32.xlu0 %v8148_v58, %s9986_s0  ;;  %v10695_v18 = vpop.permute.xlu1 %7944 }
 0x17a   :  { %15513 = vst [vmem:[#allocation34_spill] sm:$0xff] %v10695_v18  ;;  %v528_v18 = vld [vmem:[#allocation2 + $0x181] sm:$0xff] }
 0x17b   :  { %v10697_v4 = vpop.permute.xlu0 %7939  ;;  %8174 = vrot.lane.b32.xlu2 %v8173_v37, %s9986_s0  ;;  %v538_v37 = vld [vmem:[#allocation2 + $0x229] sm:$0xff]  ;;  %v8178_v8 = vpack.i.bf16 %v529_v25, %v528_v18  ;;  %v545_v25 = vld [vmem:[#allocation2 + $0x279] sm:$0xff] }
 0x17c   :  { %15514 = vst [vmem:[#allocation35_spill] sm:$0xff] %v10697_v4 }
 0x17d   :  { %v10700_v53 = vpop.permute.xlu2 %8009 }
 0x17e   :  { %15515 = vst [vmem:[#allocation36_spill] sm:$0xff] %v10700_v53  ;;  %v534_v53 = vld [vmem:[#allocation2 + $0x1f9] sm:$0xff] }
 0x17f   :  { %8169 = vrot.lane.b32.xlu1 %v8168_v46, %s9986_s0  ;;  %v8203_v46 = vpack.i.bf16 %v539_v40, %v538_v37  ;;  %v542_v37 = vld [vmem:[#allocation2 + $0x259] sm:$0xff]  ;;  %v543_v40 = vld [vmem:[#allocation2 + $0x261] sm:$0xff] }
 0x180   :  { %v8213_v2 = vpack.i.bf16 %v543_v40, %v542_v37 }
 0x181   :  { %8164 = vrot.lane.b32.xlu0 %v8163_v23, %s9986_s0  ;;  %v10704_v58 = vpop.permute.xlu1 %7959 }
 0x182   :  { %15516 = vst [vmem:[#allocation37_spill] sm:$0xff] %v10704_v58  ;;  %v535_v58 = vld [vmem:[#allocation2 + $0x201] sm:$0xff] }
 0x183   :  { %v10706_v4 = vpop.permute.xlu0 %7954  ;;  %8189 = vrot.lane.b32.xlu2 %v8188_v29, %s9986_s0  ;;  %v544_v29 = vld [vmem:[#allocation2 + $0x271] sm:$0xff]  ;;  %v8193_v18 = vpack.i.bf16 %v535_v58, %v534_v53  ;;  %v551_v53 = vld [vmem:[#allocation2 + $0x2c1] sm:$0xff] }
 0x184   :  { %15517 = vst [vmem:[#allocation38_spill] sm:$0xff] %v10706_v4 }
 0x185   :  { %v10709_v5 = vpop.permute.xlu2 %8024 }
 0x186   :  { %15518 = vst [vmem:[#allocation39_spill] sm:$0xff] %v10709_v5  ;;  %v540_v5 = vld [vmem:[#allocation2 + $0x241] sm:$0xff] }
 0x187   :  { %8184 = vrot.lane.b32.xlu1 %v8183_v34, %s9986_s0  ;;  %v8218_v34 = vpack.i.bf16 %v545_v25, %v544_v29  ;;  %v548_v29 = vld [vmem:[#allocation2 + $0x2a1] sm:$0xff]  ;;  %v549_v25 = vld [vmem:[#allocation2 + $0x2a9] sm:$0xff] }
 0x188   :  { %v8228_v37 = vpack.i.bf16 %v549_v25, %v548_v29 }
 0x189   :  { %8179 = vrot.lane.b32.xlu0 %v8178_v8, %s9986_s0  ;;  %v10713_v23 = vpop.permute.xlu1 %7974 }
 0x18a   :  { %15519 = vst [vmem:[#allocation40_spill] sm:$0xff] %v10713_v23  ;;  %v541_v23 = vld [vmem:[#allocation2 + $0x249] sm:$0xff] }
 0x18b   :  { %v10715_v4 = vpop.permute.xlu0 %7969  ;;  %8204 = vrot.lane.b32.xlu2 %v8203_v46, %s9986_s0  ;;  %v550_v46 = vld [vmem:[#allocation2 + $0x2b9] sm:$0xff]  ;;  %v8208_v58 = vpack.i.bf16 %v541_v23, %v540_v5  ;;  %v557_v5 = vld [vmem:[#allocation2 + $0x309] sm:$0xff] }
 0x18c   :  { %15520 = vst [vmem:[#allocation41_spill] sm:$0xff] %v10715_v4 }
 0x18d   :  { %v10718_v11 = vpop.permute.xlu2 %8039 }
 0x18e   :  { %15521 = vst [vmem:[#allocation42_spill] sm:$0xff] %v10718_v11  ;;  %v547_v11 = vld [vmem:[#allocation2 + $0x291] sm:$0xff] }
 0x18f   :  { %8199 = vrot.lane.b32.xlu1 %v8198_v60, %s9986_s0  ;;  %v8233_v60 = vpack.i.bf16 %v551_v53, %v550_v46  ;;  %v554_v46 = vld [vmem:[#allocation2 + $0x2e9] sm:$0xff]  ;;  %v555_v53 = vld [vmem:[#allocation2 + $0x2f1] sm:$0xff] }
 0x190   :  { %v8243_v29 = vpack.i.bf16 %v555_v53, %v554_v46 }
 0x191   :  { %8194 = vrot.lane.b32.xlu0 %v8193_v18, %s9986_s0  ;;  %v10722_v8 = vpop.permute.xlu1 %7989 }
 0x192   :  { %15522 = vst [vmem:[#allocation43_spill] sm:$0xff] %v10722_v8  ;;  %v546_v8 = vld [vmem:[#allocation2 + $0x289] sm:$0xff] }
 0x193   :  { %v10724_v4 = vpop.permute.xlu0 %7984  ;;  %8219 = vrot.lane.b32.xlu2 %v8218_v34, %s9986_s0  ;;  %v556_v34 = vld [vmem:[#allocation2 + $0x301] sm:$0xff]  ;;  %v8223_v23 = vpack.i.bf16 %v547_v11, %v546_v8 }
 0x194   :  { %15523 = vst [vmem:[#allocation44_spill] sm:$0xff] %v10724_v4  ;;  %v563_v11 = vld [vmem:[#allocation2 + $0x22] sm:$0xff] }
 0x195   :  { %v10727_v19 = vpop.permute.xlu2 %8054 }
 0x196   :  { %15524 = vst [vmem:[#allocation45_spill] sm:$0xff] %v10727_v19  ;;  %v553_v19 = vld [vmem:[#allocation2 + $0x2d9] sm:$0xff] }
 0x197   :  { %8214 = vrot.lane.b32.xlu1 %v8213_v2, %s9986_s0  ;;  %v8248_v2 = vpack.i.bf16 %v557_v5, %v556_v34  ;;  %v560_v34 = vld [vmem:[#allocation2 + $0x331] sm:$0xff]  ;;  %v561_v5 = vld [vmem:[#allocation2 + $0x339] sm:$0xff] }
 0x198   :  { %v8258_v46 = vpack.i.bf16 %v561_v5, %v560_v34 }
 0x199   :  { %8209 = vrot.lane.b32.xlu0 %v8208_v58, %s9986_s0  ;;  %v10731_v18 = vpop.permute.xlu1 %8004 }
 0x19a   :  { %15525 = vst [vmem:[#allocation46_spill] sm:$0xff] %v10731_v18  ;;  %v552_v18 = vld [vmem:[#allocation2 + $0x2d1] sm:$0xff] }
 0x19b   :  { %v10733_v4 = vpop.permute.xlu0 %7999  ;;  %8234 = vrot.lane.b32.xlu2 %v8233_v60, %s9986_s0  ;;  %v562_v60 = vld [vmem:[#allocation2 + $0x1a] sm:$0xff]  ;;  %v8238_v8 = vpack.i.bf16 %v553_v19, %v552_v18  ;;  %v568_v19 = vld [vmem:[#allocation2 + $0x62] sm:$0xff]  ;;  %v569_v18 = vld [vmem:[#allocation2 + $0x6a] sm:$0xff] }
 0x19c   :  { %15526 = vst [vmem:[#allocation47_spill] sm:$0xff] %v10733_v4 }
 0x19d   :  { %v10736_v40 = vpop.permute.xlu2 %8069 }
 0x19e   :  { %15527 = vst [vmem:[#allocation48_spill] sm:$0xff] %v10736_v40  ;;  %v558_v40 = vld [vmem:[#allocation2 + $0x319] sm:$0xff] }
 0x19f   :  { %8229 = vrot.lane.b32.xlu1 %v8228_v37, %s9986_s0  ;;  %v8263_v37 = vpack.i.bf16 %v563_v11, %v562_v60  ;;  %v566_v60 = vld [vmem:[#allocation2 + $0x4a] sm:$0xff]  ;;  %v567_v11 = vld [vmem:[#allocation2 + $0x52] sm:$0xff] }
 0x1a0   :  { %v8273_v5 = vpack.i.bf16 %v567_v11, %v566_v60 }
 0x1a1   :  { %8224 = vrot.lane.b32.xlu0 %v8223_v23, %s9986_s0  ;;  %v10740_v58 = vpop.permute.xlu1 %8019 }
 0x1a2   :  { %15528 = vst [vmem:[#allocation49_spill] sm:$0xff] %v10740_v58  ;;  %v559_v58 = vld [vmem:[#allocation2 + $0x321] sm:$0xff] }
 0x1a3   :  { %v10742_v4 = vpop.permute.xlu0 %8014  ;;  %8249 = vrot.lane.b32.xlu2 %v8248_v2, %s9986_s0  ;;  %v8253_v2 = vpack.i.bf16 %v559_v58, %v558_v40  ;;  %v575_v40 = vld [vmem:[#allocation2 + $0xb2] sm:$0xff] }
 0x1a4   :  { %15529 = vst [vmem:[#allocation50_spill] sm:$0xff] %v10742_v4 }
 0x1a5   :  { %v10745_v25 = vpop.permute.xlu2 %8084 }
 0x1a6   :  { %15530 = vst [vmem:[#allocation51_spill] sm:$0xff] %v10745_v25  ;;  %v571_v25 = vld [vmem:[#allocation2 + $0x82] sm:$0xff] }
 0x1a7   :  { %8244 = vrot.lane.b32.xlu1 %v8243_v29, %s9986_s0  ;;  %v8278_v29 = vpack.i.bf16 %v569_v18, %v568_v19  ;;  %v572_v19 = vld [vmem:[#allocation2 + $0x92] sm:$0xff]  ;;  %v573_v18 = vld [vmem:[#allocation2 + $0x9a] sm:$0xff] }
 0x1a8   :  { %v8288_v60 = vpack.i.bf16 %v573_v18, %v572_v19 }
 0x1a9   :  { %8239 = vrot.lane.b32.xlu0 %v8238_v8, %s9986_s0  ;;  %v10749_v23 = vpop.permute.xlu1 %8034 }
 0x1aa   :  { %15531 = vst [vmem:[#allocation52_spill] sm:$0xff] %v10749_v23  ;;  %v564_v23 = vld [vmem:[#allocation2 + $0x32] sm:$0xff] }
 0x1ab   :  { %v10751_v4 = vpop.permute.xlu0 %8029  ;;  %8264 = vrot.lane.b32.xlu2 %v8263_v37, %s9987_s12  ;;  %v574_v37 = vld [vmem:[#allocation2 + $0xaa] sm:$0xff] }
 0x1ac   :  { %15532 = vst [vmem:[#allocation53_spill] sm:$0xff] %v10751_v4  ;;  %v565_v4 = vld [vmem:[#allocation2 + $0x3a] sm:$0xff] }
 0x1ad   :  { %v10754_v53 = vpop.permute.xlu2 %8099  ;;  %v8268_v58 = vpack.i.bf16 %v565_v4, %v564_v23  ;;  %v581_v4 = vld [vmem:[#allocation2 + $0xfa] sm:$0xff] }
 0x1ae   :  { %15533 = vst [vmem:[#allocation54_spill] sm:$0xff] %v10754_v53 }
 0x1af   :  { %8259 = vrot.lane.b32.xlu1 %v8258_v46, %s9986_s0  ;;  %v8293_v46 = vpack.i.bf16 %v575_v40, %v574_v37  ;;  %v578_v37 = vld [vmem:[#allocation2 + $0xda] sm:$0xff]  ;;  %v579_v40 = vld [vmem:[#allocation2 + $0xe2] sm:$0xff] }
 0x1b0   :  { %v8303_v19 = vpack.i.bf16 %v579_v40, %v578_v37 }
 0x1b1   :  { %8254 = vrot.lane.b32.xlu0 %v8253_v2, %s9986_s0  ;;  %v10758_v8 = vpop.permute.xlu1 %8049 }
 0x1b2   :  { %15534 = vst [vmem:[#allocation55_spill] sm:$0xff] %v10758_v8  ;;  %v570_v8 = vld [vmem:[#allocation2 + $0x7a] sm:$0xff] }
 0x1b3   :  { %v10760_v34 = vpop.permute.xlu0 %8044  ;;  %8279 = vrot.lane.b32.xlu2 %v8278_v29, %s9987_s12  ;;  %v580_v29 = vld [vmem:[#allocation2 + $0xf2] sm:$0xff]  ;;  %v8283_v23 = vpack.i.bf16 %v571_v25, %v570_v8  ;;  %v587_v25 = vld [vmem:[#allocation2 + $0x142] sm:$0xff] }
 0x1b4   :  { %15535 = vst [vmem:[#allocation56_spill] sm:$0xff] %v10760_v34 }
 0x1b5   :  { %v10763_v53 = vpop.permute.xlu2 %8114 }
 0x1b6   :  { %15536 = vst [vmem:[#allocation57_spill] sm:$0xff] %v10763_v53  ;;  %v577_v53 = vld [vmem:[#allocation2 + $0xca] sm:$0xff] }
 0x1b7   :  { %8274 = vrot.lane.b32.xlu1 %v8273_v5, %s9987_s12  ;;  %v8308_v5 = vpack.i.bf16 %v581_v4, %v580_v29  ;;  %v584_v29 = vld [vmem:[#allocation2 + $0x122] sm:$0xff]  ;;  %v585_v4 = vld [vmem:[#allocation2 + $0x12a] sm:$0xff] }
 0x1b8   :  { %v8318_v37 = vpack.i.bf16 %v585_v4, %v584_v29 }
 0x1b9   :  { %8269 = vrot.lane.b32.xlu0 %v8268_v58, %s9987_s12  ;;  %v10767_v2 = vpop.permute.xlu1 %8064 }
 0x1ba   :  { %15537 = vst [vmem:[#allocation58_spill] sm:$0xff] %v10767_v2  ;;  %v576_v2 = vld [vmem:[#allocation2 + $0xc2] sm:$0xff] }
 0x1bb   :  { %v10769_v34 = vpop.permute.xlu0 %8059  ;;  %8294 = vrot.lane.b32.xlu2 %v8293_v46, %s9987_s12  ;;  %v586_v46 = vld [vmem:[#allocation2 + $0x13a] sm:$0xff]  ;;  %v8298_v8 = vpack.i.bf16 %v577_v53, %v576_v2  ;;  %v593_v53 = vld [vmem:[#allocation2 + $0x18a] sm:$0xff] }
 0x1bc   :  { %15538 = vst [vmem:[#allocation59_spill] sm:$0xff] %v10769_v34 }
 0x1bd   :  { %v10772_v11 = vpop.permute.xlu2 %8129 }
 0x1be   :  { %15539 = vst [vmem:[#allocation60_spill] sm:$0xff] %v10772_v11  ;;  %v582_v11 = vld [vmem:[#allocation2 + $0x10a] sm:$0xff] }
 0x1bf   :  { %8289 = vrot.lane.b32.xlu1 %v8288_v60, %s9987_s12  ;;  %v8323_v60 = vpack.i.bf16 %v587_v25, %v586_v46  ;;  %v590_v46 = vld [vmem:[#allocation2 + $0x16a] sm:$0xff]  ;;  %v591_v25 = vld [vmem:[#allocation2 + $0x172] sm:$0xff] }
 0x1c0   :  { %v8333_v29 = vpack.i.bf16 %v591_v25, %v590_v46 }
 0x1c1   :  { %8284 = vrot.lane.b32.xlu0 %v8283_v23, %s9987_s12  ;;  %v10776_v58 = vpop.permute.xlu1 %8079 }
 0x1c2   :  { %15540 = vst [vmem:[#allocation61_spill] sm:$0xff] %v10776_v58  ;;  %v583_v58 = vld [vmem:[#allocation2 + $0x112] sm:$0xff] }
 0x1c3   :  { %v10778_v34 = vpop.permute.xlu0 %8074  ;;  %8309 = vrot.lane.b32.xlu2 %v8308_v5, %s9987_s12  ;;  %v592_v5 = vld [vmem:[#allocation2 + $0x182] sm:$0xff]  ;;  %v8313_v2 = vpack.i.bf16 %v583_v58, %v582_v11 }
 0x1c4   :  { %15541 = vst [vmem:[#allocation62_spill] sm:$0xff] %v10778_v34  ;;  %v599_v11 = vld [vmem:[#allocation2 + $0x202] sm:$0xff] }
 0x1c5   :  { %v10781_v18 = vpop.permute.xlu2 %8144 }
 0x1c6   :  { %15542 = vst [vmem:[#allocation63_spill] sm:$0xff] %v10781_v18  ;;  %v589_v18 = vld [vmem:[#allocation2 + $0x15a] sm:$0xff] }
 0x1c7   :  { %8304 = vrot.lane.b32.xlu1 %v8303_v19, %s9987_s12  ;;  %v8338_v19 = vpack.i.bf16 %v593_v53, %v592_v5  ;;  %v596_v5 = vld [vmem:[#allocation2 + $0x1e2] sm:$0xff]  ;;  %v597_v53 = vld [vmem:[#allocation2 + $0x1ea] sm:$0xff] }
 0x1c8   :  { %v8348_v46 = vpack.i.bf16 %v597_v53, %v596_v5 }
 0x1c9   :  { %8299 = vrot.lane.b32.xlu0 %v8298_v8, %s9987_s12  ;;  %v10785_v23 = vpop.permute.xlu1 %8094 }
 0x1ca   :  { %15543 = vst [vmem:[#allocation64_spill] sm:$0xff] %v10785_v23  ;;  %v588_v23 = vld [vmem:[#allocation2 + $0x152] sm:$0xff] }
 0x1cb   :  { %v10787_v34 = vpop.permute.xlu0 %8089  ;;  %8324 = vrot.lane.b32.xlu2 %v8323_v60, %s9987_s12  ;;  %v598_v60 = vld [vmem:[#allocation2 + $0x1fa] sm:$0xff]  ;;  %v8328_v58 = vpack.i.bf16 %v589_v18, %v588_v23  ;;  %v605_v18 = vld [vmem:[#allocation2 + $0x24a] sm:$0xff] }
 0x1cc   :  { %15544 = vst [vmem:[#allocation65_spill] sm:$0xff] %v10787_v34 }
 0x1cd   :  { %v10790_v40 = vpop.permute.xlu2 %8159 }
 0x1ce   :  { %15545 = vst [vmem:[#allocation66_spill] sm:$0xff] %v10790_v40  ;;  %v595_v40 = vld [vmem:[#allocation2 + $0x1d2] sm:$0xff] }
 0x1cf   :  { %8319 = vrot.lane.b32.xlu1 %v8318_v37, %s9987_s12  ;;  %v8353_v37 = vpack.i.bf16 %v599_v11, %v598_v60  ;;  %v602_v60 = vld [vmem:[#allocation2 + $0x22a] sm:$0xff]  ;;  %v603_v11 = vld [vmem:[#allocation2 + $0x232] sm:$0xff] }
 0x1d0   :  { %v8363_v5 = vpack.i.bf16 %v603_v11, %v602_v60 }
 0x1d1   :  { %8314 = vrot.lane.b32.xlu0 %v8313_v2, %s9987_s12  ;;  %v10794_v8 = vpop.permute.xlu1 %8109 }
 0x1d2   :  { %15546 = vst [vmem:[#allocation67_spill] sm:$0xff] %v10794_v8  ;;  %v594_v8 = vld [vmem:[#allocation2 + $0x1ca] sm:$0xff] }
 0x1d3   :  { %v10796_v34 = vpop.permute.xlu0 %8104  ;;  %8339 = vrot.lane.b32.xlu2 %v8338_v19, %s9987_s12  ;;  %v604_v19 = vld [vmem:[#allocation2 + $0x242] sm:$0xff]  ;;  %v8343_v23 = vpack.i.bf16 %v595_v40, %v594_v8  ;;  %v611_v40 = vld [vmem:[#allocation2 + $0x292] sm:$0xff] }
 0x1d4   :  { %15547 = vst [vmem:[#allocation68_spill] sm:$0xff] %v10796_v34 }
 0x1d5   :  { %v10799_v4 = vpop.permute.xlu2 %8174 }
 0x1d6   :  { %15548 = vst [vmem:[#allocation69_spill] sm:$0xff] %v10799_v4  ;;  %v601_v4 = vld [vmem:[#allocation2 + $0x21a] sm:$0xff] }
 0x1d7   :  { %8334 = vrot.lane.b32.xlu1 %v8333_v29, %s9987_s12  ;;  %v8368_v29 = vpack.i.bf16 %v605_v18, %v604_v19  ;;  %v608_v19 = vld [vmem:[#allocation2 + $0x272] sm:$0xff]  ;;  %v609_v18 = vld [vmem:[#allocation2 + $0x27a] sm:$0xff] }
 0x1d8   :  { %v8378_v60 = vpack.i.bf16 %v609_v18, %v608_v19 }
 0x1d9   :  { %8329 = vrot.lane.b32.xlu0 %v8328_v58, %s9987_s12  ;;  %v10803_v2 = vpop.permute.xlu1 %8124 }
 0x1da   :  { %15549 = vst [vmem:[#allocation70_spill] sm:$0xff] %v10803_v2  ;;  %v600_v2 = vld [vmem:[#allocation2 + $0x212] sm:$0xff] }
 0x1db   :  { %v10805_v34 = vpop.permute.xlu0 %8119  ;;  %8354 = vrot.lane.b32.xlu2 %v8353_v37, %s9987_s12  ;;  %v610_v37 = vld [vmem:[#allocation2 + $0x28a] sm:$0xff]  ;;  %v8358_v8 = vpack.i.bf16 %v601_v4, %v600_v2  ;;  %v617_v4 = vld [vmem:[#allocation2 + $0x2da] sm:$0xff] }
 0x1dc   :  { %15550 = vst [vmem:[#allocation71_spill] sm:$0xff] %v10805_v34 }
 0x1dd   :  { %v10808_v25 = vpop.permute.xlu2 %8189 }
 0x1de   :  { %15551 = vst [vmem:[#allocation72_spill] sm:$0xff] %v10808_v25  ;;  %v607_v25 = vld [vmem:[#allocation2 + $0x262] sm:$0xff] }
 0x1df   :  { %8349 = vrot.lane.b32.xlu1 %v8348_v46, %s9987_s12  ;;  %v8383_v46 = vpack.i.bf16 %v611_v40, %v610_v37  ;;  %v614_v37 = vld [vmem:[#allocation2 + $0x2ba] sm:$0xff]  ;;  %v615_v40 = vld [vmem:[#allocation2 + $0x2c2] sm:$0xff] }
 0x1e0   :  { %v8393_v19 = vpack.i.bf16 %v615_v40, %v614_v37 }
 0x1e1   :  { %8344 = vrot.lane.b32.xlu0 %v8343_v23, %s9987_s12  ;;  %v10812_v58 = vpop.permute.xlu1 %8139 }
 0x1e2   :  { %15552 = vst [vmem:[#allocation73_spill] sm:$0xff] %v10812_v58  ;;  %v606_v58 = vld [vmem:[#allocation2 + $0x25a] sm:$0xff] }
 0x1e3   :  { %v10814_v34 = vpop.permute.xlu0 %8134  ;;  %8369 = vrot.lane.b32.xlu2 %v8368_v29, %s9987_s12  ;;  %v616_v29 = vld [vmem:[#allocation2 + $0x2d2] sm:$0xff]  ;;  %v8373_v2 = vpack.i.bf16 %v607_v25, %v606_v58  ;;  %v623_v25 = vld [vmem:[#allocation2 + $0x322] sm:$0xff] }
 0x1e4   :  { %15553 = vst [vmem:[#allocation74_spill] sm:$0xff] %v10814_v34 }
 0x1e5   :  { %v10817_v53 = vpop.permute.xlu2 %8204 }
 0x1e6   :  { %15554 = vst [vmem:[#allocation75_spill] sm:$0xff] %v10817_v53  ;;  %v612_v53 = vld [vmem:[#allocation2 + $0x2a2] sm:$0xff] }
 0x1e7   :  { %8364 = vrot.lane.b32.xlu1 %v8363_v5, %s9987_s12  ;;  %v8398_v5 = vpack.i.bf16 %v617_v4, %v616_v29  ;;  %v620_v29 = vld [vmem:[#allocation2 + $0x302] sm:$0xff]  ;;  %v621_v4 = vld [vmem:[#allocation2 + $0x30a] sm:$0xff] }
 0x1e8   :  { %v8408_v37 = vpack.i.bf16 %v621_v4, %v620_v29 }
 0x1e9   :  { %8359 = vrot.lane.b32.xlu0 %v8358_v8, %s9987_s12  ;;  %v10821_v23 = vpop.permute.xlu1 %8154 }
 0x1ea   :  { %15555 = vst [vmem:[#allocation76_spill] sm:$0xff] %v10821_v23  ;;  %v613_v23 = vld [vmem:[#allocation2 + $0x2aa] sm:$0xff] }
 0x1eb   :  { %v10823_v34 = vpop.permute.xlu0 %8149  ;;  %8384 = vrot.lane.b32.xlu2 %v8383_v46, %s9987_s12  ;;  %v622_v46 = vld [vmem:[#allocation2 + $0x31a] sm:$0xff]  ;;  %v8388_v58 = vpack.i.bf16 %v613_v23, %v612_v53  ;;  %v630_v53 = vld [vmem:[#allocation2 + $0x50] sm:$0xff] }
 0x1ec   :  { %15556 = vst [vmem:[#allocation77_spill] sm:$0xff] %v10823_v34 }
 0x1ed   :  { %v10826_v11 = vpop.permute.xlu2 %8219 }
 0x1ee   :  { %15557 = vst [vmem:[#allocation78_spill] sm:$0xff] %v10826_v11  ;;  %v618_v11 = vld [vmem:[#allocation2 + $0x2ea] sm:$0xff] }
 0x1ef   :  { %8379 = vrot.lane.b32.xlu1 %v8378_v60, %s9987_s12  ;;  %v8413_v60 = vpack.i.bf16 %v623_v25, %v622_v46  ;;  %v627_v46 = vld [vmem:[#allocation2 + $0x30] sm:$0xff]  ;;  %v628_v25 = vld [vmem:[#allocation2 + $0x38] sm:$0xff] }
 0x1f0   :  { %v8423_v29 = vpack.i.bf16 %v628_v25, %v627_v46 }
 0x1f1   :  { %8374 = vrot.lane.b32.xlu0 %v8373_v2, %s9987_s12  ;;  %v10830_v8 = vpop.permute.xlu1 %8169 }
 0x1f2   :  { %15558 = vst [vmem:[#allocation79_spill] sm:$0xff] %v10830_v8  ;;  %v619_v8 = vld [vmem:[#allocation2 + $0x2f2] sm:$0xff] }
 0x1f3   :  { %v10832_v34 = vpop.permute.xlu0 %8164  ;;  %8399 = vrot.lane.b32.xlu2 %v8398_v5, %s9987_s12  ;;  %v629_v5 = vld [vmem:[#allocation2 + $0x48] sm:$0xff]  ;;  %v8403_v23 = vpack.i.bf16 %v619_v8, %v618_v11  ;;  %v635_v11 = vld [vmem:[#allocation2 + $0x90] sm:$0xff]  ;;  %v636_v8 = vld [vmem:[#allocation2 + $0x98] sm:$0xff] }
 0x1f4   :  { %15559 = vst [vmem:[#allocation80_spill] sm:$0xff] %v10832_v34 }
 0x1f5   :  { %v10835_v18 = vpop.permute.xlu2 %8234 }
 0x1f6   :  { %15560 = vst [vmem:[#allocation81_spill] sm:$0xff] %v10835_v18  ;;  %v625_v18 = vld [vmem:[#allocation2 + $0x33a] sm:$0xff] }
 0x1f7   :  { %8394 = vrot.lane.b32.xlu1 %v8393_v19, %s9987_s12  ;;  %v8428_v19 = vpack.i.bf16 %v630_v53, %v629_v5  ;;  %v633_v5 = vld [vmem:[#allocation2 + $0x78] sm:$0xff]  ;;  %v634_v53 = vld [vmem:[#allocation2 + $0x80] sm:$0xff] }
 0x1f8   :  { %v8438_v25 = vpack.i.bf16 %v634_v53, %v633_v5 }
 0x1f9   :  { %8389 = vrot.lane.b32.xlu0 %v8388_v58, %s9987_s12  ;;  %v10839_v2 = vpop.permute.xlu1 %8184 }
 0x1fa   :  { %15561 = vst [vmem:[#allocation82_spill] sm:$0xff] %v10839_v2  ;;  %v624_v2 = vld [vmem:[#allocation2 + $0x332] sm:$0xff] }
 0x1fb   :  { %v10841_v34 = vpop.permute.xlu0 %8179  ;;  %8414 = vrot.lane.b32.xlu2 %v8413_v60, %s9987_s12  ;;  %v8418_v60 = vpack.i.bf16 %v625_v18, %v624_v2  ;;  %v642_v18 = vld [vmem:[#allocation2 + $0xe0] sm:$0xff] }
 0x1fc   :  { %15562 = vst [vmem:[#allocation83_spill] sm:$0xff] %v10841_v34 }
 0x1fd   :  { %v10844_v40 = vpop.permute.xlu2 %8249 }
 0x1fe   :  { %15563 = vst [vmem:[#allocation84_spill] sm:$0xff] %v10844_v40  ;;  %v638_v40 = vld [vmem:[#allocation2 + $0xb0] sm:$0xff] }
 0x1ff   :  { %8409 = vrot.lane.b32.xlu1 %v8408_v37, %s9987_s12  ;;  %v8443_v37 = vpack.i.bf16 %v636_v8, %v635_v11  ;;  %v639_v11 = vld [vmem:[#allocation2 + $0xc0] sm:$0xff]  ;;  %v640_v8 = vld [vmem:[#allocation2 + $0xc8] sm:$0xff] }
 0x200   :  { %v8453_v5 = vpack.i.bf16 %v640_v8, %v639_v11 }
 0x201   :  { %8404 = vrot.lane.b32.xlu0 %v8403_v23, %s9987_s12  ;;  %v10848_v58 = vpop.permute.xlu1 %8199 }
 0x202   :  { %15564 = vst [vmem:[#allocation85_spill] sm:$0xff] %v10848_v58  ;;  %v631_v58 = vld [vmem:[#allocation2 + $0x60] sm:$0xff] }
 0x203   :  { %v10850_v34 = vpop.permute.xlu0 %8194  ;;  %8429 = vrot.lane.b32.xlu2 %v8428_v19, %s9988_s13  ;;  %v641_v19 = vld [vmem:[#allocation2 + $0xd8] sm:$0xff] }
 0x204   :  { %15565 = vst [vmem:[#allocation86_spill] sm:$0xff] %v10850_v34  ;;  %v632_v34 = vld [vmem:[#allocation2 + $0x68] sm:$0xff] }
 0x205   :  { %v10853_v4 = vpop.permute.xlu2 %8264  ;;  %v8433_v2 = vpack.i.bf16 %v632_v34, %v631_v58  ;;  %v648_v34 = vld [vmem:[#allocation2 + $0x128] sm:$0xff] }
 0x206   :  { %15566 = vst [vmem:[#allocation87_spill] sm:$0xff] %v10853_v4 }
 0x207   :  { %8424 = vrot.lane.b32.xlu1 %v8423_v29, %s9988_s13  ;;  %v8458_v29 = vpack.i.bf16 %v642_v18, %v641_v19  ;;  %v645_v19 = vld [vmem:[#allocation2 + $0x108] sm:$0xff]  ;;  %v646_v18 = vld [vmem:[#allocation2 + $0x110] sm:$0xff] }
 0x208   :  { %v8468_v11 = vpack.i.bf16 %v646_v18, %v645_v19 }
 0x209   :  { %8419 = vrot.lane.b32.xlu0 %v8418_v60, %s9987_s12  ;;  %v10857_v23 = vpop.permute.xlu1 %8214 }
 0x20a   :  { %15567 = vst [vmem:[#allocation88_spill] sm:$0xff] %v10857_v23  ;;  %v637_v23 = vld [vmem:[#allocation2 + $0xa8] sm:$0xff] }
 0x20b   :  { %v10859_v46 = vpop.permute.xlu0 %8209  ;;  %8444 = vrot.lane.b32.xlu2 %v8443_v37, %s9988_s13  ;;  %v647_v37 = vld [vmem:[#allocation2 + $0x120] sm:$0xff]  ;;  %v8448_v58 = vpack.i.bf16 %v638_v40, %v637_v23  ;;  %v654_v40 = vld [vmem:[#allocation2 + $0x170] sm:$0xff] }
 0x20c   :  { %15568 = vst [vmem:[#allocation89_spill] sm:$0xff] %v10859_v46 }
 0x20d   :  { %v10862_v4 = vpop.permute.xlu2 %8279 }
 0x20e   :  { %15569 = vst [vmem:[#allocation90_spill] sm:$0xff] %v10862_v4  ;;  %v644_v4 = vld [vmem:[#allocation2 + $0xf8] sm:$0xff] }
 0x20f   :  { %8439 = vrot.lane.b32.xlu1 %v8438_v25, %s9988_s13  ;;  %v8473_v25 = vpack.i.bf16 %v648_v34, %v647_v37  ;;  %v651_v37 = vld [vmem:[#allocation2 + $0x150] sm:$0xff]  ;;  %v652_v34 = vld [vmem:[#allocation2 + $0x158] sm:$0xff] }
 0x210   :  { %v8483_v19 = vpack.i.bf16 %v652_v34, %v651_v37 }
 0x211   :  { %8434 = vrot.lane.b32.xlu0 %v8433_v2, %s9988_s13  ;;  %v10866_v60 = vpop.permute.xlu1 %8229 }
 0x212   :  { %15570 = vst [vmem:[#allocation91_spill] sm:$0xff] %v10866_v60  ;;  %v643_v60 = vld [vmem:[#allocation2 + $0xf0] sm:$0xff] }
 0x213   :  { %v10868_v46 = vpop.permute.xlu0 %8224  ;;  %8459 = vrot.lane.b32.xlu2 %v8458_v29, %s9988_s13  ;;  %v653_v29 = vld [vmem:[#allocation2 + $0x168] sm:$0xff]  ;;  %v8463_v23 = vpack.i.bf16 %v644_v4, %v643_v60 }
 0x214   :  { %15571 = vst [vmem:[#allocation92_spill] sm:$0xff] %v10868_v46  ;;  %v660_v4 = vld [vmem:[#allocation2 + $0x1e8] sm:$0xff] }
 0x215   :  { %v10871_v53 = vpop.permute.xlu2 %8294 }
 0x216   :  { %15572 = vst [vmem:[#allocation93_spill] sm:$0xff] %v10871_v53  ;;  %v649_v53 = vld [vmem:[#allocation2 + $0x138] sm:$0xff] }
 0x217   :  { %8454 = vrot.lane.b32.xlu1 %v8453_v5, %s9988_s13  ;;  %v8488_v5 = vpack.i.bf16 %v654_v40, %v653_v29  ;;  %v657_v29 = vld [vmem:[#allocation2 + $0x198] sm:$0xff]  ;;  %v658_v40 = vld [vmem:[#allocation2 + $0x1a0] sm:$0xff] }
 0x218   :  { %v8498_v37 = vpack.i.bf16 %v658_v40, %v657_v29 }
 0x219   :  { %8449 = vrot.lane.b32.xlu0 %v8448_v58, %s9988_s13  ;;  %v10875_v2 = vpop.permute.xlu1 %8244 }
 0x21a   :  { %15573 = vst [vmem:[#allocation94_spill] sm:$0xff] %v10875_v2  ;;  %v650_v2 = vld [vmem:[#allocation2 + $0x140] sm:$0xff] }
 0x21b   :  { %v10877_v46 = vpop.permute.xlu0 %8239  ;;  %8474 = vrot.lane.b32.xlu2 %v8473_v25, %s9988_s13  ;;  %v659_v25 = vld [vmem:[#allocation2 + $0x1e0] sm:$0xff]  ;;  %v8478_v60 = vpack.i.bf16 %v650_v2, %v649_v53  ;;  %v666_v53 = vld [vmem:[#allocation2 + $0x230] sm:$0xff] }
 0x21c   :  { %15574 = vst [vmem:[#allocation95_spill] sm:$0xff] %v10877_v46 }
 0x21d   :  { %v10880_v8 = vpop.permute.xlu2 %8309 }
 0x21e   :  { %15575 = vst [vmem:[#allocation96_spill] sm:$0xff] %v10880_v8  ;;  %v656_v8 = vld [vmem:[#allocation2 + $0x188] sm:$0xff] }
 0x21f   :  { %8469 = vrot.lane.b32.xlu1 %v8468_v11, %s9988_s13  ;;  %v8503_v11 = vpack.i.bf16 %v660_v4, %v659_v25  ;;  %v663_v25 = vld [vmem:[#allocation2 + $0x210] sm:$0xff]  ;;  %v664_v4 = vld [vmem:[#allocation2 + $0x218] sm:$0xff] }
 0x220   :  { %v8513_v29 = vpack.i.bf16 %v664_v4, %v663_v25 }
 0x221   :  { %8464 = vrot.lane.b32.xlu0 %v8463_v23, %s9988_s13  ;;  %v10884_v58 = vpop.permute.xlu1 %8259 }
 0x222   :  { %15576 = vst [vmem:[#allocation97_spill] sm:$0xff] %v10884_v58  ;;  %v655_v58 = vld [vmem:[#allocation2 + $0x180] sm:$0xff] }
 0x223   :  { %v10886_v46 = vpop.permute.xlu0 %8254  ;;  %8489 = vrot.lane.b32.xlu2 %v8488_v5, %s9988_s13  ;;  %v665_v5 = vld [vmem:[#allocation2 + $0x228] sm:$0xff]  ;;  %v8493_v2 = vpack.i.bf16 %v656_v8, %v655_v58  ;;  %v672_v8 = vld [vmem:[#allocation2 + $0x278] sm:$0xff] }
 0x224   :  { %15577 = vst [vmem:[#allocation98_spill] sm:$0xff] %v10886_v46 }
 0x225   :  { %v10889_v18 = vpop.permute.xlu2 %8324 }
 0x226   :  { %15578 = vst [vmem:[#allocation99_spill] sm:$0xff] %v10889_v18  ;;  %v662_v18 = vld [vmem:[#allocation2 + $0x200] sm:$0xff] }
 0x227   :  { %8484 = vrot.lane.b32.xlu1 %v8483_v19, %s9988_s13  ;;  %v8518_v19 = vpack.i.bf16 %v666_v53, %v665_v5  ;;  %v669_v5 = vld [vmem:[#allocation2 + $0x258] sm:$0xff]  ;;  %v670_v53 = vld [vmem:[#allocation2 + $0x260] sm:$0xff] }
 0x228   :  { %v8528_v25 = vpack.i.bf16 %v670_v53, %v669_v5 }
 0x229   :  { %8479 = vrot.lane.b32.xlu0 %v8478_v60, %s9988_s13  ;;  %v10893_v23 = vpop.permute.xlu1 %8274 }
 0x22a   :  { %15579 = vst [vmem:[#allocation100_spill] sm:$0xff] %v10893_v23  ;;  %v661_v23 = vld [vmem:[#allocation2 + $0x1f8] sm:$0xff] }
 0x22b   :  { %v10895_v46 = vpop.permute.xlu0 %8269  ;;  %8504 = vrot.lane.b32.xlu2 %v8503_v11, %s9988_s13  ;;  %v671_v11 = vld [vmem:[#allocation2 + $0x270] sm:$0xff]  ;;  %v8508_v58 = vpack.i.bf16 %v662_v18, %v661_v23  ;;  %v678_v18 = vld [vmem:[#allocation2 + $0x2c0] sm:$0xff] }
 0x22c   :  { %15580 = vst [vmem:[#allocation101_spill] sm:$0xff] %v10895_v46 }
 0x22d   :  { %v10898_v34 = vpop.permute.xlu2 %8339 }
 0x22e   :  { %15581 = vst [vmem:[#allocation102_spill] sm:$0xff] %v10898_v34  ;;  %v668_v34 = vld [vmem:[#allocation2 + $0x248] sm:$0xff] }
 0x22f   :  { %8499 = vrot.lane.b32.xlu1 %v8498_v37, %s9988_s13  ;;  %v8533_v37 = vpack.i.bf16 %v672_v8, %v671_v11  ;;  %v675_v11 = vld [vmem:[#allocation2 + $0x2a0] sm:$0xff]  ;;  %v676_v8 = vld [vmem:[#allocation2 + $0x2a8] sm:$0xff] }
 0x230   :  { %v8543_v5 = vpack.i.bf16 %v676_v8, %v675_v11 }
 0x231   :  { %8494 = vrot.lane.b32.xlu0 %v8493_v2, %s9988_s13  ;;  %v10902_v60 = vpop.permute.xlu1 %8289 }
 0x232   :  { %15582 = vst [vmem:[#allocation103_spill] sm:$0xff] %v10902_v60  ;;  %v667_v60 = vld [vmem:[#allocation2 + $0x240] sm:$0xff] }
 0x233   :  { %v10904_v46 = vpop.permute.xlu0 %8284  ;;  %8519 = vrot.lane.b32.xlu2 %v8518_v19, %s9988_s13  ;;  %v677_v19 = vld [vmem:[#allocation2 + $0x2b8] sm:$0xff]  ;;  %v8523_v23 = vpack.i.bf16 %v668_v34, %v667_v60  ;;  %v684_v34 = vld [vmem:[#allocation2 + $0x308] sm:$0xff] }
 0x234   :  { %15583 = vst [vmem:[#allocation104_spill] sm:$0xff] %v10904_v46 }
 0x235   :  { %v10907_v40 = vpop.permute.xlu2 %8354 }
 0x236   :  { %15584 = vst [vmem:[#allocation105_spill] sm:$0xff] %v10907_v40  ;;  %v673_v40 = vld [vmem:[#allocation2 + $0x288] sm:$0xff] }
 0x237   :  { %8514 = vrot.lane.b32.xlu1 %v8513_v29, %s9988_s13  ;;  %v8548_v29 = vpack.i.bf16 %v678_v18, %v677_v19  ;;  %v681_v19 = vld [vmem:[#allocation2 + $0x2e8] sm:$0xff]  ;;  %v682_v18 = vld [vmem:[#allocation2 + $0x2f0] sm:$0xff] }
 0x238   :  { %v8558_v11 = vpack.i.bf16 %v682_v18, %v681_v19 }
 0x239   :  { %8509 = vrot.lane.b32.xlu0 %v8508_v58, %s9988_s13  ;;  %v10911_v2 = vpop.permute.xlu1 %8304 }
 0x23a   :  { %15585 = vst [vmem:[#allocation106_spill] sm:$0xff] %v10911_v2  ;;  %v674_v2 = vld [vmem:[#allocation2 + $0x290] sm:$0xff] }
 0x23b   :  { %v10913_v46 = vpop.permute.xlu0 %8299  ;;  %8534 = vrot.lane.b32.xlu2 %v8533_v37, %s9988_s13  ;;  %v683_v37 = vld [vmem:[#allocation2 + $0x300] sm:$0xff]  ;;  %v8538_v60 = vpack.i.bf16 %v674_v2, %v673_v40  ;;  %v690_v40 = vld [vmem:[#allocation2 + $0x350] sm:$0xff] }
 0x23c   :  { %15586 = vst [vmem:[#allocation107_spill] sm:$0xff] %v10913_v46 }
 0x23d   :  { %v10916_v4 = vpop.permute.xlu2 %8369 }
 0x23e   :  { %15587 = vst [vmem:[#allocation108_spill] sm:$0xff] %v10916_v4  ;;  %v680_v4 = vld [vmem:[#allocation2 + $0x2d8] sm:$0xff] }
 0x23f   :  { %8529 = vrot.lane.b32.xlu1 %v8528_v25, %s9988_s13  ;;  %v8563_v25 = vpack.i.bf16 %v684_v34, %v683_v37  ;;  %v687_v37 = vld [vmem:[#allocation2 + $0x330] sm:$0xff]  ;;  %v688_v34 = vld [vmem:[#allocation2 + $0x338] sm:$0xff] }
 0x240   :  { %v8573_v19 = vpack.i.bf16 %v688_v34, %v687_v37 }
 0x241   :  { %8524 = vrot.lane.b32.xlu0 %v8523_v23, %s9988_s13  ;;  %v10920_v58 = vpop.permute.xlu1 %8319 }
 0x242   :  { %15588 = vst [vmem:[#allocation109_spill] sm:$0xff] %v10920_v58  ;;  %v679_v58 = vld [vmem:[#allocation2 + $0x2d0] sm:$0xff] }
 0x243   :  { %v10922_v46 = vpop.permute.xlu0 %8314  ;;  %8549 = vrot.lane.b32.xlu2 %v8548_v29, %s9988_s13  ;;  %v689_v29 = vld [vmem:[#allocation2 + $0x348] sm:$0xff]  ;;  %v8553_v2 = vpack.i.bf16 %v680_v4, %v679_v58 }
 0x244   :  { %15589 = vst [vmem:[#allocation110_spill] sm:$0xff] %v10922_v46  ;;  %v696_v4 = vld [vmem:[#allocation2 + $0x69] sm:$0xff] }
 0x245   :  { %v10925_v53 = vpop.permute.xlu2 %8384 }
 0x246   :  { %15590 = vst [vmem:[#allocation111_spill] sm:$0xff] %v10925_v53  ;;  %v686_v53 = vld [vmem:[#allocation2 + $0x320] sm:$0xff] }
 0x247   :  { %8544 = vrot.lane.b32.xlu1 %v8543_v5, %s9988_s13  ;;  %v8578_v5 = vpack.i.bf16 %v690_v40, %v689_v29  ;;  %v693_v29 = vld [vmem:[#allocation2 + $0x49] sm:$0xff]  ;;  %v694_v40 = vld [vmem:[#allocation2 + $0x51] sm:$0xff] }
 0x248   :  { %v8588_v37 = vpack.i.bf16 %v694_v40, %v693_v29 }
 0x249   :  { %8539 = vrot.lane.b32.xlu0 %v8538_v60, %s9988_s13  ;;  %v10929_v23 = vpop.permute.xlu1 %8334 }
 0x24a   :  { %15591 = vst [vmem:[#allocation112_spill] sm:$0xff] %v10929_v23  ;;  %v685_v23 = vld [vmem:[#allocation2 + $0x318] sm:$0xff] }
 0x24b   :  { %v10931_v46 = vpop.permute.xlu0 %8329  ;;  %8564 = vrot.lane.b32.xlu2 %v8563_v25, %s9988_s13  ;;  %v695_v25 = vld [vmem:[#allocation2 + $0x61] sm:$0xff]  ;;  %v8568_v58 = vpack.i.bf16 %v686_v53, %v685_v23  ;;  %v701_v53 = vld [vmem:[#allocation2 + $0xa9] sm:$0xff]  ;;  %v702_v23 = vld [vmem:[#allocation2 + $0xb1] sm:$0xff] }
 0x24c   :  { %15592 = vst [vmem:[#allocation113_spill] sm:$0xff] %v10931_v46 }
 0x24d   :  { %v10934_v8 = vpop.permute.xlu2 %8399 }
 0x24e   :  { %15593 = vst [vmem:[#allocation114_spill] sm:$0xff] %v10934_v8  ;;  %v691_v8 = vld [vmem:[#allocation2 + $0x31] sm:$0xff] }
 0x24f   :  { %8559 = vrot.lane.b32.xlu1 %v8558_v11, %s9988_s13  ;;  %v8593_v11 = vpack.i.bf16 %v696_v4, %v695_v25  ;;  %v699_v25 = vld [vmem:[#allocation2 + $0x91] sm:$0xff]  ;;  %v700_v4 = vld [vmem:[#allocation2 + $0x99] sm:$0xff] }
 0x250   :  { %v8603_v40 = vpack.i.bf16 %v700_v4, %v699_v25  ;;  %v7647_v25 = vunpack.i.h.bf16 %v10470_v39 }
 0x251   :  { %8554 = vrot.lane.b32.xlu0 %v8553_v2, %s9988_s13  ;;  %v10938_v60 = vpop.permute.xlu1 %8349 }
 0x252   :  { %15594 = vst [vmem:[#allocation115_spill] sm:$0xff] %v10938_v60  ;;  %v692_v60 = vld [vmem:[#allocation2 + $0x39] sm:$0xff] }
 0x253   :  { %v10940_v46 = vpop.permute.xlu0 %8344  ;;  %8579 = vrot.lane.b32.xlu2 %v8578_v5, %s9988_s13  ;;  %v8583_v5 = vpack.i.bf16 %v692_v60, %v691_v8  ;;  %v708_v8 = vld [vmem:[#allocation2 + $0xf9] sm:$0xff] }
 0x254   :  { %15595 = vst [vmem:[#allocation116_spill] sm:$0xff] %v10940_v46 }
 0x255   :  { %v10943_v18 = vpop.permute.xlu2 %8414 }
 0x256   :  { %15596 = vst [vmem:[#allocation117_spill] sm:$0xff] %v10943_v18  ;;  %v704_v18 = vld [vmem:[#allocation2 + $0xc9] sm:$0xff] }
 0x257   :  { %8574 = vrot.lane.b32.xlu1 %v8573_v19, %s9988_s13  ;;  %v8608_v19 = vpack.i.bf16 %v702_v23, %v701_v53  ;;  %v705_v53 = vld [vmem:[#allocation2 + $0xd9] sm:$0xff]  ;;  %v706_v23 = vld [vmem:[#allocation2 + $0xe1] sm:$0xff] }
 0x259   :  { %8569 = vrot.lane.b32.xlu0 %v8568_v58, %s9988_s13  ;;  %v10947_v2 = vpop.permute.xlu1 %8364 }
 0x25a   :  { %15597 = vst [vmem:[#allocation118_spill] sm:$0xff] %v10947_v2  ;;  %v697_v2 = vld [vmem:[#allocation2 + $0x79] sm:$0xff] }
 0x25b   :  { %v10949_v46 = vpop.permute.xlu0 %8359  ;;  %8594 = vrot.lane.b32.xlu2 %v8593_v11, %s9989_s14  ;;  %v707_v11 = vld [vmem:[#allocation2 + $0xf1] sm:$0xff] }
 0x25c   :  { %15598 = vst [vmem:[#allocation119_spill] sm:$0xff] %v10949_v46  ;;  %v698_v46 = vld [vmem:[#allocation2 + $0x81] sm:$0xff] }
 0x25d   :  { %v10952_v34 = vpop.permute.xlu2 %8429  ;;  %v8598_v60 = vpack.i.bf16 %v698_v46, %v697_v2  ;;  %v8618_v46 = vpack.i.bf16 %v706_v23, %v705_v53  ;;  %v7637_v2 = vunpack.i.h.bf16 %v10489_v13  ;;  %v242_v53 = vld [vmem:[#allocation2] sm:$0xff] }
 0x25e   :  { %15599 = vst [vmem:[#allocation120_spill] sm:$0xff] %v10952_v34 }
 0x25f   :  { %8589 = vrot.lane.b32.xlu1 %v8588_v37, %s9989_s14  ;;  %v8623_v37 = vpack.i.bf16 %v708_v8, %v707_v11  ;;  %v7627_v11 = vunpack.i.h.bf16 %v10492_v17  ;;  %v7626_v8 = vunpack.i.l.bf16 %v10492_v17  ;;  %v10985_v17 = vsel %vm25_vm0, %v9866_v47, %v7647_v25  ;;  %v712_v47 = vld [vmem:[#allocation2 + $0x129] sm:$0xff]  ;;  %v9869_v25 = vld [vmem:[#allocation2 + $0x80] sm:$0xff] }
 0x260   :  { %15607 = vst [vmem:[#allocation128_spill] sm:$0xff] %v10985_v17  ;;  %v9874_v17 = vld [vmem:[#allocation2 + $0x108] sm:$0xff] }
 0x261   :  { %8584 = vrot.lane.b32.xlu0 %v8583_v5, %s9989_s14  ;;  %v10956_v58 = vpop.permute.xlu1 %8379 }
 0x262   :  { %15600 = vst [vmem:[#allocation121_spill] sm:$0xff] %v10956_v58  ;;  %v703_v58 = vld [vmem:[#allocation2 + $0xc1] sm:$0xff] }
 0x263   :  { %v10958_v29 = vpop.permute.xlu0 %8374  ;;  %8609 = vrot.lane.b32.xlu2 %v8608_v19, %s9989_s14  ;;  %v7646_v19 = vunpack.i.l.bf16 %v10470_v39  ;;  %v7667_v39 = vunpack.i.h.bf16 %v10481_v1  ;;  %v8613_v23 = vpack.i.bf16 %v704_v18, %v703_v58  ;;  %v10992_v18 = vsel %vm25_vm0, %v9868_v61, %v7637_v2 }
 0x264   :  { %15601 = vst [vmem:[#allocation122_spill] sm:$0xff] %v10958_v29  ;;  %v7652_v29 = vunpack.i.h.bf16 %v10476_v52 }
 0x265   :  { %v10961_v34 = vpop.permute.xlu2 %8444 }
 0x266   :  { %15602 = vst [vmem:[#allocation123_spill] sm:$0xff] %v10961_v34  ;;  %v7651_v34 = vunpack.i.l.bf16 %v10476_v52 }
 0x267   :  { %8604 = vrot.lane.b32.xlu1 %v8603_v40, %s9989_s14  ;;  %v7636_v40 = vunpack.i.l.bf16 %v10489_v13  ;;  %v10982_v13 = vsel %vm25_vm0, %v9865_v59, %v7646_v19  ;;  %v10998_v59 = vsel %vm25_vm0, %v242_v53, %v7626_v8  ;;  %v711_v19 = vld [vmem:[#allocation2 + $0x121] sm:$0xff]  ;;  %v7681_v8 = vunpack.i.l.bf16 %v10486_v12  ;;  %v710_v53 = vld [vmem:[#allocation2 + $0x111] sm:$0xff] }
 0x268   :  { %15606 = vst [vmem:[#allocation127_spill] sm:$0xff] %v10982_v13  ;;  %v7656_v13 = vunpack.i.l.bf16 %v10510_v44 }
 0x269   :  { %8599 = vrot.lane.b32.xlu0 %v8598_v60, %s9989_s14  ;;  %v10965_v5 = vpop.permute.xlu1 %8394  ;;  %v713_v60 = vld [vmem:[#allocation2 + $0x139] sm:$0xff]  ;;  %v10989_v52 = vsel %vm25_vm0, %v9867_v21, %v7636_v40  ;;  %v9871_v40 = vld [vmem:[#allocation2 + $0xc8] sm:$0xff] }
 0x26a   :  { %15603 = vst [vmem:[#allocation124_spill] sm:$0xff] %v10965_v5  ;;  %v714_v5 = vld [vmem:[#allocation2 + $0x141] sm:$0xff]  ;;  %v11007_v61 = vsel %vm25_vm0, %v9871_v40, %v7667_v39  ;;  %v7641_v39 = vunpack.i.l.bf16 %v10499_v28  ;;  %v7631_v40 = vunpack.i.l.bf16 %v10501_v31 }
 0x26b   :  { %v10969_v4 = vpop.permute.xlu0 %8389  ;;  %8624 = vrot.lane.b32.xlu2 %v8623_v37, %s9989_s14  ;;  %v8638_v35 = vpack.i.bf16 %v714_v5, %v713_v60  ;;  %v9870_v5 = vld [vmem:[#allocation2 + $0x78] sm:$0xff]  ;;  %15610 = vst [vmem:[#allocation131_spill] sm:$0xff] %v11007_v61  ;;  %v7696_v60 = vunpack.i.l.bf16 %v10495_v24  ;;  %v720_v61 = vld [vmem:[#allocation2 + $0x189] sm:$0xff] }
 0x26c   :  { %15604 = vst [vmem:[#allocation125_spill] sm:$0xff] %v10969_v4  ;;  %v243_v4 = vld [vmem:[#allocation2 + $0x8] sm:$0xff]  ;;  %v11004_v21 = vsel %vm25_vm0, %v9870_v5, %v7651_v34 }
 0x26d   :  { %v10979_v37 = vpop.permute.xlu2 %8459  ;;  %v10995_v58 = vsel %vm25_vm0, %v243_v4, %v7627_v11  ;;  %15609 = vst [vmem:[#allocation130_spill] sm:$0xff] %v11004_v21  ;;  %v7666_v4 = vunpack.i.l.bf16 %v10481_v1  ;;  %v7682_v11 = vunpack.i.h.bf16 %v10486_v12  ;;  %v709_v34 = vld [vmem:[#allocation2 + $0x109] sm:$0xff]  ;;  %v7632_v1 = vunpack.i.h.bf16 %v10501_v31 }
 0x26e   :  { %15605 = vst [vmem:[#allocation126_spill] sm:$0xff] %v10979_v37  ;;  %v7712_v12 = vunpack.i.h.bf16 %v10504_v36  ;;  %v719_v37 = vld [vmem:[#allocation2 + $0x181] sm:$0xff]  ;;  %v11039_v21 = vsel %vm25_vm0, %v9874_v17, %v7681_v8 }
 0x26f   :  { %8619 = vrot.lane.b32.xlu1 %v8618_v46, %s9989_s14  ;;  %v11001_v46 = vsel %vm25_vm0, %v9869_v25, %v7652_v29  ;;  %v7697_v29 = vunpack.i.h.bf16 %v10495_v24  ;;  %v7642_v25 = vunpack.i.h.bf16 %v10499_v28  ;;  %v7662_v24 = vunpack.i.h.bf16 %v10508_v41  ;;  %15615 = vst [vmem:[#allocation136_spill] sm:$0xff] %v11039_v21  ;;  %v9875_v41 = vld [vmem:[#allocation2 + $0x158] sm:$0xff]  ;;  %v9879_v8 = vld [vmem:[#allocation2 + $0x20] sm:$0xff] }
 0x270   :  { %15608 = vst [vmem:[#allocation129_spill] sm:$0xff] %v11001_v46  ;;  %v7657_v28 = vunpack.i.h.bf16 %v10510_v44  ;;  %v9876_v44 = vld [vmem:[#allocation2 + $0x150] sm:$0xff]  ;;  %v8653_v17 = vpack.i.bf16 %v720_v61, %v719_v37  ;;  %v9884_v61 = vld [vmem:[#allocation2 + $0xa8] sm:$0xff]  ;;  %v9889_v21 = vld [vmem:[#allocation2 + $0xf8] sm:$0xff] }
 0x271   :  { %8614 = vrot.lane.b32.xlu0 %v8613_v23, %s9989_s14  ;;  %v11011_v2 = vpop.permute.xlu1 %8409  ;;  %v8633_v23 = vpack.i.bf16 %v712_v47, %v711_v19  ;;  %v9873_v47 = vld [vmem:[#allocation2 + $0x110] sm:$0xff]  ;;  %v11042_v46 = vsel %vm25_vm0, %v9875_v41, %v7697_v29  ;;  %v9880_v29 = vld [vmem:[#allocation2 + $0x18] sm:$0xff] }
 0x272   :  { %15611 = vst [vmem:[#allocation132_spill] sm:$0xff] %v11011_v2  ;;  %v7711_v2 = vunpack.i.l.bf16 %v10504_v36  ;;  %v11036_v36 = vsel %vm25_vm0, %v9873_v47, %v7682_v11  ;;  %v11055_v47 = vsel %vm25_vm0, %v9879_v8, %v7632_v1  ;;  %v11058_v41 = vsel %vm25_vm0, %v9880_v29, %v7631_v40  ;;  %v9885_v40 = vld [vmem:[#allocation2 + $0x98] sm:$0xff] }
 0x273   :  { %v11020_v5 = vpop.permute.xlu0 %8404  ;;  %8639 = vrot.lane.b32.xlu2 %v8638_v35, %s9989_s14  ;;  %v9872_v35 = vld [vmem:[#allocation2 + $0xc0] sm:$0xff]  ;;  %15614 = vst [vmem:[#allocation135_spill] sm:$0xff] %v11036_v36  ;;  %v11070_v1 = vsel %vm25_vm0, %v9884_v61, %v7661_v9  ;;  %v11073_v8 = vsel %vm25_vm0, %v9885_v40, %v7657_v28  ;;  %v7676_v9 = vunpack.i.l.bf16 %v10517_v54  ;;  %v7672_v28 = vunpack.i.h.bf16 %v10519_v57 }
 0x274   :  { %15612 = vst [vmem:[#allocation133_spill] sm:$0xff] %v11020_v5  ;;  %v8628_v5 = vpack.i.bf16 %v710_v53, %v709_v34  ;;  %v11033_v31 = vsel %vm25_vm0, %v9872_v35, %v7666_v4  ;;  %v11045_v34 = vsel %vm25_vm0, %v9876_v44, %v7696_v60  ;;  %v9877_v53 = vld [vmem:[#allocation2 + $0x50] sm:$0xff]  ;;  %v9878_v35 = vld [vmem:[#allocation2 + $0x48] sm:$0xff]  ;;  %v716_v61 = vld [vmem:[#allocation2 + $0x159] sm:$0xff]  ;;  %v7671_v40 = vunpack.i.l.bf16 %v10519_v57 }
 0x275   :  { %v11030_v19 = vpop.permute.xlu2 %8474  ;;  %15616 = vst [vmem:[#allocation137_spill] sm:$0xff] %v11042_v46  ;;  %v11048_v4 = vsel %vm25_vm0, %v9877_v53, %v7642_v25  ;;  %v11051_v11 = vsel %vm25_vm0, %v9878_v35, %v7641_v39  ;;  %v9881_v60 = vld [vmem:[#allocation2 + $0x1d0] sm:$0xff]  ;;  %v9882_v25 = vld [vmem:[#allocation2 + $0x1c8] sm:$0xff]  ;;  %v7757_v57 = vunpack.i.h.bf16 %v10531_v14  ;;  %v7756_v46 = vunpack.i.l.bf16 %v10531_v14  ;;  %v9891_v14 = vld [vmem:[#allocation2 + $0xe0] sm:$0xff] }
 0x276   :  { %15613 = vst [vmem:[#allocation134_spill] sm:$0xff] %v11030_v19  ;;  %v11061_v44 = vsel %vm25_vm0, %v9881_v60, %v7712_v12  ;;  %v11064_v53 = vsel %vm25_vm0, %v9882_v25, %v7711_v2  ;;  %v717_v39 = vld [vmem:[#allocation2 + $0x169] sm:$0xff]  ;;  %v718_v35 = vld [vmem:[#allocation2 + $0x171] sm:$0xff]  ;;  %v7727_v60 = vunpack.i.h.bf16 %v10513_v49  ;;  %v7677_v25 = vunpack.i.h.bf16 %v10517_v54 }
 0x277   :  { %15617 = vst [vmem:[#allocation138_spill] sm:$0xff] %v11045_v34  ;;  %8634 = vrot.lane.b32.xlu1 %v8633_v23, %s9989_s14  ;;  %v9883_v23 = vld [vmem:[#allocation2 + $0xb0] sm:$0xff]  ;;  %v7741_v19 = vunpack.i.l.bf16 %v10522_v62  ;;  %v7687_v54 = vunpack.i.h.bf16 %v10528_v7  ;;  %v7686_v34 = vunpack.i.l.bf16 %v10528_v7 }
 0x278   :  { %15618 = vst [vmem:[#allocation139_spill] sm:$0xff] %v11061_v44  ;;  %v11067_v37 = vsel %vm25_vm0, %v9883_v23, %v7662_v24  ;;  %v9886_v12 = vld [vmem:[#allocation2 + $0x90] sm:$0xff]  ;;  %v7726_v24 = vunpack.i.l.bf16 %v10513_v49  ;;  %v7692_v49 = vunpack.i.h.bf16 %v10526_v3  ;;  %v726_v44 = vld [vmem:[#allocation2 + $0x201] sm:$0xff]  ;;  %v11107_v36 = vsel %vm25_vm0, %v9889_v21, %v7677_v25  ;;  %v9894_v25 = vld [vmem:[#allocation2 + $0x258] sm:$0xff] }
 0x279   :  { %15619 = vst [vmem:[#allocation140_spill] sm:$0xff] %v11064_v53  ;;  %v11076_v29 = vsel %vm25_vm0, %v9886_v12, %v7656_v13  ;;  %8629 = vrot.lane.b32.xlu0 %v8628_v5, %s9989_s14  ;;  %v11079_v2 = vpop.permute.xlu1 %8424  ;;  %v715_v23 = vld [vmem:[#allocation2 + $0x151] sm:$0xff]  ;;  %v7742_v13 = vunpack.i.h.bf16 %v10522_v62  ;;  %v8648_v5 = vpack.i.bf16 %v718_v35, %v717_v39  ;;  %v725_v53 = vld [vmem:[#allocation2 + $0x1f9] sm:$0xff] }
 0x27a   :  { %15620 = vst [vmem:[#allocation141_spill] sm:$0xff] %v11070_v1  ;;  %v9888_v35 = vld [vmem:[#allocation2 + $0x210] sm:$0xff] }
 0x27b   :  { %15621 = vst [vmem:[#allocation142_spill] sm:$0xff] %v11079_v2  ;;  %v11088_v12 = vpop.permute.xlu0 %8419  ;;  %8654 = vrot.lane.b32.xlu2 %v8653_v17, %s9989_s14  ;;  %v7691_v2 = vunpack.i.l.bf16 %v10526_v3  ;;  %v9887_v17 = vld [vmem:[#allocation2 + $0x218] sm:$0xff]  ;;  %v11104_v3 = vsel %vm25_vm0, %v9888_v35, %v7726_v24  ;;  %v9890_v7 = vld [vmem:[#allocation2 + $0xf0] sm:$0xff]  ;;  %v8668_v24 = vpack.i.bf16 %v726_v44, %v725_v53  ;;  %v9895_v35 = vld [vmem:[#allocation2 + $0x140] sm:$0xff] }
 0x27c   :  { %15622 = vst [vmem:[#allocation143_spill] sm:$0xff] %v11088_v12  ;;  %v8643_v12 = vpack.i.bf16 %v716_v61, %v715_v23  ;;  %v11101_v62 = vsel %vm25_vm0, %v9887_v17, %v7727_v60  ;;  %v11110_v1 = vsel %vm25_vm0, %v9890_v7, %v7676_v9  ;;  %v11113_v23 = vsel %vm25_vm0, %v9891_v14, %v7672_v28  ;;  %v9892_v61 = vld [vmem:[#allocation2 + $0xd8] sm:$0xff]  ;;  %v9893_v17 = vld [vmem:[#allocation2 + $0x260] sm:$0xff] }
 0x27d   :  { %v11098_v39 = vpop.permute.xlu2 %8489  ;;  %15624 = vst [vmem:[#allocation145_spill] sm:$0xff] %v11101_v62  ;;  %v11116_v60 = vsel %vm25_vm0, %v9892_v61, %v7671_v40  ;;  %v11120_v21 = vsel %vm25_vm0, %v9893_v17, %v7742_v13  ;;  %v11123_v9 = vsel %vm25_vm0, %v9894_v25, %v7741_v19  ;;  %v11126_v28 = vsel %vm25_vm0, %v9895_v35, %v7692_v49  ;;  %v9896_v7 = vld [vmem:[#allocation2 + $0x138] sm:$0xff]  ;;  %v723_v14 = vld [vmem:[#allocation2 + $0x1e1] sm:$0xff]  ;;  %v724_v61 = vld [vmem:[#allocation2 + $0x1e9] sm:$0xff] }
 0x27e   :  { %15623 = vst [vmem:[#allocation144_spill] sm:$0xff] %v11098_v39  ;;  %v11129_v40 = vsel %vm25_vm0, %v9896_v7, %v7691_v2  ;;  %v9898_v53 = vld [vmem:[#allocation2 + $0x120] sm:$0xff]  ;;  %v9899_v19 = vld [vmem:[#allocation2 + $0x2a8] sm:$0xff]  ;;  %v7702_v35 = vunpack.i.h.bf16 %v10537_v22  ;;  %v7772_v7 = vunpack.i.h.bf16 %v10540_v26  ;;  %v7716_v39 = vunpack.i.l.bf16 %v10546_v38 }
 0x27f   :  { %15625 = vst [vmem:[#allocation146_spill] sm:$0xff] %v11104_v3  ;;  %8649 = vrot.lane.b32.xlu1 %v8648_v5, %s9989_s14  ;;  %v9897_v5 = vld [vmem:[#allocation2 + $0x128] sm:$0xff]  ;;  %v11135_v13 = vsel %vm25_vm0, %v9898_v53, %v7686_v34  ;;  %v11138_v17 = vsel %vm25_vm0, %v9899_v19, %v7757_v57  ;;  %v9900_v49 = vld [vmem:[#allocation2 + $0x2a0] sm:$0xff]  ;;  %v7771_v34 = vunpack.i.l.bf16 %v10540_v26  ;;  %v7722_v57 = vunpack.i.h.bf16 %v10544_v33 }
 0x280   :  { %15626 = vst [vmem:[#allocation147_spill] sm:$0xff] %v11120_v21  ;;  %v11132_v44 = vsel %vm25_vm0, %v9897_v5, %v7687_v54  ;;  %v11141_v25 = vsel %vm25_vm0, %v9900_v49, %v7756_v46  ;;  %v7701_v54 = vunpack.i.l.bf16 %v10537_v22  ;;  %v721_v5 = vld [vmem:[#allocation2 + $0x199] sm:$0xff]  ;;  %v722_v53 = vld [vmem:[#allocation2 + $0x1a1] sm:$0xff]  ;;  %v7721_v19 = vunpack.i.l.bf16 %v10544_v33 }
 0x281   :  { %15627 = vst [vmem:[#allocation148_spill] sm:$0xff] %v11123_v9  ;;  %8644 = vrot.lane.b32.xlu0 %v8643_v12, %s9989_s14  ;;  %v11144_v2 = vpop.permute.xlu1 %8439  ;;  %v7717_v46 = vunpack.i.h.bf16 %v10546_v38  ;;  %v8663_v12 = vpack.i.bf16 %v724_v61, %v723_v14  ;;  %v7737_v22 = vunpack.i.h.bf16 %v10561_v51  ;;  %v7786_v26 = vunpack.i.l.bf16 %v10549_v45  ;;  %v9902_v61 = vld [vmem:[#allocation2 + $0x168] sm:$0xff] }
 0x282   :  { %15628 = vst [vmem:[#allocation149_spill] sm:$0xff] %v11129_v40  ;;  %v7736_v9 = vunpack.i.l.bf16 %v10561_v51  ;;  %v7732_v33 = vunpack.i.h.bf16 %v10563_v56  ;;  %v7731_v21 = vunpack.i.l.bf16 %v10563_v56  ;;  %v11169_v3 = vsel %vm25_vm0, %v9902_v61, %v7701_v54  ;;  %v9904_v51 = vld [vmem:[#allocation2 + $0x2e8] sm:$0xff]  ;;  %v9905_v56 = vld [vmem:[#allocation2 + $0x200] sm:$0xff] }
 0x283   :  { %15629 = vst [vmem:[#allocation150_spill] sm:$0xff] %v11138_v17  ;;  %v11153_v49 = vpop.permute.xlu0 %8434  ;;  %8669 = vrot.lane.b32.xlu2 %v8668_v24, %s9989_s14  ;;  %v732_v17 = vld [vmem:[#allocation2 + $0x249] sm:$0xff]  ;;  %v11175_v40 = vsel %vm25_vm0, %v9904_v51, %v7771_v34  ;;  %v9908_v61 = vld [vmem:[#allocation2 + $0x1e0] sm:$0xff] }
 0x284   :  { %15630 = vst [vmem:[#allocation151_spill] sm:$0xff] %v11141_v25  ;;  %v731_v25 = vld [vmem:[#allocation2 + $0x241] sm:$0xff]  ;;  %v9901_v24 = vld [vmem:[#allocation2 + $0x170] sm:$0xff] }
 0x285   :  { %15631 = vst [vmem:[#allocation152_spill] sm:$0xff] %v11144_v2  ;;  %v7787_v2 = vunpack.i.h.bf16 %v10549_v45  ;;  %v11163_v14 = vpop.permute.xlu2 %8504  ;;  %v11166_v38 = vsel %vm25_vm0, %v9901_v24, %v7702_v35  ;;  %v9903_v45 = vld [vmem:[#allocation2 + $0x2f0] sm:$0xff]  ;;  %v9907_v24 = vld [vmem:[#allocation2 + $0x1e8] sm:$0xff] }
 0x286   :  { %15632 = vst [vmem:[#allocation153_spill] sm:$0xff] %v11153_v49  ;;  %v8658_v49 = vpack.i.bf16 %v722_v53, %v721_v5  ;;  %v11172_v62 = vsel %vm25_vm0, %v9903_v45, %v7772_v7  ;;  %v11178_v5 = vsel %vm25_vm0, %v9905_v56, %v7722_v57  ;;  %v9906_v53 = vld [vmem:[#allocation2 + $0x1f8] sm:$0xff]  ;;  %v11184_v54 = vsel %vm25_vm0, %v9907_v24, %v7717_v46  ;;  %v9909_v34 = vld [vmem:[#allocation2 + $0x248] sm:$0xff] }
 0x287   :  { %15633 = vst [vmem:[#allocation154_spill] sm:$0xff] %v11163_v14  ;;  %v11181_v35 = vsel %vm25_vm0, %v9906_v53, %v7721_v19  ;;  %8664 = vrot.lane.b32.xlu1 %v8663_v12, %s9989_s14  ;;  %v8683_v7 = vpack.i.bf16 %v732_v17, %v731_v25  ;;  %v11188_v45 = vsel %vm25_vm0, %v9908_v61, %v7716_v39  ;;  %v729_v46 = vld [vmem:[#allocation2 + $0x229] sm:$0xff]  ;;  %v730_v56 = vld [vmem:[#allocation2 + $0x231] sm:$0xff]  ;;  %v9910_v12 = vld [vmem:[#allocation2 + $0x240] sm:$0xff]  ;;  %v7747_v24 = vunpack.i.h.bf16 %v10572_v10 }
 0x288   :  { %15634 = vst [vmem:[#allocation155_spill] sm:$0xff] %v11175_v40  ;;  %v11191_v51 = vsel %vm25_vm0, %v9909_v34, %v7737_v22  ;;  %v11195_v57 = vsel %vm2931_vm3, %v10998_v59, %v7786_v26  ;;  %v11199_v19 = vsel %vm2931_vm3, %v10995_v58, %v7787_v2  ;;  %v11202_v17 = vsel %vm25_vm0, %v9910_v12, %v7736_v9  ;;  %v9911_v39 = vld [vmem:[#allocation2 + $0x230] sm:$0xff]  ;;  %v9912_v22 = vld [vmem:[#allocation2 + $0x228] sm:$0xff]  ;;  %v728_v61 = vld [vmem:[#allocation2 + $0x219] sm:$0xff] }
 0x289   :  { %15635 = vst [vmem:[#allocation156_spill] sm:$0xff] %v11195_v57  ;;  %v11205_v25 = vsel %vm25_vm0, %v9911_v39, %v7732_v33  ;;  %v11208_v53 = vsel %vm25_vm0, %v9912_v22, %v7731_v21  ;;  %v7802_v59 = vunpack.i.h.bf16 %v10566_v63  ;;  %8659 = vrot.lane.b32.xlu0 %v8658_v49, %s9989_s14  ;;  %v11212_v58 = vpop.permute.xlu1 %8454  ;;  %v7752_v2 = vunpack.i.h.bf16 %v10570_v6  ;;  %v727_v33 = vld [vmem:[#allocation2 + $0x211] sm:$0xff]  ;;  %v9914_v57 = vld [vmem:[#allocation2 + $0x288] sm:$0xff] }
 0x28a   :  { %15636 = vst [vmem:[#allocation157_spill] sm:$0xff] %v11199_v19  ;;  %v7751_v26 = vunpack.i.l.bf16 %v10570_v6  ;;  %v7801_v9 = vunpack.i.l.bf16 %v10566_v63  ;;  %v7746_v34 = vunpack.i.l.bf16 %v10572_v10  ;;  %v7817_v21 = vunpack.i.h.bf16 %v10575_v20  ;;  %v738_v19 = vld [vmem:[#allocation2 + $0x291] sm:$0xff] }
 0x28b   :  { %15637 = vst [vmem:[#allocation158_spill] sm:$0xff] %v11212_v58  ;;  %v7816_v12 = vunpack.i.l.bf16 %v10575_v20  ;;  %v11221_v39 = vpop.permute.xlu0 %8449  ;;  %v8678_v49 = vpack.i.bf16 %v730_v56, %v729_v46  ;;  %8684 = vrot.lane.b32.xlu2 %v8683_v7, %s9989_s14  ;;  %v7767_v22 = vunpack.i.h.bf16 %v10579_v27  ;;  %v7766_v6 = vunpack.i.l.bf16 %v10579_v27  ;;  %v737_v58 = vld [vmem:[#allocation2 + $0x289] sm:$0xff] }
 0x28c   :  { %15638 = vst [vmem:[#allocation159_spill] sm:$0xff] %v11221_v39  ;;  %v7762_v63 = vunpack.i.h.bf16 %v10581_v32  ;;  %v7761_v14 = vunpack.i.l.bf16 %v10581_v32  ;;  %v11230_v10 = vsel %vm2931_vm3, %v11048_v4, %v7802_v59  ;;  %v7832_v20 = vunpack.i.h.bf16 %v10584_v42  ;;  %v9913_v39 = vld [vmem:[#allocation2 + $0x290] sm:$0xff]  ;;  %v9915_v4 = vld [vmem:[#allocation2 + $0x278] sm:$0xff] }
 0x28d   :  { %v7831_v46 = vunpack.i.l.bf16 %v10584_v42  ;;  %v8673_v56 = vpack.i.bf16 %v728_v61, %v727_v33  ;;  %v11234_v7 = vpop.permute.xlu2 %8519  ;;  %v11237_v27 = vsel %vm25_vm0, %v9913_v39, %v7752_v2  ;;  %v11240_v32 = vsel %vm25_vm0, %v9914_v57, %v7751_v26  ;;  %v9916_v42 = vld [vmem:[#allocation2 + $0x270] sm:$0xff]  ;;  %v9917_v26 = vld [vmem:[#allocation2 + $0x2d8] sm:$0xff] }
 0x28e   :  { %15639 = vst [vmem:[#allocation160_spill] sm:$0xff] %v11234_v7  ;;  %v11244_v40 = vsel %vm2931_vm3, %v11051_v11, %v7801_v9  ;;  %v11247_v59 = vsel %vm25_vm0, %v9915_v4, %v7747_v24  ;;  %v11250_v33 = vsel %vm25_vm0, %v9916_v42, %v7746_v34  ;;  %v11254_v2 = vsel %vm2931_vm3, %v11076_v29, %v7816_v12  ;;  %v9918_v24 = vld [vmem:[#allocation2 + $0x2d0] sm:$0xff]  ;;  %v9919_v34 = vld [vmem:[#allocation2 + $0x2c0] sm:$0xff]  ;;  %v9920_v29 = vld [vmem:[#allocation2 + $0x2b8] sm:$0xff] }
 0x28f   :  { %v11258_v57 = vsel %vm2931_vm3, %v11073_v8, %v7817_v21  ;;  %8679 = vrot.lane.b32.xlu1 %v8678_v49, %s9989_s14  ;;  %v8698_v11 = vpack.i.bf16 %v738_v19, %v737_v58  ;;  %v11262_v9 = vsel %vm25_vm0, %v9917_v26, %v7767_v22  ;;  %v11265_v61 = vsel %vm25_vm0, %v9918_v24, %v7766_v6  ;;  %v735_v8 = vld [vmem:[#allocation2 + $0x271] sm:$0xff]  ;;  %v736_v21 = vld [vmem:[#allocation2 + $0x279] sm:$0xff]  ;;  %v734_v24 = vld [vmem:[#allocation2 + $0x261] sm:$0xff] }
 0x290   :  { %v11268_v39 = vsel %vm25_vm0, %v9919_v34, %v7762_v63  ;;  %v11271_v12 = vsel %vm25_vm0, %v9920_v29, %v7761_v14  ;;  %v7782_v19 = vunpack.i.h.bf16 %v10588_v48  ;;  %v11277_v49 = vsel %vm2931_vm3, %v11116_v60, %v7831_v46  ;;  %v733_v26 = vld [vmem:[#allocation2 + $0x259] sm:$0xff]  ;;  %v743_v58 = vld [vmem:[#allocation2 + $0x2d1] sm:$0xff] }
 0x291   :  { %15640 = vst [vmem:[#allocation161_spill] sm:$0xff] %v11277_v49  ;;  %v11281_v22 = vsel %vm2931_vm3, %v11113_v23, %v7832_v20  ;;  %8674 = vrot.lane.b32.xlu0 %v8673_v56, %s9989_s14  ;;  %v11284_v6 = vpop.permute.xlu1 %8469  ;;  %v7777_v14 = vunpack.i.h.bf16 %v10590_v55  ;;  %v7776_v63 = vunpack.i.l.bf16 %v10590_v55  ;;  %v7847_v4 = vunpack.i.h.bf16 %v10593_v0  ;;  %v744_v48 = vld [vmem:[#allocation2 + $0x2d9] sm:$0xff] }
 0x292   :  { %15641 = vst [vmem:[#allocation162_spill] sm:$0xff] %v11281_v22  ;;  %v7846_v42 = vunpack.i.l.bf16 %v10593_v0  ;;  %v7797_v60 = vunpack.i.h.bf16 %v10597_v15  ;;  %v7796_v46 = vunpack.i.l.bf16 %v10597_v15  ;;  %v7792_v23 = vunpack.i.h.bf16 %v10599_v16 }
 0x293   :  { %15642 = vst [vmem:[#allocation163_spill] sm:$0xff] %v11284_v6  ;;  %v11293_v20 = vpop.permute.xlu0 %8464  ;;  %v8693_v56 = vpack.i.bf16 %v736_v21, %v735_v8  ;;  %8699 = vrot.lane.b32.xlu2 %v8698_v11, %s9989_s14  ;;  %v7791_v34 = vunpack.i.l.bf16 %v10599_v16  ;;  %v7812_v55 = vunpack.i.h.bf16 %v10614_v43  ;;  %v7862_v29 = vunpack.i.h.bf16 %v10602_v30  ;;  %v9921_v11 = vld [vmem:[#allocation2 + $0x320] sm:$0xff]  ;;  %v9922_v21 = vld [vmem:[#allocation2 + $0x308] sm:$0xff] }
 0x294   :  { %15643 = vst [vmem:[#allocation164_spill] sm:$0xff] %v11293_v20  ;;  %v7861_v0 = vunpack.i.l.bf16 %v10602_v30  ;;  %v7811_v7 = vunpack.i.l.bf16 %v10614_v43  ;;  %v7807_v15 = vunpack.i.h.bf16 %v10616_v50  ;;  %v7806_v6 = vunpack.i.l.bf16 %v10616_v50  ;;  %v9923_v30 = vld [vmem:[#allocation2 + $0x300] sm:$0xff] }
 0x295   :  { %v8688_v20 = vpack.i.bf16 %v734_v24, %v733_v26  ;;  %v11303_v8 = vpop.permute.xlu2 %8534  ;;  %v11306_v16 = vsel %vm25_vm0, %v9921_v11, %v7782_v19  ;;  %v11309_v22 = vsel %vm25_vm0, %v9922_v21, %v7777_v14  ;;  %v11312_v49 = vsel %vm25_vm0, %v9923_v30, %v7776_v63 }
 0x296   :  { %15644 = vst [vmem:[#allocation165_spill] sm:$0xff] %v11303_v8  ;;  %v11316_v43 = vsel %vm2931_vm3, %v11135_v13, %v7846_v42  ;;  %v11320_v50 = vsel %vm2931_vm3, %v10992_v18, %v7797_v60  ;;  %v11324_v19 = vsel %vm2931_vm3, %v10989_v52, %v7796_v46  ;;  %v11328_v14 = vsel %vm2931_vm3, %v11132_v44, %v7847_v4  ;;  %v741_v44 = vld [vmem:[#allocation2 + $0x2b9] sm:$0xff]  ;;  %v742_v4 = vld [vmem:[#allocation2 + $0x2c1] sm:$0xff] }
 0x297   :  { %15645 = vst [vmem:[#allocation166_spill] sm:$0xff] %v11306_v16  ;;  %8694 = vrot.lane.b32.xlu1 %v8693_v56, %s9989_s14  ;;  %v8713_v63 = vpack.i.bf16 %v744_v48, %v743_v58  ;;  %v11333_v26 = vsel %vm2931_vm3, %v11058_v41, %v7791_v34  ;;  %v11337_v13 = vsel %vm2931_vm3, %v11055_v47, %v7792_v23  ;;  %v15649_v42 = vld [vmem:[#allocation129_spill] sm:$0xff]  ;;  %v15650_v41 = vld [vmem:[#allocation130_spill] sm:$0xff]  ;;  %v15651_v47 = vld [vmem:[#allocation128_spill] sm:$0xff] }
 0x298   :  { %15646 = vst [vmem:[#allocation167_spill] sm:$0xff] %v11328_v14  ;;  %v11341_v18 = vsel %vm2931_vm3, %v11169_v3, %v7861_v0  ;;  %v11345_v52 = vsel %vm2931_vm3, %v11166_v38, %v7862_v29  ;;  %v11349_v48 = vsel %vm2931_vm3, %v15649_v42, %v7812_v55  ;;  %v11353_v58 = vsel %vm2931_vm3, %v15650_v41, %v7811_v7  ;;  %v15652_v3 = vld [vmem:[#allocation127_spill] sm:$0xff]  ;;  %v15654_v46 = vld [vmem:[#allocation10_spill] sm:$0xff]  ;;  %v15655_v34 = vld [vmem:[#allocation9_spill] sm:$0xff] }
 0x299   :  { %15647 = vst [vmem:[#allocation168_spill] sm:$0xff] %v11341_v18  ;;  %v11357_v24 = vsel %vm2931_vm3, %v15651_v47, %v7807_v15  ;;  %v11361_v60 = vsel %vm2931_vm3, %v15652_v3, %v7806_v6  ;;  %8689 = vrot.lane.b32.xlu0 %v8688_v20, %s9989_s14  ;;  %v11364_v38 = vpop.permute.xlu1 %8484  ;;  %v7827_v23 = vunpack.i.h.bf16 %v15654_v46  ;;  %v7826_v56 = vunpack.i.l.bf16 %v15654_v46  ;;  %v739_v29 = vld [vmem:[#allocation2 + $0x2a1] sm:$0xff]  ;;  %v740_v0 = vld [vmem:[#allocation2 + $0x2a9] sm:$0xff]  ;;  %v15659_v41 = vld [vmem:[#allocation13_spill] sm:$0xff] }
 0x29a   :  { %15648 = vst [vmem:[#allocation169_spill] sm:$0xff] %v11345_v52  ;;  %v7877_v55 = vunpack.i.h.bf16 %v15655_v34  ;;  %v7876_v7 = vunpack.i.l.bf16 %v15655_v34  ;;  %v15656_v15 = vld [vmem:[#allocation11_spill] sm:$0xff]  ;;  %v15657_v6 = vld [vmem:[#allocation12_spill] sm:$0xff]  ;;  %v8708_v20 = vpack.i.bf16 %v742_v4, %v741_v44  ;;  %v7842_v47 = vunpack.i.h.bf16 %v15659_v41  ;;  %v15660_v34 = vld [vmem:[#allocation14_spill] sm:$0xff] }
 0x29b   :  { %15653 = vst [vmem:[#allocation129_spill] sm:$0xff] %v11364_v38  ;;  %v7822_v11 = vunpack.i.h.bf16 %v15656_v15  ;;  %v7821_v21 = vunpack.i.l.bf16 %v15656_v15  ;;  %v7891_v30 = vunpack.i.l.bf16 %v15657_v6  ;;  %v11373_v42 = vpop.permute.xlu0 %8479  ;;  %8714 = vrot.lane.b32.xlu2 %v8713_v63, %s9989_s14  ;;  %v7841_v3 = vunpack.i.l.bf16 %v15659_v41  ;;  %v749_v8 = vld [vmem:[#allocation2 + $0x319] sm:$0xff]  ;;  %v750_v38 = vld [vmem:[#allocation2 + $0x321] sm:$0xff] }
 0x29c   :  { %15658 = vst [vmem:[#allocation130_spill] sm:$0xff] %v11373_v42  ;;  %v7892_v46 = vunpack.i.h.bf16 %v15657_v6  ;;  %v7837_v16 = vunpack.i.h.bf16 %v15660_v34  ;;  %v7836_v52 = vunpack.i.l.bf16 %v15660_v34  ;;  %v15661_v15 = vld [vmem:[#allocation15_spill] sm:$0xff]  ;;  %v8703_v42 = vpack.i.bf16 %v740_v0, %v739_v29  ;;  %v15666_v0 = vld [vmem:[#allocation141_spill] sm:$0xff] }
 0x29d   :  { %v7907_v18 = vunpack.i.h.bf16 %v15661_v15  ;;  %v7906_v14 = vunpack.i.l.bf16 %v15661_v15  ;;  %v11383_v44 = vpop.permute.xlu2 %8549  ;;  %v15663_v63 = vld [vmem:[#allocation131_spill] sm:$0xff]  ;;  %v11391_v6 = vsel %vm2931_vm3, %v11033_v31, %v7826_v56  ;;  %v11395_v41 = vsel %vm2931_vm3, %v11188_v45, %v7876_v7  ;;  %v15678_v15 = vld [vmem:[#allocation18_spill] sm:$0xff] }
 0x29e   :  { %15662 = vst [vmem:[#allocation128_spill] sm:$0xff] %v11383_v44  ;;  %v11387_v4 = vsel %vm2931_vm3, %v15663_v63, %v7827_v23  ;;  %v11399_v34 = vsel %vm2931_vm3, %v11184_v54, %v7877_v55  ;;  %v11403_v29 = vsel %vm2931_vm3, %v11067_v37, %v7822_v11  ;;  %v11407_v23 = vsel %vm2931_vm3, %v15666_v0, %v7821_v21  ;;  %v15668_v56 = vld [vmem:[#allocation135_spill] sm:$0xff]  ;;  %v15669_v54 = vld [vmem:[#allocation136_spill] sm:$0xff] }
 0x29f   :  { %15664 = vst [vmem:[#allocation127_spill] sm:$0xff] %v11395_v41  ;;  %v11411_v31 = vsel %vm2931_vm3, %v11208_v53, %v7891_v30  ;;  %8709 = vrot.lane.b32.xlu1 %v8708_v20, %s9989_s14  ;;  %v8728_v45 = vpack.i.bf16 %v750_v38, %v749_v8  ;;  %v11416_v7 = vsel %vm2931_vm3, %v15668_v56, %v7842_v47  ;;  %v747_v11 = vld [vmem:[#allocation2 + $0x301] sm:$0xff]  ;;  %v748_v21 = vld [vmem:[#allocation2 + $0x309] sm:$0xff]  ;;  %v7922_v63 = vunpack.i.h.bf16 %v15678_v15 }
 0x2a0   :  { %15665 = vst [vmem:[#allocation10_spill] sm:$0xff] %v11399_v34  ;;  %v11420_v55 = vsel %vm2931_vm3, %v15669_v54, %v7841_v3  ;;  %v11424_v37 = vsel %vm2931_vm3, %v11205_v25, %v7892_v46  ;;  %v11428_v53 = vsel %vm2931_vm3, %v11107_v36, %v7837_v16  ;;  %v11432_v8 = vsel %vm2931_vm3, %v11110_v1, %v7836_v52  ;;  %v15675_v20 = vld [vmem:[#allocation16_spill] sm:$0xff]  ;;  %v15676_v16 = vld [vmem:[#allocation17_spill] sm:$0xff]  ;;  %v15680_v56 = vld [vmem:[#allocation22_spill] sm:$0xff] }
 0x2a1   :  { %15667 = vst [vmem:[#allocation9_spill] sm:$0xff] %v11411_v31  ;;  %v11436_v38 = vsel %vm2931_vm3, %v11250_v33, %v7906_v14  ;;  %v11440_v30 = vsel %vm2931_vm3, %v11247_v59, %v7907_v18  ;;  %8704 = vrot.lane.b32.xlu0 %v8703_v42, %s9989_s14  ;;  %v11443_v25 = vpop.permute.xlu1 %8499  ;;  %v7857_v47 = vunpack.i.h.bf16 %v15675_v20  ;;  %v7856_v36 = vunpack.i.l.bf16 %v15675_v20  ;;  %v745_v52 = vld [vmem:[#allocation2 + $0x2e9] sm:$0xff]  ;;  %v746_v46 = vld [vmem:[#allocation2 + $0x2f1] sm:$0xff] }
 0x2a2   :  { %15670 = vst [vmem:[#allocation11_spill] sm:$0xff] %v11420_v55  ;;  %v7852_v3 = vunpack.i.h.bf16 %v15676_v16  ;;  %v7851_v1 = vunpack.i.l.bf16 %v15676_v16  ;;  %v15677_v33 = vld [vmem:[#allocation19_spill] sm:$0xff]  ;;  %v7921_v59 = vunpack.i.l.bf16 %v15678_v15  ;;  %v8723_v42 = vpack.i.bf16 %v748_v21, %v747_v11  ;;  %v15681_v20 = vld [vmem:[#allocation21_spill] sm:$0xff] }
 0x2a3   :  { %15671 = vst [vmem:[#allocation12_spill] sm:$0xff] %v11424_v37  ;;  %v7872_v14 = vunpack.i.h.bf16 %v15677_v33  ;;  %v11452_v18 = vpop.permute.xlu0 %8494  ;;  %8729 = vrot.lane.b32.xlu2 %v8728_v45, %s9989_s14  ;;  %v7871_v0 = vunpack.i.l.bf16 %v15677_v33  ;;  %v7887_v54 = vunpack.i.h.bf16 %v15680_v56  ;;  %v7937_v44 = vunpack.i.h.bf16 %v15681_v20  ;;  %v15682_v37 = vld [vmem:[#allocation23_spill] sm:$0xff]  ;;  %v15684_v45 = vld [vmem:[#allocation137_spill] sm:$0xff]  ;;  %v15685_v33 = vld [vmem:[#allocation138_spill] sm:$0xff] }
 0x2a4   :  { %15672 = vst [vmem:[#allocation13_spill] sm:$0xff] %v11436_v38  ;;  %v7936_v16 = vunpack.i.l.bf16 %v15681_v20  ;;  %v7886_v38 = vunpack.i.l.bf16 %v15680_v56  ;;  %v7882_v31 = vunpack.i.h.bf16 %v15682_v37  ;;  %v7881_v15 = vunpack.i.l.bf16 %v15682_v37  ;;  %v15686_v56 = vld [vmem:[#allocation24_spill] sm:$0xff]  ;;  %v15687_v55 = vld [vmem:[#allocation149_spill] sm:$0xff] }
 0x2a5   :  { %15673 = vst [vmem:[#allocation14_spill] sm:$0xff] %v11440_v30  ;;  %v756_v30 = vld [vmem:[#allocation2 + $0x3a] sm:$0xff]  ;;  %v11462_v11 = vpop.permute.xlu2 %8564  ;;  %v11466_v21 = vsel %vm2931_vm3, %v15684_v45, %v7857_v47  ;;  %v11470_v34 = vsel %vm2931_vm3, %v15685_v33, %v7856_v36  ;;  %v11474_v20 = vsel %vm2931_vm3, %v11126_v28, %v7852_v3  ;;  %v7951_v41 = vunpack.i.l.bf16 %v15686_v56  ;;  %v15691_v3 = vld [vmem:[#allocation140_spill] sm:$0xff] }
 0x2a6   :  { %15674 = vst [vmem:[#allocation15_spill] sm:$0xff] %v11443_v25  ;;  %v755_v25 = vld [vmem:[#allocation2 + $0x32] sm:$0xff]  ;;  %v11479_v37 = vsel %vm2931_vm3, %v15687_v55, %v7851_v1  ;;  %v11487_v47 = vsel %vm2931_vm3, %v11268_v39, %v7922_v63  ;;  %v11496_v45 = vsel %vm2931_vm3, %v15691_v3, %v7871_v0  ;;  %v11500_v55 = vsel %vm2931_vm3, %v11312_v49, %v7936_v16  ;;  %v753_v39 = vld [vmem:[#allocation2 + $0x349] sm:$0xff]  ;;  %v15699_v16 = vld [vmem:[#allocation26_spill] sm:$0xff] }
 0x2a7   :  { %15679 = vst [vmem:[#allocation131_spill] sm:$0xff] %v11452_v18  ;;  %v8718_v18 = vpack.i.bf16 %v746_v46, %v745_v52  ;;  %v11483_v52 = vsel %vm2931_vm3, %v11271_v12, %v7921_v59  ;;  %8724 = vrot.lane.b32.xlu1 %v8723_v42, %s9989_s14  ;;  %v8743_v36 = vpack.i.bf16 %v756_v30, %v755_v25  ;;  %v15690_v46 = vld [vmem:[#allocation139_spill] sm:$0xff]  ;;  %v754_v1 = vld [vmem:[#allocation2 + $0x351] sm:$0xff]  ;;  %v15695_v25 = vld [vmem:[#allocation146_spill] sm:$0xff]  ;;  %v7897_v33 = vunpack.i.h.bf16 %v15699_v16 }
 0x2a8   :  { %15683 = vst [vmem:[#allocation141_spill] sm:$0xff] %v11462_v11  ;;  %v11492_v28 = vsel %vm2931_vm3, %v15690_v46, %v7872_v14  ;;  %v11504_v12 = vsel %vm2931_vm3, %v11309_v22, %v7937_v44  ;;  %v15694_v63 = vld [vmem:[#allocation145_spill] sm:$0xff]  ;;  %v11512_v14 = vsel %vm2931_vm3, %v15695_v25, %v7886_v38  ;;  %v11516_v59 = vsel %vm2931_vm3, %v11178_v5, %v7882_v31  ;;  %v761_v11 = vld [vmem:[#allocation2 + $0x7a] sm:$0xff] }
 0x2a9   :  { %15688 = vst [vmem:[#allocation135_spill] sm:$0xff] %v11483_v52  ;;  %v11508_v30 = vsel %vm2931_vm3, %v15694_v63, %v7887_v54  ;;  %v11520_v49 = vsel %vm2931_vm3, %v11181_v35, %v7881_v15  ;;  %8719 = vrot.lane.b32.xlu0 %v8718_v18, %s9989_s14  ;;  %v11523_v22 = vpop.permute.xlu1 %8514  ;;  %v15697_v44 = vld [vmem:[#allocation25_spill] sm:$0xff]  ;;  %v7952_v54 = vunpack.i.h.bf16 %v15686_v56  ;;  %v11530_v38 = vsel %vm2996_vm4, %v11333_v26, %v7951_v41  ;;  %v15700_v15 = vld [vmem:[#allocation27_spill] sm:$0xff]  ;;  %v15702_v63 = vld [vmem:[#allocation28_spill] sm:$0xff] }
 0x2aa   :  { %15689 = vst [vmem:[#allocation136_spill] sm:$0xff] %v11487_v47  ;;  %v7902_v42 = vunpack.i.h.bf16 %v15697_v44  ;;  %v7901_v0 = vunpack.i.l.bf16 %v15697_v44  ;;  %v751_v5 = vld [vmem:[#allocation2 + $0x331] sm:$0xff]  ;;  %v752_v31 = vld [vmem:[#allocation2 + $0x339] sm:$0xff]  ;;  %v7896_v35 = vunpack.i.l.bf16 %v15699_v16  ;;  %v7966_v18 = vunpack.i.l.bf16 %v15700_v15 }
 0x2ab   :  { %15692 = vst [vmem:[#allocation16_spill] sm:$0xff] %v11500_v55  ;;  %v11535_v46 = vpop.permute.xlu0 %8509  ;;  %v8738_v3 = vpack.i.bf16 %v754_v1, %v753_v39  ;;  %8744 = vrot.lane.b32.xlu2 %v8743_v36, %s9990_s15  ;;  %v7917_v56 = vunpack.i.h.bf16 %v15702_v63  ;;  %v7916_v25 = vunpack.i.l.bf16 %v15702_v63  ;;  %v7967_v26 = vunpack.i.h.bf16 %v15700_v15  ;;  %v15703_v41 = vld [vmem:[#allocation29_spill] sm:$0xff]  ;;  %v15706_v36 = vld [vmem:[#allocation147_spill] sm:$0xff]  ;;  %v15707_v63 = vld [vmem:[#allocation148_spill] sm:$0xff] }
 0x2ac   :  { %15693 = vst [vmem:[#allocation17_spill] sm:$0xff] %v11504_v12  ;;  %v7912_v44 = vunpack.i.h.bf16 %v15703_v41  ;;  %v7911_v16 = vunpack.i.l.bf16 %v15703_v41  ;;  %v8733_v39 = vpack.i.bf16 %v752_v31, %v751_v5  ;;  %v11549_v55 = vsel %vm2931_vm3, %v15706_v36, %v7902_v42  ;;  %v15708_v41 = vld [vmem:[#allocation31_spill] sm:$0xff]  ;;  %v15709_v31 = vld [vmem:[#allocation150_spill] sm:$0xff] }
 0x2ad   :  { %15696 = vst [vmem:[#allocation19_spill] sm:$0xff] %v11523_v22  ;;  %v762_v22 = vld [vmem:[#allocation2 + $0x82] sm:$0xff]  ;;  %v11545_v1 = vpop.permute.xlu2 %8579  ;;  %v11553_v15 = vsel %vm2931_vm3, %v15707_v63, %v7901_v0  ;;  %v11557_v47 = vsel %vm2996_vm4, %v11337_v13, %v7952_v54  ;;  %v7932_v52 = vunpack.i.h.bf16 %v15708_v41  ;;  %v11566_v5 = vsel %vm2931_vm3, %v11202_v17, %v7896_v35 }
 0x2ae   :  { %15698 = vst [vmem:[#allocation18_spill] sm:$0xff] %v11530_v38  ;;  %v15704_v38 = vld [vmem:[#allocation30_spill] sm:$0xff]  ;;  %v11570_v42 = vsel %vm2996_vm4, %v11361_v60, %v7966_v18  ;;  %v8758_v0 = vpack.i.bf16 %v762_v22, %v761_v11  ;;  %v11575_v13 = vsel %vm2931_vm3, %v15709_v31, %v7917_v56  ;;  %v15710_v54 = vld [vmem:[#allocation151_spill] sm:$0xff]  ;;  %v7931_v17 = vunpack.i.l.bf16 %v15708_v41  ;;  %v760_v60 = vld [vmem:[#allocation2 + $0x6a] sm:$0xff] }
 0x2af   :  { %15701 = vst [vmem:[#allocation22_spill] sm:$0xff] %v11535_v46  ;;  %v7982_v12 = vunpack.i.h.bf16 %v15704_v38  ;;  %v7981_v46 = vunpack.i.l.bf16 %v15704_v38  ;;  %v11562_v38 = vsel %vm2931_vm3, %v11191_v51, %v7897_v33  ;;  %8739 = vrot.lane.b32.xlu1 %v8738_v3, %s9989_s14  ;;  %v11579_v36 = vsel %vm2931_vm3, %v15710_v54, %v7916_v25  ;;  %v759_v33 = vld [vmem:[#allocation2 + $0x62] sm:$0xff]  ;;  %v15715_v3 = vld [vmem:[#allocation32_spill] sm:$0xff]  ;;  %v15716_v25 = vld [vmem:[#allocation33_spill] sm:$0xff] }
 0x2b0   :  { %15705 = vst [vmem:[#allocation21_spill] sm:$0xff] %v11545_v1  ;;  %v11583_v51 = vsel %vm2996_vm4, %v11357_v24, %v7967_v26  ;;  %v11588_v35 = vsel %vm2931_vm3, %v11237_v27, %v7912_v44  ;;  %v11592_v11 = vsel %vm2931_vm3, %v11240_v32, %v7911_v16  ;;  %v11607_v27 = vsel %vm2931_vm3, %v11172_v62, %v7932_v52  ;;  %v15717_v44 = vld [vmem:[#allocation34_spill] sm:$0xff]  ;;  %v15719_v62 = vld [vmem:[#allocation155_spill] sm:$0xff]  ;;  %v15720_v41 = vld [vmem:[#allocation37_spill] sm:$0xff] }
 0x2b1   :  { %15711 = vst [vmem:[#allocation23_spill] sm:$0xff] %v11583_v51  ;;  %v11596_v22 = vsel %vm2996_vm4, %v11407_v23, %v7981_v46  ;;  %v11600_v24 = vsel %vm2996_vm4, %v11403_v29, %v7982_v12  ;;  %8734 = vrot.lane.b32.xlu0 %v8733_v39, %s9989_s14  ;;  %v11603_v18 = vpop.permute.xlu1 %8529  ;;  %v7927_v56 = vunpack.i.h.bf16 %v15715_v3  ;;  %v7926_v32 = vunpack.i.l.bf16 %v15715_v3  ;;  %v757_v23 = vld [vmem:[#allocation2 + $0x4a] sm:$0xff]  ;;  %v758_v46 = vld [vmem:[#allocation2 + $0x52] sm:$0xff] }
 0x2b2   :  { %15712 = vst [vmem:[#allocation137_spill] sm:$0xff] %v11596_v22  ;;  %v7996_v26 = vunpack.i.l.bf16 %v15716_v25  ;;  %v7947_v16 = vunpack.i.h.bf16 %v15717_v44  ;;  %v7946_v29 = vunpack.i.l.bf16 %v15717_v44  ;;  %v7997_v12 = vunpack.i.h.bf16 %v15716_v25  ;;  %v15721_v54 = vld [vmem:[#allocation36_spill] sm:$0xff]  ;;  %v15722_v25 = vld [vmem:[#allocation38_spill] sm:$0xff] }
 0x2b3   :  { %15713 = vst [vmem:[#allocation138_spill] sm:$0xff] %v11600_v24  ;;  %v11615_v39 = vpop.permute.xlu0 %8524  ;;  %v8753_v63 = vpack.i.bf16 %v760_v60, %v759_v33  ;;  %8759 = vrot.lane.b32.xlu2 %v8758_v0, %s9990_s15  ;;  %v11620_v52 = vsel %vm2931_vm3, %v15719_v62, %v7931_v17  ;;  %v7961_v31 = vunpack.i.l.bf16 %v15720_v41  ;;  %v8012_v3 = vunpack.i.h.bf16 %v15721_v54  ;;  %v768_v24 = vld [vmem:[#allocation2 + $0xca] sm:$0xff] }
 0x2b4   :  { %15714 = vst [vmem:[#allocation24_spill] sm:$0xff] %v11603_v18  ;;  %v8011_v1 = vunpack.i.l.bf16 %v15721_v54  ;;  %v767_v18 = vld [vmem:[#allocation2 + $0xc2] sm:$0xff]  ;;  %v7962_v44 = vunpack.i.h.bf16 %v15720_v41  ;;  %v7957_v22 = vunpack.i.h.bf16 %v15722_v25  ;;  %v7956_v33 = vunpack.i.l.bf16 %v15722_v25  ;;  %v15724_v41 = vld [vmem:[#allocation40_spill] sm:$0xff] }
 0x2b5   :  { %15718 = vst [vmem:[#allocation149_spill] sm:$0xff] %v11615_v39  ;;  %v8748_v60 = vpack.i.bf16 %v758_v46, %v757_v23  ;;  %v11628_v0 = vpop.permute.xlu2 %8594  ;;  %v11632_v17 = vsel %vm2931_vm3, %v11262_v9, %v7927_v56  ;;  %v11636_v62 = vsel %vm2931_vm3, %v11265_v61, %v7926_v32  ;;  %v11640_v54 = vsel %vm2996_vm4, %v11432_v8, %v7996_v26  ;;  %v15725_v51 = vld [vmem:[#allocation156_spill] sm:$0xff]  ;;  %v15726_v23 = vld [vmem:[#allocation157_spill] sm:$0xff] }
 0x2b6   :  { %15723 = vst [vmem:[#allocation139_spill] sm:$0xff] %v11628_v0  ;;  %v7976_v39 = vunpack.i.l.bf16 %v15724_v41  ;;  %v11645_v25 = vsel %vm2996_vm4, %v15725_v51, %v7946_v29  ;;  %v11649_v46 = vsel %vm2996_vm4, %v15726_v23, %v7947_v16  ;;  %v11653_v9 = vsel %vm2996_vm4, %v11428_v53, %v7997_v12  ;;  %v765_v16 = vld [vmem:[#allocation2 + $0xaa] sm:$0xff]  ;;  %v766_v53 = vld [vmem:[#allocation2 + $0xb2] sm:$0xff] }
 0x2b7   :  { %15727 = vst [vmem:[#allocation140_spill] sm:$0xff] %v11653_v9  ;;  %8754 = vrot.lane.b32.xlu1 %v8753_v63, %s9990_s15  ;;  %v8773_v61 = vpack.i.bf16 %v768_v24, %v767_v18  ;;  %v11659_v32 = vsel %vm2996_vm4, %v11244_v40, %v7961_v31  ;;  %v11663_v51 = vsel %vm2996_vm4, %v11479_v37, %v8011_v1  ;;  %v7977_v37 = vunpack.i.h.bf16 %v15724_v41  ;;  %v763_v63 = vld [vmem:[#allocation2 + $0x92] sm:$0xff]  ;;  %v764_v31 = vld [vmem:[#allocation2 + $0x9a] sm:$0xff]  ;;  %v773_v0 = vld [vmem:[#allocation2 + $0x10a] sm:$0xff] }
 0x2b8   :  { %15729 = vst [vmem:[#allocation145_spill] sm:$0xff] %v11663_v51  ;;  %v11667_v26 = vsel %vm2996_vm4, %v11474_v20, %v8012_v3  ;;  %v11671_v29 = vsel %vm2996_vm4, %v11230_v10, %v7962_v44  ;;  %v11675_v24 = vsel %vm2996_vm4, %v11320_v50, %v7957_v22  ;;  %v11679_v40 = vsel %vm2996_vm4, %v11324_v19, %v7956_v33  ;;  %v15732_v10 = vld [vmem:[#allocation41_spill] sm:$0xff]  ;;  %v15733_v50 = vld [vmem:[#allocation42_spill] sm:$0xff]  ;;  %v15734_v19 = vld [vmem:[#allocation43_spill] sm:$0xff] }
 0x2b9   :  { %15730 = vst [vmem:[#allocation146_spill] sm:$0xff] %v11667_v26  ;;  %8749 = vrot.lane.b32.xlu0 %v8748_v60, %s9990_s15  ;;  %v11683_v20 = vpop.permute.xlu1 %8544  ;;  %v11687_v1 = vsel %vm2996_vm4, %v11254_v2, %v7976_v39  ;;  %v7972_v18 = vunpack.i.h.bf16 %v15732_v10  ;;  %v7971_v12 = vunpack.i.l.bf16 %v15732_v10  ;;  %v8041_v22 = vunpack.i.l.bf16 %v15733_v50  ;;  %v15736_v2 = vld [vmem:[#allocation44_spill] sm:$0xff]  ;;  %v15737_v10 = vld [vmem:[#allocation45_spill] sm:$0xff]  ;;  %v15738_v26 = vld [vmem:[#allocation46_spill] sm:$0xff] }
 0x2ba   :  { %15731 = vst [vmem:[#allocation25_spill] sm:$0xff] %v11683_v20  ;;  %v7992_v3 = vunpack.i.h.bf16 %v15734_v19  ;;  %v7991_v44 = vunpack.i.l.bf16 %v15734_v19  ;;  %v8042_v33 = vunpack.i.h.bf16 %v15733_v50  ;;  %v8768_v41 = vpack.i.bf16 %v766_v53, %v765_v16  ;;  %v774_v56 = vld [vmem:[#allocation2 + $0x112] sm:$0xff]  ;;  %v15739_v50 = vld [vmem:[#allocation47_spill] sm:$0xff] }
 0x2bb   :  { %v11695_v60 = vpop.permute.xlu0 %8539  ;;  %8774 = vrot.lane.b32.xlu2 %v8773_v61, %s9990_s15  ;;  %v7987_v39 = vunpack.i.h.bf16 %v15736_v2  ;;  %v7986_v23 = vunpack.i.l.bf16 %v15736_v2  ;;  %v8057_v8 = vunpack.i.h.bf16 %v15737_v10  ;;  %v8056_v20 = vunpack.i.l.bf16 %v15737_v10  ;;  %v15742_v10 = vld [vmem:[#allocation161_spill] sm:$0xff] }
 0x2bc   :  { %15735 = vst [vmem:[#allocation26_spill] sm:$0xff] %v11695_v60  ;;  %v8007_v51 = vunpack.i.h.bf16 %v15738_v26  ;;  %v8006_v19 = vunpack.i.l.bf16 %v15738_v26  ;;  %v8002_v9 = vunpack.i.h.bf16 %v15739_v50  ;;  %v8763_v60 = vpack.i.bf16 %v764_v31, %v763_v63  ;;  %v15743_v31 = vld [vmem:[#allocation162_spill] sm:$0xff] }
 0x2bd   :  { %v11705_v16 = vpop.permute.xlu2 %8609  ;;  %v11709_v61 = vsel %vm2996_vm4, %v11258_v57, %v7977_v37  ;;  %v11713_v53 = vsel %vm2996_vm4, %v11349_v48, %v7972_v18  ;;  %v11717_v2 = vsel %vm2996_vm4, %v11353_v58, %v7971_v12  ;;  %v11721_v26 = vsel %vm2996_vm4, %v11520_v49, %v8041_v22  ;;  %v772_v22 = vld [vmem:[#allocation2 + $0xfa] sm:$0xff] }
 0x2be   :  { %15740 = vst [vmem:[#allocation27_spill] sm:$0xff] %v11705_v16  ;;  %v11725_v63 = vsel %vm2996_vm4, %v15742_v10, %v7991_v44  ;;  %v11729_v57 = vsel %vm2996_vm4, %v15743_v31, %v7992_v3  ;;  %v11733_v48 = vsel %vm2996_vm4, %v11516_v59, %v8042_v33  ;;  %v8788_v58 = vpack.i.bf16 %v774_v56, %v773_v0  ;;  %v771_v59 = vld [vmem:[#allocation2 + $0xf2] sm:$0xff]  ;;  %v15755_v10 = vld [vmem:[#allocation52_spill] sm:$0xff] }
 0x2bf   :  { %15741 = vst [vmem:[#allocation28_spill] sm:$0xff] %v11721_v26  ;;  %8769 = vrot.lane.b32.xlu1 %v8768_v41, %s9990_s15  ;;  %v11738_v37 = vsel %vm2996_vm4, %v11387_v4, %v7987_v39  ;;  %v11742_v49 = vsel %vm2996_vm4, %v11391_v6, %v7986_v23  ;;  %v11746_v18 = vsel %vm2996_vm4, %v11566_v5, %v8056_v20  ;;  %v15747_v4 = vld [vmem:[#allocation167_spill] sm:$0xff]  ;;  %v8001_v5 = vunpack.i.l.bf16 %v15739_v50  ;;  %v15752_v39 = vld [vmem:[#allocation50_spill] sm:$0xff]  ;;  %v779_v16 = vld [vmem:[#allocation2 + $0x152] sm:$0xff] }
 0x2c0   :  { %15744 = vst [vmem:[#allocation29_spill] sm:$0xff] %v11733_v48  ;;  %v11750_v12 = vsel %vm2996_vm4, %v11562_v38, %v8057_v8  ;;  %v11754_v0 = vsel %vm2996_vm4, %v11316_v43, %v8006_v19  ;;  %v11758_v56 = vsel %vm2996_vm4, %v15747_v4, %v8007_v51  ;;  %v11762_v6 = vsel %vm2996_vm4, %v11416_v7, %v8002_v9  ;;  %v15750_v8 = vld [vmem:[#allocation49_spill] sm:$0xff]  ;;  %v15751_v43 = vld [vmem:[#allocation48_spill] sm:$0xff]  ;;  %v769_v51 = vld [vmem:[#allocation2 + $0xda] sm:$0xff] }
 0x2c1   :  { %15745 = vst [vmem:[#allocation30_spill] sm:$0xff] %v11746_v18  ;;  %8764 = vrot.lane.b32.xlu0 %v8763_v60, %s9990_s15  ;;  %v11766_v38 = vpop.permute.xlu1 %8559  ;;  %v8022_v20 = vunpack.i.h.bf16 %v15750_v8  ;;  %v8021_v3 = vunpack.i.l.bf16 %v15750_v8  ;;  %v8072_v44 = vunpack.i.h.bf16 %v15751_v43  ;;  %v8071_v33 = vunpack.i.l.bf16 %v15751_v43  ;;  %v770_v41 = vld [vmem:[#allocation2 + $0xe2] sm:$0xff]  ;;  %v15756_v43 = vld [vmem:[#allocation53_spill] sm:$0xff] }
 0x2c2   :  { %15746 = vst [vmem:[#allocation147_spill] sm:$0xff] %v11750_v12  ;;  %v8017_v23 = vunpack.i.h.bf16 %v15752_v39  ;;  %v8016_v7 = vunpack.i.l.bf16 %v15752_v39  ;;  %v15753_v9 = vld [vmem:[#allocation51_spill] sm:$0xff]  ;;  %v8783_v50 = vpack.i.bf16 %v772_v22, %v771_v59  ;;  %v8037_v31 = vunpack.i.h.bf16 %v15755_v10  ;;  %v780_v12 = vld [vmem:[#allocation2 + $0x15a] sm:$0xff] }
 0x2c3   :  { %15748 = vst [vmem:[#allocation148_spill] sm:$0xff] %v11758_v56  ;;  %v8087_v19 = vunpack.i.h.bf16 %v15753_v9  ;;  %v11775_v60 = vpop.permute.xlu0 %8554  ;;  %8789 = vrot.lane.b32.xlu2 %v8788_v58, %s9990_s15  ;;  %v8036_v4 = vunpack.i.l.bf16 %v15755_v10  ;;  %v8086_v8 = vunpack.i.l.bf16 %v15753_v9  ;;  %v8031_v39 = vunpack.i.l.bf16 %v15756_v43  ;;  %v15757_v18 = vld [vmem:[#allocation55_spill] sm:$0xff]  ;;  %v15760_v10 = vld [vmem:[#allocation168_spill] sm:$0xff] }
 0x2c4   :  { %15749 = vst [vmem:[#allocation31_spill] sm:$0xff] %v11766_v38  ;;  %v8032_v38 = vunpack.i.h.bf16 %v15756_v43  ;;  %v8052_v48 = vunpack.i.h.bf16 %v15757_v18  ;;  %v8051_v26 = vunpack.i.l.bf16 %v15757_v18  ;;  %v15759_v58 = vld [vmem:[#allocation11_spill] sm:$0xff]  ;;  %v11793_v9 = vsel %vm2996_vm4, %v15760_v10, %v8021_v3  ;;  %v15763_v18 = vld [vmem:[#allocation169_spill] sm:$0xff] }
 0x2c5   :  { %15754 = vst [vmem:[#allocation150_spill] sm:$0xff] %v11775_v60  ;;  %v8778_v60 = vpack.i.bf16 %v770_v41, %v769_v51  ;;  %v11785_v59 = vpop.permute.xlu2 %8624  ;;  %v11789_v22 = vsel %vm2996_vm4, %v15759_v58, %v8001_v5  ;;  %v11797_v56 = vsel %vm2996_vm4, %v11592_v11, %v8071_v33  ;;  %v11801_v43 = vsel %vm2996_vm4, %v11588_v35, %v8072_v44  ;;  %v15764_v33 = vld [vmem:[#allocation127_spill] sm:$0xff]  ;;  %v15765_v35 = vld [vmem:[#allocation10_spill] sm:$0xff]  ;;  %v776_v58 = vld [vmem:[#allocation2 + $0x12a] sm:$0xff] }
 0x2c6   :  { %15758 = vst [vmem:[#allocation151_spill] sm:$0xff] %v11785_v59  ;;  %v11805_v51 = vsel %vm2996_vm4, %v15763_v18, %v8022_v20  ;;  %v11809_v5 = vsel %vm2996_vm4, %v11466_v21, %v8017_v23  ;;  %v11813_v3 = vsel %vm2996_vm4, %v11470_v34, %v8016_v7  ;;  %v8803_v11 = vpack.i.bf16 %v780_v12, %v779_v16  ;;  %v777_v34 = vld [vmem:[#allocation2 + $0x13a] sm:$0xff]  ;;  %v778_v23 = vld [vmem:[#allocation2 + $0x142] sm:$0xff]  ;;  %v15768_v7 = vld [vmem:[#allocation9_spill] sm:$0xff] }
 0x2c7   :  { %15761 = vst [vmem:[#allocation32_spill] sm:$0xff] %v11797_v56  ;;  %8784 = vrot.lane.b32.xlu1 %v8783_v50, %s9990_s15  ;;  %v11818_v41 = vsel %vm2996_vm4, %v15764_v33, %v8036_v4  ;;  %v11822_v44 = vsel %vm2996_vm4, %v15765_v35, %v8037_v31  ;;  %v11826_v20 = vsel %vm2996_vm4, %v11636_v62, %v8086_v8  ;;  %v15769_v62 = vld [vmem:[#allocation12_spill] sm:$0xff]  ;;  %v785_v59 = vld [vmem:[#allocation2 + $0x19a] sm:$0xff] }
 0x2c8   :  { %15762 = vst [vmem:[#allocation33_spill] sm:$0xff] %v11801_v43  ;;  %v11830_v21 = vsel %vm2996_vm4, %v11632_v17, %v8087_v19  ;;  %v11834_v16 = vsel %vm2996_vm4, %v11492_v28, %v8032_v38  ;;  %v11838_v12 = vsel %vm2996_vm4, %v11496_v45, %v8031_v39  ;;  %v11842_v50 = vsel %vm2996_vm4, %v15768_v7, %v8051_v26  ;;  %v15772_v19 = vld [vmem:[#allocation56_spill] sm:$0xff]  ;;  %v15773_v38 = vld [vmem:[#allocation57_spill] sm:$0xff]  ;;  %v775_v39 = vld [vmem:[#allocation2 + $0x122] sm:$0xff] }
 0x2c9   :  { %15766 = vst [vmem:[#allocation34_spill] sm:$0xff] %v11826_v20  ;;  %v11846_v31 = vsel %vm2996_vm4, %v15769_v62, %v8052_v48  ;;  %8779 = vrot.lane.b32.xlu0 %v8778_v60, %s9990_s15  ;;  %v11849_v17 = vpop.permute.xlu1 %8574  ;;  %v8047_v4 = vunpack.i.h.bf16 %v15772_v19  ;;  %v8046_v28 = vunpack.i.l.bf16 %v15772_v19  ;;  %v8117_v8 = vunpack.i.h.bf16 %v15773_v38  ;;  %v15774_v26 = vld [vmem:[#allocation58_spill] sm:$0xff]  ;;  %v15775_v48 = vld [vmem:[#allocation59_spill] sm:$0xff]  ;;  %v15777_v62 = vld [vmem:[#allocation61_spill] sm:$0xff] }
 0x2ca   :  { %15767 = vst [vmem:[#allocation155_spill] sm:$0xff] %v11830_v21  ;;  %v8116_v45 = vunpack.i.l.bf16 %v15773_v38  ;;  %v8067_v10 = vunpack.i.h.bf16 %v15774_v26  ;;  %v8066_v18 = vunpack.i.l.bf16 %v15774_v26  ;;  %v8062_v33 = vunpack.i.h.bf16 %v15775_v48  ;;  %v15778_v21 = vld [vmem:[#allocation60_spill] sm:$0xff]  ;;  %v786_v20 = vld [vmem:[#allocation2 + $0x1a2] sm:$0xff]  ;;  %v15779_v26 = vld [vmem:[#allocation62_spill] sm:$0xff] }
 0x2cb   :  { %15770 = vst [vmem:[#allocation37_spill] sm:$0xff] %v11846_v31  ;;  %v11858_v35 = vpop.permute.xlu0 %8569  ;;  %v8798_v60 = vpack.i.bf16 %v778_v23, %v777_v34  ;;  %8804 = vrot.lane.b32.xlu2 %v8803_v11, %s9990_s15  ;;  %v8061_v7 = vunpack.i.l.bf16 %v15775_v48  ;;  %v8081_v19 = vunpack.i.l.bf16 %v15777_v62  ;;  %v8131_v38 = vunpack.i.l.bf16 %v15778_v21 }
 0x2cc   :  { %15771 = vst [vmem:[#allocation36_spill] sm:$0xff] %v11849_v17  ;;  %v8132_v17 = vunpack.i.h.bf16 %v15778_v21  ;;  %v8082_v43 = vunpack.i.h.bf16 %v15777_v62  ;;  %v8077_v56 = vunpack.i.h.bf16 %v15779_v26  ;;  %v8076_v31 = vunpack.i.l.bf16 %v15779_v26  ;;  %v15783_v62 = vld [vmem:[#allocation13_spill] sm:$0xff] }
 0x2cd   :  { %15776 = vst [vmem:[#allocation38_spill] sm:$0xff] %v11858_v35  ;;  %v8793_v35 = vpack.i.bf16 %v776_v58, %v775_v39  ;;  %v11868_v34 = vpop.permute.xlu2 %8639  ;;  %v11872_v11 = vsel %vm2996_vm4, %v11508_v30, %v8047_v4  ;;  %v11876_v23 = vsel %vm2996_vm4, %v11512_v14, %v8046_v28  ;;  %v11880_v21 = vsel %vm3061_vm5, %v11679_v40, %v8116_v45  ;;  %v15784_v58 = vld [vmem:[#allocation14_spill] sm:$0xff] }
 0x2ce   :  { %15780 = vst [vmem:[#allocation40_spill] sm:$0xff] %v11868_v34  ;;  %v11884_v48 = vsel %vm3061_vm5, %v11675_v24, %v8117_v8  ;;  %v11888_v39 = vsel %vm2996_vm4, %v15783_v62, %v8066_v18  ;;  %v11892_v30 = vsel %vm2996_vm4, %v15784_v58, %v8067_v10  ;;  %v11896_v14 = vsel %vm2996_vm4, %v11549_v55, %v8062_v33  ;;  %v15785_v24 = vld [vmem:[#allocation135_spill] sm:$0xff]  ;;  %v784_v10 = vld [vmem:[#allocation2 + $0x18a] sm:$0xff] }
 0x2cf   :  { %15781 = vst [vmem:[#allocation156_spill] sm:$0xff] %v11880_v21  ;;  %8799 = vrot.lane.b32.xlu1 %v8798_v60, %s9990_s15  ;;  %v8818_v40 = vpack.i.bf16 %v786_v20, %v785_v59  ;;  %v11901_v4 = vsel %vm2996_vm4, %v11553_v15, %v8061_v7  ;;  %v11905_v28 = vsel %vm2996_vm4, %v15785_v24, %v8081_v19  ;;  %v783_v55 = vld [vmem:[#allocation2 + $0x182] sm:$0xff]  ;;  %v15788_v18 = vld [vmem:[#allocation136_spill] sm:$0xff]  ;;  %v15793_v19 = vld [vmem:[#allocation65_spill] sm:$0xff] }
 0x2d0   :  { %15782 = vst [vmem:[#allocation157_spill] sm:$0xff] %v11884_v48  ;;  %v11909_v8 = vsel %vm3061_vm5, %v11717_v2, %v8131_v38  ;;  %v11913_v45 = vsel %vm3061_vm5, %v11713_v53, %v8132_v17  ;;  %v11917_v59 = vsel %vm2996_vm4, %v15788_v18, %v8082_v43  ;;  %v11921_v15 = vsel %vm2996_vm4, %v11575_v13, %v8077_v56  ;;  %v15790_v2 = vld [vmem:[#allocation63_spill] sm:$0xff]  ;;  %v15792_v17 = vld [vmem:[#allocation64_spill] sm:$0xff]  ;;  %v782_v56 = vld [vmem:[#allocation2 + $0x172] sm:$0xff] }
 0x2d1   :  { %15786 = vst [vmem:[#allocation41_spill] sm:$0xff] %v11909_v8  ;;  %v11925_v20 = vsel %vm2996_vm4, %v11579_v36, %v8076_v31  ;;  %v8146_v33 = vunpack.i.l.bf16 %v15790_v2  ;;  %8794 = vrot.lane.b32.xlu0 %v8793_v35, %s9990_s15  ;;  %v11929_v53 = vpop.permute.xlu1 %8589  ;;  %v8097_v60 = vunpack.i.h.bf16 %v15792_v17  ;;  %v8096_v7 = vunpack.i.l.bf16 %v15792_v17  ;;  %v781_v13 = vld [vmem:[#allocation2 + $0x16a] sm:$0xff]  ;;  %v15794_v36 = vld [vmem:[#allocation66_spill] sm:$0xff]  ;;  %v15796_v24 = vld [vmem:[#allocation67_spill] sm:$0xff] }
 0x2d2   :  { %15787 = vst [vmem:[#allocation42_spill] sm:$0xff] %v11913_v45  ;;  %v8147_v43 = vunpack.i.h.bf16 %v15790_v2  ;;  %v8092_v38 = vunpack.i.h.bf16 %v15793_v19  ;;  %v8091_v26 = vunpack.i.l.bf16 %v15793_v19  ;;  %v8162_v31 = vunpack.i.h.bf16 %v15794_v36  ;;  %v15797_v2 = vld [vmem:[#allocation68_spill] sm:$0xff]  ;;  %v791_v45 = vld [vmem:[#allocation2 + $0x212] sm:$0xff]  ;;  %v792_v8 = vld [vmem:[#allocation2 + $0x21a] sm:$0xff] }
 0x2d3   :  { %15789 = vst [vmem:[#allocation43_spill] sm:$0xff] %v11917_v59  ;;  %v8161_v62 = vunpack.i.l.bf16 %v15794_v36  ;;  %v11938_v58 = vpop.permute.xlu0 %8584  ;;  %v8813_v35 = vpack.i.bf16 %v784_v10, %v783_v55  ;;  %8819 = vrot.lane.b32.xlu2 %v8818_v40, %s9990_s15  ;;  %v8112_v18 = vunpack.i.h.bf16 %v15796_v24  ;;  %v8111_v17 = vunpack.i.l.bf16 %v15796_v24  ;;  %v15798_v36 = vld [vmem:[#allocation69_spill] sm:$0xff] }
 0x2d4   :  { %15791 = vst [vmem:[#allocation44_spill] sm:$0xff] %v11929_v53  ;;  %v8107_v34 = vunpack.i.h.bf16 %v15797_v2  ;;  %v8106_v53 = vunpack.i.l.bf16 %v15797_v2  ;;  %v11947_v19 = vsel %vm3061_vm5, %v11742_v49, %v8146_v33  ;;  %v8177_v48 = vunpack.i.h.bf16 %v15798_v36  ;;  %v15801_v21 = vld [vmem:[#allocation17_spill] sm:$0xff] }
 0x2d5   :  { %15795 = vst [vmem:[#allocation45_spill] sm:$0xff] %v11938_v58  ;;  %v8176_v55 = vunpack.i.l.bf16 %v15798_v36  ;;  %v8808_v10 = vpack.i.bf16 %v782_v56, %v781_v13  ;;  %v11951_v40 = vpop.permute.xlu2 %8654  ;;  %v15800_v58 = vld [vmem:[#allocation16_spill] sm:$0xff]  ;;  %v11959_v2 = vsel %vm2996_vm4, %v15801_v21, %v8097_v60  ;;  %v11963_v59 = vsel %vm3061_vm5, %v11738_v37, %v8147_v43  ;;  %v15803_v60 = vld [vmem:[#allocation18_spill] sm:$0xff] }
 0x2d6   :  { %15799 = vst [vmem:[#allocation46_spill] sm:$0xff] %v11951_v40  ;;  %v11955_v24 = vsel %vm2996_vm4, %v15800_v58, %v8096_v7  ;;  %v11967_v49 = vsel %vm2996_vm4, %v11607_v27, %v8092_v38  ;;  %v11971_v33 = vsel %vm2996_vm4, %v11620_v52, %v8091_v26  ;;  %v11975_v7 = vsel %vm3061_vm5, %v11789_v22, %v8161_v62  ;;  %v790_v38 = vld [vmem:[#allocation2 + $0x202] sm:$0xff]  ;;  %v15804_v13 = vld [vmem:[#allocation70_spill] sm:$0xff]  ;;  %v15809_v26 = vld [vmem:[#allocation72_spill] sm:$0xff] }
 0x2d7   :  { %v11979_v21 = vsel %vm3061_vm5, %v11762_v6, %v8162_v31  ;;  %8814 = vrot.lane.b32.xlu1 %v8813_v35, %s9990_s15  ;;  %v8833_v37 = vpack.i.bf16 %v792_v8, %v791_v45  ;;  %v11984_v43 = vsel %vm3061_vm5, %v15803_v60, %v8111_v17  ;;  %v11988_v27 = vsel %vm3061_vm5, %v11557_v47, %v8112_v18  ;;  %v789_v6 = vld [vmem:[#allocation2 + $0x1fa] sm:$0xff]  ;;  %v787_v58 = vld [vmem:[#allocation2 + $0x1e2] sm:$0xff]  ;;  %v788_v35 = vld [vmem:[#allocation2 + $0x1ea] sm:$0xff] }
 0x2d8   :  { %15802 = vst [vmem:[#allocation47_spill] sm:$0xff] %v11979_v21  ;;  %v11992_v52 = vsel %vm3061_vm5, %v11645_v25, %v8106_v53  ;;  %v11996_v22 = vsel %vm3061_vm5, %v11649_v46, %v8107_v34  ;;  %v8127_v8 = vunpack.i.h.bf16 %v15804_v13  ;;  %v8126_v45 = vunpack.i.l.bf16 %v15804_v13  ;;  %v15808_v46 = vld [vmem:[#allocation71_spill] sm:$0xff]  ;;  %v15813_v60 = vld [vmem:[#allocation76_spill] sm:$0xff]  ;;  %v797_v40 = vld [vmem:[#allocation2 + $0x25a] sm:$0xff] }
 0x2d9   :  { %v12002_v56 = vsel %vm3061_vm5, %v11813_v3, %v8176_v55  ;;  %v12006_v47 = vsel %vm3061_vm5, %v11809_v5, %v8177_v48  ;;  %8809 = vrot.lane.b32.xlu0 %v8808_v10, %s9990_s15  ;;  %v12009_v25 = vpop.permute.xlu1 %8604  ;;  %v8122_v34 = vunpack.i.h.bf16 %v15808_v46  ;;  %v8121_v53 = vunpack.i.l.bf16 %v15808_v46  ;;  %v15810_v3 = vld [vmem:[#allocation73_spill] sm:$0xff]  ;;  %v15811_v5 = vld [vmem:[#allocation74_spill] sm:$0xff]  ;;  %v15814_v46 = vld [vmem:[#allocation75_spill] sm:$0xff] }
 0x2da   :  { %15805 = vst [vmem:[#allocation161_spill] sm:$0xff] %v12002_v56  ;;  %v8192_v31 = vunpack.i.h.bf16 %v15809_v26  ;;  %v8191_v62 = vunpack.i.l.bf16 %v15809_v26  ;;  %v8142_v18 = vunpack.i.h.bf16 %v15810_v3  ;;  %v8141_v17 = vunpack.i.l.bf16 %v15810_v3  ;;  %v15815_v56 = vld [vmem:[#allocation23_spill] sm:$0xff] }
 0x2db   :  { %15806 = vst [vmem:[#allocation162_spill] sm:$0xff] %v12006_v47  ;;  %v8136_v48 = vunpack.i.l.bf16 %v15811_v5  ;;  %v12018_v36 = vpop.permute.xlu0 %8599  ;;  %v8828_v55 = vpack.i.bf16 %v790_v38, %v789_v6  ;;  %8834 = vrot.lane.b32.xlu2 %v8833_v37, %s9990_s15  ;;  %v8137_v10 = vunpack.i.h.bf16 %v15811_v5  ;;  %v8156_v13 = vunpack.i.l.bf16 %v15813_v60  ;;  %v798_v47 = vld [vmem:[#allocation2 + $0x262] sm:$0xff] }
 0x2dc   :  { %15807 = vst [vmem:[#allocation167_spill] sm:$0xff] %v12009_v25  ;;  %v8207_v25 = vunpack.i.h.bf16 %v15814_v46  ;;  %v8206_v26 = vunpack.i.l.bf16 %v15814_v46  ;;  %v12027_v3 = vsel %vm3061_vm5, %v11570_v42, %v8126_v45  ;;  %v8157_v37 = vunpack.i.h.bf16 %v15813_v60  ;;  %v15819_v45 = vld [vmem:[#allocation137_spill] sm:$0xff] }
 0x2dd   :  { %15812 = vst [vmem:[#allocation49_spill] sm:$0xff] %v12018_v36  ;;  %v12031_v36 = vsel %vm3061_vm5, %v15815_v56, %v8127_v8  ;;  %v8823_v6 = vpack.i.bf16 %v788_v35, %v787_v58  ;;  %v12034_v38 = vpop.permute.xlu2 %8669  ;;  %v12038_v5 = vsel %vm3061_vm5, %v11671_v29, %v8122_v34  ;;  %v12042_v46 = vsel %vm3061_vm5, %v11659_v32, %v8121_v53  ;;  %v15820_v58 = vld [vmem:[#allocation138_spill] sm:$0xff] }
 0x2de   :  { %15816 = vst [vmem:[#allocation48_spill] sm:$0xff] %v12034_v38  ;;  %v12046_v42 = vsel %vm3061_vm5, %v11838_v12, %v8191_v62  ;;  %v12050_v8 = vsel %vm3061_vm5, %v11834_v16, %v8192_v31  ;;  %v12054_v56 = vsel %vm3061_vm5, %v15819_v45, %v8141_v17  ;;  %v12058_v29 = vsel %vm3061_vm5, %v15820_v58, %v8142_v18  ;;  %v796_v62 = vld [vmem:[#allocation2 + $0x24a] sm:$0xff] }
 0x2df   :  { %15817 = vst [vmem:[#allocation50_spill] sm:$0xff] %v12046_v42  ;;  %v12062_v32 = vsel %vm3061_vm5, %v11687_v1, %v8136_v48  ;;  %8829 = vrot.lane.b32.xlu1 %v8828_v55, %s9990_s15  ;;  %v8848_v12 = vpack.i.bf16 %v798_v47, %v797_v40  ;;  %v12067_v34 = vsel %vm3061_vm5, %v11709_v61, %v8137_v10  ;;  %v795_v1 = vld [vmem:[#allocation2 + $0x242] sm:$0xff]  ;;  %v15824_v61 = vld [vmem:[#allocation140_spill] sm:$0xff]  ;;  %v15829_v55 = vld [vmem:[#allocation78_spill] sm:$0xff] }
 0x2e0   :  { %15818 = vst [vmem:[#allocation51_spill] sm:$0xff] %v12050_v8  ;;  %v12071_v16 = vsel %vm3061_vm5, %v11640_v54, %v8156_v13  ;;  %v12075_v53 = vsel %vm3061_vm5, %v11876_v23, %v8206_v26  ;;  %v12079_v31 = vsel %vm3061_vm5, %v11872_v11, %v8207_v25  ;;  %v3422_v40 = vld [vmem:[%s15262_s1 + $0x10] sm:$0x3]  ;;  %v12086_v47 = vsel %vm3061_vm5, %v15824_v61, %v8157_v37  ;;  %v15826_v54 = vld [vmem:[#allocation77_spill] sm:$0xff]  ;;  %v793_v13 = vld [vmem:[#allocation2 + $0x22a] sm:$0xff] }
 0x2e1   :  { %15821 = vst [vmem:[#allocation52_spill] sm:$0xff] %v12071_v16  ;;  %v8152_v35 = vunpack.i.h.bf16 %v15826_v54  ;;  %v8151_v18 = vunpack.i.l.bf16 %v15826_v54  ;;  %8824 = vrot.lane.b32.xlu0 %v8823_v6, %s9990_s15  ;;  %v12091_v23 = vpop.permute.xlu1 %8619  ;;  %v3436_v11 = vunpack.c.l.b16 %v3422_v40  ;;  %v15828_v25 = vld [vmem:[#allocation79_spill] sm:$0xff]  ;;  %v8222_v10 = vunpack.i.h.bf16 %v15829_v55  ;;  %v794_v26 = vld [vmem:[#allocation2 + $0x232] sm:$0xff]  ;;  %v15830_v37 = vld [vmem:[#allocation80_spill] sm:$0xff] }
 0x2e2   :  { %15822 = vst [vmem:[#allocation53_spill] sm:$0xff] %v12075_v53  ;;  %v8172_v17 = vunpack.i.h.bf16 %v15828_v25  ;;  %v8171_v48 = vunpack.i.l.bf16 %v15828_v25  ;;  %v8221_v60 = vunpack.i.l.bf16 %v15829_v55  ;;  %v8167_v45 = vunpack.i.h.bf16 %v15830_v37  ;;  %v15832_v54 = vld [vmem:[#allocation81_spill] sm:$0xff]  ;;  %v803_v55 = vld [vmem:[#allocation2 + $0x2a2] sm:$0xff]  ;;  %v804_v53 = vld [vmem:[#allocation2 + $0x2aa] sm:$0xff] }
 0x2e3   :  { %15823 = vst [vmem:[#allocation55_spill] sm:$0xff] %v12079_v31  ;;  %v8166_v58 = vunpack.i.l.bf16 %v15830_v37  ;;  %v12099_v61 = vpop.permute.xlu0 %8614  ;;  %v8843_v6 = vpack.i.bf16 %v796_v62, %v795_v1  ;;  %8849 = vrot.lane.b32.xlu2 %v8848_v12, %s9990_s15  ;;  %v3439_v40 = vpack.c.b16 %v3436_v11, %v3436_v11  ;;  %v8237_v38 = vunpack.i.h.bf16 %v15832_v54  ;;  %v15834_v42 = vld [vmem:[#allocation84_spill] sm:$0xff]  ;;  %v15836_v11 = vld [vmem:[#allocation85_spill] sm:$0xff] }
 0x2e4   :  { %15825 = vst [vmem:[#allocation11_spill] sm:$0xff] %v12086_v47  ;;  %v8236_v25 = vunpack.i.l.bf16 %v15832_v54  ;;  %v8251_v37 = vunpack.i.l.bf16 %v15834_v42  ;;  %v8838_v47 = vpack.i.bf16 %v794_v26, %v793_v13  ;;  %v12111_v12 = vsel %vm3061_vm5, %v11725_v63, %v8151_v18 }
 0x2e5   :  { %15827 = vst [vmem:[#allocation168_spill] sm:$0xff] %v12091_v23  ;;  %v15833_v23 = vld [vmem:[#allocation83_spill] sm:$0xff]  ;;  %v3541_v1 = vsel %vm3539_vm7, %v3439_v40, 0  ;;  %v12115_v62 = vsel %vm3061_vm5, %v11729_v57, %v8152_v35  ;;  %v8201_v54 = vunpack.i.l.bf16 %v15836_v11  ;;  %v8252_v16 = vunpack.i.h.bf16 %v15834_v42  ;;  %v15838_v35 = vld [vmem:[#allocation146_spill] sm:$0xff] }
 0x2e6   :  { %15831 = vst [vmem:[#allocation169_spill] sm:$0xff] %v12099_v61  ;;  %v8182_v31 = vunpack.i.h.bf16 %v15833_v23  ;;  %v8181_v8 = vunpack.i.l.bf16 %v15833_v23  ;;  %v12107_v61 = vpop.permute.xlu2 %8684  ;;  %3548 = vmatpush.bf16.msra.mxu0 %v3541_v1  ;;  %v15837_v23 = vld [vmem:[#allocation145_spill] sm:$0xff]  ;;  %v12125_v13 = vsel %vm3061_vm5, %v11901_v4, %v8221_v60  ;;  %v12129_v63 = vsel %vm3061_vm5, %v11896_v14, %v8222_v10  ;;  %v801_v14 = vld [vmem:[#allocation2 + $0x28a] sm:$0xff] }
 0x2e7   :  { %15835 = vst [vmem:[#allocation127_spill] sm:$0xff] %v12107_v61  ;;  %v12121_v21 = vsel %vm3061_vm5, %v15837_v23, %v8171_v48  ;;  %8844 = vrot.lane.b32.xlu1 %v8843_v6, %s9990_s15  ;;  %v8863_v57 = vpack.i.bf16 %v804_v53, %v803_v55  ;;  %v12134_v18 = vsel %vm3061_vm5, %v15838_v35, %v8172_v17  ;;  %v15839_v48 = vld [vmem:[#allocation148_spill] sm:$0xff]  ;;  %v802_v10 = vld [vmem:[#allocation2 + $0x292] sm:$0xff]  ;;  %v7592_v53 = vld [vmem:[%s15262_s1 + $0x8] sm:$0xff] }
 0x2e8   :  { %v12138_v42 = vsel %vm3061_vm5, %v11754_v0, %v8166_v58  ;;  %v12142_v26 = vsel %vm3061_vm5, %v15839_v48, %v8167_v45  ;;  %v12146_v4 = vsel %vm3061_vm5, %v11925_v20, %v8236_v25  ;;  %v12153_v17 = vsel %vm3061_vm5, %v11921_v15, %v8237_v38  ;;  %v15844_v15 = vld [vmem:[#allocation28_spill] sm:$0xff]  ;;  %v800_v6 = vld [vmem:[#allocation2 + $0x27a] sm:$0xff]  ;;  %v810_v48 = vld [vmem:[#allocation2 + $0x2f2] sm:$0xff] }
 0x2e9   :  { %15840 = vst [vmem:[#allocation10_spill] sm:$0xff] %v12146_v4  ;;  %v12157_v0 = vsel %vm3061_vm5, %v11793_v9, %v8181_v8  ;;  %v12161_v60 = vsel %vm3061_vm5, %v11805_v51, %v8182_v31  ;;  %v12165_v20 = vsel %vm3061_vm5, %v11971_v33, %v8251_v37  ;;  %8839 = vrot.lane.b32.xlu0 %v8838_v47, %s9990_s15  ;;  %v12168_v45 = vpop.permute.xlu1 %8634  ;;  %v8202_v58 = vunpack.i.h.bf16 %v15836_v11  ;;  %v15846_v51 = vld [vmem:[#allocation86_spill] sm:$0xff]  ;;  %v799_v31 = vld [vmem:[#allocation2 + $0x272] sm:$0xff]  ;;  %v15847_v47 = vld [vmem:[#allocation87_spill] sm:$0xff] }
 0x2ea   :  { %15841 = vst [vmem:[#allocation9_spill] sm:$0xff] %v12153_v17  ;;  %v12173_v38 = vsel %vm3061_vm5, %v15844_v15, %v8201_v54  ;;  %v12177_v9 = vsel %vm3061_vm5, %v11967_v49, %v8252_v16  ;;  %v8196_v8 = vunpack.i.l.bf16 %v15846_v51  ;;  %3549 = vmatpush.bf16.msra.mxu0 %v7592_v53  ;;  %v8197_v33 = vunpack.i.h.bf16 %v15846_v51  ;;  %v15849_v1 = vld [vmem:[#allocation88_spill] sm:$0xff]  ;;  %v15850_v16 = vld [vmem:[#allocation89_spill] sm:$0xff]  ;;  %v15851_v15 = vld [vmem:[#allocation90_spill] sm:$0xff] }
 0x2eb   :  { %15842 = vst [vmem:[#allocation12_spill] sm:$0xff] %v12165_v20  ;;  %v8267_v40 = vunpack.i.h.bf16 %v15847_v47  ;;  %v8266_v25 = vunpack.i.l.bf16 %v15847_v47  ;;  %v12183_v55 = vpop.permute.xlu0 %8629  ;;  %v8858_v37 = vpack.i.bf16 %v802_v10, %v801_v14  ;;  %8864 = vrot.lane.b32.xlu2 %v8863_v57, %s9990_s15  ;;  %v8217_v11 = vunpack.i.h.bf16 %v15849_v1  ;;  %v809_v35 = vld [vmem:[#allocation2 + $0x2ea] sm:$0xff]  ;;  %v7591_v53 = vld [vmem:[%s15262_s1] sm:$0xff] }
 0x2ec   :  { %15843 = vst [vmem:[#allocation56_spill] sm:$0xff] %v12168_v45  ;;  %v8216_v49 = vunpack.i.l.bf16 %v15849_v1  ;;  %v8212_v54 = vunpack.i.h.bf16 %v15850_v16  ;;  %v8211_v23 = vunpack.i.l.bf16 %v15850_v16  ;;  %v8282_v51 = vunpack.i.h.bf16 %v15851_v15  ;;  %v15853_v47 = vld [vmem:[#allocation29_spill] sm:$0xff]  ;;  %v15877_v45 = vld [vmem:[#allocation100_spill] sm:$0xff] }
 0x2ed   :  { %15845 = vst [vmem:[#allocation57_spill] sm:$0xff] %v12177_v9  ;;  %v8281_v14 = vunpack.i.l.bf16 %v15851_v15  ;;  %v8853_v10 = vpack.i.bf16 %v800_v6, %v799_v31  ;;  %v12199_v1 = vsel %vm3061_vm5, %v15853_v47, %v8202_v58  ;;  %v12203_v16 = vsel %vm3061_vm5, %v11818_v41, %v8196_v8  ;;  %v15854_v9 = vld [vmem:[#allocation91_spill] sm:$0xff] }
 0x2ee   :  { %15848 = vst [vmem:[#allocation58_spill] sm:$0xff] %v12183_v55  ;;  %v12195_v57 = vpop.permute.xlu2 %8699  ;;  %v8232_v20 = vunpack.i.h.bf16 %v15854_v9  ;;  %v8231_v17 = vunpack.i.l.bf16 %v15854_v9  ;;  %3550 = vmatpush.bf16.msra.mxu0 %v7591_v53  ;;  %v15855_v4 = vmov 0.0   ;;  %v12212_v15 = vsel %vm3061_vm5, %v11822_v44, %v8197_v33  ;;  %v15857_v9 = vld [vmem:[#allocation30_spill] sm:$0xff]  ;;  %v15859_v53 = vld [vmem:[#allocation147_spill] sm:$0xff]  ;;  %v807_v33 = vld [vmem:[#allocation2 + $0x2d2] sm:$0xff] }
 0x2ef   :  { %15852 = vst [vmem:[#allocation59_spill] sm:$0xff] %v12195_v57  ;;  %v12216_v58 = vsel %vm3126_vm6, %v11992_v52, %v8266_v25  ;;  %8859 = vrot.lane.b32.xlu1 %v8858_v37, %s9990_s15  ;;  %v8878_v41 = vpack.i.bf16 %v810_v48, %v809_v35  ;;  %v12223_v8 = vsel %vm3061_vm5, %v15857_v9, %v8216_v49  ;;  %v808_v25 = vld [vmem:[#allocation2 + $0x2da] sm:$0xff]  ;;  %v15862_v35 = vld [vmem:[#allocation37_spill] sm:$0xff]  ;;  %v15873_v37 = vld [vmem:[#allocation96_spill] sm:$0xff] }
 0x2f0   :  { %3776 = vst.msk [vmem:[#allocation3] sm:$0xff] %vm3321_vm8, %v15855_v4  ;;  %v12227_v47 = vsel %vm3061_vm5, %v15859_v53, %v8217_v11  ;;  %v12231_v44 = vsel %vm3126_vm6, %v11996_v22, %v8267_v40  ;;  %v12235_v52 = vsel %vm3061_vm5, %v11842_v50, %v8211_v23  ;;  %v12242_v48 = vsel %vm3061_vm5, %v15862_v35, %v8212_v54  ;;  %v15864_v40 = vld [vmem:[#allocation32_spill] sm:$0xff]  ;;  %v15866_v54 = vld [vmem:[#allocation33_spill] sm:$0xff]  ;;  %v806_v53 = vld [vmem:[#allocation2 + $0x2c2] sm:$0xff] }
 0x2f1   :  { %3777 = vst.msk [vmem:[#allocation3 + $0x8] sm:$0xff] %vm3321_vm8, %v15855_v4  ;;  %v12246_v11 = vsel %vm3126_vm6, %v12042_v46, %v8281_v14  ;;  %v12250_v22 = vsel %vm3126_vm6, %v12038_v5, %v8282_v51  ;;  %8854 = vrot.lane.b32.xlu0 %v8853_v10, %s9990_s15  ;;  %v12253_v50 = vpop.permute.xlu1 %8649  ;;  %v12259_v23 = vsel %vm3061_vm5, %v15864_v40, %v8231_v17  ;;  %v15868_v46 = vld [vmem:[#allocation92_spill] sm:$0xff]  ;;  %v805_v51 = vld [vmem:[#allocation2 + $0x2ba] sm:$0xff]  ;;  %v15870_v49 = vld [vmem:[#allocation93_spill] sm:$0xff] }
 0x2f2   :  { %15858 = vst [vmem:[#allocation61_spill] sm:$0xff] %v12223_v8  ;;  %v12263_v9 = vsel %vm3061_vm5, %v15866_v54, %v8232_v20  ;;  %v8227_v14 = vunpack.i.h.bf16 %v15868_v46  ;;  %v8226_v5 = vunpack.i.l.bf16 %v15868_v46  ;;  %v15869_v10 = vld [vmem:[#allocation94_spill] sm:$0xff]  ;;  %v8297_v6 = vunpack.i.h.bf16 %v15870_v49  ;;  %v15872_v20 = vld [vmem:[#allocation95_spill] sm:$0xff] }
 0x2f3   :  { %15860 = vst [vmem:[#allocation60_spill] sm:$0xff] %v12227_v47  ;;  %v8246_v35 = vunpack.i.l.bf16 %v15869_v10  ;;  %v8296_v17 = vunpack.i.l.bf16 %v15870_v49  ;;  %v12272_v40 = vpop.permute.xlu0 %8644  ;;  %v8873_v31 = vpack.i.bf16 %v808_v25, %v807_v33  ;;  %8879 = vrot.lane.b32.xlu2 %v8878_v41, %s9990_s15  ;;  %v8242_v54 = vunpack.i.h.bf16 %v15872_v20  ;;  %v815_v47 = vld [vmem:[#allocation2 + $0x332] sm:$0xff]  ;;  %v816_v8 = vld [vmem:[#allocation2 + $0x33a] sm:$0xff]  ;;  %v15875_v25 = vld [vmem:[#allocation99_spill] sm:$0xff] }
 0x2f4   :  { %3780 = vst.msk [vmem:[#allocation3 + $0x1b0] sm:$0xff] %vm3321_vm8, %v15855_v4  ;;  %v8241_v46 = vunpack.i.l.bf16 %v15872_v20  ;;  %v15874_v49 = vld [vmem:[#allocation98_spill] sm:$0xff]  ;;  %v8326_v57 = vunpack.i.l.bf16 %v15875_v25  ;;  %v8868_v61 = vpack.i.bf16 %v806_v53, %v805_v51  ;;  %v12296_v20 = vsel %vm3061_vm5, %v11892_v30, %v8227_v14 }
 0x2f5   :  { %15863 = vst [vmem:[#allocation62_spill] sm:$0xff] %v12253_v50  ;;  %v8257_v33 = vunpack.i.h.bf16 %v15874_v49  ;;  %v8256_v41 = vunpack.i.l.bf16 %v15874_v49  ;;  %v8327_v49 = vunpack.i.h.bf16 %v15875_v25  ;;  %v12303_v51 = vsel %vm3126_vm6, %v12062_v32, %v8296_v17  ;;  %v15880_v25 = vld [vmem:[#allocation43_spill] sm:$0xff] }
 0x2f6   :  { %3781 = vst.msk [vmem:[#allocation3 + $0x1b8] sm:$0xff] %vm3321_vm8, %v15855_v4  ;;  %v12286_v50 = vpop.permute.xlu2 %8714  ;;  %v12307_v53 = vsel %vm3126_vm6, %v12067_v34, %v8297_v6  ;;  %v12316_v14 = vsel %vm3061_vm5, %v11905_v28, %v8241_v46  ;;  %v12320_v55 = vsel %vm3061_vm5, %v15880_v25, %v8242_v54  ;;  %v813_v34 = vld [vmem:[#allocation2 + $0x31a] sm:$0xff]  ;;  %v814_v6 = vld [vmem:[#allocation2 + $0x322] sm:$0xff]  ;;  %v812_v54 = vld [vmem:[#allocation2 + $0x30a] sm:$0xff] }
 0x2f7   :  { %15865 = vst [vmem:[#allocation13_spill] sm:$0xff] %v12259_v23  ;;  %v8311_v23 = vunpack.i.l.bf16 %v15873_v37  ;;  %8874 = vrot.lane.b32.xlu1 %v8873_v31, %s9990_s15  ;;  %v12336_v28 = vsel %vm3061_vm5, %v11959_v2, %v8257_v33  ;;  %v15883_v2 = vld [vmem:[#allocation101_spill] sm:$0xff]  ;;  %v811_v17 = vld [vmem:[#allocation2 + $0x302] sm:$0xff] }
 0x2f8   :  { %15867 = vst [vmem:[#allocation14_spill] sm:$0xff] %v12263_v9  ;;  %v8312_v9 = vunpack.i.h.bf16 %v15873_v37  ;;  %v12292_v37 = vsel %vm3061_vm5, %v11888_v39, %v8226_v5  ;;  %v8893_v39 = vpack.i.bf16 %v816_v8, %v815_v47  ;;  %v15878_v5 = vld [vmem:[#allocation34_spill] sm:$0xff]  ;;  %v12332_v8 = vsel %vm3061_vm5, %v11955_v24, %v8256_v41 }
 0x2f9   :  { %3784 = vst.msk [vmem:[#allocation3 + $0x198] sm:$0xff] %vm3321_vm8, %v15855_v4  ;;  %v12312_v30 = vsel %vm3061_vm5, %v15878_v5, %v8246_v35  ;;  %v12324_v32 = vsel %vm3126_vm6, %v12111_v12, %v8311_v23  ;;  %v12340_v47 = vsel %vm3126_vm6, %v12138_v42, %v8326_v57  ;;  %8869 = vrot.lane.b32.xlu0 %v8868_v61, %s9990_s15  ;;  %v12343_v12 = vpop.permute.xlu1 %8664  ;;  %v8277_v23 = vunpack.i.h.bf16 %v15877_v45  ;;  %v15884_v57 = vld [vmem:[#allocation102_spill] sm:$0xff] }
 0x2fa   :  { %15871 = vst [vmem:[#allocation135_spill] sm:$0xff] %v12272_v40  ;;  %v8276_v40 = vunpack.i.l.bf16 %v15877_v45  ;;  %v12328_v31 = vsel %vm3126_vm6, %v12115_v62, %v8312_v9  ;;  %v15882_v62 = vld [vmem:[#allocation156_spill] sm:$0xff]  ;;  %v12352_v24 = vsel %vm3126_vm6, %v12142_v26, %v8327_v49  ;;  %v8272_v35 = vunpack.i.h.bf16 %v15883_v2 }
 0x2fb   :  { %3785 = vst.msk [vmem:[#allocation3 + $0x1a0] sm:$0xff] %vm3321_vm8, %v15855_v4  ;;  %v8271_v42 = vunpack.i.l.bf16 %v15883_v2  ;;  %v8342_v61 = vunpack.i.h.bf16 %v15884_v57  ;;  %v8341_v46 = vunpack.i.l.bf16 %v15884_v57  ;;  %v12358_v33 = vpop.permute.xlu0 %8659  ;;  %v8888_v45 = vpack.i.bf16 %v814_v6, %v813_v34  ;;  %8894 = vrot.lane.b32.xlu2 %v8893_v39, %s9990_s15  ;;  %v15887_v49 = vld [vmem:[#allocation104_spill] sm:$0xff]  ;;  %v15889_v2 = vld [vmem:[#allocation105_spill] sm:$0xff] }
 0x2fc   :  { %3787 = vst.msk [vmem:[#allocation3 + $0x348] sm:$0xff] %vm3321_vm8, %v15855_v4  ;;  %v12348_v9 = vsel %vm3126_vm6, %v15882_v62, %v8276_v40  ;;  %v15886_v40 = vld [vmem:[#allocation103_spill] sm:$0xff]  ;;  %v8287_v5 = vunpack.i.h.bf16 %v15887_v49  ;;  %v8286_v25 = vunpack.i.l.bf16 %v15887_v49  ;;  %v15888_v62 = vld [vmem:[#allocation106_spill] sm:$0xff]  ;;  %v8883_v57 = vpack.i.bf16 %v812_v54, %v811_v17  ;;  %v15891_v34 = vld [vmem:[#allocation157_spill] sm:$0xff] }
 0x2fd   :  { %15876 = vst [vmem:[#allocation136_spill] sm:$0xff] %v12286_v50  ;;  %v8292_v41 = vunpack.i.h.bf16 %v15886_v40  ;;  %v8291_v26 = vunpack.i.l.bf16 %v15886_v40  ;;  %v12372_v39 = vsel %vm3126_vm6, %v15891_v34, %v8277_v23  ;;  %v8307_v6 = vunpack.i.h.bf16 %v15888_v62  ;;  %v15892_v40 = vld [vmem:[#allocation107_spill] sm:$0xff]  ;;  %v15893_v54 = vld [vmem:[#allocation41_spill] sm:$0xff] }
 0x2fe   :  { %3788 = vst.msk [vmem:[#allocation3 + $0x350] sm:$0xff] %vm3321_vm8, %v15855_v4  ;;  %v8357_v4 = vunpack.i.h.bf16 %v15889_v2  ;;  %v12368_v10 = vpop.permute.xlu2 %8729  ;;  %v8302_v50 = vunpack.i.h.bf16 %v15892_v40  ;;  %v12379_v49 = vsel %vm3126_vm6, %v11984_v43, %v8271_v42  ;;  %v12387_v17 = vsel %vm3126_vm6, %v12157_v0, %v8341_v46  ;;  %v15894_v43 = vld [vmem:[#allocation42_spill] sm:$0xff] }
 0x2ff   :  { %15879 = vst [vmem:[#allocation63_spill] sm:$0xff] %v12312_v30  ;;  %v8356_v30 = vunpack.i.l.bf16 %v15889_v2  ;;  %v12383_v2 = vsel %vm3126_vm6, %v11988_v27, %v8272_v35  ;;  %v12391_v23 = vsel %vm3126_vm6, %v12161_v60, %v8342_v61  ;;  %8889 = vrot.lane.b32.xlu1 %v8888_v45, %s9990_s15  ;;  %v12400_v42 = vsel %vm3126_vm6, %v15894_v43, %v8292_v41  ;;  %v15897_v46 = vld [vmem:[#allocation142_spill] sm:$0xff] }
 0x300   :  { %15881 = vst [vmem:[#allocation64_spill] sm:$0xff] %v12343_v12  ;;  %v8306_v12 = vunpack.i.l.bf16 %v15888_v62  ;;  %v12396_v62 = vsel %vm3126_vm6, %v15893_v54, %v8291_v26  ;;  %v12404_v27 = vsel %vm3126_vm6, %v12027_v3, %v8286_v25  ;;  %v12408_v0 = vsel %vm3126_vm6, %v12031_v36, %v8287_v5  ;;  %v15901_v5 = vld [vmem:[#allocation45_spill] sm:$0xff] }
 0x301   :  { %15885 = vst [vmem:[#allocation65_spill] sm:$0xff] %v12358_v33  ;;  %v8301_v33 = vunpack.i.l.bf16 %v15892_v40  ;;  %v12416_v35 = vsel %vm3126_vm6, %v12203_v16, %v8356_v30  ;;  %v12420_v61 = vsel %vm3126_vm6, %v12212_v15, %v8357_v4  ;;  %v8426_v45 = vunpack.i.l.bf16 %v15897_v46  ;;  %8884 = vrot.lane.b32.xlu0 %v8883_v57, %s9990_s15  ;;  %v12424_v3 = vpop.permute.xlu1 %8679  ;;  %v817_v15 = vld [vmem:[#allocation2 + $0x34a] sm:$0xff]  ;;  %v818_v30 = vld [vmem:[#allocation2 + $0x352] sm:$0xff]  ;;  %v15905_v40 = vld [vmem:[#allocation111_spill] sm:$0xff] }
 0x302   :  { %15890 = vst [vmem:[#allocation66_spill] sm:$0xff] %v12368_v10  ;;  %v12412_v60 = vsel %vm3126_vm6, %v11947_v19, %v8306_v12  ;;  %v12428_v36 = vsel %vm3126_vm6, %v11963_v59, %v8307_v6  ;;  %v12436_v16 = vsel %vm3126_vm6, %v12058_v29, %v8302_v50  ;;  %v8427_v4 = vunpack.i.h.bf16 %v15897_v46  ;;  %v15900_v12 = vld [vmem:[#allocation108_spill] sm:$0xff]  ;;  %v15904_v29 = vld [vmem:[#allocation110_spill] sm:$0xff] }
 0x303   :  { %15895 = vst [vmem:[#allocation67_spill] sm:$0xff] %v12416_v35  ;;  %v12432_v19 = vsel %vm3126_vm6, %v12054_v56, %v8301_v33  ;;  %v8372_v41 = vunpack.i.h.bf16 %v15900_v12  ;;  %v8371_v26 = vunpack.i.l.bf16 %v15900_v12  ;;  %v8587_v25 = vunpack.i.h.bf16 %v15901_v5  ;;  %v12443_v57 = vpop.permute.xlu0 %8674  ;;  %v15903_v56 = vld [vmem:[#allocation109_spill] sm:$0xff] }
 0x304   :  { %15896 = vst [vmem:[#allocation68_spill] sm:$0xff] %v12420_v61  ;;  %v8586_v59 = vunpack.i.l.bf16 %v15901_v5  ;;  %v8322_v33 = vunpack.i.h.bf16 %v15903_v56  ;;  %v8321_v34 = vunpack.i.l.bf16 %v15903_v56  ;;  %v8317_v50 = vunpack.i.h.bf16 %v15904_v29  ;;  %v15906_v61 = vld [vmem:[#allocation112_spill] sm:$0xff] }
 0x305   :  { %15898 = vst [vmem:[#allocation69_spill] sm:$0xff] %v12424_v3  ;;  %v8316_v6 = vunpack.i.l.bf16 %v15904_v29  ;;  %v8387_v54 = vunpack.i.h.bf16 %v15905_v40  ;;  %v3192_v43 = vsel %vm3191_vm9, %v12216_v58, %v8426_v45  ;;  %v8898_v46 = vpack.i.bf16 %v818_v30, %v817_v15  ;;  %v15908_v30 = vld [vmem:[#allocation47_spill] sm:$0xff] }
 0x306   :  { %15899 = vst [vmem:[#allocation16_spill] sm:$0xff] %v12428_v36  ;;  %v8745_v12 = vpop.permute.xlu2 %8744  ;;  %v3193_v5 = vsel %vm3191_vm9, %v12231_v44, %v8427_v4  ;;  %v8337_v56 = vunpack.i.h.bf16 %v15906_v61  ;;  %v8386_v35 = vunpack.i.l.bf16 %v15905_v40  ;;  %v8336_v36 = vunpack.i.l.bf16 %v15906_v61 }
 0x307   :  { %15902 = vst [vmem:[#allocation17_spill] sm:$0xff] %v12443_v57  ;;  %v8747_v10 = vunpack.i.h.bf16 %v8745_v12  ;;  %v8746_v3 = vunpack.i.l.bf16 %v8745_v12  ;;  %v3257_v57 = vsel %vm3256_vm10, %v3192_v43, %v8586_v59  ;;  %v3258_v29 = vsel %vm3256_vm10, %v3193_v5, %v8587_v25  ;;  %v15909_v25 = vld [vmem:[#allocation52_spill] sm:$0xff]  ;;  %v15914_v12 = vld [vmem:[#allocation162_spill] sm:$0xff] }
 0x308   :  { %v12463_v44 = vsel %vm3126_vm6, %v11975_v7, %v8321_v34  ;;  %v12467_v4 = vsel %vm3126_vm6, %v12235_v52, %v8371_v26  ;;  %v12471_v15 = vsel %vm3126_vm6, %v12242_v48, %v8372_v41  ;;  %v12482_v7 = vsel %vm3126_vm6, %v15909_v25, %v8316_v6  ;;  %v15910_v59 = vld [vmem:[#allocation152_spill] sm:$0xff]  ;;  %v15912_v34 = vld [vmem:[#allocation49_spill] sm:$0xff] }
 0x309   :  { %v3322_v58 = vsel %vm3321_vm8, %v3257_v57, %v8746_v3  ;;  %v3323_v45 = vsel %vm3321_vm8, %v3258_v29, %v8747_v10  ;;  %8899 = vrot.lane.b32.xlu0 %v8898_v46, %s9990_s15  ;;  %v12474_v61 = vpop.permute.xlu1 %8694  ;;  %v12478_v10 = vsel %vm3126_vm6, %v15908_v30, %v8322_v33  ;;  %v8442_v52 = vunpack.i.h.bf16 %v15910_v59  ;;  %v15911_v57 = vld [vmem:[#allocation11_spill] sm:$0xff]  ;;  %v15913_v6 = vld [vmem:[#allocation161_spill] sm:$0xff]  ;;  %v15919_v30 = vld [vmem:[#allocation114_spill] sm:$0xff] }
 0x30a   :  { %15907 = vst [vmem:[#allocation18_spill] sm:$0xff] %v12474_v61  ;;  %v3386_v3 = vpack.c.bf16 %v3323_v45, %v3322_v58  ;;  %v8441_v26 = vunpack.i.l.bf16 %v15910_v59  ;;  %v12488_v48 = vsel %vm3126_vm6, %v15911_v57, %v8317_v50  ;;  %v12492_v41 = vsel %vm3126_vm6, %v12292_v37, %v8386_v35  ;;  %v15917_v35 = vld [vmem:[#allocation113_spill] sm:$0xff]  ;;  %v15918_v58 = vld [vmem:[#allocation115_spill] sm:$0xff]  ;;  %v15921_v61 = vld [vmem:[#allocation118_spill] sm:$0xff] }
 0x30b   :  { %v8602_v40 = vunpack.i.h.bf16 %v15912_v34  ;;  %v8601_v33 = vunpack.i.l.bf16 %v15912_v34  ;;  %v12496_v43 = vpop.permute.xlu0 %8689  ;;  %v12501_v46 = vsel %vm3126_vm6, %v15913_v6, %v8336_v36  ;;  %v12505_v50 = vsel %vm3126_vm6, %v15914_v12, %v8337_v56  ;;  %v15920_v34 = vld [vmem:[#allocation117_spill] sm:$0xff] }
 0x30c   :  { %7455 = vmatmul.msk.bf16.vlgmr.msra.gmra.mxu0 %vm3442_vm11, %v3386_v3  ;;  %15915 = vst [vmem:[#allocation70_spill] sm:$0xff] %v12505_v50  ;;  %v12509_v37 = vsel %vm3126_vm6, %v12296_v20, %v8387_v54  ;;  %v8332_v5 = vunpack.i.h.bf16 %v15917_v35  ;;  %v8331_v29 = vunpack.i.l.bf16 %v15917_v35  ;;  %v8351_v45 = vunpack.i.l.bf16 %v15918_v58 }
 0x30d   :  { %15916 = vst [vmem:[#allocation71_spill] sm:$0xff] %v12509_v37  ;;  %v8402_v3 = vunpack.i.h.bf16 %v15919_v30  ;;  %v8401_v25 = vunpack.i.l.bf16 %v15919_v30  ;;  %v3198_v59 = vsel %vm3191_vm9, %v12246_v11, %v8441_v26  ;;  %v3199_v56 = vsel %vm3191_vm9, %v12250_v22, %v8442_v52 }
 0x30e   :  { %v8760_v36 = vpop.permute.xlu2 %8759  ;;  %v8352_v54 = vunpack.i.h.bf16 %v15918_v58  ;;  %v8417_v6 = vunpack.i.h.bf16 %v15920_v34  ;;  %v3263_v12 = vsel %vm3256_vm10, %v3198_v59, %v8601_v33  ;;  %v3264_v35 = vsel %vm3256_vm10, %v3199_v56, %v8602_v40  ;;  %v15923_v58 = vld [vmem:[#allocation50_spill] sm:$0xff]  ;;  %v15925_v59 = vld [vmem:[#allocation51_spill] sm:$0xff]  ;;  %v15927_v56 = vld [vmem:[#allocation169_spill] sm:$0xff] }
 0x30f   :  { %v8762_v57 = vunpack.i.h.bf16 %v8760_v36  ;;  %v8761_v20 = vunpack.i.l.bf16 %v8760_v36  ;;  %v8366_v50 = vunpack.i.l.bf16 %v15921_v61  ;;  %v8416_v30 = vunpack.i.l.bf16 %v15920_v34  ;;  %v15928_v34 = vld [vmem:[#allocation53_spill] sm:$0xff] }
 0x310   :  { %v12534_v22 = vsel %vm3126_vm6, %v12121_v21, %v8331_v29  ;;  %v12538_v52 = vsel %vm3126_vm6, %v12134_v18, %v8332_v5  ;;  %v12542_v26 = vsel %vm3126_vm6, %v12316_v14, %v8401_v25  ;;  %v12550_v36 = vsel %vm3126_vm6, %v15923_v58, %v8351_v45  ;;  %v15924_v29 = vld [vmem:[#allocation158_spill] sm:$0xff]  ;;  %v15933_v58 = vld [vmem:[#allocation121_spill] sm:$0xff] }
 0x311   :  { %v12527_v37 = vsel %vm3321_vm8, %v3263_v12, %v8761_v20  ;;  %v12530_v11 = vsel %vm3321_vm8, %v3264_v35, %v8762_v57  ;;  %v12544_v40 = vpop.permute.xlu1 %8709  ;;  %v12554_v21 = vsel %vm3126_vm6, %v12320_v55, %v8402_v3  ;;  %v8457_v18 = vunpack.i.h.bf16 %v15924_v29  ;;  %v15932_v12 = vld [vmem:[#allocation119_spill] sm:$0xff] }
 0x312   :  { %15922 = vst [vmem:[#allocation72_spill] sm:$0xff] %v12544_v40  ;;  %v8456_v5 = vunpack.i.l.bf16 %v15924_v29  ;;  %v12560_v14 = vsel %vm3126_vm6, %v15925_v59, %v8352_v54  ;;  %v8367_v25 = vunpack.i.h.bf16 %v15921_v61  ;;  %v8617_v57 = vunpack.i.h.bf16 %v15927_v56  ;;  %v15934_v59 = vld [vmem:[#allocation120_spill] sm:$0xff] }
 0x313   :  { %15926 = vst [vmem:[#allocation73_spill] sm:$0xff] %v12560_v14  ;;  %v8616_v20 = vunpack.i.l.bf16 %v15927_v56  ;;  %v12565_v45 = vpop.permute.xlu0 %8704  ;;  %v12569_v55 = vsel %vm3126_vm6, %v15928_v34, %v8366_v50  ;;  %v12573_v3 = vsel %vm3126_vm6, %v12332_v8, %v8416_v30  ;;  %v12577_v54 = vsel %vm3126_vm6, %v12336_v28, %v8417_v6  ;;  %v15935_v6 = vld [vmem:[#allocation55_spill] sm:$0xff] }
 0x314   :  { %15929 = vst [vmem:[#allocation74_spill] sm:$0xff] %v12569_v55  ;;  %v8362_v61 = vunpack.i.h.bf16 %v15932_v12  ;;  %v8361_v35 = vunpack.i.l.bf16 %v15932_v12  ;;  %v8381_v29 = vunpack.i.l.bf16 %v15933_v58  ;;  %v8432_v56 = vunpack.i.h.bf16 %v15934_v59 }
 0x315   :  { %15930 = vst [vmem:[#allocation76_spill] sm:$0xff] %v12573_v3  ;;  %v8431_v33 = vunpack.i.l.bf16 %v15934_v59  ;;  %v3204_v34 = vsel %vm3191_vm9, %v12303_v51, %v8456_v5  ;;  %v3205_v8 = vsel %vm3191_vm9, %v12307_v53, %v8457_v18  ;;  %v12590_v40 = vsel %vm3126_vm6, %v15935_v6, %v8367_v25  ;;  %v15936_v59 = vld [vmem:[#allocation123_spill] sm:$0xff] }
 0x316   :  { %15931 = vst [vmem:[#allocation75_spill] sm:$0xff] %v12577_v54  ;;  %v8775_v50 = vpop.permute.xlu2 %8774  ;;  %v8382_v12 = vunpack.i.h.bf16 %v15933_v58  ;;  %v3269_v55 = vsel %vm3256_vm10, %v3204_v34, %v8616_v20  ;;  %v3270_v54 = vsel %vm3256_vm10, %v3205_v8, %v8617_v57  ;;  %v8447_v3 = vunpack.i.h.bf16 %v15936_v59  ;;  %v15943_v58 = vld [vmem:[#allocation58_spill] sm:$0xff] }
 0x317   :  { %v8777_v30 = vunpack.i.h.bf16 %v8775_v50  ;;  %v8776_v28 = vunpack.i.l.bf16 %v8775_v50  ;;  %v8446_v14 = vunpack.i.l.bf16 %v15936_v59  ;;  %v12605_v18 = vsel %vm3126_vm6, %v12173_v38, %v8361_v35  ;;  %v15946_v59 = vld [vmem:[#allocation144_spill] sm:$0xff]  ;;  %v15947_v35 = vld [vmem:[#allocation153_spill] sm:$0xff] }
 0x318   :  { %v12609_v5 = vsel %vm3126_vm6, %v12199_v1, %v8362_v61  ;;  %v12613_v25 = vsel %vm3191_vm9, %v12379_v49, %v8431_v33  ;;  %v12625_v38 = vsel %vm3191_vm9, %v12383_v2, %v8432_v56  ;;  %v12631_v49 = vsel %vm3126_vm6, %v12129_v63, %v8382_v12  ;;  %v15942_v33 = vld [vmem:[#allocation122_spill] sm:$0xff] }
 0x319   :  { %v12598_v51 = vsel %vm3321_vm8, %v3269_v55, %v8776_v28  ;;  %v12601_v53 = vsel %vm3321_vm8, %v3270_v54, %v8777_v30  ;;  %v12615_v57 = vpop.permute.xlu1 %8724  ;;  %v12621_v55 = vsel %vm3126_vm6, %v12125_v13, %v8381_v29  ;;  %v15940_v54 = vld [vmem:[#allocation163_spill] sm:$0xff]  ;;  %15941 = vst [vmem:[#allocation140_spill] sm:$0xff] %v12631_v49  ;;  %v8632_v50 = vunpack.i.h.bf16 %v15943_v58  ;;  %v15944_v63 = vld [vmem:[#allocation126_spill] sm:$0xff] }
 0x31a   :  { %15937 = vst [vmem:[#allocation23_spill] sm:$0xff] %v12598_v51  ;;  %v8472_v1 = vunpack.i.h.bf16 %v15940_v54  ;;  %v8471_v61 = vunpack.i.l.bf16 %v15940_v54  ;;  %v8631_v34 = vunpack.i.l.bf16 %v15943_v58  ;;  %v12641_v2 = vsel %vm3191_vm9, %v12404_v27, %v8446_v14  ;;  %v15945_v28 = vld [vmem:[#allocation134_spill] sm:$0xff] }
 0x31b   :  { %15938 = vst [vmem:[#allocation137_spill] sm:$0xff] %v12601_v53  ;;  %v12636_v13 = vpop.permute.xlu0 %8719  ;;  %v12645_v56 = vsel %vm3191_vm9, %v12408_v0, %v8447_v3  ;;  %v8462_v8 = vunpack.i.h.bf16 %v15944_v63  ;;  %v8461_v30 = vunpack.i.l.bf16 %v15944_v63  ;;  %v8477_v6 = vunpack.i.h.bf16 %v15945_v28  ;;  %v15948_v53 = vld [vmem:[#allocation159_spill] sm:$0xff] }
 0x31c   :  { %15939 = vst [vmem:[#allocation138_spill] sm:$0xff] %v12615_v57  ;;  %v8476_v12 = vunpack.i.l.bf16 %v15945_v28  ;;  %v8492_v54 = vunpack.i.h.bf16 %v15946_v59  ;;  %v3210_v20 = vsel %vm3191_vm9, %v12324_v32, %v8471_v61  ;;  %v3211_v27 = vsel %vm3191_vm9, %v12328_v31, %v8472_v1  ;;  %v15951_v1 = vld [vmem:[#allocation129_spill] sm:$0xff] }
 0x31d   :  { %v8491_v3 = vunpack.i.l.bf16 %v15946_v59  ;;  %v8437_v29 = vunpack.i.h.bf16 %v15947_v35  ;;  %v3275_v63 = vsel %vm3256_vm10, %v3210_v20, %v8631_v34  ;;  %v3276_v51 = vsel %vm3256_vm10, %v3211_v27, %v8632_v50 }
 0x31e   :  { %v8790_v58 = vpop.permute.xlu2 %8789  ;;  %v8436_v28 = vunpack.i.l.bf16 %v15947_v35  ;;  %v8452_v57 = vunpack.i.h.bf16 %v15948_v53  ;;  %v8451_v31 = vunpack.i.l.bf16 %v15948_v53  ;;  %v8487_v61 = vunpack.i.h.bf16 %v15951_v1  ;;  %v15952_v35 = vld [vmem:[#allocation124_spill] sm:$0xff] }
 0x31f   :  { %v8792_v14 = vunpack.i.h.bf16 %v8790_v58  ;;  %v8791_v0 = vunpack.i.l.bf16 %v8790_v58  ;;  %v8486_v59 = vunpack.i.l.bf16 %v15951_v1  ;;  %v12679_v27 = vsel %vm3191_vm9, %v12432_v19, %v8461_v30 }
 0x320   :  { %v12687_v53 = vsel %vm3191_vm9, %v12482_v7, %v8476_v12  ;;  %v12699_v19 = vsel %vm3191_vm9, %v12534_v22, %v8491_v3  ;;  %v3196_v7 = vsel %vm3191_vm9, %v12348_v9, %v8436_v28  ;;  %v12715_v30 = vsel %vm3191_vm9, %v12400_v42, %v8452_v57  ;;  %v15954_v12 = vld [vmem:[#allocation15_spill] sm:$0xff] }
 0x321   :  { %v12663_v49 = vsel %vm3321_vm8, %v3275_v63, %v8791_v0  ;;  %v12666_v32 = vsel %vm3321_vm8, %v3276_v51, %v8792_v14  ;;  %v12671_v58 = vpop.permute.xlu1 %8739  ;;  %v12683_v51 = vsel %vm3191_vm9, %v12436_v16, %v8462_v8  ;;  %v12691_v14 = vsel %vm3191_vm9, %v12488_v48, %v8477_v6  ;;  %v15953_v0 = vld [vmem:[#allocation135_spill] sm:$0xff] }
 0x322   :  { %15949 = vst [vmem:[#allocation77_spill] sm:$0xff] %v12663_v49  ;;  %v8647_v63 = vunpack.i.h.bf16 %v15953_v0  ;;  %v8646_v1 = vunpack.i.l.bf16 %v15953_v0  ;;  %v12703_v16 = vsel %vm3191_vm9, %v12538_v52, %v8492_v54  ;;  %v3197_v48 = vsel %vm3191_vm9, %v12372_v39, %v8437_v29  ;;  %v15955_v3 = vld [vmem:[#allocation139_spill] sm:$0xff] }
 0x323   :  { %15950 = vst [vmem:[#allocation79_spill] sm:$0xff] %v12666_v32  ;;  %v12695_v20 = vpop.permute.xlu0 %8734  ;;  %v12711_v8 = vsel %vm3191_vm9, %v12396_v62, %v8451_v31  ;;  %v3216_v22 = vsel %vm3191_vm9, %v12340_v47, %v8486_v59  ;;  %v3217_v52 = vsel %vm3191_vm9, %v12352_v24, %v8487_v61  ;;  %v8502_v9 = vunpack.i.h.bf16 %v15954_v12  ;;  %v15956_v31 = vld [vmem:[#allocation160_spill] sm:$0xff] }
 0x324   :  { %v8501_v54 = vunpack.i.l.bf16 %v15954_v12  ;;  %v8597_v62 = vunpack.i.h.bf16 %v15955_v3  ;;  %v8596_v28 = vunpack.i.l.bf16 %v15955_v3  ;;  %v3281_v42 = vsel %vm3256_vm10, %v3216_v22, %v8646_v1  ;;  %v15957_v59 = vld [vmem:[#allocation164_spill] sm:$0xff] }
 0x325   :  { %v3282_v57 = vsel %vm3256_vm10, %v3217_v52, %v8647_v63  ;;  %v8467_v0 = vunpack.i.h.bf16 %v15957_v59  ;;  %v15958_v12 = vld [vmem:[#allocation44_spill] sm:$0xff]  ;;  %v3223_v22 = vsel %vm3191_vm9, %v12391_v23, %v8502_v9  ;;  %v15960_v23 = vld [vmem:[#allocation27_spill] sm:$0xff] }
 0x326   :  { %v8805_v6 = vpop.permute.xlu2 %8804  ;;  %v8592_v50 = vunpack.i.h.bf16 %v15958_v12  ;;  %v8591_v3 = vunpack.i.l.bf16 %v15958_v12  ;;  %v3222_v1 = vsel %vm3191_vm9, %v12387_v17, %v8501_v54  ;;  %v3261_v47 = vsel %vm3256_vm10, %v3196_v7, %v8596_v28 }
 0x327   :  { %v8807_v39 = vunpack.i.h.bf16 %v8805_v6  ;;  %v8806_v29 = vunpack.i.l.bf16 %v8805_v6  ;;  %v8466_v6 = vunpack.i.l.bf16 %v15957_v59  ;;  %v3262_v12 = vsel %vm3256_vm10, %v3197_v48, %v8597_v62 }
 0x328   :  { %v8612_v9 = vunpack.i.h.bf16 %v15960_v23  ;;  %v3260_v54 = vsel %vm3256_vm10, %v12625_v38, %v8592_v50  ;;  %v15961_v38 = vld [vmem:[#allocation130_spill] sm:$0xff] }
 0x329   :  { %v12730_v24 = vsel %vm3321_vm8, %v3281_v42, %v8806_v29  ;;  %v12733_v61 = vsel %vm3321_vm8, %v3282_v57, %v8807_v39  ;;  %v8755_v34 = vpop.permute.xlu1 %8754  ;;  %v15959_v39 = vld [vmem:[#allocation65_spill] sm:$0xff]  ;;  %v8481_v50 = vunpack.i.l.bf16 %v15961_v38 }
 0x32a   :  { %v8757_v52 = vunpack.i.h.bf16 %v8755_v34  ;;  %v8756_v29 = vunpack.i.l.bf16 %v8755_v34  ;;  %v8662_v42 = vunpack.i.h.bf16 %v15959_v39  ;;  %v8661_v57 = vunpack.i.l.bf16 %v15959_v39 }
 0x32b   :  { %v8750_v59 = vpop.permute.xlu0 %8749  ;;  %v3259_v34 = vsel %vm3256_vm10, %v12613_v25, %v8591_v3 }
 0x32c   :  { %v8752_v49 = vunpack.i.h.bf16 %v8750_v59  ;;  %v8751_v32 = vunpack.i.l.bf16 %v8750_v59  ;;  %v12749_v63 = vsel %vm3321_vm8, %v3261_v47, %v8756_v29  ;;  %v12752_v17 = vsel %vm3321_vm8, %v3262_v12, %v8757_v52 }
 0x32d   :  { %v8611_v52 = vunpack.i.l.bf16 %v15960_v23  ;;  %v3287_v29 = vsel %vm3256_vm10, %v3222_v1, %v8661_v57  ;;  %v3288_v59 = vsel %vm3256_vm10, %v3223_v22, %v8662_v42  ;;  %v8482_v1 = vunpack.i.h.bf16 %v15961_v38  ;;  %v15964_v57 = vld [vmem:[#allocation19_spill] sm:$0xff] }
 0x32e   :  { %v8820_v39 = vpop.permute.xlu2 %8819  ;;  %v3324_v48 = vsel %vm3321_vm8, %v3259_v34, %v8751_v32  ;;  %v3325_v62 = vsel %vm3321_vm8, %v3260_v54, %v8752_v49  ;;  %v3208_v49 = vsel %vm3191_vm9, %v12412_v60, %v8466_v6  ;;  %v15963_v34 = vld [vmem:[#allocation16_spill] sm:$0xff]  ;;  %v8517_v54 = vunpack.i.h.bf16 %v15964_v57  ;;  %v15970_v42 = vld [vmem:[#allocation151_spill] sm:$0xff] }
 0x32f   :  { %v8822_v28 = vunpack.i.h.bf16 %v8820_v39  ;;  %v8821_v47 = vunpack.i.l.bf16 %v8820_v39  ;;  %v3387_v25 = vpack.c.bf16 %v3325_v62, %v3324_v48  ;;  %v3209_v23 = vsel %vm3191_vm9, %v15963_v34, %v8467_v0 }
 0x330   :  { %v8516_v39 = vunpack.i.l.bf16 %v15964_v57  ;;  %v3267_v0 = vsel %vm3256_vm10, %v12711_v8, %v8611_v52  ;;  %v12805_v57 = vsel %vm3191_vm9, %v12478_v10, %v8482_v1  ;;  %v15967_v8 = vld [vmem:[#allocation131_spill] sm:$0xff]  ;;  %v8627_v3 = vunpack.i.h.bf16 %v15970_v42 }
 0x331   :  { %v12769_v12 = vsel %vm3321_vm8, %v3287_v29, %v8821_v47  ;;  %v12772_v32 = vsel %vm3321_vm8, %v3288_v59, %v8822_v28  ;;  %7456 = vmatmul.msk.bf16.gmra.mxu0 %vm3442_vm11, %v3387_v25  ;;  %v8770_v22 = vpop.permute.xlu1 %8769  ;;  %v15965_v28 = vld [vmem:[#allocation17_spill] sm:$0xff]  ;;  %v3268_v29 = vsel %vm3256_vm10, %v12715_v30, %v8612_v9  ;;  %v12794_v59 = vsel %vm3191_vm9, %v12463_v44, %v8481_v50  ;;  %v15966_v25 = vld [vmem:[#allocation24_spill] sm:$0xff]  ;;  %v15968_v50 = vld [vmem:[#allocation67_spill] sm:$0xff] }
 0x332   :  { %15962 = vst [vmem:[#allocation78_spill] sm:$0xff] %v12769_v12  ;;  %v8772_v48 = vunpack.i.h.bf16 %v8770_v22  ;;  %v8771_v62 = vunpack.i.l.bf16 %v8770_v22  ;;  %v8677_v47 = vunpack.i.h.bf16 %v15965_v28  ;;  %v8676_v60 = vunpack.i.l.bf16 %v15965_v28 }
 0x333   :  { %v12786_v6 = vpop.permute.xlu0 %8764  ;;  %v8531_v38 = vunpack.i.l.bf16 %v15966_v25  ;;  %v8532_v30 = vunpack.i.h.bf16 %v15966_v25  ;;  %v3228_v28 = vsel %vm3191_vm9, %v15968_v50, %v8516_v39  ;;  %v8626_v10 = vunpack.i.l.bf16 %v15970_v42  ;;  %v15973_v50 = vld [vmem:[#allocation168_spill] sm:$0xff] }
 0x334   :  { %v12798_v34 = vsel %vm3321_vm8, %v3267_v0, %v8771_v62  ;;  %v12801_v22 = vsel %vm3321_vm8, %v3268_v29, %v8772_v48  ;;  %v15969_v62 = vld [vmem:[#allocation68_spill] sm:$0xff]  ;;  %v3293_v1 = vsel %vm3256_vm10, %v3228_v28, %v8676_v60  ;;  %v8496_v52 = vunpack.i.l.bf16 %v15967_v8 }
 0x335   :  { %v3229_v0 = vsel %vm3191_vm9, %v15969_v62, %v8517_v54  ;;  %v3234_v44 = vsel %vm3191_vm9, %v12467_v4, %v8531_v38  ;;  %v8622_v42 = vunpack.i.h.bf16 %v15973_v50  ;;  %v8621_v60 = vunpack.i.l.bf16 %v15973_v50  ;;  %v15974_v62 = vld [vmem:[#allocation25_spill] sm:$0xff] }
 0x336   :  { %v8835_v9 = vpop.permute.xlu2 %8834  ;;  %v3294_v25 = vsel %vm3256_vm10, %v3229_v0, %v8677_v47  ;;  %v8547_v0 = vunpack.i.h.bf16 %v15974_v62  ;;  %v8546_v4 = vunpack.i.l.bf16 %v15974_v62  ;;  %v15975_v62 = vld [vmem:[#allocation40_spill] sm:$0xff] }
 0x337   :  { %v8837_v48 = vunpack.i.h.bf16 %v8835_v9  ;;  %v8836_v29 = vunpack.i.l.bf16 %v8835_v9  ;;  %v3235_v9 = vsel %vm3191_vm9, %v12471_v15, %v8532_v30  ;;  %v3273_v15 = vsel %vm3256_vm10, %v3208_v49, %v8626_v10 }
 0x338   :  { %v3274_v30 = vsel %vm3256_vm10, %v3209_v23, %v8627_v3 }
 0x339   :  { %v12823_v39 = vsel %vm3321_vm8, %v3293_v1, %v8836_v29  ;;  %v12826_v54 = vsel %vm3321_vm8, %v3294_v25, %v8837_v48  ;;  %v8785_v28 = vpop.permute.xlu1 %8784  ;;  %v8692_v48 = vunpack.i.h.bf16 %v12496_v43  ;;  %v8691_v1 = vunpack.i.l.bf16 %v12496_v43 }
 0x33a   :  { %15971 = vst [vmem:[#allocation80_spill] sm:$0xff] %v12823_v39  ;;  %v8787_v38 = vunpack.i.h.bf16 %v8785_v28  ;;  %v8786_v29 = vunpack.i.l.bf16 %v8785_v28  ;;  %v8642_v39 = vunpack.i.h.bf16 %v15975_v62  ;;  %v3272_v43 = vsel %vm3256_vm10, %v12683_v51, %v8622_v42 }
 0x33b   :  { %15972 = vst [vmem:[#allocation81_spill] sm:$0xff] %v12826_v54  ;;  %v8780_v25 = vpop.permute.xlu0 %8779  ;;  %v3271_v54 = vsel %vm3256_vm10, %v12679_v27, %v8621_v60  ;;  %v3300_v27 = vsel %vm3256_vm10, %v3235_v9, %v8692_v48  ;;  %v3220_v42 = vsel %vm3191_vm9, %v12501_v46, %v8496_v52  ;;  %v3240_v60 = vsel %vm3191_vm9, %v12492_v41, %v8546_v4  ;;  %v15979_v52 = vld [vmem:[#allocation31_spill] sm:$0xff]  ;;  %v15997_v41 = vld [vmem:[#allocation74_spill] sm:$0xff] }
 0x33c   :  { %v8782_v50 = vunpack.i.h.bf16 %v8780_v25  ;;  %v8781_v7 = vunpack.i.l.bf16 %v8780_v25  ;;  %v12841_v12 = vsel %vm3321_vm8, %v3273_v15, %v8786_v29  ;;  %v12844_v47 = vsel %vm3321_vm8, %v3274_v30, %v8787_v38  ;;  %v15976_v15 = vld [vmem:[#allocation71_spill] sm:$0xff] }
 0x33d   :  { %v8641_v29 = vunpack.i.l.bf16 %v15975_v62  ;;  %v3299_v25 = vsel %vm3256_vm10, %v3234_v44, %v8691_v1  ;;  %v3241_v44 = vsel %vm3191_vm9, %v15976_v15, %v8547_v0  ;;  %v15977_v1 = vld [vmem:[#allocation56_spill] sm:$0xff]  ;;  %v15978_v30 = vpack.c.bf16 %v12752_v17, %v12749_v63 }
 0x33e   :  { %v8850_v28 = vpop.permute.xlu2 %8849  ;;  %v12854_v10 = vsel %vm3321_vm8, %v3271_v54, %v8781_v7  ;;  %v12857_v38 = vsel %vm3321_vm8, %v3272_v43, %v8782_v50  ;;  %v8637_v9 = vunpack.i.h.bf16 %v15977_v1  ;;  %v8636_v48 = vunpack.i.l.bf16 %v15977_v1  ;;  %v15980_v1 = vld [vmem:[#allocation46_spill] sm:$0xff] }
 0x33f   :  { %v8852_v49 = vunpack.i.h.bf16 %v8850_v28  ;;  %v8851_v23 = vunpack.i.l.bf16 %v8850_v28  ;;  %v8562_v4 = vunpack.i.h.bf16 %v15979_v52  ;;  %v8561_v50 = vunpack.i.l.bf16 %v15979_v52 }
 0x340   :  { %v8707_v0 = vunpack.i.h.bf16 %v12565_v45  ;;  %v8706_v43 = vunpack.i.l.bf16 %v12565_v45  ;;  %v3279_v63 = vsel %vm3256_vm10, %v12794_v59, %v8641_v29  ;;  %v3280_v17 = vsel %vm3256_vm10, %v12805_v57, %v8642_v39 }
 0x341   :  { %v12869_v7 = vsel %vm3321_vm8, %v3299_v25, %v8851_v23  ;;  %v12872_v54 = vsel %vm3321_vm8, %v3300_v27, %v8852_v49  ;;  %7457 = vmatmul.msk.bf16.gmra.mxu0 %vm3442_vm11, %v15978_v30  ;;  %v8800_v46 = vpop.permute.xlu1 %8799  ;;  %v8657_v30 = vunpack.i.h.bf16 %v15980_v1  ;;  %v3277_v45 = vsel %vm3256_vm10, %v12687_v53, %v8636_v48  ;;  %v15982_v48 = vld [vmem:[#allocation70_spill] sm:$0xff] }
 0x342   :  { %v8802_v62 = vunpack.i.h.bf16 %v8800_v46  ;;  %v8801_v28 = vunpack.i.l.bf16 %v8800_v46  ;;  %v3278_v59 = vsel %vm3256_vm10, %v12691_v14, %v8637_v9  ;;  %v3306_v53 = vsel %vm3256_vm10, %v3241_v44, %v8707_v0 }
 0x343   :  { %v8795_v49 = vpop.permute.xlu0 %8794  ;;  %v15981_v9 = vunpack.i.h.bf16 %v15967_v8 }
 0x344   :  { %v8797_v23 = vunpack.i.h.bf16 %v8795_v49  ;;  %v8796_v25 = vunpack.i.l.bf16 %v8795_v49  ;;  %v12893_v27 = vsel %vm3321_vm8, %v3279_v63, %v8801_v28  ;;  %v12896_v15 = vsel %vm3321_vm8, %v3280_v17, %v8802_v62  ;;  %v15983_v17 = vld [vmem:[#allocation22_spill] sm:$0xff] }
 0x345   :  { %v8656_v28 = vunpack.i.l.bf16 %v15980_v1  ;;  %v3305_v49 = vsel %vm3256_vm10, %v3240_v60, %v8706_v43  ;;  %v3221_v63 = vsel %vm3191_vm9, %v15982_v48, %v15981_v9  ;;  %v8511_v60 = vunpack.i.l.bf16 %v15983_v17  ;;  %v15984_v43 = vld [vmem:[#allocation62_spill] sm:$0xff] }
 0x346   :  { %v8865_v46 = vpop.permute.xlu2 %8864  ;;  %v12906_v52 = vsel %vm3321_vm8, %v3277_v45, %v8796_v25  ;;  %v12909_v62 = vsel %vm3321_vm8, %v3278_v59, %v8797_v23  ;;  %v8512_v25 = vunpack.i.h.bf16 %v15983_v17  ;;  %v8652_v44 = vunpack.i.h.bf16 %v15984_v43 }
 0x347   :  { %v8867_v39 = vunpack.i.h.bf16 %v8865_v46  ;;  %v8866_v29 = vunpack.i.l.bf16 %v8865_v46  ;;  %v8651_v0 = vunpack.i.l.bf16 %v15984_v43  ;;  %v3246_v45 = vsel %vm3191_vm9, %v12542_v26, %v8561_v50 }
 0x348   :  { %v3247_v59 = vsel %vm3191_vm9, %v12554_v21, %v8562_v4  ;;  %v8722_v9 = vunpack.i.h.bf16 %v12636_v13  ;;  %v8721_v48 = vunpack.i.l.bf16 %v12636_v13  ;;  %v15985_v21 = vld [vmem:[#allocation48_spill] sm:$0xff] }
 0x349   :  { %v12922_v46 = vsel %vm3321_vm8, %v3305_v49, %v8866_v29  ;;  %v12925_v23 = vsel %vm3321_vm8, %v3306_v53, %v8867_v39  ;;  %v8815_v1 = vpop.permute.xlu1 %8814  ;;  %v3285_v39 = vsel %vm3256_vm10, %v3220_v42, %v8656_v28  ;;  %v3286_v53 = vsel %vm3256_vm10, %v3221_v63, %v8657_v30 }
 0x34a   :  { %v8817_v29 = vunpack.i.h.bf16 %v8815_v1  ;;  %v8816_v49 = vunpack.i.l.bf16 %v8815_v1  ;;  %v8672_v4 = vunpack.i.h.bf16 %v15985_v21  ;;  %v3283_v42 = vsel %vm3256_vm10, %v12699_v19, %v8651_v0 }
 0x34b   :  { %v8810_v17 = vpop.permute.xlu0 %8809  ;;  %v3284_v30 = vsel %vm3256_vm10, %v12703_v16, %v8652_v44  ;;  %v3312_v19 = vsel %vm3256_vm10, %v3247_v59, %v8722_v9  ;;  %v15986_v44 = vunpack.i.l.bf16 %v15956_v31  ;;  %v3226_v9 = vsel %vm3191_vm9, %v12550_v36, %v8511_v60 }
 0x34c   :  { %v12941_v43 = vsel %vm3321_vm8, %v3285_v39, %v8816_v49  ;;  %v12944_v8 = vsel %vm3321_vm8, %v3286_v53, %v8817_v29  ;;  %v8812_v26 = vunpack.i.h.bf16 %v8810_v17  ;;  %v8811_v50 = vunpack.i.l.bf16 %v8810_v17  ;;  %v15987_v17 = vld [vmem:[#allocation36_spill] sm:$0xff] }
 0x34d   :  { %v8671_v39 = vunpack.i.l.bf16 %v15985_v21  ;;  %v3311_v53 = vsel %vm3256_vm10, %v3246_v45, %v8721_v48  ;;  %v3230_v0 = vsel %vm3191_vm9, %v12605_v18, %v15986_v44  ;;  %v15988_v45 = vunpack.i.h.bf16 %v15956_v31 }
 0x34e   :  { %v8880_v28 = vpop.permute.xlu2 %8879  ;;  %v12954_v63 = vsel %vm3321_vm8, %v3283_v42, %v8811_v50  ;;  %v12957_v1 = vsel %vm3321_vm8, %v3284_v30, %v8812_v26  ;;  %v8576_v50 = vunpack.i.l.bf16 %v15987_v17  ;;  %v8577_v48 = vunpack.i.h.bf16 %v15987_v17  ;;  %v15992_v17 = vld [vmem:[#allocation76_spill] sm:$0xff] }
 0x34f   :  { %v8882_v29 = vunpack.i.h.bf16 %v8880_v28  ;;  %v8881_v49 = vunpack.i.l.bf16 %v8880_v28  ;;  %v3231_v59 = vsel %vm3191_vm9, %v12609_v5, %v15988_v45  ;;  %v15989_v18 = vpack.c.bf16 %v12530_v11, %v12527_v37  ;;  %v15990_v28 = vld [vmem:[#allocation73_spill] sm:$0xff] }
 0x350   :  { %v3227_v31 = vsel %vm3191_vm9, %v15990_v28, %v8512_v25  ;;  %v3291_v36 = vsel %vm3256_vm10, %v3226_v9, %v8671_v39  ;;  %v8736_v37 = vunpack.i.l.bf16 %v12695_v20  ;;  %v3252_v45 = vsel %vm3191_vm9, %v15992_v17, %v8576_v50  ;;  %v15993_v39 = vld [vmem:[#allocation75_spill] sm:$0xff] }
 0x351   :  { %v12970_v26 = vsel %vm3321_vm8, %v3311_v53, %v8881_v49  ;;  %v12973_v42 = vsel %vm3321_vm8, %v3312_v19, %v8882_v29  ;;  %7458 = vmatmul.msk.bf16.gmra.mxu0 %vm3442_vm11, %v15989_v18  ;;  %v8830_v21 = vpop.permute.xlu1 %8829  ;;  %v15991_v29 = vld [vmem:[#allocation149_spill] sm:$0xff]  ;;  %v3292_v60 = vsel %vm3256_vm10, %v3227_v31, %v8672_v4  ;;  %v8737_v19 = vunpack.i.h.bf16 %v12695_v20  ;;  %v15994_v9 = vld [vmem:[#allocation167_spill] sm:$0xff] }
 0x352   :  { %v8527_v49 = vunpack.i.h.bf16 %v15991_v29  ;;  %v8832_v5 = vunpack.i.h.bf16 %v8830_v21  ;;  %v8831_v53 = vunpack.i.l.bf16 %v8830_v21  ;;  %v8526_v44 = vunpack.i.l.bf16 %v15991_v29  ;;  %v15995_v29 = vld [vmem:[#allocation127_spill] sm:$0xff] }
 0x353   :  { %v12995_v11 = vpop.permute.xlu0 %8824  ;;  %v3253_v4 = vsel %vm3191_vm9, %v15993_v39, %v8577_v48  ;;  %v8607_v21 = vunpack.i.h.bf16 %v15994_v9  ;;  %v8606_v20 = vunpack.i.l.bf16 %v15994_v9  ;;  %v8687_v30 = vunpack.i.h.bf16 %v15995_v29  ;;  %v15996_v39 = vld [vmem:[#allocation165_spill] sm:$0xff] }
 0x354   :  { %v13001_v25 = vsel %vm3321_vm8, %v3291_v36, %v8831_v53  ;;  %v13004_v18 = vsel %vm3321_vm8, %v3292_v60, %v8832_v5  ;;  %v8686_v50 = vunpack.i.l.bf16 %v15995_v29  ;;  %v3317_v5 = vsel %vm3256_vm10, %v3252_v45, %v8736_v37  ;;  %v15999_v45 = vld [vmem:[#allocation69_spill] sm:$0xff] }
 0x355   :  { %v3318_v60 = vsel %vm3256_vm10, %v3253_v4, %v8737_v19  ;;  %v8767_v48 = vunpack.i.h.bf16 %v12786_v6  ;;  %v8766_v17 = vunpack.i.l.bf16 %v12786_v6  ;;  %v8537_v9 = vunpack.i.h.bf16 %v15996_v39 }
 0x356   :  { %v8895_v28 = vpop.permute.xlu2 %8894  ;;  %v3232_v13 = vsel %vm3191_vm9, %v15997_v41, %v8526_v44  ;;  %v3233_v37 = vsel %vm3191_vm9, %v12590_v40, %v8527_v49  ;;  %v8682_v19 = vunpack.i.h.bf16 %v15999_v45  ;;  %v8681_v4 = vunpack.i.l.bf16 %v15999_v45 }
 0x357   :  { %v8897_v53 = vunpack.i.h.bf16 %v8895_v28  ;;  %v8896_v36 = vunpack.i.l.bf16 %v8895_v28  ;;  %v3265_v41 = vsel %vm3256_vm10, %v12641_v2, %v8606_v20  ;;  %v3266_v44 = vsel %vm3256_vm10, %v12645_v56, %v8607_v21  ;;  %v16000_v21 = vld [vmem:[#allocation26_spill] sm:$0xff] }
 0x358   :  { %v3298_v40 = vsel %vm3256_vm10, %v3233_v37, %v8687_v30  ;;  %v8536_v20 = vunpack.i.l.bf16 %v15996_v39  ;;  %v3295_v56 = vsel %vm3256_vm10, %v3230_v0, %v8681_v4  ;;  %v16003_v4 = vld [vmem:[#allocation61_spill] sm:$0xff] }
 0x359   :  { %v13022_v31 = vsel %vm3321_vm8, %v3317_v5, %v8896_v36  ;;  %v13025_v29 = vsel %vm3321_vm8, %v3318_v60, %v8897_v53  ;;  %v8845_v28 = vpop.permute.xlu1 %8844  ;;  %v3297_v53 = vsel %vm3256_vm10, %v3232_v13, %v8686_v50  ;;  %v3330_v36 = vsel %vm3321_vm8, %v3265_v41, %v8766_v17  ;;  %v16001_v17 = vld [vmem:[#allocation59_spill] sm:$0xff] }
 0x35a   :  { %15998 = vst [vmem:[#allocation83_spill] sm:$0xff] %v13022_v31  ;;  %v8847_v16 = vunpack.i.h.bf16 %v8845_v28  ;;  %v8846_v57 = vunpack.i.l.bf16 %v8845_v28  ;;  %v3331_v5 = vsel %vm3321_vm8, %v3266_v44, %v8767_v48  ;;  %v3296_v13 = vsel %vm3256_vm10, %v3231_v59, %v8682_v19 }
 0x35b   :  { %v8840_v49 = vpop.permute.xlu0 %8839  ;;  %v8542_v50 = vunpack.i.h.bf16 %v16000_v21  ;;  %v8541_v48 = vunpack.i.l.bf16 %v16000_v21  ;;  %v8702_v37 = vunpack.i.h.bf16 %v16001_v17  ;;  %v8701_v39 = vunpack.i.l.bf16 %v16001_v17 }
 0x35c   :  { %v13042_v60 = vsel %vm3321_vm8, %v3297_v53, %v8846_v57  ;;  %v13045_v45 = vsel %vm3321_vm8, %v3298_v40, %v8847_v16  ;;  %v8842_v28 = vunpack.i.h.bf16 %v8840_v49  ;;  %v8841_v2 = vunpack.i.l.bf16 %v8840_v49  ;;  %v16005_v53 = vld [vmem:[#allocation60_spill] sm:$0xff] }
 0x35d   :  { %v3390_v0 = vpack.c.bf16 %v3331_v5, %v3330_v36  ;;  %v16002_v19 = vunpack.i.l.bf16 %v15942_v33  ;;  %v16004_v44 = vunpack.i.h.bf16 %v15942_v33  ;;  %v16006_v49 = vunpack.i.l.bf16 %v15952_v35  ;;  %v16009_v5 = vld [vmem:[#allocation9_spill] sm:$0xff] }
 0x35e   :  { %v13055_v57 = vsel %vm3321_vm8, %v3295_v56, %v8841_v2  ;;  %v13058_v16 = vsel %vm3321_vm8, %v3296_v13, %v8842_v28  ;;  %v16007_v28 = vld [vmem:[#allocation10_spill] sm:$0xff]  ;;  %v16008_v36 = vunpack.i.h.bf16 %v15952_v35  ;;  %v16010_v13 = vld [vmem:[#allocation125_spill] sm:$0xff] }
 0x35f   :  { %v3171_v41 = vsel %vm3126_vm6, %v16003_v4, %v16002_v19  ;;  %v3172_v40 = vsel %vm3126_vm6, %v16005_v53, %v16004_v44  ;;  %v3179_v2 = vsel %vm3126_vm6, %v16007_v28, %v16006_v49  ;;  %v8392_v21 = vunpack.i.h.bf16 %v16010_v13  ;;  %v16011_v19 = vld [vmem:[#allocation18_spill] sm:$0xff]  ;;  %v16012_v49 = vld [vmem:[#allocation140_spill] sm:$0xff] }
 0x360   :  { %v3180_v56 = vsel %vm3126_vm6, %v16009_v5, %v16008_v36  ;;  %v8391_v17 = vunpack.i.l.bf16 %v16010_v13  ;;  %v8697_v4 = vunpack.i.h.bf16 %v16011_v19  ;;  %v8696_v33 = vunpack.i.l.bf16 %v16011_v19 }
 0x361   :  { %7459 = vmatmul.msk.bf16.gmra.mxu0 %vm3442_vm11, %v3390_v0  ;;  %v8860_v44 = vpop.permute.xlu1 %8859  ;;  %v3238_v53 = vsel %vm3191_vm9, %v12621_v55, %v8541_v48  ;;  %v3239_v35 = vsel %vm3191_vm9, %v16012_v49, %v8542_v50  ;;  %v3236_v36 = vsel %vm3191_vm9, %v3171_v41, %v8536_v20  ;;  %v3237_v5 = vsel %vm3191_vm9, %v3172_v40, %v8537_v9  ;;  %v16013_v50 = vld [vmem:[#allocation128_spill] sm:$0xff] }
 0x362   :  { %v8862_v28 = vunpack.i.h.bf16 %v8860_v44  ;;  %v8861_v6 = vunpack.i.l.bf16 %v8860_v44  ;;  %v3303_v13 = vsel %vm3256_vm10, %v3238_v53, %v8701_v39  ;;  %v3304_v30 = vsel %vm3256_vm10, %v3239_v35, %v8702_v37  ;;  %v16014_v39 = vld [vmem:[#allocation150_spill] sm:$0xff]  ;;  %v16015_v53 = vld [vmem:[#allocation136_spill] sm:$0xff] }
 0x363   :  { %v8855_v19 = vpop.permute.xlu0 %8854  ;;  %v8552_v49 = vunpack.i.h.bf16 %v16013_v50  ;;  %v3301_v44 = vsel %vm3256_vm10, %v3236_v36, %v8696_v33  ;;  %v3302_v20 = vsel %vm3256_vm10, %v3237_v5, %v8697_v4  ;;  %v8557_v37 = vunpack.i.h.bf16 %v16014_v39  ;;  %v16017_v5 = vld [vmem:[#allocation14_spill] sm:$0xff] }
 0x364   :  { %v13094_v0 = vsel %vm3321_vm8, %v3303_v13, %v8861_v6  ;;  %v13097_v59 = vsel %vm3321_vm8, %v3304_v30, %v8862_v28  ;;  %v8857_v55 = vunpack.i.h.bf16 %v8855_v19  ;;  %v8856_v48 = vunpack.i.l.bf16 %v8855_v19  ;;  %v16016_v28 = vld [vmem:[#allocation13_spill] sm:$0xff]  ;;  %v16018_v19 = vld [vmem:[#allocation132_spill] sm:$0xff] }
 0x365   :  { %v8556_v41 = vunpack.i.l.bf16 %v16014_v39  ;;  %v8551_v40 = vunpack.i.l.bf16 %v16013_v50  ;;  %v8717_v35 = vunpack.i.h.bf16 %v16015_v53  ;;  %v8716_v33 = vunpack.i.l.bf16 %v16015_v53  ;;  %v16020_v39 = vld [vmem:[#allocation72_spill] sm:$0xff] }
 0x366   :  { %v13107_v6 = vsel %vm3321_vm8, %v3301_v44, %v8856_v48  ;;  %v13110_v30 = vsel %vm3321_vm8, %v3302_v20, %v8857_v55  ;;  %v3177_v36 = vsel %vm3126_vm6, %v16016_v28, %v8391_v17  ;;  %v3178_v13 = vsel %vm3126_vm6, %v16017_v5, %v8392_v21  ;;  %v16019_v44 = vld [vmem:[#allocation133_spill] sm:$0xff] }
 0x367   :  { %v8412_v48 = vunpack.i.h.bf16 %v16018_v19  ;;  %v8411_v55 = vunpack.i.l.bf16 %v16018_v19  ;;  %v8407_v20 = vunpack.i.h.bf16 %v16019_v44  ;;  %v8406_v50 = vunpack.i.l.bf16 %v16019_v44 }
 0x368   :  { %v8712_v9 = vunpack.i.h.bf16 %v16020_v39  ;;  %v8711_v53 = vunpack.i.l.bf16 %v16020_v39  ;;  %v3244_v4 = vsel %vm3191_vm9, %v3179_v2, %v8556_v41  ;;  %v3245_v17 = vsel %vm3191_vm9, %v3180_v56, %v8557_v37  ;;  %v16021_v56 = vld [vmem:[#allocation141_spill] sm:$0xff] }
 0x369   :  { %v8875_v14 = vpop.permute.xlu1 %8874  ;;  %v3242_v21 = vsel %vm3191_vm9, %v3177_v36, %v8551_v40  ;;  %v3243_v5 = vsel %vm3191_vm9, %v3178_v13, %v8552_v49  ;;  %v3309_v19 = vsel %vm3256_vm10, %v3244_v4, %v8716_v33  ;;  %v3310_v51 = vsel %vm3256_vm10, %v3245_v17, %v8717_v35  ;;  %v16022_v33 = vld [vmem:[#allocation38_spill] sm:$0xff] }
 0x36a   :  { %v8877_v28 = vunpack.i.h.bf16 %v8875_v14  ;;  %v8876_v3 = vunpack.i.l.bf16 %v8875_v14  ;;  %v8566_v37 = vunpack.i.l.bf16 %v16021_v56  ;;  %v3307_v14 = vsel %vm3256_vm10, %v3242_v21, %v8711_v53  ;;  %v16023_v13 = vld [vmem:[#allocation66_spill] sm:$0xff] }
 0x36b   :  { %v8870_v44 = vpop.permute.xlu0 %8869  ;;  %v3308_v40 = vsel %vm3256_vm10, %v3243_v5, %v8712_v9  ;;  %v8572_v35 = vunpack.i.h.bf16 %v16022_v33  ;;  %v8571_v4 = vunpack.i.l.bf16 %v16022_v33  ;;  %v8567_v36 = vunpack.i.h.bf16 %v16021_v56  ;;  %v16026_v5 = vld [vmem:[#allocation155_spill] sm:$0xff]  ;;  %v16030_v49 = vld [vmem:[#allocation138_spill] sm:$0xff] }
 0x36c   :  { %v13134_v31 = vsel %vm3321_vm8, %v3309_v19, %v8876_v3  ;;  %v13137_v39 = vsel %vm3321_vm8, %v3310_v51, %v8877_v28  ;;  %v8872_v2 = vunpack.i.h.bf16 %v8870_v44  ;;  %v8871_v41 = vunpack.i.l.bf16 %v8870_v44  ;;  %v16024_v28 = vld [vmem:[#allocation94_spill] sm:$0xff]  ;;  %v16027_v44 = vld [vmem:[#allocation12_spill] sm:$0xff] }
 0x36d   :  { %v8732_v17 = vunpack.i.h.bf16 %v16023_v13  ;;  %v8731_v53 = vunpack.i.l.bf16 %v16023_v13  ;;  %v16025_v21 = vunpack.i.h.bf16 %v16024_v28  ;;  %v8727_v9 = vunpack.i.h.bf16 %v16030_v49 }
 0x36e   :  { %v13147_v3 = vsel %vm3321_vm8, %v3307_v14, %v8871_v41  ;;  %v13150_v51 = vsel %vm3321_vm8, %v3308_v40, %v8872_v2  ;;  %v3185_v41 = vsel %vm3126_vm6, %v16027_v44, %v8411_v55  ;;  %v16028_v14 = vld [vmem:[#allocation57_spill] sm:$0xff]  ;;  %v16029_v40 = vld [vmem:[#allocation63_spill] sm:$0xff]  ;;  %v8726_v28 = vunpack.i.l.bf16 %v16030_v49 }
 0x36f   :  { %v3119_v19 = vsel %vm3061_vm5, %v16026_v5, %v16025_v21  ;;  %v3186_v2 = vsel %vm3126_vm6, %v16028_v14, %v8412_v48  ;;  %v3183_v56 = vsel %vm3126_vm6, %v16029_v40, %v8406_v50  ;;  %v16031_v21 = vpack.c.bf16 %v12801_v22, %v12798_v34  ;;  %v16034_v40 = vld [vmem:[#allocation97_spill] sm:$0xff] }
 0x370   :  { %v3184_v33 = vsel %vm3126_vm6, %v3119_v19, %v8407_v20  ;;  %v3248_v13 = vsel %vm3191_vm9, %v3183_v56, %v8566_v37  ;;  %v3250_v5 = vsel %vm3191_vm9, %v3185_v41, %v8571_v4  ;;  %v3251_v48 = vsel %vm3191_vm9, %v3186_v2, %v8572_v35  ;;  %v16033_v35 = vld [vmem:[#allocation54_spill] sm:$0xff] }
 0x371   :  { %7460 = vmatmul.msk.bf16.gmra.mxu0 %vm3442_vm11, %v16031_v21  ;;  %v8890_v55 = vpop.permute.xlu1 %8889  ;;  %v3249_v20 = vsel %vm3191_vm9, %v3184_v33, %v8567_v36  ;;  %v3315_v37 = vsel %vm3256_vm10, %v3250_v5, %v8731_v53  ;;  %v3316_v19 = vsel %vm3256_vm10, %v3251_v48, %v8732_v17  ;;  %v16032_v41 = vmov 0.0   ;;  %v16037_v48 = vld [vmem:[#allocation143_spill] sm:$0xff] }
 0x372   :  { %v8892_v44 = vunpack.i.h.bf16 %v8890_v55  ;;  %v8891_v50 = vunpack.i.l.bf16 %v8890_v55  ;;  %3829 = vst.msk [vmem:[#allocation3 + $0x41] sm:$0x1] %vm3790_vm12, %v16032_v41  ;;  %v8101_v2 = vunpack.i.l.bf16 %v16033_v35  ;;  %v3313_v36 = vsel %vm3256_vm10, %v3248_v13, %v8726_v28  ;;  %v16035_v13 = vld [vmem:[#allocation8_spill] sm:$0xff] }
 0x373   :  { %v8885_v14 = vpop.permute.xlu0 %8884  ;;  %v3314_v53 = vsel %vm3256_vm10, %v3249_v20, %v8727_v9  ;;  %3791 = vst.msk [vmem:[#allocation3] sm:$0x1] %vm3790_vm12, %v16032_v41  ;;  %v8262_v56 = vunpack.i.h.bf16 %v16034_v40  ;;  %v8261_v33 = vunpack.i.l.bf16 %v16034_v40  ;;  %v9924_v9 = vld [vmem:[#allocation2 + $0x318] sm:$0xff]  ;;  %v16036_v28 = vunpack.i.l.bf16 %v16035_v13 }
 0x374   :  { %v13181_v49 = vsel %vm3321_vm8, %v3315_v37, %v8891_v50  ;;  %v13184_v34 = vsel %vm3321_vm8, %v3316_v19, %v8892_v44  ;;  %v8887_v22 = vunpack.i.h.bf16 %v8885_v14  ;;  %v8886_v4 = vunpack.i.l.bf16 %v8885_v14  ;;  %3792 = vst.msk [vmem:[#allocation3 + $0x18] sm:$0x1] %vm3790_vm12, %v16032_v41  ;;  %v16038_v37 = vld [vmem:[#allocation35_spill] sm:$0xff]  ;;  %v16040_v14 = vld [vmem:[#allocation166_spill] sm:$0xff] }
 0x375   :  { %v2929_v5 = vsel %vm25_vm0, %v9924_v9, %v16036_v28  ;;  %v8422_v44 = vunpack.i.h.bf16 %v16037_v48  ;;  %v8421_v50 = vunpack.i.l.bf16 %v16037_v48  ;;  %3793 = vst.msk [vmem:[#allocation3 + $0x30] sm:$0x1] %vm3790_vm12, %v16032_v41  ;;  %v16039_v19 = vunpack.i.h.bf16 %v16038_v37 }
 0x376   :  { %v13198_v21 = vsel %vm3321_vm8, %v3313_v36, %v8886_v4  ;;  %v13201_v55 = vsel %vm3321_vm8, %v3314_v53, %v8887_v22  ;;  %v16041_v4 = vunpack.i.l.bf16 %v16038_v37  ;;  %v16042_v53 = vld [vmem:[#allocation21_spill] sm:$0xff]  ;;  %3794 = vst.msk [vmem:[#allocation3 + $0x48] sm:$0x1] %vm3790_vm12, %v16032_v41  ;;  %v16043_v28 = vunpack.i.h.bf16 %v16033_v35 }
 0x377   :  { %v3414_v20 = vpack.c.bf16 %v13201_v55, %v13198_v21  ;;  %v2995_v22 = vsel %vm2931_vm3, %v16040_v14, %v16039_v19  ;;  %v8582_v40 = vunpack.i.h.bf16 %v16042_v53  ;;  %v8581_v9 = vunpack.i.l.bf16 %v16042_v53  ;;  %3795 = vst.msk [vmem:[#allocation3 + $0x60] sm:$0x1] %vm3790_vm12, %v16032_v41 }
 0x378   :  { %v2994_v36 = vsel %vm2931_vm3, %v2929_v5, %v16041_v4  ;;  %v3060_v48 = vsel %vm2996_vm4, %v2995_v22, %v16043_v28  ;;  %v8742_v17 = vunpack.i.h.bf16 %v12671_v58  ;;  %v8741_v19 = vunpack.i.l.bf16 %v12671_v58  ;;  %3796 = vst.msk [vmem:[#allocation3 + $0x78] sm:$0x1] %vm3790_vm12, %v16032_v41 }
 0x379   :  { %v3059_v13 = vsel %vm2996_vm4, %v2994_v36, %v8101_v2  ;;  %v3125_v37 = vsel %vm3061_vm5, %v3060_v48, %v8262_v56  ;;  %3797 = vst.msk [vmem:[#allocation3 + $0x90] sm:$0x1] %vm3790_vm12, %v16032_v41 }
 0x37a   :  { %v3124_v5 = vsel %vm3061_vm5, %v3059_v13, %v8261_v33  ;;  %v3190_v35 = vsel %vm3126_vm6, %v3125_v37, %v8422_v44  ;;  %3798 = vst.msk [vmem:[#allocation3 + $0xa8] sm:$0x1] %vm3790_vm12, %v16032_v41  ;;  %v13278_v13 = vld [vmem:[%s15263_s2] ss:$0 sm:$0xff]  ;;  %v16047_v37 = vpack.c.bf16 %v12857_v38, %v12854_v10 }
 0x37b   :  { %v3189_v2 = vsel %vm3126_vm6, %v3124_v5, %v8421_v50  ;;  %v8900_v14 = vpop.permute.xlu0 %8899  ;;  %v3255_v22 = vsel %vm3191_vm9, %v3190_v35, %v8582_v40  ;;  %3799 = vst.msk [vmem:[#allocation3 + $0xc0] sm:$0x1] %vm3790_vm12, %v16032_v41  ;;  %v16045_v40 = vld [vmem:[#allocation23_spill] sm:$0xff] }
 0x37c   :  { %v3254_v58 = vsel %vm3191_vm9, %v3189_v2, %v8581_v9  ;;  %v8902_v4 = vunpack.i.h.bf16 %v8900_v14  ;;  %v8901_v36 = vunpack.i.l.bf16 %v8900_v14  ;;  %v3320_v33 = vsel %vm3256_vm10, %v3255_v22, %v8742_v17  ;;  %3800 = vst.msk [vmem:[#allocation3 + $0xd8] sm:$0x1] %vm3790_vm12, %v16032_v41  ;;  %v16044_v17 = vld [vmem:[#allocation137_spill] sm:$0xff] }
 0x37d   :  { %v3319_v56 = vsel %vm3256_vm10, %v3254_v58, %v8741_v19  ;;  %3801 = vst.msk [vmem:[#allocation3 + $0xf0] sm:$0x1] %vm3790_vm12, %v16032_v41  ;;  %v16046_v9 = vpack.c.bf16 %v16044_v17, %v16045_v40  ;;  %v7610_v58 = vld [vmem:[%s15264_s3 + $0x88] sm:$0xff]  ;;  %v16048_v22 = vpack.c.bf16 %v12844_v47, %v12841_v12 }
 0x37e   :  { %v13250_v44 = vsel %vm3321_vm8, %v3319_v56, %v8901_v36  ;;  %v13253_v50 = vsel %vm3321_vm8, %v3320_v33, %v8902_v4  ;;  %3802 = vst.msk [vmem:[#allocation3 + $0x108] sm:$0x1] %vm3790_vm12, %v16032_v41  ;;  %7111 = vmatpush.bf16.msra.mxu3 %v7610_v58  ;;  %v7609_v4 = vld [vmem:[%s15264_s3 + $0x80] sm:$0xff]  ;;  %v16049_v56 = vld [vmem:[#allocation79_spill] sm:$0xff] }
 0x37f   :  { %v3417_v53 = vpack.c.bf16 %v13253_v50, %v13250_v44  ;;  %3803 = vst.msk [vmem:[#allocation3 + $0x120] sm:$0x1] %vm3790_vm12, %v16032_v41  ;;  %v16050_v33 = vld [vmem:[#allocation77_spill] sm:$0xff] }
 0x380   :  { %3804 = vst.msk [vmem:[#allocation3 + $0x138] sm:$0x1] %vm3790_vm12, %v16032_v41  ;;  %v16051_v17 = vpack.c.bf16 %v16049_v56, %v16050_v33 }
 0x381   :  { %7461 = vmatmul.msk.bf16.gmra.mxu0 %vm3442_vm11, %v16046_v9  ;;  %3805 = vst.msk [vmem:[#allocation3 + $0x150] sm:$0x1] %vm3790_vm12, %v16032_v41 }
 0x382   :  { %3806 = vst.msk [vmem:[#allocation3 + $0x168] sm:$0x1] %vm3790_vm12, %v16032_v41  ;;  %7112 = vmatpush.bf16.msra.mxu3 %v7609_v4 }
 0x383   :  { %3807 = vst.msk [vmem:[#allocation3 + $0x180] sm:$0x1] %vm3790_vm12, %v16032_v41 }
 0x384   :  { %3808 = vst.msk [vmem:[#allocation3 + $0x198] sm:$0x1] %vm3790_vm12, %v16032_v41 }
 0x385   :  { %3809 = vst.msk [vmem:[#allocation3 + $0x1b0] sm:$0x1] %vm3790_vm12, %v16032_v41 }
 0x386   :  { %3810 = vst.msk [vmem:[#allocation3 + $0x1c8] sm:$0x1] %vm3790_vm12, %v16032_v41 }
 0x387   :  { %3811 = vst.msk [vmem:[#allocation3 + $0x1e0] sm:$0x1] %vm3790_vm12, %v16032_v41 }
 0x388   :  { %3812 = vst.msk [vmem:[#allocation3 + $0x1f8] sm:$0x1] %vm3790_vm12, %v16032_v41 }
 0x389   :  { %v3552_v28 = vpop.f32.mrf.mxu0  ;;  %3813 = vst.msk [vmem:[#allocation3 + $0x210] sm:$0x1] %vm3790_vm12, %v16032_v41 }
 0x38a   :  { %v3553_v48 = vadd.f32 %v13278_v13, %v3552_v28  ;;  %3814 = vst.msk [vmem:[#allocation3 + $0x228] sm:$0x1] %vm3790_vm12, %v16032_v41 }
 0x38b   :  { %3815 = vst.msk [vmem:[#allocation3 + $0x240] sm:$0x1] %vm3790_vm12, %v16032_v41 }
 0x38c   :  { %v3712_v19 = vmax.f32 %v3553_v48, 0.0  ;;  %3816 = vst.msk [vmem:[#allocation3 + $0x258] sm:$0x1] %vm3790_vm12, %v16032_v41 }
 0x38d   :  { %3817 = vst.msk [vmem:[#allocation3 + $0x270] sm:$0x1] %vm3790_vm12, %v16032_v41 }
 0x38e   :  { %3864 = vst.msk [vmem:[#allocation3 + $0x19] sm:$0xff] %vm3321_vm8, %v3712_v19 }
 0x38f   :  { %3818 = vst.msk [vmem:[#allocation3 + $0x288] sm:$0x1] %vm3790_vm12, %v16032_v41 }
 0x390   :  { %3819 = vst.msk [vmem:[#allocation3 + $0x2a0] sm:$0x1] %vm3790_vm12, %v16032_v41 }
 0x391   :  { %v3554_v5 = vpop.f32.mrf.mxu0  ;;  %7462 = vmatmul.msk.bf16.gmra.mxu0 %vm3442_vm11, %v16047_v37  ;;  %3820 = vst.msk [vmem:[#allocation3 + $0x2b8] sm:$0x1] %vm3790_vm12, %v16032_v41  ;;  %v16052_v37 = vpack.c.bf16 %v12909_v62, %v12906_v52 }
 0x392   :  { %v3555_v2 = vadd.f32 %v13278_v13, %v3554_v5  ;;  %3821 = vst.msk [vmem:[#allocation3 + $0x2d0] sm:$0x1] %vm3790_vm12, %v16032_v41 }
 0x393   :  { %3822 = vst.msk [vmem:[#allocation3 + $0x2e8] sm:$0x1] %vm3790_vm12, %v16032_v41 }
 0x394   :  { %v3713_v35 = vmax.f32 %v3555_v2, 0.0  ;;  %3823 = vst.msk [vmem:[#allocation3 + $0x300] sm:$0x1] %vm3790_vm12, %v16032_v41 }
 0x395   :  { %3824 = vst.msk [vmem:[#allocation3 + $0x318] sm:$0x1] %vm3790_vm12, %v16032_v41  ;;  %v3994_v10 = vld [vmem:[#allocation3 + $0x19] sm:$0xff] }
 0x396   :  { %3865 = vst.msk [vmem:[#allocation3 + $0x21] sm:$0xff] %vm3321_vm8, %v3713_v35  ;;  %v3992_v35 = vld [vmem:[#allocation3 + $0x1] sm:$0xff] }
 0x397   :  { %3825 = vst.msk [vmem:[#allocation3 + $0x330] sm:$0x1] %vm3790_vm12, %v16032_v41 }
 0x398   :  { %3826 = vst.msk [vmem:[#allocation3 + $0x348] sm:$0x1] %vm3790_vm12, %v16032_v41 }
 0x399   :  { %3828 = vst.msk [vmem:[#allocation3 + $0x29] sm:$0x1] %vm3790_vm12, %v16032_v41 }
 0x39a   :  { %3830 = vst.msk [vmem:[#allocation3 + $0x59] sm:$0x1] %vm3790_vm12, %v16032_v41 }
 0x39b   :  { %3831 = vst.msk [vmem:[#allocation3 + $0x71] sm:$0x1] %vm3790_vm12, %v16032_v41 }
 0x39c   :  { %3832 = vst.msk [vmem:[#allocation3 + $0x89] sm:$0x1] %vm3790_vm12, %v16032_v41 }
 0x39d   :  { %v3995_v38 = vld [vmem:[#allocation3 + $0x21] sm:$0xff]  ;;  %3833 = vst.msk [vmem:[#allocation3 + $0xa1] sm:$0x1] %vm3790_vm12, %v16032_v41 }
 0x39e   :  { %v8908_v14 = vpack.i.bf16 %v3995_v38, %v3994_v10  ;;  %3834 = vst.msk [vmem:[#allocation3 + $0xb9] sm:$0x1] %vm3790_vm12, %v16032_v41 }
 0x39f   :  { %3835 = vst.msk [vmem:[#allocation3 + $0xd1] sm:$0x1] %vm3790_vm12, %v16032_v41 }
 0x3a0   :  { %8909 = vrot.lane.b32.xlu2 %v8908_v14, %s9990_s15  ;;  %3836 = vst.msk [vmem:[#allocation3 + $0xe9] sm:$0x1] %vm3790_vm12, %v16032_v41 }
 0x3a1   :  { %7463 = vmatmul.msk.bf16.gmra.mxu0 %vm3442_vm11, %v16048_v22  ;;  %3837 = vst.msk [vmem:[#allocation3 + $0x101] sm:$0x1] %vm3790_vm12, %v16032_v41 }
 0x3a2   :  { %3838 = vst.msk [vmem:[#allocation3 + $0x119] sm:$0x1] %vm3790_vm12, %v16032_v41 }
 0x3a3   :  { %3839 = vst.msk [vmem:[#allocation3 + $0x131] sm:$0x1] %vm3790_vm12, %v16032_v41 }
 0x3a4   :  { %3840 = vst.msk [vmem:[#allocation3 + $0x149] sm:$0x1] %vm3790_vm12, %v16032_v41 }
 0x3a5   :  { %3841 = vst.msk [vmem:[#allocation3 + $0x161] sm:$0x1] %vm3790_vm12, %v16032_v41 }
 0x3a6   :  { %3842 = vst.msk [vmem:[#allocation3 + $0x179] sm:$0x1] %vm3790_vm12, %v16032_v41 }
 0x3a7   :  { %3843 = vst.msk [vmem:[#allocation3 + $0x191] sm:$0x1] %vm3790_vm12, %v16032_v41 }
 0x3a8   :  { %3846 = vst.msk [vmem:[#allocation3 + $0x1d9] sm:$0x1] %vm3790_vm12, %v16032_v41 }
 0x3a9   :  { %3847 = vst.msk [vmem:[#allocation3 + $0x1f1] sm:$0x1] %vm3790_vm12, %v16032_v41 }
 0x3aa   :  { %3848 = vst.msk [vmem:[#allocation3 + $0x209] sm:$0x1] %vm3790_vm12, %v16032_v41 }
 0x3ab   :  { %3849 = vst.msk [vmem:[#allocation3 + $0x221] sm:$0x1] %vm3790_vm12, %v16032_v41 }
 0x3ac   :  { %3850 = vst.msk [vmem:[#allocation3 + $0x239] sm:$0x1] %vm3790_vm12, %v16032_v41 }
 0x3ad   :  { %3851 = vst.msk [vmem:[#allocation3 + $0x251] sm:$0x1] %vm3790_vm12, %v16032_v41 }
 0x3ae   :  { %v3557_v12 = vpop.f32.mrf.mxu0  ;;  %3852 = vst.msk [vmem:[#allocation3 + $0x269] sm:$0x1] %vm3790_vm12, %v16032_v41 }
 0x3af   :  { %v3558_v47 = vadd.f32 %v13278_v13, %v3557_v12  ;;  %3853 = vst.msk [vmem:[#allocation3 + $0x281] sm:$0x1] %vm3790_vm12, %v16032_v41 }
 0x3b0   :  { %3854 = vst.msk [vmem:[#allocation3 + $0x299] sm:$0x1] %vm3790_vm12, %v16032_v41 }
 0x3b1   :  { %v3714_v36 = vmax.f32 %v3558_v47, 0.0  ;;  %7464 = vmatmul.msk.bf16.gmra.mxu0 %vm3442_vm11, %v16051_v17  ;;  %3855 = vst.msk [vmem:[#allocation3 + $0x2b1] sm:$0x1] %vm3790_vm12, %v16032_v41  ;;  %v16053_v17 = vpack.c.bf16 %v12896_v15, %v12893_v27 }
 0x3b2   :  { %3856 = vst.msk [vmem:[#allocation3 + $0x2c9] sm:$0x1] %vm3790_vm12, %v16032_v41 }
 0x3b3   :  { %3866 = vst.msk [vmem:[#allocation3 + $0x31] sm:$0xff] %vm3321_vm8, %v3714_v36 }
 0x3b4   :  { %3857 = vst.msk [vmem:[#allocation3 + $0x2e1] sm:$0x1] %vm3790_vm12, %v16032_v41 }
 0x3b5   :  { %3858 = vst.msk [vmem:[#allocation3 + $0x2f9] sm:$0x1] %vm3790_vm12, %v16032_v41 }
 0x3b6   :  { %v3559_v40 = vpop.f32.mrf.mxu0  ;;  %3859 = vst.msk [vmem:[#allocation3 + $0x311] sm:$0x1] %vm3790_vm12, %v16032_v41 }
 0x3b7   :  { %v3560_v9 = vadd.f32 %v13278_v13, %v3559_v40  ;;  %3860 = vst.msk [vmem:[#allocation3 + $0x329] sm:$0x1] %vm3790_vm12, %v16032_v41 }
 0x3b8   :  { %3861 = vst.msk [vmem:[#allocation3 + $0x341] sm:$0x1] %vm3790_vm12, %v16032_v41 }
 0x3b9   :  { %v3715_v28 = vmax.f32 %v3560_v9, 0.0  ;;  %3779 = vst.msk [vmem:[#allocation3 + $0x10] sm:$0x3] %vm3778_vm13, %v16032_v41 }
 0x3ba   :  { %3782 = vst.msk [vmem:[#allocation3 + $0x1c0] sm:$0x3] %vm3778_vm13, %v16032_v41  ;;  %v3996_v2 = vld [vmem:[#allocation3 + $0x31] sm:$0xff] }
 0x3bb   :  { %3867 = vst.msk [vmem:[#allocation3 + $0x39] sm:$0xff] %vm3321_vm8, %v3715_v28 }
 0x3bc   :  { %3786 = vst.msk [vmem:[#allocation3 + $0x1a8] sm:$0x3] %vm3778_vm13, %v16032_v41 }
 0x3bd   :  { %3789 = vst.msk [vmem:[#allocation3 + $0x358] sm:$0x3] %vm3778_vm13, %v16032_v41 }
 0x3be   :  { %v3562_v48 = vpop.f32.mrf.mxu0  ;;  %3827 = vst.msk [vmem:[#allocation3 + $0x11] sm:$0x1] %vm3790_vm12, %v16032_v41 }
 0x3bf   :  { %v3563_v19 = vadd.f32 %v13278_v13, %v3562_v48  ;;  %3844 = vst.msk [vmem:[#allocation3 + $0x1a9] sm:$0x1] %vm3790_vm12, %v16032_v41 }
 0x3c0   :  { %3845 = vst.msk [vmem:[#allocation3 + $0x1c1] sm:$0x1] %vm3790_vm12, %v16032_v41  ;;  %v3993_v4 = vld [vmem:[#allocation3 + $0x9] sm:$0xff] }
 0x3c1   :  { %v3716_v5 = vmax.f32 %v3563_v19, 0.0  ;;  %7465 = vmatmul.msk.bf16.gmra.mxu0 %vm3442_vm11, %v16052_v37  ;;  %v8903_v12 = vpack.i.bf16 %v3993_v4, %v3992_v35  ;;  %3862 = vst.msk [vmem:[#allocation3 + $0x359] sm:$0x1] %vm3790_vm12, %v16032_v41 }
 0x3c2   :  { %v4441_v10 = vld [vmem:[#allocation3 + $0x32] sm:$0xff]  ;;  %v4442_v38 = vld [vmem:[#allocation3 + $0x3a] sm:$0xff] }
 0x3c3   :  { %v3997_v14 = vld [vmem:[#allocation3 + $0x39] sm:$0xff]  ;;  %3868 = vst.msk [vmem:[#allocation3 + $0x49] sm:$0xff] %vm3321_vm8, %v3716_v5  ;;  %v6429_v58 = vpack.c.bf16 %v4442_v38, %v4441_v10  ;;  %8904 = vrot.lane.b32.xlu1 %v8903_v12, %s9990_s15  ;;  %v16054_v10 = vpack.c.bf16 %v12733_v61, %v12730_v24 }
 0x3c4   :  { %v8913_v22 = vpack.i.bf16 %v3997_v14, %v3996_v2 }
 0x3c5   :  { %7559 = vmatmul.msk.bf16.vlgmr.msra.gmra.mxu3 %vm3321_vm8, %v6429_v58 }
 0x3c6   :  { %8914 = vrot.lane.b32.xlu0 %v8913_v22, %s9990_s15  ;;  %v3564_v52 = vpop.f32.mrf.mxu0 }
 0x3c7   :  { %v3565_v62 = vadd.f32 %v13278_v13, %v3564_v52 }
 0x3c9   :  { %v3717_v47 = vmax.f32 %v3565_v62, 0.0 }
 0x3ca   :  { %v3998_v41 = vld [vmem:[#allocation3 + $0x49] sm:$0xff] }
 0x3cb   :  { %3869 = vst.msk [vmem:[#allocation3 + $0x51] sm:$0xff] %vm3321_vm8, %v3717_v47 }
 0x3ce   :  { %v3567_v36 = vpop.f32.mrf.mxu0 }
 0x3cf   :  { %v3568_v56 = vadd.f32 %v13278_v13, %v3567_v36 }
 0x3d1   :  { %v3718_v33 = vmax.f32 %v3568_v56, 0.0  ;;  %7466 = vmatmul.msk.bf16.gmra.mxu0 %vm3442_vm11, %v16053_v17  ;;  %v16055_v56 = vpack.c.bf16 %v12957_v1, %v12954_v63 }
 0x3d2   :  { %v3999_v40 = vld [vmem:[#allocation3 + $0x51] sm:$0xff] }
 0x3d3   :  { %v4443_v9 = vld [vmem:[#allocation3 + $0x4a] sm:$0xff]  ;;  %v4444_v28 = vld [vmem:[#allocation3 + $0x52] sm:$0xff]  ;;  %3870 = vst.msk [vmem:[#allocation3 + $0x61] sm:$0xff] %vm3321_vm8, %v3718_v33  ;;  %v8918_v48 = vpack.i.bf16 %v3999_v40, %v3998_v41 }
 0x3d4   :  { %v6432_v19 = vpack.c.bf16 %v4444_v28, %v4443_v9 }
 0x3d5   :  { %8919 = vrot.lane.b32.xlu1 %v8918_v48, %s9990_s15 }
 0x3d6   :  { %7560 = vmatmul.msk.bf16.gmra.mxu3 %vm3321_vm8, %v6432_v19  ;;  %v3569_v5 = vpop.f32.mrf.mxu0 }
 0x3d7   :  { %v3570_v37 = vadd.f32 %v13278_v13, %v3569_v5 }
 0x3d9   :  { %v3719_v2 = vmax.f32 %v3570_v37, 0.0 }
 0x3da   :  { %v4000_v38 = vld [vmem:[#allocation3 + $0x61] sm:$0xff] }
 0x3db   :  { %3871 = vst.msk [vmem:[#allocation3 + $0x69] sm:$0xff] %vm3321_vm8, %v3719_v2  ;;  %v16056_v2 = vpack.c.bf16 %v12944_v8, %v12941_v43 }
 0x3de   :  { %v3572_v27 = vpop.f32.mrf.mxu0 }
 0x3df   :  { %v3573_v15 = vadd.f32 %v13278_v13, %v3572_v27 }
 0x3e1   :  { %v3720_v35 = vmax.f32 %v3573_v15, 0.0  ;;  %7467 = vmatmul.msk.bf16.gmra.mxu0 %vm3442_vm11, %v16054_v10 }
 0x3e2   :  { %v4445_v14 = vld [vmem:[#allocation3 + $0x62] sm:$0xff]  ;;  %v4446_v58 = vld [vmem:[#allocation3 + $0x6a] sm:$0xff] }
 0x3e3   :  { %v4001_v22 = vld [vmem:[#allocation3 + $0x69] sm:$0xff]  ;;  %3872 = vst.msk [vmem:[#allocation3 + $0x79] sm:$0xff] %vm3321_vm8, %v3720_v35  ;;  %v6435_v4 = vpack.c.bf16 %v4446_v58, %v4445_v14 }
 0x3e4   :  { %v8923_v12 = vpack.i.bf16 %v4001_v22, %v4000_v38 }
 0x3e6   :  { %7561 = vmatmul.msk.bf16.gmra.mxu3 %vm3321_vm8, %v6435_v4  ;;  %8924 = vrot.lane.b32.xlu2 %v8923_v12, %s9990_s15  ;;  %v3574_v52 = vpop.f32.mrf.mxu0  ;;  %v16057_v12 = vld [vmem:[#allocation7_spill] sm:$0xff] }
 0x3e7   :  { %v3575_v62 = vadd.f32 %v13278_v13, %v3574_v52  ;;  %v7706_v52 = vunpack.i.l.bf16 %v16057_v12 }
 0x3e9   :  { %v3721_v47 = vmax.f32 %v3575_v62, 0.0  ;;  %v275_v62 = vld [vmem:[#allocation2 + $0x1b8] sm:$0xff] }
 0x3ea   :  { %v4002_v33 = vld [vmem:[#allocation3 + $0x79] sm:$0xff] }
 0x3eb   :  { %3873 = vst.msk [vmem:[#allocation3 + $0x81] sm:$0xff] %vm3321_vm8, %v3721_v47  ;;  %v7707_v47 = vunpack.i.h.bf16 %v16057_v12 }
 0x3ee   :  { %v3577_v24 = vpop.f32.mrf.mxu0 }
 0x3ef   :  { %v3578_v61 = vadd.f32 %v13278_v13, %v3577_v24  ;;  %v274_v24 = vld [vmem:[#allocation2 + $0x1b0] sm:$0xff] }
 0x3f1   :  { %v3722_v36 = vmax.f32 %v3578_v61, 0.0  ;;  %7468 = vmatmul.msk.bf16.gmra.mxu0 %vm3442_vm11, %v16055_v56  ;;  %v16058_v61 = vld [vmem:[#allocation20_spill] sm:$0xff] }
 0x3f2   :  { %v4447_v17 = vld [vmem:[#allocation3 + $0x7a] sm:$0xff]  ;;  %v4448_v41 = vld [vmem:[#allocation3 + $0x82] sm:$0xff] }
 0x3f3   :  { %v4003_v40 = vld [vmem:[#allocation3 + $0x81] sm:$0xff]  ;;  %3874 = vst.msk [vmem:[#allocation3 + $0x91] sm:$0xff] %vm3321_vm8, %v3722_v36  ;;  %v6438_v9 = vpack.c.bf16 %v4448_v41, %v4447_v17  ;;  %v7866_v36 = vunpack.i.l.bf16 %v16058_v61 }
 0x3f4   :  { %v8928_v28 = vpack.i.bf16 %v4003_v40, %v4002_v33  ;;  %v16059_v33 = vld [vmem:[#allocation78_spill] sm:$0xff]  ;;  %v7867_v40 = vunpack.i.h.bf16 %v16058_v61 }
 0x3f5   :  { %v16060_v17 = vpack.c.bf16 %v12772_v32, %v16059_v33 }
 0x3f6   :  { %7562 = vmatmul.msk.bf16.gmra.mxu3 %vm3321_vm8, %v6438_v9  ;;  %8929 = vrot.lane.b32.xlu0 %v8928_v28, %s9990_s15  ;;  %v3579_v48 = vpop.f32.mrf.mxu0  ;;  %v16061_v9 = vld [vmem:[#allocation39_spill] sm:$0xff] }
 0x3f7   :  { %v3580_v19 = vadd.f32 %v13278_v13, %v3579_v48  ;;  %v8026_v28 = vunpack.i.l.bf16 %v16061_v9 }
 0x3f9   :  { %v3723_v5 = vmax.f32 %v3580_v19, 0.0 }
 0x3fa   :  { %v4004_v27 = vld [vmem:[#allocation3 + $0x91] sm:$0xff] }
 0x3fb   :  { %3875 = vst.msk [vmem:[#allocation3 + $0x99] sm:$0xff] %vm3321_vm8, %v3723_v5 }
 0x3fe   :  { %v3582_v63 = vpop.f32.mrf.mxu0 }
 0x3ff   :  { %v3583_v1 = vadd.f32 %v13278_v13, %v3582_v63  ;;  %v8027_v63 = vunpack.i.h.bf16 %v16061_v9 }
 0x401   :  { %v3724_v37 = vmax.f32 %v3583_v1, 0.0  ;;  %7469 = vmatmul.msk.bf16.gmra.mxu0 %vm3442_vm11, %v16056_v2  ;;  %v2899_v2 = vsel %vm25_vm0, %v274_v24, %v7706_v52 }
 0x402   :  { %v4005_v15 = vld [vmem:[#allocation3 + $0x99] sm:$0xff] }
 0x403   :  { %v4449_v35 = vld [vmem:[#allocation3 + $0x92] sm:$0xff]  ;;  %v4450_v10 = vld [vmem:[#allocation3 + $0x9a] sm:$0xff]  ;;  %3876 = vst.msk [vmem:[#allocation3 + $0xa9] sm:$0xff] %vm3321_vm8, %v3724_v37  ;;  %v8933_v38 = vpack.i.bf16 %v4005_v15, %v4004_v27 }
 0x404   :  { %v6441_v14 = vpack.c.bf16 %v4450_v10, %v4449_v35  ;;  %v16062_v27 = vld [vmem:[#allocation82_spill] sm:$0xff]  ;;  %v2900_v35 = vsel %vm25_vm0, %v275_v62, %v7707_v47  ;;  %v2964_v10 = vsel %vm2931_vm3, %v2899_v2, %v7866_v36  ;;  %v16065_v47 = vld [vmem:[#allocation64_spill] sm:$0xff] }
 0x405   :  { %8934 = vrot.lane.b32.xlu1 %v8933_v38, %s9990_s15  ;;  %v8187_v32 = vunpack.i.h.bf16 %v16062_v27  ;;  %v8186_v15 = vunpack.i.l.bf16 %v16062_v27  ;;  %v16063_v38 = vld [vmem:[#allocation116_spill] sm:$0xff]  ;;  %v8667_v24 = vunpack.i.h.bf16 %v16065_v47  ;;  %v8666_v61 = vunpack.i.l.bf16 %v16065_v47 }
 0x406   :  { %7563 = vmatmul.msk.bf16.gmra.mxu3 %vm3321_vm8, %v6441_v14  ;;  %v3584_v58 = vpop.f32.mrf.mxu0  ;;  %v8347_v14 = vunpack.i.h.bf16 %v16063_v38 }
 0x407   :  { %v3585_v22 = vadd.f32 %v13278_v13, %v3584_v58  ;;  %v8346_v58 = vunpack.i.l.bf16 %v16063_v38 }
 0x409   :  { %v3725_v4 = vmax.f32 %v3585_v22, 0.0  ;;  %v2965_v22 = vsel %vm2931_vm3, %v2900_v35, %v7867_v40 }
 0x40a   :  { %v4006_v41 = vld [vmem:[#allocation3 + $0xa9] sm:$0xff]  ;;  %v3030_v62 = vsel %vm2996_vm4, %v2965_v22, %v8027_v63 }
 0x40b   :  { %3877 = vst.msk [vmem:[#allocation3 + $0xb1] sm:$0xff] %vm3321_vm8, %v3725_v4  ;;  %v3029_v4 = vsel %vm2996_vm4, %v2964_v10, %v8026_v28  ;;  %v3095_v33 = vsel %vm3061_vm5, %v3030_v62, %v8187_v32  ;;  %v16066_v62 = vpack.c.bf16 %v13004_v18, %v13001_v25 }
 0x40c   :  { %v3160_v9 = vsel %vm3126_vm6, %v3095_v33, %v8347_v14 }
 0x40e   :  { %v3587_v8 = vpop.f32.mrf.mxu0 }
 0x40f   :  { %v3588_v43 = vadd.f32 %v13278_v13, %v3587_v8  ;;  %v16064_v8 = vld [vmem:[#allocation154_spill] sm:$0xff] }
 0x410   :  { %v8506_v12 = vunpack.i.l.bf16 %v16064_v8 }
 0x411   :  { %v3726_v56 = vmax.f32 %v3588_v43, 0.0  ;;  %7470 = vmatmul.msk.bf16.gmra.mxu0 %vm3442_vm11, %v16060_v17  ;;  %v8507_v43 = vunpack.i.h.bf16 %v16064_v8  ;;  %v8827_v17 = vunpack.i.h.bf16 %v12995_v11 }
 0x412   :  { %v4451_v48 = vld [vmem:[#allocation3 + $0xaa] sm:$0xff]  ;;  %v4452_v19 = vld [vmem:[#allocation3 + $0xb2] sm:$0xff] }
 0x413   :  { %v4007_v5 = vld [vmem:[#allocation3 + $0xb1] sm:$0xff]  ;;  %3878 = vst.msk [vmem:[#allocation3 + $0xc1] sm:$0xff] %vm3321_vm8, %v3726_v56  ;;  %v6444_v1 = vpack.c.bf16 %v4452_v19, %v4451_v48  ;;  %v3094_v56 = vsel %vm3061_vm5, %v3029_v4, %v8186_v15  ;;  %v3225_v19 = vsel %vm3191_vm9, %v3160_v9, %v8507_v43 }
 0x414   :  { %v8938_v37 = vpack.i.bf16 %v4007_v5, %v4006_v41  ;;  %v8826_v41 = vunpack.i.l.bf16 %v12995_v11  ;;  %v3159_v40 = vsel %vm3126_vm6, %v3094_v56, %v8346_v58  ;;  %v3290_v63 = vsel %vm3256_vm10, %v3225_v19, %v8667_v24 }
 0x415   :  { %v3224_v48 = vsel %vm3191_vm9, %v3159_v40, %v8506_v12 }
 0x416   :  { %7564 = vmatmul.msk.bf16.gmra.mxu3 %vm3321_vm8, %v6444_v1  ;;  %8939 = vrot.lane.b32.xlu2 %v8938_v37, %s9990_s15  ;;  %v3589_v52 = vpop.f32.mrf.mxu0  ;;  %v3289_v5 = vsel %vm3256_vm10, %v3224_v48, %v8666_v61  ;;  %v3355_v37 = vsel %vm3321_vm8, %v3290_v63, %v8827_v17  ;;  %v16068_v48 = vld [vmem:[#allocation80_spill] sm:$0xff] }
 0x417   :  { %v3590_v36 = vadd.f32 %v13278_v13, %v3589_v52  ;;  %v3354_v1 = vsel %vm3321_vm8, %v3289_v5, %v8826_v41 }
 0x418   :  { %v3402_v27 = vpack.c.bf16 %v3355_v37, %v3354_v1 }
 0x419   :  { %v3727_v28 = vmax.f32 %v3590_v36, 0.0 }
 0x41a   :  { %v4008_v15 = vld [vmem:[#allocation3 + $0xc1] sm:$0xff] }
 0x41b   :  { %3879 = vst.msk [vmem:[#allocation3 + $0xc9] sm:$0xff] %vm3321_vm8, %v3727_v28  ;;  %v16067_v28 = vld [vmem:[#allocation81_spill] sm:$0xff] }
 0x41c   :  { %v16069_v19 = vpack.c.bf16 %v16067_v28, %v16068_v48 }
 0x41e   :  { %v3592_v11 = vpop.f32.mrf.mxu0 }
 0x41f   :  { %v3593_v2 = vadd.f32 %v13278_v13, %v3592_v11 }
 0x421   :  { %v3728_v32 = vmax.f32 %v3593_v2, 0.0  ;;  %7471 = vmatmul.msk.bf16.gmra.mxu0 %vm3442_vm11, %v3402_v27 }
 0x422   :  { %v4453_v35 = vld [vmem:[#allocation3 + $0xc2] sm:$0xff]  ;;  %v4454_v10 = vld [vmem:[#allocation3 + $0xca] sm:$0xff] }
 0x423   :  { %v4009_v38 = vld [vmem:[#allocation3 + $0xc9] sm:$0xff]  ;;  %3880 = vst.msk [vmem:[#allocation3 + $0xd9] sm:$0xff] %vm3321_vm8, %v3728_v32  ;;  %v6447_v14 = vpack.c.bf16 %v4454_v10, %v4453_v35 }
 0x424   :  { %v8943_v58 = vpack.i.bf16 %v4009_v38, %v4008_v15 }
 0x426   :  { %7565 = vmatmul.msk.bf16.gmra.mxu3 %vm3321_vm8, %v6447_v14  ;;  %8944 = vrot.lane.b32.xlu0 %v8943_v58, %s9990_s15  ;;  %v3594_v22 = vpop.f32.mrf.mxu0 }
 0x427   :  { %v3595_v4 = vadd.f32 %v13278_v13, %v3594_v22  ;;  %v16072_v22 = vpack.c.bf16 %v13058_v16, %v13055_v57 }
 0x429   :  { %v3729_v8 = vmax.f32 %v3595_v4, 0.0 }
 0x42a   :  { %v4010_v47 = vld [vmem:[#allocation3 + $0xd9] sm:$0xff] }
 0x42b   :  { %3881 = vst.msk [vmem:[#allocation3 + $0xe1] sm:$0xff] %vm3321_vm8, %v3729_v8 }
 0x42e   :  { %v3597_v43 = vpop.f32.mrf.mxu0 }
 0x42f   :  { %v3598_v12 = vadd.f32 %v13278_v13, %v3597_v43 }
 0x431   :  { %v3730_v52 = vmax.f32 %v3598_v12, 0.0  ;;  %7472 = vmatmul.msk.bf16.gmra.mxu0 %vm3442_vm11, %v16066_v62 }
 0x432   :  { %v4011_v24 = vld [vmem:[#allocation3 + $0xe1] sm:$0xff] }
 0x433   :  { %v4455_v61 = vld [vmem:[#allocation3 + $0xda] sm:$0xff]  ;;  %v4456_v36 = vld [vmem:[#allocation3 + $0xe2] sm:$0xff]  ;;  %3882 = vst.msk [vmem:[#allocation3 + $0xf1] sm:$0xff] %vm3321_vm8, %v3730_v52  ;;  %v8948_v56 = vpack.i.bf16 %v4011_v24, %v4010_v47 }
 0x434   :  { %v6450_v33 = vpack.c.bf16 %v4456_v36, %v4455_v61 }
 0x435   :  { %8949 = vrot.lane.b32.xlu1 %v8948_v56, %s9990_s15 }
 0x436   :  { %7566 = vmatmul.msk.bf16.gmra.mxu3 %vm3321_vm8, %v6450_v33  ;;  %v3599_v17 = vpop.f32.mrf.mxu0 }
 0x437   :  { %v3600_v41 = vadd.f32 %v13278_v13, %v3599_v17  ;;  %v16075_v17 = vpack.c.bf16 %v13045_v45, %v13042_v60 }
 0x439   :  { %v3731_v40 = vmax.f32 %v3600_v41, 0.0 }
 0x43a   :  { %v4012_v5 = vld [vmem:[#allocation3 + $0xf1] sm:$0xff] }
 0x43b   :  { %3883 = vst.msk [vmem:[#allocation3 + $0xf9] sm:$0xff] %vm3321_vm8, %v3731_v40 }
 0x43e   :  { %v3602_v25 = vpop.f32.mrf.mxu0 }
 0x43f   :  { %v3603_v18 = vadd.f32 %v13278_v13, %v3602_v25 }
 0x441   :  { %v3732_v9 = vmax.f32 %v3603_v18, 0.0  ;;  %7473 = vmatmul.msk.bf16.gmra.mxu0 %vm3442_vm11, %v16069_v19 }
 0x442   :  { %v4457_v63 = vld [vmem:[#allocation3 + $0xf2] sm:$0xff]  ;;  %v4458_v1 = vld [vmem:[#allocation3 + $0xfa] sm:$0xff] }
 0x443   :  { %v4013_v37 = vld [vmem:[#allocation3 + $0xf9] sm:$0xff]  ;;  %3884 = vst.msk [vmem:[#allocation3 + $0x109] sm:$0xff] %vm3321_vm8, %v3732_v9  ;;  %v6453_v11 = vpack.c.bf16 %v4458_v1, %v4457_v63 }
 0x444   :  { %v8953_v2 = vpack.i.bf16 %v4013_v37, %v4012_v5 }
 0x446   :  { %7567 = vmatmul.msk.bf16.gmra.mxu3 %vm3321_vm8, %v6453_v11  ;;  %8954 = vrot.lane.b32.xlu2 %v8953_v2, %s9990_s15  ;;  %v3604_v27 = vpop.f32.mrf.mxu0  ;;  %v16078_v11 = vpack.c.bf16 %v12872_v54, %v12869_v7 }
 0x447   :  { %v3605_v32 = vadd.f32 %v13278_v13, %v3604_v27 }
 0x448   :  { %v13544_v15 = vpop.f32.mrf.mxu3 }
 0x449   :  { %16070 = vst [vmem:[#allocation84_spill] sm:$0xff] %v13544_v15  ;;  %v3733_v35 = vmax.f32 %v3605_v32, 0.0  ;;  %v13963_v15 = vld [vmem:[#allocation3 + $0x91] sm:$0xff] }
 0x44a   :  { %v4014_v4 = vld [vmem:[#allocation3 + $0x109] sm:$0xff] }
 0x44b   :  { %3885 = vst.msk [vmem:[#allocation3 + $0x111] sm:$0xff] %vm3321_vm8, %v3733_v35 }
 0x44e   :  { %v3607_v10 = vpop.f32.mrf.mxu0 }
 0x44f   :  { %v3608_v38 = vadd.f32 %v13278_v13, %v3607_v10 }
 0x450   :  { %v13548_v14 = vpop.f32.mrf.mxu3 }
 0x451   :  { %16071 = vst [vmem:[#allocation85_spill] sm:$0xff] %v13548_v14  ;;  %v3734_v58 = vmax.f32 %v3608_v38, 0.0  ;;  %7474 = vmatmul.msk.bf16.gmra.mxu0 %vm3442_vm11, %v16072_v22 }
 0x452   :  { %v4459_v8 = vld [vmem:[#allocation3 + $0x10a] sm:$0xff]  ;;  %v4460_v43 = vld [vmem:[#allocation3 + $0x112] sm:$0xff] }
 0x453   :  { %v4015_v12 = vld [vmem:[#allocation3 + $0x111] sm:$0xff]  ;;  %3886 = vst.msk [vmem:[#allocation3 + $0x121] sm:$0xff] %vm3321_vm8, %v3734_v58  ;;  %v6456_v52 = vpack.c.bf16 %v4460_v43, %v4459_v8 }
 0x454   :  { %v8958_v62 = vpack.i.bf16 %v4015_v12, %v4014_v4 }
 0x456   :  { %7568 = vmatmul.msk.bf16.gmra.mxu3 %vm3321_vm8, %v6456_v52  ;;  %8959 = vrot.lane.b32.xlu0 %v8958_v62, %s9990_s15  ;;  %v3609_v47 = vpop.f32.mrf.mxu0  ;;  %v16081_v52 = vpack.c.bf16 %v13110_v30, %v13107_v6 }
 0x457   :  { %v3610_v24 = vadd.f32 %v13278_v13, %v3609_v47 }
 0x459   :  { %v13558_v61 = vpop.f32.mrf.mxu3  ;;  %v3735_v57 = vmax.f32 %v3610_v24, 0.0 }
 0x45a   :  { %16073 = vst [vmem:[#allocation145_spill] sm:$0xff] %v13558_v61  ;;  %v4016_v41 = vld [vmem:[#allocation3 + $0x121] sm:$0xff] }
 0x45b   :  { %3887 = vst.msk [vmem:[#allocation3 + $0x129] sm:$0xff] %vm3321_vm8, %v3735_v57 }
 0x45e   :  { %v3612_v16 = vpop.f32.mrf.mxu0 }
 0x45f   :  { %v3613_v36 = vadd.f32 %v13278_v13, %v3612_v16 }
 0x461   :  { %v13562_v56 = vpop.f32.mrf.mxu3  ;;  %v3736_v33 = vmax.f32 %v3613_v36, 0.0  ;;  %7475 = vmatmul.msk.bf16.gmra.mxu0 %vm3442_vm11, %v16075_v17 }
 0x462   :  { %16074 = vst [vmem:[#allocation146_spill] sm:$0xff] %v13562_v56  ;;  %v4017_v40 = vld [vmem:[#allocation3 + $0x129] sm:$0xff] }
 0x463   :  { %v4461_v25 = vld [vmem:[#allocation3 + $0x122] sm:$0xff]  ;;  %v4462_v18 = vld [vmem:[#allocation3 + $0x12a] sm:$0xff]  ;;  %3888 = vst.msk [vmem:[#allocation3 + $0x139] sm:$0xff] %vm3321_vm8, %v3736_v33  ;;  %v8963_v9 = vpack.i.bf16 %v4017_v40, %v4016_v41 }
 0x464   :  { %v6459_v28 = vpack.c.bf16 %v4462_v18, %v4461_v25 }
 0x465   :  { %8964 = vrot.lane.b32.xlu1 %v8963_v9, %s9990_s15  ;;  %v16084_v9 = vpack.c.bf16 %v13097_v59, %v13094_v0 }
 0x466   :  { %7569 = vmatmul.msk.bf16.gmra.mxu3 %vm3321_vm8, %v6459_v28  ;;  %v3614_v48 = vpop.f32.mrf.mxu0 }
 0x467   :  { %v3615_v19 = vadd.f32 %v13278_v13, %v3614_v48 }
 0x469   :  { %v13572_v5 = vpop.f32.mrf.mxu3  ;;  %v3737_v60 = vmax.f32 %v3615_v19, 0.0 }
 0x46a   :  { %16076 = vst [vmem:[#allocation148_spill] sm:$0xff] %v13572_v5  ;;  %v4018_v2 = vld [vmem:[#allocation3 + $0x139] sm:$0xff] }
 0x46b   :  { %3889 = vst.msk [vmem:[#allocation3 + $0x141] sm:$0xff] %vm3321_vm8, %v3737_v60  ;;  %v4391_v5 = vld [vmem:[#allocation3 + $0xd9] sm:$0xff] }
 0x46e   :  { %v3617_v45 = vpop.f32.mrf.mxu0 }
 0x46f   :  { %v3618_v63 = vadd.f32 %v13278_v13, %v3617_v45 }
 0x471   :  { %v13576_v1 = vpop.f32.mrf.mxu3  ;;  %v3738_v37 = vmax.f32 %v3618_v63, 0.0  ;;  %7476 = vmatmul.msk.bf16.gmra.mxu0 %vm3442_vm11, %v16078_v11 }
 0x472   :  { %16077 = vst [vmem:[#allocation28_spill] sm:$0xff] %v13576_v1  ;;  %v4463_v27 = vld [vmem:[#allocation3 + $0x13a] sm:$0xff]  ;;  %v4464_v32 = vld [vmem:[#allocation3 + $0x142] sm:$0xff] }
 0x473   :  { %v4019_v35 = vld [vmem:[#allocation3 + $0x141] sm:$0xff]  ;;  %3890 = vst.msk [vmem:[#allocation3 + $0x151] sm:$0xff] %vm3321_vm8, %v3738_v37  ;;  %v6462_v10 = vpack.c.bf16 %v4464_v32, %v4463_v27 }
 0x474   :  { %v8968_v38 = vpack.i.bf16 %v4019_v35, %v4018_v2  ;;  %v7607_v1 = vld [vmem:[%s15264_s3 + $0x70] sm:$0xff] }
 0x476   :  { %7570 = vmatmul.msk.bf16.gmra.mxu3 %vm3321_vm8, %v6462_v10  ;;  %8969 = vrot.lane.b32.xlu2 %v8968_v38, %s9990_s15  ;;  %v3619_v58 = vpop.f32.mrf.mxu0  ;;  %v16087_v38 = vpack.c.bf16 %v12925_v23, %v12922_v46 }
 0x477   :  { %v3620_v22 = vadd.f32 %v13278_v13, %v3619_v58 }
 0x479   :  { %v13586_v4 = vpop.f32.mrf.mxu3  ;;  %v3739_v7 = vmax.f32 %v3620_v22, 0.0 }
 0x47a   :  { %16079 = vst [vmem:[#allocation86_spill] sm:$0xff] %v13586_v4  ;;  %v4020_v62 = vld [vmem:[#allocation3 + $0x151] sm:$0xff] }
 0x47b   :  { %3891 = vst.msk [vmem:[#allocation3 + $0x159] sm:$0xff] %vm3321_vm8, %v3739_v7 }
 0x47e   :  { %v3622_v54 = vpop.f32.mrf.mxu0 }
 0x47f   :  { %v3623_v8 = vadd.f32 %v13278_v13, %v3622_v54 }
 0x481   :  { %v13590_v43 = vpop.f32.mrf.mxu3  ;;  %v3740_v12 = vmax.f32 %v3623_v8, 0.0  ;;  %7477 = vmatmul.msk.bf16.gmra.mxu0 %vm3442_vm11, %v16081_v52 }
 0x482   :  { %16080 = vst [vmem:[#allocation87_spill] sm:$0xff] %v13590_v43  ;;  %v4465_v47 = vld [vmem:[#allocation3 + $0x152] sm:$0xff]  ;;  %v4466_v24 = vld [vmem:[#allocation3 + $0x15a] sm:$0xff] }
 0x483   :  { %v4021_v57 = vld [vmem:[#allocation3 + $0x159] sm:$0xff]  ;;  %3892 = vst.msk [vmem:[#allocation3 + $0x169] sm:$0xff] %vm3321_vm8, %v3740_v12  ;;  %v6465_v16 = vpack.c.bf16 %v4466_v24, %v4465_v47 }
 0x484   :  { %v8973_v36 = vpack.i.bf16 %v4021_v57, %v4020_v62  ;;  %v4024_v62 = vld [vmem:[#allocation3 + $0x1b1] sm:$0xff]  ;;  %v4025_v47 = vld [vmem:[#allocation3 + $0x1b9] sm:$0xff]  ;;  %v4472_v57 = vld [vmem:[#allocation3 + $0x1a2] sm:$0xff] }
 0x485   :  { %v8983_v46 = vpack.i.bf16 %v4025_v47, %v4024_v62  ;;  %v4471_v24 = vld [vmem:[#allocation3 + $0x19a] sm:$0xff] }
 0x486   :  { %7571 = vmatmul.msk.bf16.gmra.mxu3 %vm3321_vm8, %v6465_v16  ;;  %8974 = vrot.lane.b32.xlu0 %v8973_v36, %s9990_s15  ;;  %v3624_v33 = vpop.f32.mrf.mxu0 }
 0x487   :  { %v3625_v17 = vadd.f32 %v13278_v13, %v3624_v33  ;;  %8984 = vrot.lane.b32.xlu2 %v8983_v46, %s9990_s15  ;;  %v16089_v33 = vpack.c.bf16 %v13150_v51, %v13147_v3 }
 0x489   :  { %v13600_v41 = vpop.f32.mrf.mxu3  ;;  %v3741_v6 = vmax.f32 %v3625_v17, 0.0  ;;  %v6474_v17 = vpack.c.bf16 %v4472_v57, %v4471_v24 }
 0x48a   :  { %16082 = vst [vmem:[#allocation88_spill] sm:$0xff] %v13600_v41  ;;  %v4022_v28 = vld [vmem:[#allocation3 + $0x169] sm:$0xff] }
 0x48b   :  { %3893 = vst.msk [vmem:[#allocation3 + $0x171] sm:$0xff] %vm3321_vm8, %v3741_v6 }
 0x48e   :  { %v3627_v30 = vpop.f32.mrf.mxu0 }
 0x48f   :  { %v3628_v40 = vadd.f32 %v13278_v13, %v3627_v30 }
 0x491   :  { %v13604_v25 = vpop.f32.mrf.mxu3  ;;  %v3742_v18 = vmax.f32 %v3628_v40, 0.0  ;;  %7478 = vmatmul.msk.bf16.gmra.mxu0 %vm3442_vm11, %v16084_v9 }
 0x492   :  { %16083 = vst [vmem:[#allocation89_spill] sm:$0xff] %v13604_v25  ;;  %v4023_v48 = vld [vmem:[#allocation3 + $0x171] sm:$0xff] }
 0x493   :  { %v13610_v19 = vld [vmem:[#allocation3 + $0x16a] sm:$0xff]  ;;  %v13612_v60 = vld [vmem:[#allocation3 + $0x172] sm:$0xff]  ;;  %3894 = vst.msk [vmem:[#allocation3 + $0x181] sm:$0xff] %vm3321_vm8, %v3742_v18  ;;  %v8978_v45 = vpack.i.bf16 %v4023_v48, %v4022_v28 }
 0x494   :  { %v6468_v63 = vpack.c.bf16 %v13612_v60, %v13610_v19  ;;  %v9138_v37 = vpack.i.bf16 %v13612_v60, %v13610_v19  ;;  %v4088_v19 = vld [vmem:[#allocation3 + $0x1b2] sm:$0xff]  ;;  %v4089_v60 = vld [vmem:[#allocation3 + $0x1ba] sm:$0xff] }
 0x495   :  { %8979 = vrot.lane.b32.xlu1 %v8978_v45, %s9990_s15 }
 0x496   :  { %7572 = vmatmul.msk.bf16.gmra.mxu3 %vm3321_vm8, %v6468_v63  ;;  %v3629_v59 = vpop.f32.mrf.mxu0 }
 0x497   :  { %v3630_v0 = vadd.f32 %v13278_v13, %v3629_v59  ;;  %v16092_v59 = vpack.c.bf16 %v13137_v39, %v13134_v31 }
 0x499   :  { %v13622_v11 = vpop.f32.mrf.mxu3  ;;  %v3743_v2 = vmax.f32 %v3630_v0, 0.0 }
 0x49a   :  { %16085 = vst [vmem:[#allocation90_spill] sm:$0xff] %v13622_v11  ;;  %v4394_v11 = vld [vmem:[#allocation3 + $0xf9] sm:$0xff] }
 0x49b   :  { %3895 = vst.msk [vmem:[#allocation3 + $0x189] sm:$0xff] %vm3321_vm8, %v3743_v2 }
 0x49e   :  { %v3632_v27 = vpop.f32.mrf.mxu0 }
 0x49f   :  { %v3633_v32 = vadd.f32 %v13278_v13, %v3632_v27 }
 0x4a1   :  { %v3744_v35 = vmax.f32 %v3633_v32, 0.0  ;;  %v13626_v10 = vpop.f32.mrf.mxu3  ;;  %7479 = vmatmul.msk.bf16.gmra.mxu0 %vm3442_vm11, %v16087_v38 }
 0x4a2   :  { %16086 = vst [vmem:[#allocation29_spill] sm:$0xff] %v13626_v10  ;;  %v4469_v58 = vld [vmem:[#allocation3 + $0x182] sm:$0xff]  ;;  %v4470_v22 = vld [vmem:[#allocation3 + $0x18a] sm:$0xff] }
 0x4a3   :  { %3896 = vst.msk [vmem:[#allocation3 + $0x1c9] sm:$0xff] %vm3321_vm8, %v3744_v35  ;;  %v6471_v7 = vpack.c.bf16 %v4470_v22, %v4469_v58 }
 0x4a6   :  { %7573 = vmatmul.msk.bf16.gmra.mxu3 %vm3321_vm8, %v6471_v7  ;;  %v3634_v54 = vpop.f32.mrf.mxu0 }
 0x4a7   :  { %v3635_v8 = vadd.f32 %v13278_v13, %v3634_v54 }
 0x4a9   :  { %v3745_v12 = vmax.f32 %v3635_v8, 0.0  ;;  %v13636_v52 = vpop.f32.mrf.mxu3 }
 0x4aa   :  { %16088 = vst [vmem:[#allocation91_spill] sm:$0xff] %v13636_v52  ;;  %v4026_v6 = vld [vmem:[#allocation3 + $0x1c9] sm:$0xff] }
 0x4ab   :  { %3897 = vst.msk [vmem:[#allocation3 + $0x1d1] sm:$0xff] %vm3321_vm8, %v3745_v12  ;;  %v16094_v12 = vpack.c.bf16 %v12973_v42, %v12970_v26 }
 0x4ae   :  { %v3637_v23 = vpop.f32.mrf.mxu0 }
 0x4af   :  { %v3638_v16 = vadd.f32 %v13278_v13, %v3637_v23 }
 0x4b1   :  { %v3746_v36 = vmax.f32 %v3638_v16, 0.0  ;;  %7480 = vmatmul.msk.bf16.gmra.mxu0 %vm3442_vm11, %v16089_v33  ;;  %v13645_v18 = vpop.f32.mrf.mxu3 }
 0x4b2   :  { %v4027_v30 = vld [vmem:[#allocation3 + $0x1d1] sm:$0xff]  ;;  %16090 = vst [vmem:[#allocation30_spill] sm:$0xff] %v13645_v18 }
 0x4b3   :  { %3898 = vst.msk [vmem:[#allocation3 + $0x1e1] sm:$0xff] %vm3321_vm8, %v3746_v36  ;;  %v8988_v40 = vpack.i.bf16 %v4027_v30, %v4026_v6 }
 0x4b5   :  { %8989 = vrot.lane.b32.xlu0 %v8988_v40, %s9990_s15 }
 0x4b6   :  { %7574 = vmatmul.msk.bf16.gmra.mxu3 %vm3321_vm8, %v6474_v17  ;;  %v3639_v9 = vpop.f32.mrf.mxu0 }
 0x4b7   :  { %v3640_v28 = vadd.f32 %v13278_v13, %v3639_v9 }
 0x4b9   :  { %v3747_v48 = vmax.f32 %v3640_v28, 0.0  ;;  %v13651_v51 = vpop.f32.mrf.mxu3 }
 0x4ba   :  { %16091 = vst [vmem:[#allocation147_spill] sm:$0xff] %v13651_v51  ;;  %v4028_v0 = vld [vmem:[#allocation3 + $0x1e1] sm:$0xff]  ;;  %v4332_v51 = vld [vmem:[#allocation3 + $0x110] sm:$0xff] }
 0x4bb   :  { %3899 = vst.msk [vmem:[#allocation3 + $0x1e9] sm:$0xff] %vm3321_vm8, %v3747_v48 }
 0x4be   :  { %v3642_v3 = vpop.f32.mrf.mxu0 }
 0x4bf   :  { %v3643_v45 = vadd.f32 %v13278_v13, %v3642_v3 }
 0x4c1   :  { %v3748_v63 = vmax.f32 %v3643_v45, 0.0  ;;  %7481 = vmatmul.msk.bf16.gmra.mxu0 %vm3442_vm11, %v16092_v59  ;;  %v13662_v7 = vpop.f32.mrf.mxu3 }
 0x4c2   :  { %v4029_v2 = vld [vmem:[#allocation3 + $0x1e9] sm:$0xff]  ;;  %16093 = vst [vmem:[#allocation37_spill] sm:$0xff] %v13662_v7 }
 0x4c3   :  { %v4473_v27 = vld [vmem:[#allocation3 + $0x1e2] sm:$0xff]  ;;  %v4474_v32 = vld [vmem:[#allocation3 + $0x1ea] sm:$0xff]  ;;  %3900 = vst.msk [vmem:[#allocation3 + $0x1f9] sm:$0xff] %vm3321_vm8, %v3748_v63  ;;  %v8993_v35 = vpack.i.bf16 %v4029_v2, %v4028_v0 }
 0x4c4   :  { %v6477_v38 = vpack.c.bf16 %v4474_v32, %v4473_v27  ;;  %v16099_v32 = vpack.c.bf16 %v13184_v34, %v13181_v49  ;;  %v4398_v7 = vld [vmem:[#allocation3 + $0x129] sm:$0xff] }
 0x4c5   :  { %8994 = vrot.lane.b32.xlu1 %v8993_v35, %s9990_s15 }
 0x4c6   :  { %7575 = vmatmul.msk.bf16.gmra.mxu3 %vm3321_vm8, %v6477_v38  ;;  %v3644_v58 = vpop.f32.mrf.mxu0 }
 0x4c7   :  { %v3645_v22 = vadd.f32 %v13278_v13, %v3644_v58 }
 0x4c9   :  { %v3749_v31 = vmax.f32 %v3645_v22, 0.0  ;;  %v13670_v24 = vpop.f32.mrf.mxu3 }
 0x4ca   :  { %v4030_v62 = vld [vmem:[#allocation3 + $0x1f9] sm:$0xff]  ;;  %16095 = vst [vmem:[#allocation32_spill] sm:$0xff] %v13670_v24  ;;  %v13904_v24 = vld [vmem:[#allocation3 + $0x49] sm:$0xff] }
 0x4cb   :  { %3901 = vst.msk [vmem:[#allocation3 + $0x201] sm:$0xff] %vm3321_vm8, %v3749_v31 }
 0x4ce   :  { %v3647_v39 = vpop.f32.mrf.mxu0 }
 0x4cf   :  { %v3648_v54 = vadd.f32 %v13278_v13, %v3647_v39 }
 0x4d1   :  { %v3750_v8 = vmax.f32 %v3648_v54, 0.0  ;;  %7482 = vmatmul.msk.bf16.gmra.mxu0 %vm3442_vm11, %v16094_v12  ;;  %v13677_v42 = vpop.f32.mrf.mxu3 }
 0x4d2   :  { %v4475_v47 = vld [vmem:[#allocation3 + $0x1fa] sm:$0xff]  ;;  %v4476_v46 = vld [vmem:[#allocation3 + $0x202] sm:$0xff]  ;;  %16096 = vst [vmem:[#allocation33_spill] sm:$0xff] %v13677_v42 }
 0x4d3   :  { %v4031_v23 = vld [vmem:[#allocation3 + $0x201] sm:$0xff]  ;;  %3902 = vst.msk [vmem:[#allocation3 + $0x211] sm:$0xff] %vm3321_vm8, %v3750_v8  ;;  %v6480_v57 = vpack.c.bf16 %v4476_v46, %v4475_v47 }
 0x4d4   :  { %v8998_v16 = vpack.i.bf16 %v4031_v23, %v4030_v62  ;;  %v16101_v46 = vld [vmem:[#allocation83_spill] sm:$0xff] }
 0x4d5   :  { %v16102_v23 = vpack.c.bf16 %v13025_v29, %v16101_v46 }
 0x4d6   :  { %7576 = vmatmul.msk.bf16.gmra.mxu3 %vm3321_vm8, %v6480_v57  ;;  %8999 = vrot.lane.b32.xlu2 %v8998_v16, %s9990_s15  ;;  %v3649_v36 = vpop.f32.mrf.mxu0 }
 0x4d7   :  { %v3650_v33 = vadd.f32 %v13278_v13, %v3649_v36 }
 0x4d9   :  { %v3751_v26 = vmax.f32 %v3650_v33, 0.0  ;;  %v13687_v59 = vpop.f32.mrf.mxu3 }
 0x4da   :  { %v4032_v40 = vld [vmem:[#allocation3 + $0x211] sm:$0xff]  ;;  %16097 = vst [vmem:[#allocation92_spill] sm:$0xff] %v13687_v59 }
 0x4db   :  { %3903 = vst.msk [vmem:[#allocation3 + $0x219] sm:$0xff] %vm3321_vm8, %v3751_v26 }
 0x4de   :  { %v3652_v17 = vpop.f32.mrf.mxu0 }
 0x4df   :  { %v3653_v6 = vadd.f32 %v13278_v13, %v3652_v17 }
 0x4e1   :  { %v3752_v30 = vmax.f32 %v3653_v6, 0.0  ;;  %7483 = vmatmul.msk.bf16.gmra.mxu0 %vm3442_vm11, %v3414_v20  ;;  %v13692_v2 = vpop.f32.mrf.mxu3 }
 0x4e2   :  { %v4477_v9 = vld [vmem:[#allocation3 + $0x212] sm:$0xff]  ;;  %v4478_v28 = vld [vmem:[#allocation3 + $0x21a] sm:$0xff]  ;;  %16098 = vst [vmem:[#allocation93_spill] sm:$0xff] %v13692_v2 }
 0x4e3   :  { %v4033_v48 = vld [vmem:[#allocation3 + $0x219] sm:$0xff]  ;;  %3904 = vst.msk [vmem:[#allocation3 + $0x229] sm:$0xff] %vm3321_vm8, %v3752_v30  ;;  %v6483_v3 = vpack.c.bf16 %v4478_v28, %v4477_v9 }
 0x4e4   :  { %v9003_v45 = vpack.i.bf16 %v4033_v48, %v4032_v40 }
 0x4e6   :  { %7577 = vmatmul.msk.bf16.gmra.mxu3 %vm3321_vm8, %v6483_v3  ;;  %9004 = vrot.lane.b32.xlu0 %v9003_v45, %s9990_s15  ;;  %v3654_v63 = vpop.f32.mrf.mxu0 }
 0x4e7   :  { %v3655_v0 = vadd.f32 %v13278_v13, %v3654_v63 }
 0x4e9   :  { %v3753_v21 = vmax.f32 %v3655_v0, 0.0  ;;  %v13702_v62 = vpop.f32.mrf.mxu3 }
 0x4ea   :  { %v4034_v35 = vld [vmem:[#allocation3 + $0x229] sm:$0xff]  ;;  %16100 = vst [vmem:[#allocation95_spill] sm:$0xff] %v13702_v62 }
 0x4eb   :  { %3905 = vst.msk [vmem:[#allocation3 + $0x231] sm:$0xff] %vm3321_vm8, %v3753_v21 }
 0x4ee   :  { %v3657_v55 = vpop.f32.mrf.mxu0 }
 0x4ef   :  { %v3658_v20 = vadd.f32 %v13278_v13, %v3657_v55 }
 0x4f1   :  { %v3754_v27 = vmax.f32 %v3658_v20, 0.0  ;;  %7484 = vmatmul.msk.bf16.gmra.mxu0 %vm3442_vm11, %v16099_v32  ;;  %v13711_v6 = vpop.f32.mrf.mxu3 }
 0x4f2   :  { %v4035_v38 = vld [vmem:[#allocation3 + $0x231] sm:$0xff]  ;;  %16103 = vst [vmem:[#allocation96_spill] sm:$0xff] %v13711_v6  ;;  %v4318_v6 = vld [vmem:[#allocation3 + $0x68] sm:$0xff] }
 0x4f3   :  { %v4479_v58 = vld [vmem:[#allocation3 + $0x22a] sm:$0xff]  ;;  %v4480_v22 = vld [vmem:[#allocation3 + $0x232] sm:$0xff]  ;;  %3906 = vst.msk [vmem:[#allocation3 + $0x241] sm:$0xff] %vm3321_vm8, %v3754_v27  ;;  %v9008_v31 = vpack.i.bf16 %v4035_v38, %v4034_v35 }
 0x4f4   :  { %v6486_v39 = vpack.c.bf16 %v4480_v22, %v4479_v58 }
 0x4f5   :  { %9009 = vrot.lane.b32.xlu1 %v9008_v31, %s9990_s15 }
 0x4f6   :  { %7578 = vmatmul.msk.bf16.gmra.mxu3 %vm3321_vm8, %v6486_v39  ;;  %v3659_v54 = vpop.f32.mrf.mxu0 }
 0x4f7   :  { %v3660_v8 = vadd.f32 %v13278_v13, %v3659_v54 }
 0x4f9   :  { %v3755_v12 = vmax.f32 %v3660_v8, 0.0  ;;  %v13717_v28 = vpop.f32.mrf.mxu3 }
 0x4fa   :  { %v4036_v57 = vld [vmem:[#allocation3 + $0x241] sm:$0xff]  ;;  %16104 = vst [vmem:[#allocation98_spill] sm:$0xff] %v13717_v28 }
 0x4fb   :  { %3907 = vst.msk [vmem:[#allocation3 + $0x249] sm:$0xff] %vm3321_vm8, %v3755_v12  ;;  %v4317_v28 = vld [vmem:[#allocation3 + $0x60] sm:$0xff] }
 0x4fe   :  { %v3662_v49 = vpop.f32.mrf.mxu0 }
 0x4ff   :  { %v3663_v34 = vadd.f32 %v13278_v13, %v3662_v49 }
 0x501   :  { %v3756_v47 = vmax.f32 %v3663_v34, 0.0  ;;  %7485 = vmatmul.msk.bf16.gmra.mxu0 %vm3442_vm11, %v16102_v23  ;;  %v13733_v50 = vpop.f32.mrf.mxu3 }
 0x502   :  { %v4481_v16 = vld [vmem:[#allocation3 + $0x242] sm:$0xff]  ;;  %v4482_v36 = vld [vmem:[#allocation3 + $0x24a] sm:$0xff]  ;;  %16105 = vst [vmem:[#allocation99_spill] sm:$0xff] %v13733_v50  ;;  %v9198_v50 = vpack.i.bf16 %v4318_v6, %v4317_v28 }
 0x503   :  { %v4037_v33 = vld [vmem:[#allocation3 + $0x249] sm:$0xff]  ;;  %3908 = vst.msk [vmem:[#allocation3 + $0x259] sm:$0xff] %vm3321_vm8, %v3756_v47  ;;  %v6489_v26 = vpack.c.bf16 %v4482_v36, %v4481_v16 }
 0x504   :  { %v9013_v17 = vpack.i.bf16 %v4037_v33, %v4036_v57 }
 0x506   :  { %7579 = vmatmul.msk.bf16.gmra.mxu3 %vm3321_vm8, %v6489_v26  ;;  %9014 = vrot.lane.b32.xlu2 %v9013_v17, %s9990_s15  ;;  %v3664_v30 = vpop.f32.mrf.mxu0 }
 0x507   :  { %v3665_v40 = vadd.f32 %v13278_v13, %v3664_v30 }
 0x509   :  { %v3757_v29 = vmax.f32 %v3665_v40, 0.0  ;;  %v13737_v54 = vpop.f32.mrf.mxu3 }
 0x50a   :  { %v4038_v45 = vld [vmem:[#allocation3 + $0x259] sm:$0xff]  ;;  %16106 = vst [vmem:[#allocation100_spill] sm:$0xff] %v13737_v54 }
 0x50b   :  { %3909 = vst.msk [vmem:[#allocation3 + $0x261] sm:$0xff] %vm3321_vm8, %v3757_v29 }
 0x50e   :  { %v3667_v9 = vpop.f32.mrf.mxu0 }
 0x50f   :  { %v3668_v48 = vadd.f32 %v13278_v13, %v3667_v9  ;;  %v13730_v13 = vld [vmem:[%s15263_s2] ss:$0 sm:$0xff]  ;;  %s9991_s2 = smov 64  }
 0x511   :  { %v3758_v3 = vmax.f32 %v3668_v48, 0.0  ;;  %7486 = vmatmul.msk.bf16.gmra.mxu0 %vm3442_vm11, %v3417_v53  ;;  %v13744_v46 = vpop.f32.mrf.mxu3 }
 0x512   :  { %v4483_v63 = vld [vmem:[#allocation3 + $0x25a] sm:$0xff]  ;;  %v4484_v0 = vld [vmem:[#allocation3 + $0x262] sm:$0xff]  ;;  %16107 = vst [vmem:[#allocation34_spill] sm:$0xff] %v13744_v46 }
 0x513   :  { %v4039_v21 = vld [vmem:[#allocation3 + $0x261] sm:$0xff]  ;;  %3910 = vst.msk [vmem:[#allocation3 + $0x271] sm:$0xff] %vm3321_vm8, %v3758_v3  ;;  %v6492_v55 = vpack.c.bf16 %v4484_v0, %v4483_v63  ;;  %v13930_v46 = vld [vmem:[#allocation3 + $0x39] sm:$0xff] }
 0x514   :  { %v9018_v20 = vpack.i.bf16 %v4039_v21, %v4038_v45 }
 0x516   :  { %7580 = vmatmul.msk.bf16.gmra.mxu3 %vm3321_vm8, %v6492_v55  ;;  %9019 = vrot.lane.b32.xlu0 %v9018_v20, %s9990_s15  ;;  %v3669_v27 = vpop.f32.mrf.mxu0 }
 0x517   :  { %v3670_v44 = vadd.f32 %v13730_v13, %v3669_v27 }
 0x519   :  { %v3759_v53 = vmax.f32 %v3670_v44, 0.0  ;;  %v13750_v9 = vpop.f32.mrf.mxu3 }
 0x51a   :  { %v4040_v58 = vld [vmem:[#allocation3 + $0x271] sm:$0xff]  ;;  %16108 = vst [vmem:[#allocation43_spill] sm:$0xff] %v13750_v9 }
 0x51b   :  { %3911 = vst.msk [vmem:[#allocation3 + $0x279] sm:$0xff] %vm3321_vm8, %v3759_v53  ;;  %v13932_v9 = vld [vmem:[#allocation3 + $0x31] sm:$0xff] }
 0x51c   :  { %v9163_v6 = vpack.i.bf16 %v13930_v46, %v13932_v9 }
 0x51e   :  { %v3672_v32 = vpop.f32.mrf.mxu0 }
 0x51f   :  { %v3673_v35 = vadd.f32 %v13730_v13, %v3672_v32 }
 0x521   :  { %v3760_v38 = vmax.f32 %v3673_v35, 0.0  ;;  %v13755_v0 = vpop.f32.mrf.mxu3 }
 0x522   :  { %v4041_v22 = vld [vmem:[#allocation3 + $0x279] sm:$0xff]  ;;  %16109 = vst [vmem:[#allocation156_spill] sm:$0xff] %v13755_v0  ;;  %v13948_v0 = vld [vmem:[#allocation3 + $0x61] sm:$0xff] }
 0x523   :  { %v4485_v31 = vld [vmem:[#allocation3 + $0x272] sm:$0xff]  ;;  %v4486_v39 = vld [vmem:[#allocation3 + $0x27a] sm:$0xff]  ;;  %3912 = vst.msk [vmem:[#allocation3 + $0x289] sm:$0xff] %vm3321_vm8, %v3760_v38  ;;  %v9023_v8 = vpack.i.bf16 %v4041_v22, %v4040_v58 }
 0x524   :  { %v6495_v12 = vpack.c.bf16 %v4486_v39, %v4485_v31 }
 0x525   :  { %9024 = vrot.lane.b32.xlu1 %v9023_v8, %s9990_s15 }
 0x526   :  { %7581 = vmatmul.msk.bf16.gmra.mxu3 %vm3321_vm8, %v6495_v12  ;;  %v3674_v49 = vpop.f32.mrf.mxu0 }
 0x527   :  { %v3675_v34 = vadd.f32 %v13730_v13, %v3674_v49 }
 0x529   :  { %v3761_v47 = vmax.f32 %v3675_v34, 0.0  ;;  %v13761_v22 = vpop.f32.mrf.mxu3 }
 0x52a   :  { %v4042_v36 = vld [vmem:[#allocation3 + $0x289] sm:$0xff]  ;;  %16110 = vst [vmem:[#allocation101_spill] sm:$0xff] %v13761_v22 }
 0x52b   :  { %3913 = vst.msk [vmem:[#allocation3 + $0x291] sm:$0xff] %vm3321_vm8, %v3761_v47 }
 0x52e   :  { %v3677_v23 = vpop.f32.mrf.mxu0 }
 0x52f   :  { %v3678_v57 = vadd.f32 %v13730_v13, %v3677_v23 }
 0x531   :  { %v3762_v16 = vmax.f32 %v3678_v57, 0.0 }
 0x532   :  { %v4487_v33 = vld [vmem:[#allocation3 + $0x28a] sm:$0xff]  ;;  %v4488_v26 = vld [vmem:[#allocation3 + $0x292] sm:$0xff] }
 0x533   :  { %v4043_v17 = vld [vmem:[#allocation3 + $0x291] sm:$0xff]  ;;  %3914 = vst.msk [vmem:[#allocation3 + $0x2a1] sm:$0xff] %vm3321_vm8, %v3762_v16  ;;  %v6498_v30 = vpack.c.bf16 %v4488_v26, %v4487_v33  ;;  %v13766_v16 = vpop.f32.mrf.mxu3 }
 0x534   :  { %v9028_v40 = vpack.i.bf16 %v4043_v17, %v4042_v36  ;;  %16111 = vst [vmem:[#allocation102_spill] sm:$0xff] %v13766_v16 }
 0x536   :  { %7582 = vmatmul.msk.bf16.gmra.mxu3 %vm3321_vm8, %v6498_v30  ;;  %9029 = vrot.lane.b32.xlu2 %v9028_v40, %s9990_s15  ;;  %v3679_v29 = vpop.f32.mrf.mxu0 }
 0x537   :  { %v3680_v48 = vadd.f32 %v13730_v13, %v3679_v29 }
 0x539   :  { %v3763_v3 = vmax.f32 %v3680_v48, 0.0 }
 0x53a   :  { %v4044_v55 = vld [vmem:[#allocation3 + $0x2a1] sm:$0xff] }
 0x53b   :  { %3915 = vst.msk [vmem:[#allocation3 + $0x2a9] sm:$0xff] %vm3321_vm8, %v3763_v3  ;;  %v13772_v30 = vpop.f32.mrf.mxu3 }
 0x53c   :  { %16112 = vst [vmem:[#allocation103_spill] sm:$0xff] %v13772_v30 }
 0x53e   :  { %v3682_v45 = vpop.f32.mrf.mxu0 }
 0x53f   :  { %v3683_v63 = vadd.f32 %v13730_v13, %v3682_v45 }
 0x541   :  { %v3764_v21 = vmax.f32 %v3683_v63, 0.0 }
 0x542   :  { %v4489_v20 = vld [vmem:[#allocation3 + $0x2a2] sm:$0xff]  ;;  %v4490_v27 = vld [vmem:[#allocation3 + $0x2aa] sm:$0xff] }
 0x543   :  { %v4045_v44 = vld [vmem:[#allocation3 + $0x2a9] sm:$0xff]  ;;  %3916 = vst.msk [vmem:[#allocation3 + $0x2b9] sm:$0xff] %vm3321_vm8, %v3764_v21  ;;  %v6501_v53 = vpack.c.bf16 %v4490_v27, %v4489_v20 }
 0x544   :  { %v9033_v32 = vpack.i.bf16 %v4045_v44, %v4044_v55  ;;  %v13779_v44 = vpop.f32.mrf.mxu3 }
 0x545   :  { %16113 = vst [vmem:[#allocation104_spill] sm:$0xff] %v13779_v44  ;;  %v4320_v44 = vld [vmem:[#allocation3 + $0x80] sm:$0xff] }
 0x546   :  { %7583 = vmatmul.msk.bf16.gmra.mxu3 %vm3321_vm8, %v6501_v53  ;;  %9034 = vrot.lane.b32.xlu0 %v9033_v32, %s9990_s15  ;;  %v3684_v35 = vpop.f32.mrf.mxu0 }
 0x547   :  { %v3685_v38 = vadd.f32 %v13730_v13, %v3684_v35 }
 0x549   :  { %v3765_v58 = vmax.f32 %v3685_v38, 0.0 }
 0x54a   :  { %v4046_v12 = vld [vmem:[#allocation3 + $0x2b9] sm:$0xff] }
 0x54b   :  { %3917 = vst.msk [vmem:[#allocation3 + $0x2c1] sm:$0xff] %vm3321_vm8, %v3765_v58 }
 0x54e   :  { %v3687_v31 = vpop.f32.mrf.mxu0 }
 0x54f   :  { %v3688_v39 = vadd.f32 %v13730_v13, %v3687_v31 }
 0x551   :  { %v3766_v8 = vmax.f32 %v3688_v39, 0.0 }
 0x552   :  { %v4047_v49 = vld [vmem:[#allocation3 + $0x2c1] sm:$0xff] }
 0x553   :  { %v4491_v34 = vld [vmem:[#allocation3 + $0x2ba] sm:$0xff]  ;;  %v4492_v47 = vld [vmem:[#allocation3 + $0x2c2] sm:$0xff]  ;;  %3918 = vst.msk [vmem:[#allocation3 + $0x2d1] sm:$0xff] %vm3321_vm8, %v3766_v8  ;;  %v9038_v23 = vpack.i.bf16 %v4047_v49, %v4046_v12  ;;  %v13783_v12 = vpop.f32.mrf.mxu3 }
 0x554   :  { %v6504_v57 = vpack.c.bf16 %v4492_v47, %v4491_v34  ;;  %16114 = vst [vmem:[#allocation106_spill] sm:$0xff] %v13783_v12  ;;  %v13886_v12 = vld [vmem:[#allocation3 + $0x18] sm:$0xff] }
 0x555   :  { %9039 = vrot.lane.b32.xlu1 %v9038_v23, %s9990_s15  ;;  %v4056_v23 = vld [vmem:[#allocation3 + $0x2] sm:$0xff] }
 0x556   :  { %7584 = vmatmul.msk.bf16.gmra.mxu3 %vm3321_vm8, %v6504_v57  ;;  %v3689_v36 = vpop.f32.mrf.mxu0  ;;  %v4057_v57 = vld [vmem:[#allocation3 + $0xa] sm:$0xff] }
 0x557   :  { %v3690_v33 = vadd.f32 %v13730_v13, %v3689_v36 }
 0x559   :  { %v3767_v26 = vmax.f32 %v3690_v33, 0.0 }
 0x55a   :  { %v4048_v48 = vld [vmem:[#allocation3 + $0x2d1] sm:$0xff] }
 0x55b   :  { %3919 = vst.msk [vmem:[#allocation3 + $0x2d9] sm:$0xff] %vm3321_vm8, %v3767_v26  ;;  %v9058_v26 = vpack.i.bf16 %v4057_v57, %v4056_v23 }
 0x55e   :  { %v3692_v17 = vpop.f32.mrf.mxu0 }
 0x55f   :  { %v3693_v40 = vadd.f32 %v13730_v13, %v3692_v17  ;;  %v13790_v17 = vpop.f32.mrf.mxu3 }
 0x560   :  { %16115 = vst [vmem:[#allocation105_spill] sm:$0xff] %v13790_v17 }
 0x561   :  { %v3768_v29 = vmax.f32 %v3693_v40, 0.0 }
 0x562   :  { %v4493_v3 = vld [vmem:[#allocation3 + $0x2d2] sm:$0xff]  ;;  %v4494_v45 = vld [vmem:[#allocation3 + $0x2da] sm:$0xff] }
 0x563   :  { %v4049_v63 = vld [vmem:[#allocation3 + $0x2d9] sm:$0xff]  ;;  %3920 = vst.msk [vmem:[#allocation3 + $0x2e9] sm:$0xff] %vm3321_vm8, %v3768_v29  ;;  %v6507_v21 = vpack.c.bf16 %v4494_v45, %v4493_v3  ;;  %v4062_v45 = vld [vmem:[#allocation3 + $0x4a] sm:$0xff] }
 0x564   :  { %v9043_v55 = vpack.i.bf16 %v4049_v63, %v4048_v48  ;;  %v4063_v63 = vld [vmem:[#allocation3 + $0x52] sm:$0xff] }
 0x566   :  { %7585 = vmatmul.msk.bf16.gmra.mxu3 %vm3321_vm8, %v6507_v21  ;;  %9044 = vrot.lane.b32.xlu2 %v9043_v55, %s9990_s15  ;;  %v3694_v20 = vpop.f32.mrf.mxu0 }
 0x567   :  { %v3695_v27 = vadd.f32 %v13730_v13, %v3694_v20 }
 0x569   :  { %v3769_v53 = vmax.f32 %v3695_v27, 0.0 }
 0x56a   :  { %v4050_v58 = vld [vmem:[#allocation3 + $0x2e9] sm:$0xff] }
 0x56b   :  { %3921 = vst.msk [vmem:[#allocation3 + $0x2f1] sm:$0xff] %vm3321_vm8, %v3769_v53 }
 0x56e   :  { %v3697_v32 = vpop.f32.mrf.mxu0 }
 0x56f   :  { %v3698_v35 = vadd.f32 %v13730_v13, %v3697_v32  ;;  %v13795_v32 = vpack.i.bf16 %v4063_v63, %v4062_v45 }
 0x571   :  { %v3770_v38 = vmax.f32 %v3698_v35, 0.0 }
 0x572   :  { %v4495_v31 = vld [vmem:[#allocation3 + $0x2ea] sm:$0xff]  ;;  %v4496_v39 = vld [vmem:[#allocation3 + $0x2f2] sm:$0xff] }
 0x573   :  { %v4051_v8 = vld [vmem:[#allocation3 + $0x2f1] sm:$0xff]  ;;  %3922 = vst.msk [vmem:[#allocation3 + $0x301] sm:$0xff] %vm3321_vm8, %v3770_v38  ;;  %v6510_v49 = vpack.c.bf16 %v4496_v39, %v4495_v31  ;;  %v13801_v38 = vpop.f32.mrf.mxu3  ;;  %v4058_v31 = vld [vmem:[#allocation3 + $0x1a] sm:$0xff]  ;;  %v4059_v39 = vld [vmem:[#allocation3 + $0x22] sm:$0xff] }
 0x574   :  { %v9048_v34 = vpack.i.bf16 %v4051_v8, %v4050_v58  ;;  %16116 = vst [vmem:[#allocation157_spill] sm:$0xff] %v13801_v38 }
 0x576   :  { %7586 = vmatmul.msk.bf16.gmra.mxu3 %vm3321_vm8, %v6510_v49  ;;  %9049 = vrot.lane.b32.xlu0 %v9048_v34, %s9990_s15  ;;  %v3699_v47 = vpop.f32.mrf.mxu0  ;;  %v4068_v49 = vld [vmem:[#allocation3 + $0x92] sm:$0xff]  ;;  %v4069_v34 = vld [vmem:[#allocation3 + $0x9a] sm:$0xff] }
 0x577   :  { %v3700_v36 = vadd.f32 %v13730_v13, %v3699_v47  ;;  %v13805_v47 = vpack.i.bf16 %v4059_v39, %v4058_v31  ;;  %v13807_v23 = vpack.i.bf16 %v4069_v34, %v4068_v49  ;;  %v4070_v39 = vld [vmem:[#allocation3 + $0xaa] sm:$0xff]  ;;  %v4060_v49 = vld [vmem:[#allocation3 + $0x32] sm:$0xff] }
 0x579   :  { %v3771_v33 = vmax.f32 %v3700_v36, 0.0 }
 0x57a   :  { %v4052_v3 = vld [vmem:[#allocation3 + $0x301] sm:$0xff] }
 0x57b   :  { %3923 = vst.msk [vmem:[#allocation3 + $0x309] sm:$0xff] %vm3321_vm8, %v3771_v33  ;;  %v4064_v33 = vld [vmem:[#allocation3 + $0x62] sm:$0xff] }
 0x57e   :  { %9059 = vrot.lane.b32.xlu0 %v9058_v26, %s9991_s2  ;;  %v3702_v40 = vpop.f32.mrf.mxu0  ;;  %v4065_v26 = vld [vmem:[#allocation3 + $0x6a] sm:$0xff] }
 0x57f   :  { %v3703_v29 = vadd.f32 %v13730_v13, %v3702_v40  ;;  %v13814_v40 = vpop.f32.mrf.mxu3 }
 0x580   :  { %16117 = vst [vmem:[#allocation107_spill] sm:$0xff] %v13814_v40  ;;  %v4314_v40 = vld [vmem:[#allocation3 + $0x38] sm:$0xff] }
 0x581   :  { %v3772_v48 = vmax.f32 %v3703_v29, 0.0 }
 0x582   :  { %v4053_v21 = vld [vmem:[#allocation3 + $0x309] sm:$0xff] }
 0x583   :  { %v4497_v55 = vld [vmem:[#allocation3 + $0x302] sm:$0xff]  ;;  %v4498_v20 = vld [vmem:[#allocation3 + $0x30a] sm:$0xff]  ;;  %3924 = vst.msk [vmem:[#allocation3 + $0x319] sm:$0xff] %vm3321_vm8, %v3772_v48  ;;  %v9053_v27 = vpack.i.bf16 %v4053_v21, %v4052_v3  ;;  %v4074_v48 = vld [vmem:[#allocation3 + $0xda] sm:$0xff] }
 0x584   :  { %v6513_v53 = vpack.c.bf16 %v4498_v20, %v4497_v55  ;;  %v4075_v3 = vld [vmem:[#allocation3 + $0xe2] sm:$0xff] }
 0x585   :  { %9054 = vrot.lane.b32.xlu1 %v9053_v27, %s9990_s15  ;;  %v13817_v27 = vpack.i.bf16 %v4065_v26, %v4064_v33  ;;  %v4061_v33 = vld [vmem:[#allocation3 + $0x3a] sm:$0xff] }
 0x586   :  { %7587 = vmatmul.msk.bf16.gmra.mxu3 %vm3321_vm8, %v6513_v53  ;;  %9079 = vrot.lane.b32.xlu0 %v13795_v32, %s9991_s2  ;;  %v3704_v35 = vpop.f32.mrf.mxu0 }
 0x587   :  { %v3705_v58 = vadd.f32 %v13730_v13, %v3704_v35  ;;  %v13819_v35 = vpack.i.bf16 %v4075_v3, %v4074_v48  ;;  %v13828_v26 = vpop.f32.mrf.mxu3  ;;  %v13835_v3 = vpack.i.bf16 %v4061_v33, %v4060_v49  ;;  %v13851_v49 = vpop.permute.xlu1 %8904  ;;  %v4082_v33 = vld [vmem:[#allocation3 + $0x13a] sm:$0xff] }
 0x588   :  { %16118 = vst [vmem:[#allocation41_spill] sm:$0xff] %v13828_v26  ;;  %v13902_v26 = vld [vmem:[#allocation3 + $0x51] sm:$0xff] }
 0x589   :  { %v3773_v8 = vmax.f32 %v3705_v58, 0.0  ;;  %v9183_v42 = vpack.i.bf16 %v13902_v26, %v13904_v24 }
 0x58a   :  { %v4054_v45 = vld [vmem:[#allocation3 + $0x319] sm:$0xff] }
 0x58b   :  { %3925 = vst.msk [vmem:[#allocation3 + $0x321] sm:$0xff] %vm3321_vm8, %v3773_v8  ;;  %v4071_v8 = vld [vmem:[#allocation3 + $0xb2] sm:$0xff] }
 0x58d   :  { %9064 = vrot.lane.b32.xlu1 %v13805_v47, %s9991_s2 }
 0x58e   :  { %9094 = vrot.lane.b32.xlu0 %v13807_v23, %s9991_s2  ;;  %v3707_v57 = vpop.f32.mrf.mxu0 }
 0x58f   :  { %v3708_v36 = vadd.f32 %v13730_v13, %v3707_v57  ;;  %v4080_v57 = vld [vmem:[#allocation3 + $0x122] sm:$0xff] }
 0x591   :  { %v3774_v29 = vmax.f32 %v3708_v36, 0.0  ;;  %v4081_v36 = vld [vmem:[#allocation3 + $0x12a] sm:$0xff] }
 0x592   :  { %v4499_v63 = vld [vmem:[#allocation3 + $0x31a] sm:$0xff]  ;;  %v4500_v21 = vld [vmem:[#allocation3 + $0x322] sm:$0xff]  ;;  %v13833_v48 = vpack.i.bf16 %v4081_v36, %v4080_v57 }
 0x593   :  { %v4055_v55 = vld [vmem:[#allocation3 + $0x321] sm:$0xff]  ;;  %3926 = vst.msk [vmem:[#allocation3 + $0x331] sm:$0xff] %vm3321_vm8, %v3774_v29  ;;  %v6516_v20 = vpack.c.bf16 %v4500_v21, %v4499_v63  ;;  %v13831_v29 = vpack.i.bf16 %v4071_v8, %v4070_v39  ;;  %v4076_v63 = vld [vmem:[#allocation3 + $0xf2] sm:$0xff] }
 0x594   :  { %v9068_v53 = vpack.i.bf16 %v4055_v55, %v4054_v45  ;;  %v13845_v45 = vpop.permute.xlu0 %8914  ;;  %v4077_v21 = vld [vmem:[#allocation3 + $0xfa] sm:$0xff] }
 0x595   :  { %9084 = vrot.lane.b32.xlu1 %v13817_v27, %s9991_s2  ;;  %v4066_v55 = vld [vmem:[#allocation3 + $0x7a] sm:$0xff]  ;;  %v13847_v39 = vpack.i.bf16 %v4077_v21, %v4076_v63  ;;  %v4083_v63 = vld [vmem:[#allocation3 + $0x142] sm:$0xff] }
 0x596   :  { %7588 = vmatmul.msk.bf16.gmra.mxu3 %vm3321_vm8, %v6516_v20  ;;  %9109 = vrot.lane.b32.xlu0 %v13819_v35, %s9991_s2  ;;  %v3709_v58 = vpop.f32.mrf.mxu0  ;;  %v4067_v20 = vld [vmem:[#allocation3 + $0x82] sm:$0xff] }
 0x597   :  { %9069 = vrot.lane.b32.xlu2 %v9068_v53, %s9990_s15  ;;  %v3710_v31 = vadd.f32 %v13730_v13, %v3709_v58  ;;  %v13839_v13 = vpop.permute.xlu2 %8909  ;;  %v13849_v8 = vpack.i.bf16 %v4067_v20, %v4066_v55  ;;  %v4072_v21 = vld [vmem:[#allocation3 + $0xc2] sm:$0xff]  ;;  %v4073_v55 = vld [vmem:[#allocation3 + $0xca] sm:$0xff]  ;;  %v13868_v20 = vpack.i.bf16 %v4083_v63, %v4082_v33  ;;  %v9143_v63 = vpack.i.bf16 %v4089_v60, %v4088_v19 }
 0x598   :  { %v13884_v33 = vld [vmem:[#allocation3 + $0x20] sm:$0xff] }
 0x599   :  { %v3775_v34 = vmax.f32 %v3710_v31, 0.0  ;;  %v9168_v17 = vpack.i.bf16 %v13884_v33, %v13886_v12 }
 0x59b   :  { %3927 = vst.msk [vmem:[#allocation3 + $0x339] sm:$0xff] %vm3321_vm8, %v3775_v34  ;;  %v13853_v34 = vpop.f32.mrf.mxu3 }
 0x59c   :  { %16119 = vst [vmem:[#allocation42_spill] sm:$0xff] %v13853_v34  ;;  %v13866_v36 = vpop.permute.xlu0 %8929  ;;  %v4084_v34 = vld [vmem:[#allocation3 + $0x152] sm:$0xff] }
 0x59d   :  { %9099 = vrot.lane.b32.xlu1 %v13831_v29, %s9991_s2 }
 0x59e   :  { %9124 = vrot.lane.b32.xlu0 %v13833_v48, %s9991_s2 }
 0x59f   :  { %9074 = vrot.lane.b32.xlu2 %v13835_v3, %s9991_s2  ;;  %v13858_v57 = vpop.permute.xlu2 %8924 }
 0x5a2   :  { %v4501_v53 = vld [vmem:[#allocation3 + $0x332] sm:$0xff]  ;;  %v4502_v58 = vld [vmem:[#allocation3 + $0x33a] sm:$0xff] }
 0x5a3   :  { %v6519_v31 = vpack.c.bf16 %v4502_v58, %v4501_v53  ;;  %v13870_v53 = vpack.i.bf16 %v4073_v55, %v4072_v21  ;;  %v4078_v21 = vld [vmem:[#allocation3 + $0x10a] sm:$0xff]  ;;  %v4079_v55 = vld [vmem:[#allocation3 + $0x112] sm:$0xff] }
 0x5a5   :  { %9114 = vrot.lane.b32.xlu1 %v13847_v39, %s9991_s2 }
 0x5a6   :  { %7589 = vmatmul.msk.bf16.gmra.mxu3 %vm3321_vm8, %v6519_v31  ;;  %9139 = vrot.lane.b32.xlu0 %v9138_v37, %s9991_s2  ;;  %v13880_v37 = vpop.permute.xlu1 %8919  ;;  %v13882_v31 = vpop.permute.xlu0 %8944 }
 0x5a7   :  { %9089 = vrot.lane.b32.xlu2 %v13849_v8, %s9991_s2  ;;  %v13874_v58 = vpop.permute.xlu2 %8939 }
 0x5ad   :  { %9129 = vrot.lane.b32.xlu1 %v13868_v20, %s9991_s2 }
 0x5ae   :  { %9154 = vrot.lane.b32.xlu0 %v13805_v47, %s9990_s15  ;;  %v13890_v47 = vpack.i.bf16 %v4079_v55, %v4078_v21  ;;  %v13898_v19 = vpop.permute.xlu1 %8934  ;;  %v13900_v60 = vpop.permute.xlu0 %8959  ;;  %v4085_v21 = vld [vmem:[#allocation3 + $0x15a] sm:$0xff]  ;;  %v4313_v55 = vld [vmem:[#allocation3 + $0x30] sm:$0xff] }
 0x5af   :  { %9104 = vrot.lane.b32.xlu2 %v13870_v53, %s9991_s2  ;;  %v13893_v38 = vpop.permute.xlu2 %8954 }
 0x5b5   :  { %9144 = vrot.lane.b32.xlu1 %v9143_v63, %s9991_s2  ;;  %v9158_v63 = vpack.i.bf16 %v4314_v40, %v4313_v55  ;;  %v4090_v40 = vld [vmem:[#allocation3 + $0x1ca] sm:$0xff]  ;;  %v4091_v55 = vld [vmem:[#allocation3 + $0x1d2] sm:$0xff] }
 0x5b6   :  { %9169 = vrot.lane.b32.xlu0 %v9168_v17, %s9992_s28  ;;  %v13908_v17 = vpack.i.bf16 %v4085_v21, %v4084_v34  ;;  %v13916_v2 = vpop.permute.xlu1 %8949  ;;  %v13918_v62 = vpop.permute.xlu0 %8974  ;;  %v9148_v34 = vpack.i.bf16 %v4091_v55, %v4090_v40  ;;  %v13946_v55 = vld [vmem:[#allocation3 + $0x69] sm:$0xff] }
 0x5b7   :  { %9119 = vrot.lane.b32.xlu2 %v13890_v47, %s9991_s2  ;;  %v13911_v59 = vpop.permute.xlu2 %8969  ;;  %16121 = vst [vmem:[#allocation108_spill] sm:$0xff] %v13918_v62  ;;  %v9203_v22 = vpack.i.bf16 %v13946_v55, %v13948_v0  ;;  %v4396_v62 = vld [vmem:[#allocation3 + $0x111] sm:$0xff] }
 0x5b8   :  { %16120 = vst [vmem:[#allocation142_spill] sm:$0xff] %v13911_v59 }
 0x5bd   :  { %9159 = vrot.lane.b32.xlu1 %v9158_v63, %s9991_s2 }
 0x5be   :  { %9184 = vrot.lane.b32.xlu0 %v9183_v42, %s9992_s28  ;;  %v13926_v42 = vpop.permute.xlu1 %8964  ;;  %v13928_v54 = vpop.permute.xlu0 %8989 }
 0x5bf   :  { %9134 = vrot.lane.b32.xlu2 %v13908_v17, %s9991_s2  ;;  %v13922_v21 = vpop.permute.xlu2 %8984  ;;  %16123 = vst [vmem:[#allocation109_spill] sm:$0xff] %v13926_v42 }
 0x5c0   :  { %16122 = vst [vmem:[#allocation45_spill] sm:$0xff] %v13922_v21  ;;  %v4397_v21 = vld [vmem:[#allocation3 + $0x121] sm:$0xff] }
 0x5c1   :  { %16124 = vst [vmem:[#allocation110_spill] sm:$0xff] %v13928_v54  ;;  %v4331_v54 = vld [vmem:[#allocation3 + $0x108] sm:$0xff] }
 0x5c5   :  { %9174 = vrot.lane.b32.xlu1 %v13835_v3, %s9990_s15 }
 0x5c6   :  { %9199 = vrot.lane.b32.xlu0 %v9198_v50, %s9991_s2  ;;  %v13940_v28 = vpop.permute.xlu1 %8979  ;;  %v13942_v3 = vpop.permute.xlu0 %9004 }
 0x5c7   :  { %9149 = vrot.lane.b32.xlu2 %v9148_v34, %s9991_s2  ;;  %16125 = vst [vmem:[#allocation111_spill] sm:$0xff] %v13940_v28  ;;  %v13944_v40 = vpop.permute.xlu2 %8999  ;;  %v4316_v34 = vld [vmem:[#allocation3 + $0x50] sm:$0xff]  ;;  %v8907_v28 = vunpack.i.h.bf16 %v13851_v49 }
 0x5c8   :  { %16126 = vst [vmem:[#allocation112_spill] sm:$0xff] %v13942_v3  ;;  %v13961_v3 = vld [vmem:[#allocation3 + $0x99] sm:$0xff] }
 0x5c9   :  { %16127 = vst [vmem:[#allocation47_spill] sm:$0xff] %v13944_v40  ;;  %v4319_v40 = vld [vmem:[#allocation3 + $0x78] sm:$0xff] }
 0x5ca   :  { %v9218_v14 = vpack.i.bf16 %v4320_v44, %v4319_v40 }
 0x5cd   :  { %9189 = vrot.lane.b32.xlu1 %v9158_v63, %s9992_s28  ;;  %v4315_v63 = vld [vmem:[#allocation3 + $0x48] sm:$0xff] }
 0x5ce   :  { %9214 = vrot.lane.b32.xlu0 %v13817_v27, %s9990_s15  ;;  %v9178_v16 = vpack.i.bf16 %v4316_v34, %v4315_v63  ;;  %v13955_v27 = vpop.permute.xlu1 %8994 }
 0x5cf   :  { %9164 = vrot.lane.b32.xlu2 %v9163_v6, %s9992_s28  ;;  %16128 = vst [vmem:[#allocation52_spill] sm:$0xff] %v13955_v27  ;;  %v13957_v6 = vpop.permute.xlu0 %9019  ;;  %v13959_v30 = vpop.permute.xlu2 %9014 }
 0x5d0   :  { %16129 = vst [vmem:[#allocation152_spill] sm:$0xff] %v13957_v6  ;;  %v4324_v6 = vld [vmem:[#allocation3 + $0xb0] sm:$0xff] }
 0x5d1   :  { %16130 = vst [vmem:[#allocation11_spill] sm:$0xff] %v13959_v30  ;;  %v4323_v30 = vld [vmem:[#allocation3 + $0xa8] sm:$0xff] }
 0x5d2   :  { %v9258_v61 = vpack.i.bf16 %v4324_v6, %v4323_v30 }
 0x5d5   :  { %9204 = vrot.lane.b32.xlu1 %v9203_v22, %s9992_s28  ;;  %v9243_v22 = vpack.i.bf16 %v13961_v3, %v13963_v15 }
 0x5d6   :  { %9229 = vrot.lane.b32.xlu0 %v9198_v50, %s9992_s28  ;;  %v13971_v50 = vpop.permute.xlu1 %9009 }
 0x5d7   :  { %9179 = vrot.lane.b32.xlu2 %v9178_v16, %s9991_s2  ;;  %16131 = vst [vmem:[#allocation49_spill] sm:$0xff] %v13971_v50  ;;  %v13973_v34 = vpop.permute.xlu0 %9034  ;;  %v13975_v63 = vpop.permute.xlu2 %9029 }
 0x5d8   :  { %16132 = vst [vmem:[#allocation161_spill] sm:$0xff] %v13973_v34  ;;  %v13989_v34 = vld [vmem:[#allocation3 + $0x79] sm:$0xff] }
 0x5d9   :  { %16133 = vst [vmem:[#allocation162_spill] sm:$0xff] %v13975_v63  ;;  %v4322_v63 = vld [vmem:[#allocation3 + $0x98] sm:$0xff] }
 0x5dd   :  { %9219 = vrot.lane.b32.xlu1 %v9218_v14, %s9991_s2 }
 0x5de   :  { %9244 = vrot.lane.b32.xlu0 %v9243_v22, %s9992_s28  ;;  %v13981_v44 = vpop.permute.xlu1 %9024  ;;  %v13987_v22 = vld [vmem:[#allocation3 + $0x81] sm:$0xff] }
 0x5df   :  { %9194 = vrot.lane.b32.xlu2 %v13795_v32, %s9990_s15  ;;  %16134 = vst [vmem:[#allocation113_spill] sm:$0xff] %v13981_v44  ;;  %v13985_v32 = vpop.permute.xlu2 %9044  ;;  %v9223_v30 = vpack.i.bf16 %v13987_v22, %v13989_v34  ;;  %v4321_v44 = vld [vmem:[#allocation3 + $0x90] sm:$0xff] }
 0x5e0   :  { %16136 = vst [vmem:[#allocation114_spill] sm:$0xff] %v13985_v32  ;;  %v14006_v32 = vld [vmem:[#allocation3 + $0xb1] sm:$0xff]  ;;  %v9238_v50 = vpack.i.bf16 %v4322_v63, %v4321_v44  ;;  %v4326_v44 = vld [vmem:[#allocation3 + $0xc8] sm:$0xff] }
 0x5e5   :  { %9234 = vrot.lane.b32.xlu1 %v13849_v8, %s9990_s15 }
 0x5e6   :  { %9259 = vrot.lane.b32.xlu0 %v9258_v61, %s9991_s2  ;;  %v14000_v8 = vpop.permute.xlu1 %9039 }
 0x5e7   :  { %9209 = vrot.lane.b32.xlu2 %v9178_v16, %s9992_s28  ;;  %v7600_v16 = vld [vmem:[%s15264_s3 + $0x38] sm:$0xff]  ;;  %16137 = vst [vmem:[#allocation117_spill] sm:$0xff] %v14000_v8 }
 0x5e8   :  { %v13983_v40 = vpop.permute.xlu0 %9049  ;;  %6767 = vmatpush.bf16.msra.mxu1 %v7600_v16  ;;  %v7598_v16 = vld [vmem:[%s15264_s3 + $0x28] sm:$0xff] }
 0x5e9   :  { %16135 = vst [vmem:[#allocation115_spill] sm:$0xff] %v13983_v40 }
 0x5ed   :  { %9249 = vrot.lane.b32.xlu1 %v9218_v14, %s9992_s28  ;;  %v7599_v14 = vld [vmem:[%s15264_s3 + $0x30] sm:$0xff] }
 0x5ee   :  { %9274 = vrot.lane.b32.xlu0 %v13831_v29, %s9990_s15  ;;  %v14011_v29 = vld [vmem:[#allocation3 + $0xa9] sm:$0xff]  ;;  %6768 = vmatpush.bf16.msra.mxu1 %v7599_v14  ;;  %v4325_v14 = vld [vmem:[#allocation3 + $0xc0] sm:$0xff] }
 0x5ef   :  { %9224 = vrot.lane.b32.xlu2 %v9223_v30, %s9992_s28  ;;  %v9263_v30 = vpack.i.bf16 %v14006_v32, %v14011_v29  ;;  %v9278_v27 = vpack.i.bf16 %v4326_v44, %v4325_v14  ;;  %v7605_v14 = vld [vmem:[%s15264_s3 + $0x60] sm:$0xff] }
 0x5f0   :  { %v14002_v6 = vpop.permute.xlu0 %9059 }
 0x5f1   :  { %v14004_v40 = vpop.permute.xlu2 %9069 }
 0x5f2   :  { %16138 = vst [vmem:[#allocation118_spill] sm:$0xff] %v14004_v40  ;;  %v7608_v40 = vld [vmem:[%s15264_s3 + $0x78] sm:$0xff]  ;;  %6769 = vmatpush.bf16.msra.mxu1 %v7598_v16  ;;  %v7606_v16 = vld [vmem:[%s15264_s3 + $0x68] sm:$0xff] }
 0x5f3   :  { %6936 = vmatpush.bf16.msra.mxu2 %v7608_v40  ;;  %v7596_v40 = vld [vmem:[%s15264_s3 + $0x18] sm:$0xff] }
 0x5f5   :  { %9264 = vrot.lane.b32.xlu1 %v9263_v30, %s9992_s28  ;;  %v7597_v30 = vld [vmem:[%s15264_s3 + $0x20] sm:$0xff] }
 0x5f6   :  { %9289 = vrot.lane.b32.xlu0 %v9258_v61, %s9992_s28  ;;  %v4392_v61 = vld [vmem:[#allocation3 + $0xe1] sm:$0xff]  ;;  %6770 = vmatpush.bf16.msra.mxu1 %v7597_v30 }
 0x5f7   :  { %9239 = vrot.lane.b32.xlu2 %v9238_v50, %s9991_s2  ;;  %v14024_v8 = vpop.permute.xlu1 %9054  ;;  %6937 = vmatpush.bf16.msra.mxu2 %v7607_v1  ;;  %v4330_v1 = vld [vmem:[#allocation3 + $0xf8] sm:$0xff] }
 0x5f8   :  { %16139 = vst [vmem:[#allocation50_spill] sm:$0xff] %v14024_v8  ;;  %v14026_v56 = vpop.permute.xlu0 %9079  ;;  %v9303_v8 = vpack.i.bf16 %v4392_v61, %v4391_v5 }
 0x5f9   :  { %v14028_v63 = vpop.permute.xlu2 %9074 }
 0x5fa   :  { %6771 = vmatpush.bf16.msra.mxu1 %v7596_v40  ;;  %v7594_v40 = vld [vmem:[%s15264_s3 + $0x8] sm:$0xff] }
 0x5fb   :  { %6938 = vmatpush.bf16.msra.mxu2 %v7606_v16  ;;  %v7604_v16 = vld [vmem:[%s15264_s3 + $0x58] sm:$0xff] }
 0x5fd   :  { %9279 = vrot.lane.b32.xlu1 %v9278_v27, %s9991_s2 }
 0x5fe   :  { %9304 = vrot.lane.b32.xlu0 %v9303_v8, %s9992_s28  ;;  %v4329_v8 = vld [vmem:[#allocation3 + $0xf0] sm:$0xff] }
 0x5ff   :  { %9254 = vrot.lane.b32.xlu2 %v13807_v23, %s9990_s15  ;;  %v14046_v44 = vpop.permute.xlu1 %9064  ;;  %v7595_v23 = vld [vmem:[%s15264_s3 + $0x10] sm:$0xff]  ;;  %v9318_v30 = vpack.i.bf16 %v4330_v1, %v4329_v8  ;;  %6939 = vmatpush.bf16.msra.mxu2 %v7605_v14 }
 0x600   :  { %v14048_v5 = vpop.permute.xlu0 %9094  ;;  %6772 = vmatpush.bf16.msra.mxu1 %v7595_v23  ;;  %v7603_v8 = vld [vmem:[%s15264_s3 + $0x50] sm:$0xff] }
 0x601   :  { %v14050_v61 = vpop.permute.xlu2 %9089  ;;  %v14082_v14 = vld [vmem:[#allocation3 + $0xc1] sm:$0xff] }
 0x603   :  { %6940 = vmatpush.bf16.msra.mxu2 %v7604_v16  ;;  %v7602_v16 = vld [vmem:[%s15264_s3 + $0x48] sm:$0xff] }
 0x604   :  { %6773 = vmatpush.bf16.msra.mxu1 %v7594_v40 }
 0x605   :  { %9294 = vrot.lane.b32.xlu1 %v13870_v53, %s9990_s15  ;;  %v14074_v53 = vld [vmem:[#allocation3 + $0xc9] sm:$0xff] }
 0x606   :  { %9319 = vrot.lane.b32.xlu0 %v9318_v30, %s9991_s2  ;;  %v9283_v43 = vpack.i.bf16 %v14074_v53, %v14082_v14 }
 0x607   :  { %9269 = vrot.lane.b32.xlu2 %v9238_v50, %s9992_s28  ;;  %v14068_v4 = vpop.permute.xlu1 %9084  ;;  %v7593_v50 = vld [vmem:[%s15264_s3] sm:$0xff]  ;;  %6941 = vmatpush.bf16.msra.mxu2 %v7603_v8 }
 0x608   :  { %v14070_v1 = vpop.permute.xlu0 %9109  ;;  %6774 = vmatpush.bf16.msra.mxu1 %v7593_v50  ;;  %v4328_v50 = vld [vmem:[#allocation3 + $0xe0] sm:$0xff] }
 0x609   :  { %v14072_v23 = vpop.permute.xlu2 %9104 }
 0x60b   :  { %6942 = vmatpush.bf16.msra.mxu2 %v7602_v16 }
 0x60d   :  { %9309 = vrot.lane.b32.xlu1 %v9278_v27, %s9992_s28  ;;  %v7601_v27 = vld [vmem:[%s15264_s3 + $0x40] sm:$0xff] }
 0x60e   :  { %9334 = vrot.lane.b32.xlu0 %v13847_v39, %s9990_s15  ;;  %v4393_v39 = vld [vmem:[#allocation3 + $0xf1] sm:$0xff] }
 0x60f   :  { %9284 = vrot.lane.b32.xlu2 %v9283_v43, %s9992_s28  ;;  %v14090_v40 = vpop.permute.xlu1 %9099  ;;  %v9323_v8 = vpack.i.bf16 %v4394_v11, %v4393_v39  ;;  %v4327_v43 = vld [vmem:[#allocation3 + $0xd8] sm:$0xff]  ;;  %6943 = vmatpush.bf16.msra.mxu2 %v7601_v27  ;;  %v9338_v11 = vpack.i.bf16 %v4332_v51, %v4331_v54  ;;  %v9363_v39 = vpack.i.bf16 %v4398_v7, %v4397_v21  ;;  %v8906_v51 = vunpack.i.l.bf16 %v13851_v49  ;;  %v3929_v21 = vld [vmem:[#allocation3 + $0x8] sm:$0xff] }
 0x610   :  { %v14095_v41 = vpop.permute.xlu0 %9124  ;;  %v9298_v10 = vpack.i.bf16 %v4328_v50, %v4327_v43  ;;  %v4335_v43 = vld [vmem:[#allocation3 + $0x138] sm:$0xff]  ;;  %v9062_v7 = vunpack.i.h.bf16 %v14002_v6  ;;  %v9061_v54 = vunpack.i.l.bf16 %v14002_v6 }
 0x611   :  { %16140 = vst [vmem:[#allocation158_spill] sm:$0xff] %v14095_v41  ;;  %v14097_v25 = vpop.permute.xlu2 %9119 }
 0x612   :  { %16141 = vst [vmem:[#allocation51_spill] sm:$0xff] %v14097_v25 }
 0x615   :  { %9324 = vrot.lane.b32.xlu1 %v9323_v8, %s9992_s28  ;;  %v4336_v8 = vld [vmem:[#allocation3 + $0x140] sm:$0xff] }
 0x616   :  { %9349 = vrot.lane.b32.xlu0 %v9318_v30, %s9992_s28 }
 0x617   :  { %9299 = vrot.lane.b32.xlu2 %v9298_v10, %s9991_s2  ;;  %v14105_v52 = vpop.permute.xlu1 %9114 }
 0x618   :  { %v14107_v18 = vpop.permute.xlu0 %9139 }
 0x619   :  { %16142 = vst [vmem:[#allocation169_spill] sm:$0xff] %v14107_v18  ;;  %v14109_v16 = vpop.permute.xlu2 %9134  ;;  %v9378_v18 = vpack.i.bf16 %v4336_v8, %v4335_v43 }
 0x61a   :  { %16143 = vst [vmem:[#allocation53_spill] sm:$0xff] %v14109_v16 }
 0x61d   :  { %9339 = vrot.lane.b32.xlu1 %v9338_v11, %s9991_s2 }
 0x61e   :  { %9364 = vrot.lane.b32.xlu0 %v9363_v39, %s9992_s28 }
 0x61f   :  { %9314 = vrot.lane.b32.xlu2 %v13819_v35, %s9990_s15  ;;  %v14115_v30 = vpop.permute.xlu1 %9129  ;;  %v3928_v35 = vld [vmem:[#allocation3] sm:$0xff] }
 0x620   :  { %16144 = vst [vmem:[#allocation119_spill] sm:$0xff] %v14115_v30  ;;  %v9155_v50 = vpop.permute.xlu0 %9154 }
 0x621   :  { %v14117_v27 = vpop.permute.xlu2 %9149  ;;  %v9157_v42 = vunpack.i.h.bf16 %v9155_v50  ;;  %v9156_v25 = vunpack.i.l.bf16 %v9155_v50 }
 0x622   :  { %16145 = vst [vmem:[#allocation121_spill] sm:$0xff] %v14117_v27  ;;  %v6041_v27 = vsel %vm3321_vm8, %v3928_v35, %v8906_v51  ;;  %v4184_v51 = vld [vmem:[#allocation3 + $0x19] sm:$0xff] }
 0x623   :  { %v6106_v16 = vsel %vm6105_vm14, %v6041_v27, %v9061_v54  ;;  %v4185_v27 = vld [vmem:[#allocation3 + $0x21] sm:$0xff]  ;;  %v6235_v35 = vsel %vm3321_vm8, %v4184_v51, %v9156_v25  ;;  %v4337_v51 = vld [vmem:[#allocation3 + $0x150] sm:$0xff] }
 0x624   :  { %v4400_v54 = vld [vmem:[#allocation3 + $0x141] sm:$0xff] }
 0x625   :  { %9354 = vrot.lane.b32.xlu1 %v13890_v47, %s9990_s15  ;;  %v6042_v47 = vsel %vm3321_vm8, %v3929_v21, %v8907_v28 }
 0x626   :  { %9379 = vrot.lane.b32.xlu0 %v9378_v18, %s9991_s2  ;;  %v6107_v6 = vsel %vm6105_vm14, %v6042_v47, %v9062_v7  ;;  %v4333_v47 = vld [vmem:[#allocation3 + $0x120] sm:$0xff] }
 0x627   :  { %9329 = vrot.lane.b32.xlu2 %v9298_v10, %s9992_s28  ;;  %v14127_v39 = vpop.permute.xlu1 %9144 }
 0x628   :  { %16146 = vst [vmem:[#allocation120_spill] sm:$0xff] %v14127_v39  ;;  %v9170_v8 = vpop.permute.xlu0 %9169  ;;  %v4395_v39 = vld [vmem:[#allocation3 + $0x109] sm:$0xff] }
 0x629   :  { %v9172_v43 = vunpack.i.h.bf16 %v9170_v8  ;;  %v9171_v49 = vunpack.i.l.bf16 %v9170_v8  ;;  %v9165_v30 = vpop.permute.xlu2 %9164  ;;  %v9343_v8 = vpack.i.bf16 %v4396_v62, %v4395_v39  ;;  %v4334_v62 = vld [vmem:[#allocation3 + $0x128] sm:$0xff] }
 0x62a   :  { %v9167_v50 = vunpack.i.h.bf16 %v9165_v30  ;;  %v9166_v21 = vunpack.i.l.bf16 %v9165_v30 }
 0x62b   :  { %v6171_v10 = vsel %vm6170_vm15, %v6106_v16, %v9171_v49  ;;  %v6172_v59 = vsel %vm6170_vm15, %v6107_v6, %v9172_v43 }
 0x62c   :  { %v6427_v41 = vpack.c.bf16 %v6172_v59, %v6171_v10  ;;  %v6236_v59 = vsel %vm3321_vm8, %v4185_v27, %v9157_v42  ;;  %v9358_v42 = vpack.i.bf16 %v4334_v62, %v4333_v47  ;;  %v4404_v27 = vld [vmem:[#allocation3 + $0x171] sm:$0xff] }
 0x62d   :  { %9369 = vrot.lane.b32.xlu1 %v9338_v11, %s9992_s28  ;;  %v4399_v11 = vld [vmem:[#allocation3 + $0x139] sm:$0xff] }
 0x62e   :  { %9394 = vrot.lane.b32.xlu0 %v13868_v20, %s9990_s15  ;;  %6775 = vmatmul.bf16.vlgmr.msra.gmra.mxu1 %v6427_v41  ;;  %v9383_v20 = vpack.i.bf16 %v4400_v54, %v4399_v11 }
 0x62f   :  { %9344 = vrot.lane.b32.xlu2 %v9343_v8, %s9992_s28  ;;  %v9160_v28 = vpop.permute.xlu1 %9159 }
 0x630   :  { %v9162_v7 = vunpack.i.h.bf16 %v9160_v28  ;;  %v9161_v16 = vunpack.i.l.bf16 %v9160_v28  ;;  %v4338_v28 = vld [vmem:[#allocation3 + $0x158] sm:$0xff] }
 0x631   :  { %v9180_v10 = vpop.permute.xlu2 %9179 }
 0x632   :  { %v6299_v39 = vsel %vm6105_vm14, %v6235_v35, %v9161_v16  ;;  %v6300_v41 = vsel %vm6105_vm14, %v6236_v59, %v9162_v7  ;;  %v8912_v7 = vunpack.i.h.bf16 %v13839_v13  ;;  %v9185_v16 = vpop.permute.xlu0 %9184  ;;  %v4403_v35 = vld [vmem:[#allocation3 + $0x169] sm:$0xff]  ;;  %v9181_v11 = vunpack.i.l.bf16 %v9180_v10 }
 0x633   :  { %v6363_v43 = vsel %vm6170_vm15, %v6299_v39, %v9166_v21  ;;  %v6364_v49 = vsel %vm6170_vm15, %v6300_v41, %v9167_v50  ;;  %v8911_v50 = vunpack.i.l.bf16 %v13839_v13  ;;  %v9182_v21 = vunpack.i.h.bf16 %v9180_v10 }
 0x634   :  { %v6428_v6 = vpack.c.bf16 %v6364_v49, %v6363_v43  ;;  %v9423_v62 = vpack.i.bf16 %v4404_v27, %v4403_v35  ;;  %v9067_v39 = vunpack.i.h.bf16 %v14046_v44  ;;  %v9066_v41 = vunpack.i.l.bf16 %v14046_v44 }
 0x635   :  { %9384 = vrot.lane.b32.xlu1 %v9383_v20, %s9992_s28  ;;  %v9186_v43 = vunpack.i.l.bf16 %v9185_v16  ;;  %v6043_v44 = vsel %vm3321_vm8, %v13886_v12, %v8911_v50  ;;  %v6044_v10 = vsel %vm3321_vm8, %v13884_v33, %v8912_v7  ;;  %v4278_v33 = vld [vmem:[#allocation3 + $0x182] sm:$0xff]  ;;  %v4279_v7 = vld [vmem:[#allocation3 + $0x18a] sm:$0xff]  ;;  %v4402_v50 = vld [vmem:[#allocation3 + $0x159] sm:$0xff] }
 0x636   :  { %9409 = vrot.lane.b32.xlu0 %v9378_v18, %s9992_s28  ;;  %6944 = vmatmul.bf16.vlgmr.msra.gmra.mxu2 %v6428_v6  ;;  %v9398_v18 = vpack.i.bf16 %v4338_v28, %v4337_v51 }
 0x637   :  { %9359 = vrot.lane.b32.xlu2 %v9358_v42, %s9991_s2  ;;  %v9175_v25 = vpop.permute.xlu1 %9174 }
 0x638   :  { %v9177_v30 = vunpack.i.h.bf16 %v9175_v25  ;;  %v9176_v8 = vunpack.i.l.bf16 %v9175_v25  ;;  %v4342_v25 = vld [vmem:[#allocation3 + $0x188] sm:$0xff] }
 0x639   :  { %v9195_v49 = vpop.permute.xlu2 %9194 }
 0x63a   :  { %v6238_v54 = vsel %vm3321_vm8, %v13930_v46, %v9177_v30  ;;  %v6237_v59 = vsel %vm3321_vm8, %v13932_v9, %v9176_v8  ;;  %v9187_v9 = vunpack.i.h.bf16 %v9185_v16  ;;  %v6108_v30 = vsel %vm6105_vm14, %v6043_v44, %v9066_v41  ;;  %v4341_v16 = vld [vmem:[#allocation3 + $0x180] sm:$0xff]  ;;  %v9200_v35 = vpop.permute.xlu0 %9199 }
 0x63b   :  { %v6301_v46 = vsel %vm6105_vm14, %v6237_v59, %v9181_v11  ;;  %v6302_v20 = vsel %vm6105_vm14, %v6238_v54, %v9182_v21  ;;  %v6109_v8 = vsel %vm6105_vm14, %v6044_v10, %v9067_v39  ;;  %v9438_v59 = vpack.i.bf16 %v4342_v25, %v4341_v16 }
 0x63c   :  { %v6365_v28 = vsel %vm6170_vm15, %v6301_v46, %v9186_v43  ;;  %v6366_v27 = vsel %vm6170_vm15, %v6302_v20, %v9187_v9  ;;  %v9197_v21 = vunpack.i.h.bf16 %v9195_v49  ;;  %v9196_v11 = vunpack.i.l.bf16 %v9195_v49  ;;  %v4401_v20 = vld [vmem:[#allocation3 + $0x151] sm:$0xff] }
 0x63d   :  { %9399 = vrot.lane.b32.xlu1 %v9398_v18, %s9991_s2  ;;  %v6431_v12 = vpack.c.bf16 %v6366_v27, %v6365_v28  ;;  %v8917_v39 = vunpack.i.h.bf16 %v13845_v45  ;;  %v8916_v41 = vunpack.i.l.bf16 %v13845_v45  ;;  %v9076_v9 = vunpack.i.l.bf16 %v14028_v63 }
 0x63e   :  { %9424 = vrot.lane.b32.xlu0 %v9423_v62, %s9992_s28  ;;  %v9453_v43 = vpack.i.bf16 %v4279_v7, %v4278_v33  ;;  %v6240_v49 = vsel %vm3321_vm8, %v13902_v26, %v9197_v21  ;;  %v6239_v10 = vsel %vm3321_vm8, %v13904_v24, %v9196_v11  ;;  %v4406_v24 = vld [vmem:[#allocation3 + $0x189] sm:$0xff]  ;;  %v4405_v33 = vld [vmem:[#allocation3 + $0x181] sm:$0xff] }
 0x63f   :  { %9374 = vrot.lane.b32.xlu2 %v13833_v48, %s9990_s15  ;;  %v9190_v13 = vpop.permute.xlu1 %9189  ;;  %v4340_v7 = vld [vmem:[#allocation3 + $0x170] sm:$0xff]  ;;  %v4339_v11 = vld [vmem:[#allocation3 + $0x168] sm:$0xff] }
 0x640   :  { %v9192_v47 = vunpack.i.h.bf16 %v9190_v13  ;;  %v9191_v6 = vunpack.i.l.bf16 %v9190_v13  ;;  %v9403_v13 = vpack.i.bf16 %v4402_v50, %v4401_v20  ;;  %v9443_v50 = vpack.i.bf16 %v4406_v24, %v4405_v33  ;;  %v4344_v20 = vld [vmem:[#allocation3 + $0x1a0] sm:$0xff]  ;;  %v3934_v24 = vld [vmem:[#allocation3 + $0x48] sm:$0xff] }
 0x641   :  { %v9210_v62 = vpop.permute.xlu2 %9209 }
 0x642   :  { %v6173_v48 = vsel %vm6170_vm15, %v6108_v30, %v9191_v6  ;;  %v6174_v51 = vsel %vm6170_vm15, %v6109_v8, %v9192_v47  ;;  %v9202_v47 = vunpack.i.h.bf16 %v9200_v35  ;;  %v9212_v6 = vunpack.i.h.bf16 %v9210_v62  ;;  %v3932_v30 = vld [vmem:[#allocation3 + $0x30] sm:$0xff]  ;;  %v3933_v8 = vld [vmem:[#allocation3 + $0x38] sm:$0xff]  ;;  %v9215_v27 = vpop.permute.xlu0 %9214 }
 0x643   :  { %v6430_v54 = vpack.c.bf16 %v6174_v51, %v6173_v48  ;;  %v9211_v44 = vunpack.i.l.bf16 %v9210_v62  ;;  %v6046_v28 = vsel %vm3321_vm8, %v3933_v8, %v8917_v39  ;;  %v4409_v8 = vld [vmem:[#allocation3 + $0x1e1] sm:$0xff] }
 0x645   :  { %9414 = vrot.lane.b32.xlu1 %v13908_v17, %s9990_s15  ;;  %6780 = vmatmul.bf16.gmra.mxu1 %v6430_v54  ;;  %v9077_v17 = vunpack.i.h.bf16 %v14028_v63  ;;  %v6045_v63 = vsel %vm3321_vm8, %v3932_v30, %v8916_v41  ;;  %v6304_v54 = vsel %vm6105_vm14, %v6240_v49, %v9202_v47  ;;  %v9418_v41 = vpack.i.bf16 %v4340_v7, %v4339_v11  ;;  %v4280_v7 = vld [vmem:[#allocation3 + $0x1ca] sm:$0xff] }
 0x646   :  { %9439 = vrot.lane.b32.xlu0 %v9438_v59, %s9991_s2  ;;  %6949 = vmatmul.bf16.gmra.mxu2 %v6431_v12  ;;  %v6110_v26 = vsel %vm6105_vm14, %v6045_v63, %v9076_v9  ;;  %v9216_v9 = vunpack.i.l.bf16 %v9215_v27 }
 0x647   :  { %9389 = vrot.lane.b32.xlu2 %v9358_v42, %s9992_s28  ;;  %v9205_v46 = vpop.permute.xlu1 %9204  ;;  %v9201_v42 = vunpack.i.l.bf16 %v9200_v35  ;;  %v6111_v48 = vsel %vm6105_vm14, %v6046_v28, %v9077_v17  ;;  %v6175_v51 = vsel %vm6170_vm15, %v6110_v26, %v9211_v44  ;;  %v9217_v17 = vunpack.i.h.bf16 %v9215_v27 }
 0x648   :  { %v9207_v25 = vunpack.i.h.bf16 %v9205_v46  ;;  %v9206_v45 = vunpack.i.l.bf16 %v9205_v46  ;;  %v4343_v46 = vld [vmem:[#allocation3 + $0x198] sm:$0xff] }
 0x649   :  { %v6303_v16 = vsel %vm6105_vm14, %v6239_v10, %v9201_v42  ;;  %v9458_v47 = vpack.i.bf16 %v4344_v20, %v4343_v46  ;;  %v8922_v42 = vunpack.i.h.bf16 %v13880_v37  ;;  %v4276_v10 = vld [vmem:[#allocation3 + $0x16a] sm:$0xff]  ;;  %v9225_v30 = vpop.permute.xlu2 %9224  ;;  %v6242_v26 = vsel %vm3321_vm8, %v13946_v55, %v9217_v17  ;;  %v4347_v20 = vld [vmem:[#allocation3 + $0x1f8] sm:$0xff] }
 0x64a   :  { %v6367_v12 = vsel %vm6170_vm15, %v6303_v16, %v9206_v45  ;;  %v6368_v35 = vsel %vm6170_vm15, %v6304_v54, %v9207_v25  ;;  %v4277_v25 = vld [vmem:[#allocation3 + $0x172] sm:$0xff]  ;;  %v9081_v45 = vunpack.i.l.bf16 %v14026_v56  ;;  %v9226_v55 = vunpack.i.l.bf16 %v9225_v30 }
 0x64b   :  { %v6434_v62 = vpack.c.bf16 %v6368_v35, %v6367_v12  ;;  %v9227_v12 = vunpack.i.h.bf16 %v9225_v30 }
 0x64d   :  { %9429 = vrot.lane.b32.xlu1 %v9398_v18, %s9992_s28  ;;  %v6176_v18 = vsel %vm6170_vm15, %v6111_v48, %v9212_v6  ;;  %v8921_v6 = vunpack.i.l.bf16 %v13880_v37  ;;  %v6241_v48 = vsel %vm3321_vm8, %v13948_v0, %v9216_v9  ;;  %v9433_v37 = vpack.i.bf16 %v4277_v25, %v4276_v10  ;;  %v4153_v10 = vld [vmem:[#allocation3 + $0x1d0] sm:$0xff]  ;;  %v4407_v25 = vld [vmem:[#allocation3 + $0x199] sm:$0xff] }
 0x64e   :  { %9454 = vrot.lane.b32.xlu0 %v9453_v43, %s9990_s15  ;;  %v6433_v21 = vpack.c.bf16 %v6176_v18, %v6175_v51  ;;  %v9230_v43 = vpop.permute.xlu0 %9229  ;;  %v3935_v51 = vld [vmem:[#allocation3 + $0x50] sm:$0xff] }
 0x64f   :  { %9404 = vrot.lane.b32.xlu2 %v9403_v13, %s9992_s28  ;;  %v9220_v39 = vpop.permute.xlu1 %9219  ;;  %v4410_v13 = vld [vmem:[#allocation3 + $0x1e9] sm:$0xff]  ;;  %v9232_v63 = vunpack.i.h.bf16 %v9230_v43  ;;  %v9231_v28 = vunpack.i.l.bf16 %v9230_v43  ;;  %v6048_v18 = vsel %vm3321_vm8, %v3935_v51, %v8922_v42 }
 0x650   :  { %v9222_v44 = vunpack.i.h.bf16 %v9220_v39  ;;  %v9221_v49 = vunpack.i.l.bf16 %v9220_v39  ;;  %v9483_v27 = vpack.i.bf16 %v4410_v13, %v4409_v8  ;;  %v4152_v8 = vld [vmem:[#allocation3 + $0x1c8] sm:$0xff] }
 0x652   :  { %v6305_v16 = vsel %vm6105_vm14, %v6241_v48, %v9221_v49  ;;  %v6306_v54 = vsel %vm6105_vm14, %v6242_v26, %v9222_v44  ;;  %v4284_v44 = vld [vmem:[#allocation3 + $0x1fa] sm:$0xff]  ;;  %v4285_v49 = vld [vmem:[#allocation3 + $0x202] sm:$0xff]  ;;  %v9488_v26 = vpack.i.bf16 %v4153_v10, %v4152_v8  ;;  %v9086_v48 = vunpack.i.l.bf16 %v14068_v4 }
 0x653   :  { %v6369_v39 = vsel %vm6170_vm15, %v6305_v16, %v9226_v55  ;;  %v6370_v46 = vsel %vm6170_vm15, %v6306_v54, %v9227_v12  ;;  %v3937_v12 = vld [vmem:[#allocation3 + $0x68] sm:$0xff] }
 0x654   :  { %v6437_v13 = vpack.c.bf16 %v6370_v46, %v6369_v39  ;;  %v4092_v39 = vld [vmem:[#allocation3 + $0x1e2] sm:$0xff]  ;;  %v4093_v46 = vld [vmem:[#allocation3 + $0x1ea] sm:$0xff] }
 0x655   :  { %9444 = vrot.lane.b32.xlu1 %v9443_v50, %s9992_s28  ;;  %6785 = vmatmul.bf16.gmra.mxu1 %v6433_v21  ;;  %v4281_v50 = vld [vmem:[#allocation3 + $0x1d2] sm:$0xff] }
 0x656   :  { %9469 = vrot.lane.b32.xlu0 %v9438_v59, %s9992_s28  ;;  %6954 = vmatmul.bf16.gmra.mxu2 %v6434_v62  ;;  %v9082_v59 = vunpack.i.h.bf16 %v14026_v56  ;;  %v6047_v56 = vsel %vm3321_vm8, %v3934_v24, %v8921_v6  ;;  %v4348_v62 = vld [vmem:[#allocation3 + $0x200] sm:$0xff]  ;;  %v9473_v17 = vpack.i.bf16 %v4281_v50, %v4280_v7 }
 0x657   :  { %9419 = vrot.lane.b32.xlu2 %v9418_v41, %s9991_s2  ;;  %v9235_v35 = vpop.permute.xlu1 %9234  ;;  %v6112_v0 = vsel %vm6105_vm14, %v6047_v56, %v9081_v45  ;;  %v14221_v43 = vpack.i.bf16 %v4348_v62, %v4347_v20  ;;  %v8927_v45 = vunpack.i.h.bf16 %v13858_v57 }
 0x658   :  { %v6113_v33 = vsel %vm6105_vm14, %v6048_v18, %v9082_v59  ;;  %v6177_v21 = vsel %vm6170_vm15, %v6112_v0, %v9231_v28  ;;  %v9237_v42 = vunpack.i.h.bf16 %v9235_v35  ;;  %v9236_v6 = vunpack.i.l.bf16 %v9235_v35  ;;  %v4408_v59 = vld [vmem:[#allocation3 + $0x1a1] sm:$0xff] }
 0x659   :  { %v6178_v11 = vsel %vm6170_vm15, %v6113_v33, %v9232_v63  ;;  %v8926_v63 = vunpack.i.l.bf16 %v13858_v57  ;;  %v9087_v28 = vunpack.i.h.bf16 %v14068_v4  ;;  %v9463_v51 = vpack.i.bf16 %v4408_v59, %v4407_v25  ;;  %v3936_v57 = vld [vmem:[#allocation3 + $0x60] sm:$0xff]  ;;  %v4352_v59 = vld [vmem:[#allocation3 + $0x230] sm:$0xff] }
 0x65a   :  { %v6436_v9 = vpack.c.bf16 %v6178_v11, %v6177_v21  ;;  %v6243_v24 = vsel %vm3321_vm8, %v13989_v34, %v9236_v6  ;;  %v6050_v55 = vsel %vm3321_vm8, %v3937_v12, %v8927_v45  ;;  %v4412_v21 = vld [vmem:[#allocation3 + $0x201] sm:$0xff]  ;;  %v9528_v6 = vpack.i.bf16 %v4093_v46, %v4092_v39  ;;  %v4350_v45 = vld [vmem:[#allocation3 + $0x218] sm:$0xff] }
 0x65b   :  { %v6049_v4 = vsel %vm3321_vm8, %v3936_v57, %v8926_v63  ;;  %v6115_v50 = vsel %vm6105_vm14, %v6050_v55, %v9087_v28  ;;  %v8932_v28 = vunpack.i.h.bf16 %v13866_v36 }
 0x65c   :  { %v6114_v7 = vsel %vm6105_vm14, %v6049_v4, %v9086_v48 }
 0x65d   :  { %9459 = vrot.lane.b32.xlu1 %v9458_v47, %s9991_s2  ;;  %v9240_v47 = vpop.permute.xlu2 %9239 }
 0x65e   :  { %9484 = vrot.lane.b32.xlu0 %v9483_v27, %s9992_s28  ;;  %v14230_v27 = vpack.i.bf16 %v4285_v49, %v4284_v44  ;;  %v9242_v56 = vunpack.i.h.bf16 %v9240_v47  ;;  %v9241_v18 = vunpack.i.l.bf16 %v9240_v47  ;;  %v4345_v44 = vld [vmem:[#allocation3 + $0x1e0] sm:$0xff] }
 0x65f   :  { %9434 = vrot.lane.b32.xlu2 %v9433_v37, %s9990_s15  ;;  %v9250_v30 = vpop.permute.xlu1 %9249  ;;  %v9245_v37 = vpop.permute.xlu0 %9244 }
 0x660   :  { %v9252_v16 = vunpack.i.h.bf16 %v9250_v30  ;;  %v9251_v54 = vunpack.i.l.bf16 %v9250_v30  ;;  %v9247_v35 = vunpack.i.h.bf16 %v9245_v37  ;;  %v9246_v0 = vunpack.i.l.bf16 %v9245_v37  ;;  %v4351_v37 = vld [vmem:[#allocation3 + $0x228] sm:$0xff] }
 0x662   :  { %v6179_v11 = vsel %vm6170_vm15, %v6114_v7, %v9251_v54  ;;  %v6180_v62 = vsel %vm6170_vm15, %v6115_v50, %v9252_v16 }
 0x665   :  { %9474 = vrot.lane.b32.xlu1 %v9473_v17, %s9990_s15  ;;  %6790 = vmatmul.bf16.gmra.mxu1 %v6436_v9  ;;  %v9255_v33 = vpop.permute.xlu2 %9254  ;;  %v4411_v9 = vld [vmem:[#allocation3 + $0x1f9] sm:$0xff] }
 0x666   :  { %9499 = vrot.lane.b32.xlu0 %v14221_v43, %s9991_s2  ;;  %6959 = vmatmul.bf16.gmra.mxu2 %v6437_v13  ;;  %v4346_v13 = vld [vmem:[#allocation3 + $0x1e8] sm:$0xff]  ;;  %v9503_v47 = vpack.i.bf16 %v4412_v21, %v4411_v9  ;;  %v9257_v30 = vunpack.i.h.bf16 %v9255_v33  ;;  %v9256_v8 = vunpack.i.l.bf16 %v9255_v33  ;;  %v4416_v9 = vld [vmem:[#allocation3 + $0x231] sm:$0xff] }
 0x667   :  { %9449 = vrot.lane.b32.xlu2 %v9418_v41, %s9992_s28  ;;  %v6244_v41 = vsel %vm3321_vm8, %v13987_v22, %v9237_v42  ;;  %v6307_v22 = vsel %vm6105_vm14, %v6243_v24, %v9241_v18  ;;  %v6439_v42 = vpack.c.bf16 %v6180_v62, %v6179_v11  ;;  %v9260_v10 = vpop.permute.xlu0 %9259  ;;  %v9478_v25 = vpack.i.bf16 %v4346_v13, %v4345_v44  ;;  %v9265_v48 = vpop.permute.xlu1 %9264 }
 0x668   :  { %v6308_v34 = vsel %vm6105_vm14, %v6244_v41, %v9242_v56  ;;  %v6371_v20 = vsel %vm6170_vm15, %v6307_v22, %v9246_v0  ;;  %v4349_v41 = vld [vmem:[#allocation3 + $0x210] sm:$0xff]  ;;  %v9092_v24 = vunpack.i.h.bf16 %v14050_v61  ;;  %v14258_v56 = vpack.i.bf16 %v4352_v59, %v4351_v37 }
 0x669   :  { %v6372_v17 = vsel %vm6170_vm15, %v6308_v34, %v9247_v35  ;;  %v9518_v18 = vpack.i.bf16 %v4350_v45, %v4349_v41  ;;  %v9262_v16 = vunpack.i.h.bf16 %v9260_v10  ;;  %v9261_v54 = vunpack.i.l.bf16 %v9260_v10  ;;  %v3938_v34 = vld [vmem:[#allocation3 + $0x78] sm:$0xff]  ;;  %v3939_v35 = vld [vmem:[#allocation3 + $0x80] sm:$0xff]  ;;  %v4415_v45 = vld [vmem:[#allocation3 + $0x229] sm:$0xff] }
 0x66a   :  { %v6440_v49 = vpack.c.bf16 %v6372_v17, %v6371_v20  ;;  %v6246_v4 = vsel %vm3321_vm8, %v13961_v3, %v9257_v30  ;;  %v9267_v55 = vunpack.i.h.bf16 %v9265_v48  ;;  %v9266_v22 = vunpack.i.l.bf16 %v9265_v48  ;;  %v4414_v30 = vld [vmem:[#allocation3 + $0x219] sm:$0xff]  ;;  %v4413_v41 = vld [vmem:[#allocation3 + $0x211] sm:$0xff] }
 0x66b   :  { %v6052_v0 = vsel %vm3321_vm8, %v3939_v35, %v8932_v28  ;;  %v6310_v11 = vsel %vm6105_vm14, %v6246_v4, %v9262_v16  ;;  %v8937_v44 = vunpack.i.h.bf16 %v13898_v19  ;;  %v4417_v28 = vld [vmem:[#allocation3 + $0x241] sm:$0xff]  ;;  %v3941_v16 = vld [vmem:[#allocation3 + $0x98] sm:$0xff] }
 0x66c   :  { %v6374_v39 = vsel %vm6170_vm15, %v6310_v11, %v9267_v55 }
 0x66d   :  { %9489 = vrot.lane.b32.xlu1 %v9488_v26, %s9992_s28  ;;  %v9270_v63 = vpop.permute.xlu2 %9269  ;;  %v8931_v26 = vunpack.i.l.bf16 %v13866_v36  ;;  %v6245_v36 = vsel %vm3321_vm8, %v13963_v15, %v9256_v8  ;;  %v6117_v15 = vsel %vm6105_vm14, %v6052_v0, %v9092_v24  ;;  %v9096_v8 = vunpack.i.l.bf16 %v14048_v5  ;;  %v4290_v0 = vld [vmem:[#allocation3 + $0x242] sm:$0xff] }
 0x66e   :  { %9514 = vrot.lane.b32.xlu0 %v14230_v27, %s9990_s15  ;;  %v9272_v57 = vunpack.i.h.bf16 %v9270_v63  ;;  %v9271_v12 = vunpack.i.l.bf16 %v9270_v63  ;;  %v6309_v21 = vsel %vm6105_vm14, %v6245_v36, %v9261_v54  ;;  %v6054_v54 = vsel %vm3321_vm8, %v3941_v16, %v8937_v44 }
 0x66f   :  { %9464 = vrot.lane.b32.xlu2 %v9463_v51, %s9992_s28  ;;  %v9091_v51 = vunpack.i.l.bf16 %v14050_v61  ;;  %v6051_v61 = vsel %vm3321_vm8, %v3938_v34, %v8931_v26  ;;  %v9275_v33 = vpop.permute.xlu0 %9274  ;;  %v6373_v62 = vsel %vm6170_vm15, %v6309_v21, %v9266_v22  ;;  %v9280_v17 = vpop.permute.xlu1 %9279  ;;  %v4288_v22 = vld [vmem:[#allocation3 + $0x22a] sm:$0xff]  ;;  %v4289_v34 = vld [vmem:[#allocation3 + $0x232] sm:$0xff]  ;;  %v9101_v44 = vunpack.i.l.bf16 %v14090_v40 }
 0x670   :  { %v6182_v50 = vsel %vm6170_vm15, %v6117_v15, %v9272_v57  ;;  %v6443_v20 = vpack.c.bf16 %v6374_v39, %v6373_v62  ;;  %v9277_v13 = vunpack.i.h.bf16 %v9275_v33  ;;  %v9282_v10 = vunpack.i.h.bf16 %v9280_v17 }
 0x671   :  { %v6116_v3 = vsel %vm6105_vm14, %v6051_v61, %v9091_v51  ;;  %v9281_v59 = vunpack.i.l.bf16 %v9280_v17  ;;  %v9523_v51 = vpack.i.bf16 %v4414_v30, %v4413_v41  ;;  %v9563_v21 = vpack.i.bf16 %v4289_v34, %v4288_v22 }
 0x672   :  { %v6181_v7 = vsel %vm6170_vm15, %v6116_v3, %v9271_v12  ;;  %v6248_v24 = vsel %vm3321_vm8, %v14006_v32, %v9277_v13 }
 0x673   :  { %v6442_v46 = vpack.c.bf16 %v6182_v50, %v6181_v7  ;;  %v6312_v12 = vsel %vm6105_vm14, %v6248_v24, %v9282_v10  ;;  %v4286_v7 = vld [vmem:[#allocation3 + $0x212] sm:$0xff]  ;;  %v4287_v50 = vld [vmem:[#allocation3 + $0x21a] sm:$0xff] }
 0x674   :  { %v4356_v24 = vld [vmem:[#allocation3 + $0x260] sm:$0xff] }
 0x675   :  { %9504 = vrot.lane.b32.xlu1 %v9503_v47, %s9992_s28  ;;  %6795 = vmatmul.bf16.gmra.mxu1 %v6439_v42  ;;  %v9276_v47 = vunpack.i.l.bf16 %v9275_v33  ;;  %v9285_v63 = vpop.permute.xlu2 %9284  ;;  %v4291_v33 = vld [vmem:[#allocation3 + $0x24a] sm:$0xff] }
 0x676   :  { %9529 = vrot.lane.b32.xlu0 %v9528_v6, %s9991_s2  ;;  %6964 = vmatmul.bf16.gmra.mxu2 %v6440_v49  ;;  %v8936_v49 = vunpack.i.l.bf16 %v13898_v19  ;;  %v9287_v4 = vunpack.i.h.bf16 %v9285_v63  ;;  %v9286_v32 = vunpack.i.l.bf16 %v9285_v63  ;;  %v14303_v62 = vpack.i.bf16 %v4291_v33, %v4290_v0  ;;  %v3942_v63 = vld [vmem:[#allocation3 + $0xa8] sm:$0xff] }
 0x677   :  { %9479 = vrot.lane.b32.xlu2 %v9478_v25, %s9991_s2  ;;  %v9290_v42 = vpop.permute.xlu0 %9289  ;;  %v6247_v19 = vsel %vm3321_vm8, %v14011_v29, %v9276_v47  ;;  %v9295_v36 = vpop.permute.xlu1 %9294  ;;  %v8942_v47 = vunpack.i.h.bf16 %v13874_v58  ;;  %v8947_v0 = vunpack.i.h.bf16 %v13882_v31  ;;  %v8946_v33 = vunpack.i.l.bf16 %v13882_v31  ;;  %v3944_v31 = vld [vmem:[#allocation3 + $0xc0] sm:$0xff] }
 0x678   :  { %v9292_v26 = vunpack.i.h.bf16 %v9290_v42  ;;  %v9291_v48 = vunpack.i.l.bf16 %v9290_v42  ;;  %v6311_v57 = vsel %vm6105_vm14, %v6247_v19, %v9281_v59  ;;  %v6376_v15 = vsel %vm6170_vm15, %v6312_v12, %v9287_v4  ;;  %v4357_v12 = vld [vmem:[#allocation3 + $0x270] sm:$0xff] }
 0x679   :  { %v6375_v3 = vsel %vm6170_vm15, %v6311_v57, %v9286_v32  ;;  %v9297_v17 = vunpack.i.h.bf16 %v9295_v36  ;;  %v8941_v42 = vunpack.i.l.bf16 %v13874_v58  ;;  %v4354_v57 = vld [vmem:[#allocation3 + $0x248] sm:$0xff] }
 0x67a   :  { %v6446_v39 = vpack.c.bf16 %v6376_v15, %v6375_v3  ;;  %v9107_v15 = vunpack.i.h.bf16 %v14072_v23 }
 0x67b   :  { %v6250_v10 = vsel %vm3321_vm8, %v14074_v53, %v9297_v17  ;;  %v6055_v58 = vsel %vm3321_vm8, %v3942_v63, %v8941_v42  ;;  %v3945_v42 = vld [vmem:[#allocation3 + $0xc8] sm:$0xff] }
 0x67d   :  { %9519 = vrot.lane.b32.xlu1 %v9518_v18, %s9991_s2 }
 0x67e   :  { %9544 = vrot.lane.b32.xlu0 %v14258_v56, %s9991_s2 }
 0x67f   :  { %9494 = vrot.lane.b32.xlu2 %v9528_v6, %s9990_s15  ;;  %v4418_v6 = vld [vmem:[#allocation3 + $0x249] sm:$0xff]  ;;  %v9310_v13 = vpop.permute.xlu1 %9309 }
 0x680   :  { %v9573_v37 = vpack.i.bf16 %v4418_v6, %v4417_v28  ;;  %v9102_v6 = vunpack.i.h.bf16 %v14090_v40  ;;  %v3943_v28 = vld [vmem:[#allocation3 + $0xb0] sm:$0xff] }
 0x681   :  { %v6056_v40 = vsel %vm3321_vm8, %v3943_v28, %v8942_v47  ;;  %v4424_v28 = vld [vmem:[#allocation3 + $0x291] sm:$0xff] }
 0x682   :  { %v6121_v41 = vsel %vm6105_vm14, %v6056_v40, %v9102_v6  ;;  %v6058_v6 = vsel %vm3321_vm8, %v3945_v42, %v8947_v0  ;;  %v4293_v0 = vld [vmem:[#allocation3 + $0x262] sm:$0xff] }
 0x685   :  { %9534 = vrot.lane.b32.xlu1 %v14221_v43, %s9992_s28  ;;  %6800 = vmatmul.bf16.gmra.mxu1 %v6442_v46  ;;  %v9097_v43 = vunpack.i.h.bf16 %v14048_v5  ;;  %v9300_v46 = vpop.permute.xlu2 %9299 }
 0x686   :  { %9559 = vrot.lane.b32.xlu0 %v9518_v18, %s9992_s28  ;;  %6969 = vmatmul.bf16.gmra.mxu2 %v6443_v20  ;;  %v3940_v18 = vld [vmem:[#allocation3 + $0x90] sm:$0xff]  ;;  %v9538_v20 = vpack.i.bf16 %v4287_v50, %v4286_v7  ;;  %v9301_v30 = vunpack.i.l.bf16 %v9300_v46  ;;  %v9106_v7 = vunpack.i.l.bf16 %v14072_v23  ;;  %v6057_v23 = vsel %vm3321_vm8, %v3944_v31, %v8946_v33 }
 0x687   :  { %9509 = vrot.lane.b32.xlu2 %v9478_v25, %s9992_s28  ;;  %v9548_v25 = vpack.i.bf16 %v4416_v9, %v4415_v45  ;;  %v6053_v5 = vsel %vm3321_vm8, %v3940_v18, %v8936_v49  ;;  %v6119_v55 = vsel %vm6105_vm14, %v6054_v54, %v9097_v43  ;;  %v9296_v9 = vunpack.i.l.bf16 %v9295_v36  ;;  %v9305_v49 = vpop.permute.xlu0 %9304  ;;  %v4358_v18 = vld [vmem:[#allocation3 + $0x278] sm:$0xff]  ;;  %v4353_v36 = vld [vmem:[#allocation3 + $0x240] sm:$0xff]  ;;  %v9325_v3 = vpop.permute.xlu1 %9324 }
 0x688   :  { %v6118_v29 = vsel %vm6105_vm14, %v6053_v5, %v9096_v8  ;;  %v6184_v61 = vsel %vm6170_vm15, %v6119_v55, %v9292_v26  ;;  %v9302_v45 = vunpack.i.h.bf16 %v9300_v46  ;;  %v9312_v43 = vunpack.i.h.bf16 %v9310_v13  ;;  %v4355_v54 = vld [vmem:[#allocation3 + $0x258] sm:$0xff] }
 0x689   :  { %v6183_v35 = vsel %vm6170_vm15, %v6118_v29, %v9291_v48  ;;  %v6249_v59 = vsel %vm3321_vm8, %v14082_v14, %v9296_v9  ;;  %v9311_v8 = vunpack.i.l.bf16 %v9310_v13  ;;  %v9307_v26 = vunpack.i.h.bf16 %v9305_v49 }
 0x68a   :  { %v6445_v11 = vpack.c.bf16 %v6184_v61, %v6183_v35  ;;  %v6314_v53 = vsel %vm6105_vm14, %v6250_v10, %v9302_v45  ;;  %v9306_v14 = vunpack.i.l.bf16 %v9305_v49  ;;  %v9593_v4 = vpack.i.bf16 %v4356_v24, %v4355_v54  ;;  %v4422_v45 = vld [vmem:[#allocation3 + $0x279] sm:$0xff] }
 0x68b   :  { %v6378_v5 = vsel %vm6170_vm15, %v6314_v53, %v9307_v26  ;;  %v9568_v22 = vpack.i.bf16 %v4354_v57, %v4353_v36  ;;  %v9327_v13 = vunpack.i.h.bf16 %v9325_v3  ;;  %v9326_v47 = vunpack.i.l.bf16 %v9325_v3  ;;  %v4423_v53 = vld [vmem:[#allocation3 + $0x289] sm:$0xff]  ;;  %v4297_v36 = vld [vmem:[#allocation3 + $0x292] sm:$0xff] }
 0x68c   :  { %v6122_v49 = vsel %vm6105_vm14, %v6057_v23, %v9106_v7  ;;  %v6123_v10 = vsel %vm6105_vm14, %v6058_v6, %v9107_v15  ;;  %v9112_v33 = vunpack.i.h.bf16 %v14070_v1  ;;  %v9111_v3 = vunpack.i.l.bf16 %v14070_v1 }
 0x68d   :  { %9549 = vrot.lane.b32.xlu1 %v9548_v25, %s9992_s28  ;;  %v6313_v25 = vsel %vm6105_vm14, %v6249_v59, %v9301_v30  ;;  %v9315_v48 = vpop.permute.xlu2 %9314 }
 0x68e   :  { %9574 = vrot.lane.b32.xlu0 %v9573_v37, %s9992_s28  ;;  %v6120_v37 = vsel %vm6105_vm14, %v6055_v58, %v9101_v44  ;;  %v6377_v16 = vsel %vm6170_vm15, %v6313_v25, %v9306_v14  ;;  %v9317_v34 = vunpack.i.h.bf16 %v9315_v48  ;;  %v9316_v35 = vunpack.i.l.bf16 %v9315_v48  ;;  %v4420_v25 = vld [vmem:[#allocation3 + $0x261] sm:$0xff] }
 0x68f   :  { %9524 = vrot.lane.b32.xlu2 %v9523_v51, %s9992_s28  ;;  %v6185_v19 = vsel %vm6170_vm15, %v6120_v37, %v9311_v8  ;;  %v6186_v51 = vsel %vm6170_vm15, %v6121_v41, %v9312_v43  ;;  %v6449_v29 = vpack.c.bf16 %v6378_v5, %v6377_v16  ;;  %v9320_v55 = vpop.permute.xlu0 %9319  ;;  %v9648_v48 = vpack.i.bf16 %v4424_v28, %v4423_v53  ;;  %v4419_v37 = vld [vmem:[#allocation3 + $0x259] sm:$0xff]  ;;  %v9340_v24 = vpop.permute.xlu1 %9339 }
 0x690   :  { %v6448_v32 = vpack.c.bf16 %v6186_v51, %v6185_v19  ;;  %v9322_v50 = vunpack.i.h.bf16 %v9320_v55  ;;  %v14360_v19 = vld [vmem:[%s15265_s4] ss:$0 sm:$0xff]  ;;  %v9598_v51 = vpack.i.bf16 %v4420_v25, %v4419_v37  ;;  %v4295_v16 = vld [vmem:[#allocation3 + $0x27a] sm:$0xff]  ;;  %v8957_v37 = vunpack.i.h.bf16 %v13893_v38 }
 0x695   :  { %9564 = vrot.lane.b32.xlu1 %v9563_v21, %s9990_s15  ;;  %6805 = vmatmul.bf16.gmra.mxu1 %v6445_v11  ;;  %v9330_v61 = vpop.permute.xlu2 %9329  ;;  %v4200_v11 = vld [vmem:[#allocation3 + $0xd9] sm:$0xff] }
 0x696   :  { %9589 = vrot.lane.b32.xlu0 %v14303_v62, %s9990_s15  ;;  %6974 = vmatmul.bf16.gmra.mxu2 %v6446_v39  ;;  %v4201_v39 = vld [vmem:[#allocation3 + $0xe1] sm:$0xff]  ;;  %v9332_v46 = vunpack.i.h.bf16 %v9330_v61  ;;  %v6251_v9 = vsel %vm3321_vm8, %v4200_v11, %v9316_v35 }
 0x697   :  { %9539 = vrot.lane.b32.xlu2 %v9538_v20, %s9990_s15  ;;  %v6252_v17 = vsel %vm3321_vm8, %v4201_v39, %v9317_v34  ;;  %v9335_v44 = vpop.permute.xlu0 %9334  ;;  %v9341_v34 = vunpack.i.l.bf16 %v9340_v24 }
 0x698   :  { %v6188_v43 = vsel %vm6170_vm15, %v6123_v10, %v9332_v46  ;;  %v6316_v63 = vsel %vm6105_vm14, %v6252_v17, %v9322_v50  ;;  %v9337_v5 = vunpack.i.h.bf16 %v9335_v44  ;;  %v9336_v54 = vunpack.i.l.bf16 %v9335_v44  ;;  %v9926_v46 = vld [vmem:[#allocation3 + $0xf9] sm:$0xff] }
 0x699   :  { %v6380_v40 = vsel %vm6170_vm15, %v6316_v63, %v9327_v13  ;;  %v3946_v13 = vld [vmem:[#allocation3 + $0xd8] sm:$0xff] }
 0x69d   :  { %9579 = vrot.lane.b32.xlu1 %v9538_v20, %s9991_s2  ;;  %v9331_v20 = vunpack.i.l.bf16 %v9330_v61  ;;  %v4292_v61 = vld [vmem:[#allocation3 + $0x25a] sm:$0xff]  ;;  %v9345_v15 = vpop.permute.xlu2 %9344 }
 0x69e   :  { %9604 = vrot.lane.b32.xlu0 %v9563_v21, %s9991_s2  ;;  %v9321_v21 = vunpack.i.l.bf16 %v9320_v55  ;;  %v8951_v55 = vunpack.i.l.bf16 %v13916_v2  ;;  %v9347_v6 = vunpack.i.h.bf16 %v9345_v15  ;;  %v9346_v44 = vunpack.i.l.bf16 %v9345_v15 }
 0x69f   :  { %9554 = vrot.lane.b32.xlu2 %v14230_v27, %s9991_s2  ;;  %v14331_v27 = vpack.i.bf16 %v4358_v18, %v4357_v12  ;;  %v6187_v30 = vsel %vm6170_vm15, %v6122_v49, %v9331_v20  ;;  %v4294_v18 = vld [vmem:[#allocation3 + $0x272] sm:$0xff]  ;;  %v9350_v57 = vpop.permute.xlu0 %9349  ;;  %v9355_v49 = vpop.permute.xlu1 %9354 }
 0x6a0   :  { %v6315_v8 = vsel %vm6105_vm14, %v6251_v9, %v9321_v21  ;;  %v6451_v14 = vpack.c.bf16 %v6188_v43, %v6187_v30  ;;  %v9638_v50 = vpack.i.bf16 %v4295_v16, %v4294_v18  ;;  %v9352_v21 = vunpack.i.h.bf16 %v9350_v57  ;;  %v9927_v20 = vld [vmem:[#allocation3 + $0xf1] sm:$0xff]  ;;  %v4361_v18 = vld [vmem:[#allocation3 + $0x2a0] sm:$0xff] }
 0x6a1   :  { %v6379_v58 = vsel %vm6170_vm15, %v6315_v8, %v9326_v47  ;;  %v9351_v11 = vunpack.i.l.bf16 %v9350_v57  ;;  %v6253_v17 = vsel %vm3321_vm8, %v9927_v20, %v9336_v54  ;;  %v9613_v9 = vpack.i.bf16 %v4293_v0, %v4292_v61  ;;  %v3947_v47 = vld [vmem:[#allocation3 + $0xe0] sm:$0xff] }
 0x6a2   :  { %v6452_v41 = vpack.c.bf16 %v6380_v40, %v6379_v58  ;;  %v6059_v1 = vsel %vm3321_vm8, %v3946_v13, %v8951_v55  ;;  %v6317_v42 = vsel %vm6105_vm14, %v6253_v17, %v9341_v34  ;;  %v9357_v25 = vunpack.i.h.bf16 %v9355_v49 }
 0x6a3   :  { %v6124_v10 = vsel %vm6105_vm14, %v6059_v1, %v9111_v3  ;;  %v6381_v8 = vsel %vm6170_vm15, %v6317_v42, %v9346_v44  ;;  %v9356_v53 = vunpack.i.l.bf16 %v9355_v49  ;;  %v8956_v16 = vunpack.i.l.bf16 %v13893_v38  ;;  %v4359_v3 = vld [vmem:[#allocation3 + $0x288] sm:$0xff] }
 0x6a5   :  { %9594 = vrot.lane.b32.xlu1 %v9593_v4, %s9991_s2  ;;  %6810 = vmatmul.bf16.gmra.mxu1 %v6448_v32  ;;  %v4296_v32 = vld [vmem:[#allocation3 + $0x28a] sm:$0xff] }
 0x6a6   :  { %9619 = vrot.lane.b32.xlu0 %v14331_v27, %s9991_s2  ;;  %6979 = vmatmul.bf16.gmra.mxu2 %v6449_v29  ;;  %v8952_v29 = vunpack.i.h.bf16 %v13916_v2  ;;  %v14374_v39 = vpack.i.bf16 %v4297_v36, %v4296_v32  ;;  %v6254_v2 = vsel %vm3321_vm8, %v9926_v46, %v9337_v5  ;;  %v9116_v32 = vunpack.i.l.bf16 %v14105_v52 }
 0x6a7   :  { %9569 = vrot.lane.b32.xlu2 %v9568_v22, %s9991_s2  ;;  %v9365_v36 = vpop.permute.xlu0 %9364 }
 0x6a8   :  { %v6060_v31 = vsel %vm3321_vm8, %v3947_v47, %v8952_v29  ;;  %v9928_v29 = vld [vmem:[#allocation3 + $0x111] sm:$0xff]  ;;  %v9367_v20 = vunpack.i.h.bf16 %v9365_v36  ;;  %v9366_v17 = vunpack.i.l.bf16 %v9365_v36  ;;  %v4207_v36 = vld [vmem:[#allocation3 + $0x129] sm:$0xff] }
 0x6a9   :  { %v6256_v55 = vsel %vm3321_vm8, %v9928_v29, %v9357_v25 }
 0x6ab   :  { %v6776_v59 = vpop.f32.mrf.mxu1 }
 0x6ac   :  { %v6777_v12 = vadd.f32 %v14360_v19, %v6776_v59  ;;  %v6125_v59 = vsel %vm6105_vm14, %v6060_v31, %v9112_v33 }
 0x6ad   :  { %9609 = vrot.lane.b32.xlu1 %v9568_v22, %s9992_s28  ;;  %v9342_v22 = vunpack.i.h.bf16 %v9340_v24  ;;  %v6190_v30 = vsel %vm6170_vm15, %v6125_v59, %v9352_v21  ;;  %v3949_v21 = vld [vmem:[#allocation3 + $0xf8] sm:$0xff] }
 0x6ae   :  { %9634 = vrot.lane.b32.xlu0 %v9593_v4, %s9992_s28 }
 0x6af   :  { %9584 = vrot.lane.b32.xlu2 %v14258_v56, %s9992_s28  ;;  %v4421_v56 = vld [vmem:[#allocation3 + $0x271] sm:$0xff]  ;;  %v6318_v23 = vsel %vm6105_vm14, %v6254_v2, %v9342_v22  ;;  %v9929_v22 = vld [vmem:[#allocation3 + $0x109] sm:$0xff] }
 0x6b0   :  { %v9623_v26 = vpack.i.bf16 %v4422_v45, %v4421_v56  ;;  %v6189_v45 = vsel %vm6170_vm15, %v6124_v10, %v9351_v11  ;;  %v6382_v63 = vsel %vm6170_vm15, %v6318_v23, %v9347_v6  ;;  %v9360_v56 = vpop.permute.xlu2 %9359  ;;  %v6255_v34 = vsel %vm3321_vm8, %v9929_v22, %v9356_v53  ;;  %v4429_v53 = vld [vmem:[#allocation3 + $0x2d1] sm:$0xff] }
 0x6b1   :  { %v6454_v58 = vpack.c.bf16 %v6190_v30, %v6189_v45  ;;  %v6455_v40 = vpack.c.bf16 %v6382_v63, %v6381_v8  ;;  %v9362_v61 = vunpack.i.h.bf16 %v9360_v56  ;;  %v9361_v38 = vunpack.i.l.bf16 %v9360_v56  ;;  %v9380_v30 = vpop.permute.xlu0 %9379  ;;  %v4430_v8 = vld [vmem:[#allocation3 + $0x2d9] sm:$0xff]  ;;  %v4428_v63 = vld [vmem:[#allocation3 + $0x2c1] sm:$0xff] }
 0x6b2   :  { %v6062_v11 = vsel %vm3321_vm8, %v3949_v21, %v8957_v37 }
 0x6b3   :  { %v14368_v35 = vpop.f32.mrf.mxu1  ;;  %v6319_v46 = vsel %vm6105_vm14, %v6255_v34, %v9361_v38  ;;  %v6320_v2 = vsel %vm6105_vm14, %v6256_v55, %v9362_v61 }
 0x6b4   :  { %v6383_v6 = vsel %vm6170_vm15, %v6319_v46, %v9366_v17  ;;  %v6384_v44 = vsel %vm6170_vm15, %v6320_v2, %v9367_v20  ;;  %v4300_v20 = vld [vmem:[#allocation3 + $0x2ba] sm:$0xff]  ;;  %v4301_v17 = vld [vmem:[#allocation3 + $0x2c2] sm:$0xff] }
 0x6b5   :  { %9624 = vrot.lane.b32.xlu1 %v9623_v26, %s9992_s28  ;;  %6815 = vmatmul.bf16.gmra.mxu1 %v6451_v14  ;;  %v4364_v26 = vld [vmem:[#allocation3 + $0x2c0] sm:$0xff]  ;;  %v4362_v14 = vld [vmem:[#allocation3 + $0x2a8] sm:$0xff]  ;;  %v6458_v45 = vpack.c.bf16 %v6384_v44, %v6383_v6 }
 0x6b6   :  { %9649 = vrot.lane.b32.xlu0 %v9648_v48, %s9992_s28  ;;  %6984 = vmatmul.bf16.gmra.mxu2 %v6452_v41  ;;  %v9370_v41 = vpop.permute.xlu1 %9369 }
 0x6b7   :  { %9599 = vrot.lane.b32.xlu2 %v9598_v51, %s9992_s28  ;;  %v4363_v51 = vld [vmem:[#allocation3 + $0x2b8] sm:$0xff]  ;;  %v9372_v0 = vunpack.i.h.bf16 %v9370_v41  ;;  %v9371_v33 = vunpack.i.l.bf16 %v9370_v41 }
 0x6b8   :  { %v14403_v57 = vpack.i.bf16 %v4364_v26, %v4363_v51  ;;  %v4427_v26 = vld [vmem:[#allocation3 + $0x2b9] sm:$0xff] }
 0x6b9   :  { %v6945_v4 = vpop.f32.mrf.mxu2  ;;  %v9698_v51 = vpack.i.bf16 %v4428_v63, %v4427_v26  ;;  %v9395_v21 = vpop.permute.xlu0 %9394 }
 0x6ba   :  { %v14372_v7 = vadd.f32 %v6945_v4, %v6777_v12  ;;  %v9668_v12 = vpack.i.bf16 %v4362_v14, %v4361_v18  ;;  %v4360_v4 = vld [vmem:[#allocation3 + $0x290] sm:$0xff]  ;;  %v8962_v14 = vunpack.i.h.bf16 %v13900_v60  ;;  %v9397_v26 = vunpack.i.h.bf16 %v9395_v21 }
 0x6bb   :  { %v9643_v15 = vpack.i.bf16 %v4360_v4, %v4359_v3  ;;  %v4426_v18 = vld [vmem:[#allocation3 + $0x2a9] sm:$0xff]  ;;  %v4206_v4 = vld [vmem:[#allocation3 + $0x121] sm:$0xff] }
 0x6bc   :  { %v3951_v3 = vld [vmem:[#allocation3 + $0x110] sm:$0xff] }
 0x6bd   :  { %9639 = vrot.lane.b32.xlu1 %v9638_v50, %s9990_s15 }
 0x6be   :  { %9664 = vrot.lane.b32.xlu0 %v14374_v39, %s9990_s15  ;;  %v9385_v37 = vpop.permute.xlu1 %9384 }
 0x6bf   :  { %9614 = vrot.lane.b32.xlu2 %v9613_v9, %s9990_s15  ;;  %v9387_v61 = vunpack.i.h.bf16 %v9385_v37  ;;  %v9386_v38 = vunpack.i.l.bf16 %v9385_v37 }
 0x6c1   :  { %v14390_v43 = vpop.f32.mrf.mxu2 }
 0x6c2   :  { %v6781_v28 = vpop.f32.mrf.mxu1 }
 0x6c3   :  { %v6782_v48 = vadd.f32 %v14360_v19, %v6781_v28 }
 0x6c5   :  { %9654 = vrot.lane.b32.xlu1 %v9613_v9, %s9991_s2  ;;  %6820 = vmatmul.bf16.gmra.mxu1 %v6454_v58  ;;  %v9375_v9 = vpop.permute.xlu2 %9374 }
 0x6c6   :  { %9679 = vrot.lane.b32.xlu0 %v9638_v50, %s9991_s2  ;;  %6989 = vmatmul.bf16.gmra.mxu2 %v6455_v40  ;;  %v3948_v50 = vld [vmem:[#allocation3 + $0xf0] sm:$0xff]  ;;  %v9376_v28 = vunpack.i.l.bf16 %v9375_v9  ;;  %v9377_v58 = vunpack.i.h.bf16 %v9375_v9 }
 0x6c7   :  { %9629 = vrot.lane.b32.xlu2 %v14303_v62, %s9991_s2  ;;  %v9117_v62 = vunpack.i.h.bf16 %v14105_v52  ;;  %v6061_v52 = vsel %vm3321_vm8, %v3948_v50, %v8956_v16  ;;  %v6064_v50 = vsel %vm3321_vm8, %v3951_v3, %v8962_v14  ;;  %v9396_v14 = vunpack.i.l.bf16 %v9395_v21 }
 0x6c8   :  { %v6126_v13 = vsel %vm6105_vm14, %v6061_v52, %v9116_v32  ;;  %v9382_v32 = vunpack.i.h.bf16 %v9380_v30  ;;  %v6257_v29 = vsel %vm3321_vm8, %v4206_v4, %v9376_v28  ;;  %v6258_v34 = vsel %vm3321_vm8, %v4207_v36, %v9377_v58  ;;  %v9400_v58 = vpop.permute.xlu1 %9399 }
 0x6c9   :  { %v6950_v24 = vpop.f32.mrf.mxu2  ;;  %v6127_v47 = vsel %vm6105_vm14, %v6062_v11, %v9117_v62  ;;  %v6191_v1 = vsel %vm6170_vm15, %v6126_v13, %v9371_v33  ;;  %v3950_v33 = vld [vmem:[#allocation3 + $0x108] sm:$0xff] }
 0x6ca   :  { %v14401_v5 = vadd.f32 %v6950_v24, %v6782_v48  ;;  %v6783_v54 = vpop.f32.mrf.mxu1  ;;  %v6192_v31 = vsel %vm6170_vm15, %v6127_v47, %v9372_v0  ;;  %v8961_v48 = vunpack.i.l.bf16 %v13900_v60  ;;  %v9723_v24 = vpack.i.bf16 %v4430_v8, %v4429_v53  ;;  %v4425_v60 = vld [vmem:[#allocation3 + $0x2a1] sm:$0xff] }
 0x6cb   :  { %v6784_v42 = vadd.f32 %v14360_v19, %v6783_v54  ;;  %v6457_v59 = vpack.c.bf16 %v6192_v31, %v6191_v1  ;;  %v9673_v0 = vpack.i.bf16 %v4426_v18, %v4425_v60  ;;  %v6322_v47 = vsel %vm6105_vm14, %v6258_v34, %v9382_v32  ;;  %v4302_v31 = vld [vmem:[#allocation3 + $0x2d2] sm:$0xff] }
 0x6cc   :  { %v6386_v6 = vsel %vm6170_vm15, %v6322_v47, %v9387_v61  ;;  %v9401_v18 = vunpack.i.l.bf16 %v9400_v58  ;;  %v9931_v34 = vld [vmem:[#allocation3 + $0x139] sm:$0xff] }
 0x6cd   :  { %9669 = vrot.lane.b32.xlu1 %v9668_v12, %s9991_s2  ;;  %v9390_v40 = vpop.permute.xlu2 %9389  ;;  %v6259_v61 = vsel %vm3321_vm8, %v9931_v34, %v9396_v14  ;;  %v3954_v34 = vld [vmem:[#allocation3 + $0x138] sm:$0xff] }
 0x6ce   :  { %9694 = vrot.lane.b32.xlu0 %v14403_v57, %s9991_s2  ;;  %v9392_v55 = vunpack.i.h.bf16 %v9390_v40  ;;  %v9391_v22 = vunpack.i.l.bf16 %v9390_v40  ;;  %v6323_v3 = vsel %vm6105_vm14, %v6259_v61, %v9401_v18  ;;  %v16151_v18 = vld [vmem:[#allocation119_spill] sm:$0xff] }
 0x6cf   :  { %9644 = vrot.lane.b32.xlu2 %v9643_v15, %s9991_s2  ;;  %v3955_v61 = vld [vmem:[#allocation3 + $0x140] sm:$0xff] }
 0x6d0   :  { %v9415_v21 = vpop.permute.xlu1 %9414 }
 0x6d1   :  { %v6952_v23 = vpop.f32.mrf.mxu2 }
 0x6d2   :  { %v6786_v49 = vpop.f32.mrf.mxu1  ;;  %v14424_v10 = vadd.f32 %v6952_v23, %v6784_v42  ;;  %v4303_v42 = vld [vmem:[#allocation3 + $0x2da] sm:$0xff] }
 0x6d3   :  { %v6787_v56 = vadd.f32 %v14360_v19, %v6786_v49  ;;  %v14455_v63 = vpack.i.bf16 %v4303_v42, %v4302_v31  ;;  %v4367_v42 = vld [vmem:[#allocation3 + $0x2e8] sm:$0xff] }
 0x6d5   :  { %9684 = vrot.lane.b32.xlu1 %v9643_v15, %s9992_s28  ;;  %6825 = vmatmul.bf16.gmra.mxu1 %v6457_v59  ;;  %v6063_v15 = vsel %vm3321_vm8, %v3950_v33, %v8961_v48  ;;  %v4298_v59 = vld [vmem:[#allocation3 + $0x2a2] sm:$0xff]  ;;  %v9410_v48 = vpop.permute.xlu0 %9409 }
 0x6d6   :  { %9709 = vrot.lane.b32.xlu0 %v9668_v12, %s9992_s28  ;;  %6994 = vmatmul.bf16.gmra.mxu2 %v6458_v45  ;;  %v9381_v12 = vunpack.i.l.bf16 %v9380_v30  ;;  %v4299_v45 = vld [vmem:[#allocation3 + $0x2aa] sm:$0xff]  ;;  %v9713_v30 = vpack.i.bf16 %v4301_v17, %v4300_v20  ;;  %v9412_v32 = vunpack.i.h.bf16 %v9410_v48  ;;  %v9411_v36 = vunpack.i.l.bf16 %v9410_v48  ;;  %v16150_v48 = vld [vmem:[#allocation142_spill] sm:$0xff] }
 0x6d7   :  { %9659 = vrot.lane.b32.xlu2 %v14331_v27, %s9992_s28  ;;  %v16147_v27 = vld [vmem:[#allocation51_spill] sm:$0xff]  ;;  %v9688_v40 = vpack.i.bf16 %v4299_v45, %v4298_v59 }
 0x6d8   :  { %v9122_v16 = vunpack.i.h.bf16 %v16147_v27  ;;  %v9121_v54 = vunpack.i.l.bf16 %v16147_v27  ;;  %v6321_v46 = vsel %vm6105_vm14, %v6257_v29, %v9381_v12  ;;  %v3952_v29 = vld [vmem:[#allocation3 + $0x120] sm:$0xff] }
 0x6d9   :  { %v6955_v25 = vpop.f32.mrf.mxu2  ;;  %v6385_v23 = vsel %vm6170_vm15, %v6321_v46, %v9386_v38  ;;  %v4368_v46 = vld [vmem:[#allocation3 + $0x2f0] sm:$0xff] }
 0x6da   :  { %v6788_v41 = vpop.f32.mrf.mxu1  ;;  %v14435_v62 = vadd.f32 %v6955_v25, %v6787_v56  ;;  %v6128_v52 = vsel %vm6105_vm14, %v6063_v15, %v9121_v54  ;;  %v6129_v11 = vsel %vm6105_vm14, %v6064_v50, %v9122_v16  ;;  %v6461_v28 = vpack.c.bf16 %v6386_v6, %v6385_v23  ;;  %v16148_v25 = vld [vmem:[#allocation109_spill] sm:$0xff]  ;;  %v16149_v54 = vld [vmem:[#allocation158_spill] sm:$0xff] }
 0x6db   :  { %v6789_v2 = vadd.f32 %v14360_v19, %v6788_v41  ;;  %v6193_v9 = vsel %vm6170_vm15, %v6128_v52, %v9391_v22  ;;  %v6194_v13 = vsel %vm6170_vm15, %v6129_v11, %v9392_v55  ;;  %v8967_v53 = vunpack.i.h.bf16 %v16148_v25  ;;  %v3953_v55 = vld [vmem:[#allocation3 + $0x128] sm:$0xff]  ;;  %v4369_v6 = vld [vmem:[#allocation3 + $0x300] sm:$0xff] }
 0x6dc   :  { %v6460_v8 = vpack.c.bf16 %v6194_v13, %v6193_v9  ;;  %v8966_v41 = vunpack.i.l.bf16 %v16148_v25  ;;  %v9127_v12 = vunpack.i.h.bf16 %v16149_v54  ;;  %v9126_v4 = vunpack.i.l.bf16 %v16149_v54  ;;  %v9930_v22 = vld [vmem:[#allocation3 + $0x141] sm:$0xff] }
 0x6dd   :  { %9699 = vrot.lane.b32.xlu1 %v9698_v51, %s9992_s28  ;;  %v9402_v51 = vunpack.i.h.bf16 %v9400_v58  ;;  %v6260_v60 = vsel %vm3321_vm8, %v9930_v22, %v9397_v26  ;;  %v6066_v38 = vsel %vm3321_vm8, %v3953_v55, %v8967_v53  ;;  %v4370_v13 = vld [vmem:[#allocation3 + $0x308] sm:$0xff]  ;;  %v9416_v25 = vunpack.i.l.bf16 %v9415_v21  ;;  %v9430_v26 = vpop.permute.xlu1 %9429 }
 0x6de   :  { %9724 = vrot.lane.b32.xlu0 %v9723_v24, %s9992_s28  ;;  %v9405_v24 = vpop.permute.xlu2 %9404  ;;  %v6131_v11 = vsel %vm6105_vm14, %v6066_v38, %v9127_v12  ;;  %v9131_v54 = vunpack.i.l.bf16 %v16151_v18  ;;  %v9932_v12 = vld [vmem:[#allocation3 + $0x159] sm:$0xff]  ;;  %v9432_v22 = vunpack.i.h.bf16 %v9430_v26 }
 0x6df   :  { %9674 = vrot.lane.b32.xlu2 %v9673_v0, %s9992_s28  ;;  %v6065_v0 = vsel %vm3321_vm8, %v3952_v29, %v8966_v41  ;;  %v6324_v33 = vsel %vm6105_vm14, %v6260_v60, %v9402_v51  ;;  %v9407_v15 = vunpack.i.h.bf16 %v9405_v24  ;;  %v9406_v50 = vunpack.i.l.bf16 %v9405_v24 }
 0x6e0   :  { %v6130_v52 = vsel %vm6105_vm14, %v6065_v0, %v9126_v4  ;;  %v6196_v20 = vsel %vm6170_vm15, %v6131_v11, %v9412_v32  ;;  %v8971_v41 = vunpack.i.l.bf16 %v16150_v48  ;;  %v9933_v32 = vld [vmem:[#allocation3 + $0x151] sm:$0xff]  ;;  %v9431_v60 = vunpack.i.l.bf16 %v9430_v26  ;;  %v4308_v26 = vld [vmem:[#allocation3 + $0x31a] sm:$0xff] }
 0x6e1   :  { %v6957_v1 = vpop.f32.mrf.mxu2  ;;  %v6387_v47 = vsel %vm6170_vm15, %v6323_v3, %v9406_v50 }
 0x6e2   :  { %v14453_v44 = vadd.f32 %v6957_v1, %v6789_v2  ;;  %v6791_v49 = vpop.f32.mrf.mxu1  ;;  %v6195_v2 = vsel %vm6170_vm15, %v6130_v52, %v9411_v36  ;;  %v6388_v1 = vsel %vm6170_vm15, %v6324_v33, %v9407_v15  ;;  %v6261_v36 = vsel %vm3321_vm8, %v9933_v32, %v9416_v25  ;;  %v4305_v25 = vld [vmem:[#allocation3 + $0x2f2] sm:$0xff] }
 0x6e3   :  { %v6792_v56 = vadd.f32 %v14360_v19, %v6791_v49  ;;  %v9743_v49 = vpack.i.bf16 %v4368_v46, %v4367_v42  ;;  %v6463_v59 = vpack.c.bf16 %v6196_v20, %v6195_v2  ;;  %v6067_v0 = vsel %vm3321_vm8, %v3954_v34, %v8971_v41  ;;  %v4434_v46 = vld [vmem:[#allocation3 + $0x309] sm:$0xff]  ;;  %v4433_v42 = vld [vmem:[#allocation3 + $0x301] sm:$0xff] }
 0x6e4   :  { %v6132_v50 = vsel %vm6105_vm14, %v6067_v0, %v9131_v54  ;;  %v4212_v0 = vld [vmem:[#allocation3 + $0x169] sm:$0xff] }
 0x6e5   :  { %9714 = vrot.lane.b32.xlu1 %v9713_v30, %s9990_s15  ;;  %6830 = vmatmul.bf16.gmra.mxu1 %v6460_v8  ;;  %v4365_v8 = vld [vmem:[#allocation3 + $0x2d0] sm:$0xff]  ;;  %v6197_v2 = vsel %vm6170_vm15, %v6132_v50, %v9431_v60 }
 0x6e6   :  { %9739 = vrot.lane.b32.xlu0 %v14455_v63, %s9990_s15  ;;  %6999 = vmatmul.bf16.gmra.mxu2 %v6461_v28  ;;  %v9420_v45 = vpop.permute.xlu2 %9419  ;;  %v6464_v28 = vpack.c.bf16 %v6388_v1, %v6387_v47  ;;  %v3956_v50 = vld [vmem:[#allocation3 + $0x150] sm:$0xff] }
 0x6e7   :  { %9689 = vrot.lane.b32.xlu2 %v9688_v40, %s9990_s15  ;;  %v9422_v29 = vunpack.i.h.bf16 %v9420_v45  ;;  %v9421_v55 = vunpack.i.l.bf16 %v9420_v45  ;;  %v4431_v45 = vld [vmem:[#allocation3 + $0x2e9] sm:$0xff] }
 0x6e9   :  { %v6960_v37 = vpop.f32.mrf.mxu2  ;;  %v6325_v3 = vsel %vm6105_vm14, %v6261_v36, %v9421_v55  ;;  %v16153_v36 = vld [vmem:[#allocation53_spill] sm:$0xff] }
 0x6ea   :  { %v14464_v27 = vadd.f32 %v6960_v37, %v6792_v56  ;;  %v6793_v16 = vpop.f32.mrf.mxu1  ;;  %v9417_v56 = vunpack.i.h.bf16 %v9415_v21  ;;  %v8972_v37 = vunpack.i.h.bf16 %v16150_v48  ;;  %v4307_v48 = vld [vmem:[#allocation3 + $0x30a] sm:$0xff]  ;;  %v9136_v55 = vunpack.i.l.bf16 %v16153_v36 }
 0x6eb   :  { %v6794_v17 = vadd.f32 %v14360_v19, %v6793_v16  ;;  %v9132_v16 = vunpack.i.h.bf16 %v16151_v18 }
 0x6ec   :  { %v6262_v4 = vsel %vm3321_vm8, %v9932_v12, %v9417_v56  ;;  %v6068_v38 = vsel %vm3321_vm8, %v3955_v61, %v8972_v37  ;;  %v4304_v56 = vld [vmem:[#allocation3 + $0x2ea] sm:$0xff] }
 0x6ed   :  { %9729 = vrot.lane.b32.xlu1 %v9688_v40, %s9991_s2  ;;  %v9425_v40 = vpop.permute.xlu0 %9424  ;;  %v6326_v15 = vsel %vm6105_vm14, %v6262_v4, %v9422_v29  ;;  %v6133_v21 = vsel %vm6105_vm14, %v6068_v38, %v9132_v16  ;;  %v16152_v16 = vld [vmem:[#allocation108_spill] sm:$0xff]  ;;  %v9763_v32 = vpack.i.bf16 %v4305_v25, %v4304_v56  ;;  %v9137_v29 = vunpack.i.h.bf16 %v16153_v36 }
 0x6ee   :  { %9754 = vrot.lane.b32.xlu0 %v9713_v30, %s9991_s2  ;;  %v14487_v30 = vpack.i.bf16 %v4370_v13, %v4369_v6  ;;  %v14507_v33 = vpop.permute.xlu2 %9434  ;;  %v9427_v52 = vunpack.i.h.bf16 %v9425_v40  ;;  %v9426_v11 = vunpack.i.l.bf16 %v9425_v40  ;;  %v6198_v20 = vsel %vm6170_vm15, %v6133_v21, %v9432_v22  ;;  %v4436_v13 = vld [vmem:[#allocation3 + $0x321] sm:$0xff]  ;;  %v4435_v6 = vld [vmem:[#allocation3 + $0x319] sm:$0xff] }
 0x6ef   :  { %9704 = vrot.lane.b32.xlu2 %v14374_v39, %s9991_s2  ;;  %v4366_v39 = vld [vmem:[#allocation3 + $0x2d8] sm:$0xff]  ;;  %v4306_v40 = vld [vmem:[#allocation3 + $0x302] sm:$0xff]  ;;  %v9437_v37 = vunpack.i.h.bf16 %v14507_v33  ;;  %v9436_v41 = vunpack.i.l.bf16 %v14507_v33  ;;  %v8977_v54 = vunpack.i.h.bf16 %v16152_v16  ;;  %v8976_v12 = vunpack.i.l.bf16 %v16152_v16 }
 0x6f0   :  { %v9718_v58 = vpack.i.bf16 %v4366_v39, %v4365_v8  ;;  %v6389_v47 = vsel %vm6170_vm15, %v6325_v3, %v9426_v11  ;;  %v6390_v1 = vsel %vm6170_vm15, %v6326_v15, %v9427_v52  ;;  %v4432_v39 = vld [vmem:[#allocation3 + $0x2f1] sm:$0xff]  ;;  %v9788_v34 = vpack.i.bf16 %v4307_v48, %v4306_v40  ;;  %v4375_v25 = vld [vmem:[#allocation3 + $0x348] sm:$0xff] }
 0x6f1   :  { %v6962_v9 = vpop.f32.mrf.mxu2  ;;  %v6467_v8 = vpack.c.bf16 %v6390_v1, %v6389_v47  ;;  %v4213_v33 = vld [vmem:[#allocation3 + $0x171] sm:$0xff]  ;;  %v6263_v11 = vsel %vm3321_vm8, %v4212_v0, %v9436_v41 }
 0x6f2   :  { %v6796_v31 = vpop.f32.mrf.mxu1  ;;  %v14485_v23 = vadd.f32 %v6962_v9, %v6794_v17  ;;  %v3957_v21 = vld [vmem:[#allocation3 + $0x158] sm:$0xff]  ;;  %v6264_v52 = vsel %vm3321_vm8, %v4213_v33, %v9437_v37 }
 0x6f3   :  { %v6797_v53 = vadd.f32 %v14360_v19, %v6796_v31 }
 0x6f5   :  { %9744 = vrot.lane.b32.xlu1 %v9743_v49, %s9991_s2  ;;  %6835 = vmatmul.bf16.gmra.mxu1 %v6463_v59  ;;  %v14518_v17 = vpop.permute.xlu0 %9439  ;;  %v9798_v59 = vpack.i.bf16 %v4436_v13, %v4435_v6  ;;  %v6069_v13 = vsel %vm3321_vm8, %v3956_v50, %v8976_v12  ;;  %v4372_v12 = vld [vmem:[#allocation3 + $0x320] sm:$0xff] }
 0x6f6   :  { %9769 = vrot.lane.b32.xlu0 %v14487_v30, %s9991_s2  ;;  %7004 = vmatmul.bf16.gmra.mxu2 %v6464_v28  ;;  %v9445_v28 = vpop.permute.xlu1 %9444  ;;  %v9442_v61 = vunpack.i.h.bf16 %v14518_v17  ;;  %v9441_v38 = vunpack.i.l.bf16 %v14518_v17  ;;  %v6134_v47 = vsel %vm6105_vm14, %v6069_v13, %v9136_v55 }
 0x6f7   :  { %9719 = vrot.lane.b32.xlu2 %v9718_v58, %s9991_s2 }
 0x6f8   :  { %v6327_v6 = vsel %vm6105_vm14, %v6263_v11, %v9441_v38  ;;  %v3959_v11 = vld [vmem:[#allocation3 + $0x170] sm:$0xff] }
 0x6f9   :  { %v6965_v14 = vpop.f32.mrf.mxu2 }
 0x6fa   :  { %v14496_v24 = vadd.f32 %v6965_v14, %v6797_v53  ;;  %v14498_v51 = vpop.f32.mrf.mxu1  ;;  %v9450_v53 = vpop.permute.xlu2 %9449  ;;  %v4309_v14 = vld [vmem:[#allocation3 + $0x322] sm:$0xff] }
 0x6fb   :  { %v14541_v60 = vpack.i.bf16 %v4309_v14, %v4308_v26  ;;  %v9452_v3 = vunpack.i.h.bf16 %v9450_v53  ;;  %v9451_v15 = vunpack.i.l.bf16 %v9450_v53  ;;  %v4376_v53 = vld [vmem:[#allocation3 + $0x350] sm:$0xff]  ;;  %v4374_v26 = vld [vmem:[#allocation3 + $0x338] sm:$0xff]  ;;  %v16154_v14 = vld [vmem:[#allocation111_spill] sm:$0xff] }
 0x6fc   :  { %v8982_v48 = vunpack.i.h.bf16 %v16154_v14 }
 0x6fd   :  { %9759 = vrot.lane.b32.xlu1 %v9718_v58, %s9992_s28  ;;  %v9748_v58 = vpack.i.bf16 %v4432_v39, %v4431_v45  ;;  %v14539_v22 = vpop.permute.xlu0 %9454 }
 0x6fe   :  { %9784 = vrot.lane.b32.xlu0 %v9743_v49, %s9992_s28  ;;  %v6466_v49 = vpack.c.bf16 %v6198_v20, %v6197_v2  ;;  %v9446_v2 = vunpack.i.l.bf16 %v9445_v28  ;;  %v6070_v20 = vsel %vm3321_vm8, %v3957_v21, %v8977_v54  ;;  %v9460_v1 = vpop.permute.xlu1 %9459  ;;  %v9457_v37 = vunpack.i.h.bf16 %v14539_v22 }
 0x6ff   :  { %9734 = vrot.lane.b32.xlu2 %v14403_v57, %s9992_s28  ;;  %v9773_v57 = vpack.i.bf16 %v4434_v46, %v4433_v42  ;;  %v9447_v46 = vunpack.i.h.bf16 %v9445_v28  ;;  %v6135_v17 = vsel %vm6105_vm14, %v6070_v20, %v9137_v29  ;;  %v6199_v42 = vsel %vm6170_vm15, %v6134_v47, %v9451_v15  ;;  %v9935_v20 = vld [vmem:[#allocation3 + $0x181] sm:$0xff] }
 0x700   :  { %v6200_v39 = vsel %vm6170_vm15, %v6135_v17, %v9452_v3  ;;  %v9456_v41 = vunpack.i.l.bf16 %v14539_v22  ;;  %v9462_v36 = vunpack.i.h.bf16 %v9460_v1  ;;  %v9461_v29 = vunpack.i.l.bf16 %v9460_v1  ;;  %v4371_v3 = vld [vmem:[#allocation3 + $0x318] sm:$0xff] }
 0x701   :  { %v14520_v9 = vpop.f32.mrf.mxu2  ;;  %v9793_v21 = vpack.i.bf16 %v4372_v12, %v4371_v3  ;;  %v6072_v1 = vsel %vm3321_vm8, %v3959_v11, %v8982_v48  ;;  %v4439_v12 = vld [vmem:[#allocation3 + $0x349] sm:$0xff]  ;;  %v3961_v11 = vld [vmem:[#allocation3 + $0x1b8] sm:$0xff] }
 0x702   :  { %v14524_v31 = vpop.f32.mrf.mxu1  ;;  %v6265_v13 = vsel %vm3321_vm8, %v9935_v20, %v9456_v41 }
 0x705   :  { %9774 = vrot.lane.b32.xlu1 %v9773_v57, %s9992_s28  ;;  %6840 = vmatmul.bf16.gmra.mxu1 %v6466_v49  ;;  %v6328_v57 = vsel %vm6105_vm14, %v6264_v52, %v9442_v61  ;;  %v9470_v56 = vpop.permute.xlu0 %9469  ;;  %v16155_v61 = vld [vmem:[#allocation169_spill] sm:$0xff]  ;;  %v3958_v52 = vld [vmem:[#allocation3 + $0x168] sm:$0xff] }
 0x706   :  { %9799 = vrot.lane.b32.xlu0 %v9798_v59, %s9992_s28  ;;  %7009 = vmatmul.bf16.gmra.mxu2 %v6467_v8  ;;  %v6391_v59 = vsel %vm6170_vm15, %v6327_v6, %v9446_v2  ;;  %v6392_v45 = vsel %vm6170_vm15, %v6328_v57, %v9447_v46  ;;  %v9465_v8 = vpop.permute.xlu2 %9464  ;;  %v14572_v16 = vpop.permute.xlu1 %9474  ;;  %v9142_v38 = vunpack.i.h.bf16 %v16155_v61  ;;  %v9141_v0 = vunpack.i.l.bf16 %v16155_v61  ;;  %v9934_v46 = vld [vmem:[#allocation3 + $0x189] sm:$0xff] }
 0x707   :  { %9749 = vrot.lane.b32.xlu2 %v9748_v58, %s9992_s28  ;;  %v6469_v58 = vpack.c.bf16 %v6200_v39, %v6199_v42  ;;  %v6470_v40 = vpack.c.bf16 %v6392_v45, %v6391_v59  ;;  %v9472_v22 = vunpack.i.h.bf16 %v9470_v56  ;;  %v9471_v15 = vunpack.i.l.bf16 %v9470_v56 }
 0x708   :  { %v6266_v2 = vsel %vm3321_vm8, %v9934_v46, %v9457_v37  ;;  %v9467_v17 = vunpack.i.h.bf16 %v9465_v8  ;;  %v9466_v47 = vunpack.i.l.bf16 %v9465_v8  ;;  %v6329_v6 = vsel %vm6105_vm14, %v6265_v13, %v9461_v29 }
 0x709   :  { %v14531_v18 = vpop.f32.mrf.mxu2  ;;  %v6330_v39 = vsel %vm6105_vm14, %v6266_v2, %v9462_v36  ;;  %v6137_v57 = vsel %vm6105_vm14, %v6072_v1, %v9142_v38  ;;  %v9476_v37 = vunpack.i.l.bf16 %v14572_v16  ;;  %v9477_v36 = vunpack.i.h.bf16 %v14572_v16  ;;  %v16156_v38 = vld [vmem:[#allocation45_spill] sm:$0xff]  ;;  %v16157_v16 = vld [vmem:[#allocation120_spill] sm:$0xff] }
 0x70a   :  { %v14535_v4 = vpop.f32.mrf.mxu1  ;;  %v6393_v56 = vsel %vm6170_vm15, %v6329_v6, %v9466_v47  ;;  %v8986_v3 = vunpack.i.l.bf16 %v16156_v38  ;;  %v9147_v46 = vunpack.i.h.bf16 %v16157_v16  ;;  %v4437_v1 = vld [vmem:[#allocation3 + $0x331] sm:$0xff] }
 0x70d   :  { %9789 = vrot.lane.b32.xlu1 %v9788_v34, %s9990_s15  ;;  %v14593_v45 = vpop.permute.xlu0 %9484 }
 0x70e   :  { %9814 = vrot.lane.b32.xlu0 %v14541_v60, %s9990_s15  ;;  %v14581_v50 = vpop.permute.xlu2 %9479 }
 0x70f   :  { %9764 = vrot.lane.b32.xlu2 %v9763_v32, %s9990_s15  ;;  %v9481_v2 = vunpack.i.l.bf16 %v14581_v50  ;;  %v9482_v13 = vunpack.i.h.bf16 %v14581_v50 }
 0x711   :  { %v14559_v49 = vpop.f32.mrf.mxu2 }
 0x712   :  { %v14563_v28 = vpop.f32.mrf.mxu1 }
 0x715   :  { %9804 = vrot.lane.b32.xlu1 %v9763_v32, %s9991_s2  ;;  %6845 = vmatmul.bf16.gmra.mxu1 %v6469_v58  ;;  %v8981_v32 = vunpack.i.l.bf16 %v16154_v14  ;;  %v6202_v58 = vsel %vm6170_vm15, %v6137_v57, %v9472_v22  ;;  %v14610_v29 = vpop.permute.xlu0 %9499  ;;  %v4217_v22 = vld [vmem:[#allocation3 + $0x1d1] sm:$0xff] }
 0x716   :  { %9829 = vrot.lane.b32.xlu0 %v9788_v34, %s9991_s2  ;;  %7014 = vmatmul.bf16.gmra.mxu2 %v6470_v40  ;;  %v4373_v34 = vld [vmem:[#allocation3 + $0x330] sm:$0xff]  ;;  %v14604_v41 = vpop.permute.xlu2 %9494  ;;  %v6268_v20 = vsel %vm3321_vm8, %v4217_v22, %v9477_v36  ;;  %v6807_v22 = vadd.f32 %v14360_v19, %v14563_v28 }
 0x717   :  { %9779 = vrot.lane.b32.xlu2 %v14455_v63, %s9991_s2  ;;  %v9843_v63 = vpack.i.bf16 %v4376_v53, %v4375_v25  ;;  %v9818_v33 = vpack.i.bf16 %v4374_v26, %v4373_v34  ;;  %v6071_v42 = vsel %vm3321_vm8, %v3958_v52, %v8981_v32  ;;  %v6394_v25 = vsel %vm6170_vm15, %v6330_v39, %v9467_v17  ;;  %v9490_v26 = vpop.permute.xlu1 %9489  ;;  %v4440_v32 = vld [vmem:[#allocation3 + $0x351] sm:$0xff] }
 0x718   :  { %v6136_v59 = vsel %vm6105_vm14, %v6071_v42, %v9141_v0  ;;  %v6473_v48 = vpack.c.bf16 %v6394_v25, %v6393_v56  ;;  %v9848_v61 = vpack.i.bf16 %v4440_v32, %v4439_v12  ;;  %v8987_v0 = vunpack.i.h.bf16 %v16156_v38  ;;  %v3960_v52 = vld [vmem:[#allocation3 + $0x1b0] sm:$0xff]  ;;  %v4311_v38 = vld [vmem:[#allocation3 + $0x33a] sm:$0xff] }
 0x719   :  { %v14574_v54 = vpop.f32.mrf.mxu2  ;;  %v6201_v8 = vsel %vm6170_vm15, %v6136_v59, %v9471_v15  ;;  %v9492_v17 = vunpack.i.h.bf16 %v9490_v26  ;;  %v9491_v47 = vunpack.i.l.bf16 %v9490_v26  ;;  %v6073_v59 = vsel %vm3321_vm8, %v3960_v52, %v8986_v3 }
 0x71a   :  { %v14577_v55 = vpop.f32.mrf.mxu1  ;;  %v6472_v14 = vpack.c.bf16 %v6202_v58, %v6201_v8  ;;  %v6074_v57 = vsel %vm3321_vm8, %v3961_v11, %v8987_v0  ;;  %v9486_v8 = vunpack.i.l.bf16 %v14593_v45  ;;  %v6332_v58 = vsel %vm6105_vm14, %v6268_v20, %v9482_v13  ;;  %v16158_v11 = vld [vmem:[#allocation110_spill] sm:$0xff]  ;;  %v16160_v20 = vld [vmem:[#allocation147_spill] sm:$0xff] }
 0x71b   :  { %v6139_v56 = vsel %vm6105_vm14, %v6074_v57, %v9147_v46  ;;  %v9487_v25 = vunpack.i.h.bf16 %v14593_v45  ;;  %v6809_v32 = vadd.f32 %v14360_v19, %v14577_v55  ;;  %v4310_v45 = vld [vmem:[#allocation3 + $0x332] sm:$0xff]  ;;  %v8992_v55 = vunpack.i.h.bf16 %v16158_v11 }
 0x71c   :  { %v6976_v46 = vadd.f32 %v14574_v54, %v6807_v22  ;;  %v8991_v28 = vunpack.i.l.bf16 %v16158_v11  ;;  %v16161_v54 = vld [vmem:[#allocation30_spill] sm:$0xff]  ;;  %v9497_v57 = vunpack.i.h.bf16 %v14604_v41 }
 0x71d   :  { %9819 = vrot.lane.b32.xlu1 %v9818_v33, %s9991_s2  ;;  %v14642_v3 = vpop.permute.xlu0 %9514 }
 0x71e   :  { %9844 = vrot.lane.b32.xlu0 %v9843_v63, %s9991_s2  ;;  %v4216_v63 = vld [vmem:[#allocation3 + $0x1c9] sm:$0xff] }
 0x71f   :  { %9794 = vrot.lane.b32.xlu2 %v9793_v21, %s9991_s2  ;;  %v14620_v42 = vpop.permute.xlu1 %9504 }
 0x721   :  { %v14598_v40 = vpop.f32.mrf.mxu2 }
 0x722   :  { %v6811_v53 = vpop.f32.mrf.mxu1 }
 0x723   :  { %v6812_v26 = vadd.f32 %v14360_v19, %v6811_v53  ;;  %v6396_v53 = vsel %vm6170_vm15, %v6332_v58, %v9487_v25 }
 0x725   :  { %9834 = vrot.lane.b32.xlu1 %v9793_v21, %s9992_s28  ;;  %6850 = vmatmul.bf16.gmra.mxu1 %v6472_v14  ;;  %v4438_v21 = vld [vmem:[#allocation3 + $0x339] sm:$0xff]  ;;  %v14633_v14 = vpop.permute.xlu2 %9509 }
 0x726   :  { %9859 = vrot.lane.b32.xlu0 %v9818_v33, %s9992_s28  ;;  %7019 = vmatmul.bf16.gmra.mxu2 %v6473_v48  ;;  %v6267_v33 = vsel %vm3321_vm8, %v4216_v63, %v9476_v37  ;;  %v9823_v39 = vpack.i.bf16 %v4438_v21, %v4437_v1  ;;  %v6204_v37 = vsel %vm6170_vm15, %v6139_v56, %v9492_v17  ;;  %v16162_v56 = vld [vmem:[#allocation91_spill] sm:$0xff]  ;;  %v9511_v22 = vunpack.i.l.bf16 %v14633_v14 }
 0x727   :  { %9809 = vrot.lane.b32.xlu2 %v14487_v30, %s9992_s28  ;;  %v9146_v30 = vunpack.i.l.bf16 %v16157_v16  ;;  %v6331_v6 = vsel %vm6105_vm14, %v6267_v33, %v9481_v2  ;;  %v6978_v33 = vadd.f32 %v14598_v40, %v6809_v32  ;;  %v3963_v40 = vld [vmem:[#allocation3 + $0x1d0] sm:$0xff]  ;;  %v14654_v17 = vpop.permute.xlu1 %9519  ;;  %v7145_v25 = vadd.f32 %v16162_v56, %v6976_v46 }
 0x728   :  { %v6395_v12 = vsel %vm6170_vm15, %v6331_v6, %v9486_v8  ;;  %v6076_v6 = vsel %vm3321_vm8, %v3963_v40, %v8992_v55  ;;  %v6799_v8 = vadd.f32 %v14360_v19, %v14498_v51  ;;  %v16165_v55 = vld [vmem:[#allocation90_spill] sm:$0xff] }
 0x729   :  { %v6980_v34 = vpop.f32.mrf.mxu2  ;;  %v6138_v50 = vsel %vm6105_vm14, %v6073_v59, %v9146_v30  ;;  %v6476_v16 = vpack.c.bf16 %v6396_v53, %v6395_v12  ;;  %v16159_v30 = vld [vmem:[#allocation37_spill] sm:$0xff]  ;;  %v9496_v59 = vunpack.i.l.bf16 %v14604_v41  ;;  %v9502_v12 = vunpack.i.h.bf16 %v14610_v29 }
 0x72a   :  { %v6813_v15 = vpop.f32.mrf.mxu1  ;;  %v6203_v48 = vsel %vm6170_vm15, %v6138_v50, %v9491_v47  ;;  %v6981_v36 = vadd.f32 %v6980_v34, %v6812_v26  ;;  %v9838_v34 = vpack.i.bf16 %v4311_v38, %v4310_v45  ;;  %v6802_v47 = vadd.f32 %v14360_v19, %v14524_v31  ;;  %v16163_v26 = vld [vmem:[#allocation121_spill] sm:$0xff]  ;;  %v4219_v38 = vld [vmem:[#allocation3 + $0x1e9] sm:$0xff] }
 0x72b   :  { %v6814_v63 = vadd.f32 %v14360_v19, %v6813_v15  ;;  %v6475_v52 = vpack.c.bf16 %v6204_v37, %v6203_v48  ;;  %v6804_v15 = vadd.f32 %v14360_v19, %v14535_v4  ;;  %v9152_v48 = vunpack.i.h.bf16 %v16163_v26 }
 0x72c   :  { %v7150_v13 = vadd.f32 %v16160_v20, %v6981_v36  ;;  %v6971_v58 = vadd.f32 %v14531_v18, %v6802_v47  ;;  %v9151_v37 = vunpack.i.l.bf16 %v16163_v26  ;;  %v9501_v41 = vunpack.i.l.bf16 %v14610_v29  ;;  %v4218_v36 = vld [vmem:[#allocation3 + $0x1e1] sm:$0xff] }
 0x72d   :  { %9849 = vrot.lane.b32.xlu1 %v9848_v61, %s9992_s28  ;;  %v6973_v1 = vadd.f32 %v14559_v49, %v6804_v15  ;;  %v14673_v32 = vpop.permute.xlu2 %9524  ;;  %v6968_v18 = vadd.f32 %v14520_v9, %v6799_v8  ;;  %v6269_v53 = vsel %vm3321_vm8, %v4218_v36, %v9496_v59  ;;  %v9506_v29 = vunpack.i.l.bf16 %v14620_v42  ;;  %v16171_v36 = vld [vmem:[#allocation52_spill] sm:$0xff] }
 0x72e   :  { %v7288_v50 = vmax.f32 %v7150_v13, 0.0  ;;  %v9507_v9 = vunpack.i.h.bf16 %v14620_v42  ;;  %v7286_v11 = vmax.f32 %v7145_v25, 0.0  ;;  %v6141_v15 = vsel %vm6105_vm14, %v6076_v6, %v9152_v48  ;;  %v16167_v6 = vld [vmem:[#allocation88_spill] sm:$0xff]  ;;  %v16169_v48 = vld [vmem:[#allocation86_spill] sm:$0xff] }
 0x72f   :  { %9824 = vrot.lane.b32.xlu2 %v9823_v39, %s9992_s28  ;;  %v7147_v39 = vadd.f32 %v16161_v54, %v6978_v33  ;;  %v3962_v33 = vld [vmem:[#allocation3 + $0x1c8] sm:$0xff]  ;;  %v6333_v20 = vsel %vm6105_vm14, %v6269_v53, %v9501_v41  ;;  %v14699_v47 = vpop.permute.xlu1 %9534 }
 0x731   :  { %v6982_v61 = vpop.f32.mrf.mxu2 }
 0x732   :  { %v6816_v0 = vpop.f32.mrf.mxu1  ;;  %v6983_v21 = vadd.f32 %v6982_v61, %v6814_v63  ;;  %v7287_v63 = vmax.f32 %v7147_v39, 0.0  ;;  %v16164_v61 = vld [vmem:[#allocation29_spill] sm:$0xff] }
 0x733   :  { %v6817_v31 = vadd.f32 %v14360_v19, %v6816_v0  ;;  %v7142_v45 = vadd.f32 %v16164_v61, %v6973_v1  ;;  %v9512_v0 = vunpack.i.h.bf16 %v14633_v14 }
 0x734   :  { %v7152_v2 = vadd.f32 %v16159_v30, %v6983_v21  ;;  %v6270_v21 = vsel %vm3321_vm8, %v4219_v38, %v9497_v57  ;;  %v16166_v30 = vld [vmem:[#allocation89_spill] sm:$0xff]  ;;  %v7135_v57 = vadd.f32 %v16167_v6, %v14496_v24 }
 0x735   :  { %6855 = vmatmul.bf16.gmra.mxu1 %v6475_v52  ;;  %v14684_v52 = vpop.permute.xlu0 %9529  ;;  %v7285_v14 = vmax.f32 %v7142_v45, 0.0  ;;  %v6206_v13 = vsel %vm6170_vm15, %v6141_v15, %v9512_v0  ;;  %v6334_v40 = vsel %vm6105_vm14, %v6270_v21, %v9502_v12  ;;  %v14714_v56 = vpop.permute.xlu2 %9539  ;;  %v16172_v0 = vld [vmem:[#allocation148_spill] sm:$0xff] }
 0x736   :  { %7024 = vmatmul.bf16.gmra.mxu2 %v6476_v16  ;;  %v7289_v4 = vmax.f32 %v7152_v2, 0.0  ;;  %v6075_v16 = vsel %vm3321_vm8, %v3962_v33, %v8991_v28  ;;  %v7137_v2 = vadd.f32 %v16166_v30, %v6968_v18  ;;  %v6397_v28 = vsel %vm6170_vm15, %v6333_v20, %v9506_v29  ;;  %v9937_v30 = vld [vmem:[#allocation3 + $0x201] sm:$0xff] }
 0x737   :  { %9839 = vrot.lane.b32.xlu2 %v9838_v34, %s9990_s15  ;;  %v7140_v34 = vadd.f32 %v16165_v55, %v6971_v58  ;;  %v6140_v46 = vsel %vm6105_vm14, %v6075_v16, %v9151_v37  ;;  %v6398_v39 = vsel %vm6170_vm15, %v6334_v40, %v9507_v9  ;;  %v7282_v26 = vmax.f32 %v7135_v57, 0.0  ;;  %v3965_v55 = vld [vmem:[#allocation3 + $0x1e8] sm:$0xff]  ;;  %v14740_v16 = vpop.permute.xlu1 %9549 }
 0x738   :  { %7349 = vmatpush.msrb.mxu3 %v7289_v4  ;;  %v6205_v42 = vsel %vm6170_vm15, %v6140_v46, %v9511_v22  ;;  %v7283_v58 = vmax.f32 %v7137_v2, 0.0  ;;  %v6479_v25 = vpack.c.bf16 %v6398_v39, %v6397_v28  ;;  %v7130_v37 = vadd.f32 %v16169_v48, %v14464_v27  ;;  %v9938_v2 = vld [vmem:[#allocation3 + $0x1f9] sm:$0xff] }
 0x739   :  { %v6985_v49 = vpop.f32.mrf.mxu2  ;;  %v7284_v54 = vmax.f32 %v7140_v34, 0.0  ;;  %v8997_v18 = vunpack.i.h.bf16 %v16171_v36  ;;  %v9517_v27 = vunpack.i.h.bf16 %v14642_v3  ;;  %v7125_v22 = vadd.f32 %v16172_v0, %v14435_v62 }
 0x73a   :  { %v6818_v51 = vpop.f32.mrf.mxu1  ;;  %v14676_v19 = vadd.f32 %v6985_v49, %v6817_v31  ;;  %7350 = vmatpush.msrb.mxu3 %v7288_v50  ;;  %v6478_v31 = vpack.c.bf16 %v6206_v13, %v6205_v42  ;;  %v16168_v49 = vld [vmem:[#allocation87_spill] sm:$0xff]  ;;  %v7280_v53 = vmax.f32 %v7130_v37, 0.0  ;;  %v9521_v29 = vunpack.i.l.bf16 %v14654_v17  ;;  %v16174_v42 = vld [vmem:[#allocation145_spill] sm:$0xff]  ;;  %v16176_v37 = vld [vmem:[#allocation84_spill] sm:$0xff] }
 0x73b   :  { %v7132_v50 = vadd.f32 %v16168_v49, %v14485_v23  ;;  %v9531_v34 = vunpack.i.l.bf16 %v14684_v52  ;;  %v6078_v15 = vsel %vm3321_vm8, %v3965_v55, %v8997_v18  ;;  %v9537_v46 = vunpack.i.h.bf16 %v14699_v47 }
 0x73c   :  { %7351 = vmatpush.msrb.mxu3 %v7287_v63  ;;  %v8996_v63 = vunpack.i.l.bf16 %v16171_v36  ;;  %v7120_v13 = vadd.f32 %v16174_v42, %v14401_v5  ;;  %v9527_v57 = vunpack.i.h.bf16 %v14673_v32 }
 0x73d   :  { %v14720_v12 = vpop.permute.xlu0 %9544  ;;  %v7281_v41 = vmax.f32 %v7132_v50, 0.0 }
 0x73e   :  { %7352 = vmatpush.msrb.mxu3 %v7286_v11  ;;  %v3964_v11 = vld [vmem:[#allocation3 + $0x1e0] sm:$0xff]  ;;  %v9547_v55 = vunpack.i.h.bf16 %v14720_v12 }
 0x73f   :  { %9854 = vrot.lane.b32.xlu2 %v14541_v60, %s9991_s2  ;;  %v14704_v60 = vld [vmem:[%s15265_s4] ss:$0 sm:$0xff]  ;;  %v14766_v18 = vpop.permute.xlu1 %9564 }
 0x740   :  { %v6819_v1 = vadd.f32 %v14704_v60, %v6818_v51  ;;  %7353 = vmatpush.msrb.mxu3 %v7285_v14  ;;  %v6779_v24 = vadd.f32 %v14704_v60, %v14368_v35  ;;  %v16170_v51 = vld [vmem:[#allocation28_spill] sm:$0xff]  ;;  %v9516_v35 = vunpack.i.l.bf16 %v14642_v3  ;;  %v9532_v3 = vunpack.i.h.bf16 %v14684_v52 }
 0x741   :  { %v6987_v4 = vpop.f32.mrf.mxu2  ;;  %v7127_v23 = vadd.f32 %v16170_v51, %v14453_v44  ;;  %v9522_v44 = vunpack.i.h.bf16 %v14654_v17  ;;  %v6077_v17 = vsel %vm3321_vm8, %v3964_v11, %v8996_v63  ;;  %v9536_v14 = vunpack.i.l.bf16 %v14699_v47 }
 0x742   :  { %v6821_v59 = vpop.f32.mrf.mxu1  ;;  %v14710_v8 = vadd.f32 %v6987_v4, %v6819_v1  ;;  %7354 = vmatpush.msrb.mxu3 %v7284_v54  ;;  %v6948_v61 = vadd.f32 %v14390_v43, %v6779_v24  ;;  %v16173_v43 = vld [vmem:[#allocation146_spill] sm:$0xff]  ;;  %v6271_v20 = vsel %vm3321_vm8, %v9938_v2, %v9516_v35  ;;  %v7278_v52 = vmax.f32 %v7125_v22, 0.0  ;;  %v9555_v1 = vpop.permute.xlu2 %9554  ;;  %v16175_v54 = vld [vmem:[#allocation85_spill] sm:$0xff] }
 0x743   :  { %v6822_v45 = vadd.f32 %v14704_v60, %v6821_v59  ;;  %v7122_v9 = vadd.f32 %v16173_v43, %v14424_v10  ;;  %v7279_v62 = vmax.f32 %v7127_v23, 0.0  ;;  %v6272_v10 = vsel %vm3321_vm8, %v9937_v30, %v9517_v27 }
 0x744   :  { %7355 = vmatpush.msrb.mxu3 %v7283_v58  ;;  %v6336_v40 = vsel %vm6105_vm14, %v6272_v10, %v9522_v44  ;;  %v6335_v28 = vsel %vm6105_vm14, %v6271_v20, %v9521_v29  ;;  %v7117_v39 = vadd.f32 %v16175_v54, %v6948_v61  ;;  %v6143_v47 = vsel %vm6105_vm14, %v6078_v15, %v9532_v3  ;;  %v16177_v61 = vld [vmem:[#allocation47_spill] sm:$0xff] }
 0x745   :  { %6860 = vmatmul.bf16.gmra.mxu1 %v6478_v31  ;;  %v7277_v4 = vmax.f32 %v7122_v9, 0.0  ;;  %v6142_v6 = vsel %vm6105_vm14, %v6077_v17, %v9531_v34  ;;  %v9526_v59 = vunpack.i.l.bf16 %v14673_v32  ;;  %v6208_v31 = vsel %vm6170_vm15, %v6143_v47, %v9537_v46  ;;  %v9560_v49 = vpop.permute.xlu0 %9559  ;;  %v9940_v17 = vld [vmem:[#allocation3 + $0x211] sm:$0xff] }
 0x746   :  { %7029 = vmatmul.bf16.gmra.mxu2 %v6479_v25  ;;  %7356 = vmatpush.msrb.mxu3 %v7282_v26  ;;  %v6207_v5 = vsel %vm6170_vm15, %v6142_v6, %v9536_v14  ;;  %v7276_v25 = vmax.f32 %v7120_v13, 0.0  ;;  %v6400_v48 = vsel %vm6170_vm15, %v6336_v40, %v9527_v57  ;;  %v7115_v24 = vadd.f32 %v16176_v37, %v14372_v7 }
 0x747   :  { %v6399_v26 = vsel %vm6170_vm15, %v6335_v28, %v9526_v59  ;;  %v7275_v51 = vmax.f32 %v7117_v39, 0.0  ;;  %v6481_v23 = vpack.c.bf16 %v6208_v31, %v6207_v5  ;;  %v9001_v27 = vunpack.i.l.bf16 %v16177_v61 }
 0x748   :  { %7357 = vmatpush.msrb.mxu3 %v7281_v41  ;;  %v6482_v36 = vpack.c.bf16 %v6400_v48, %v6399_v26  ;;  %v7274_v63 = vmax.f32 %v7115_v24, 0.0  ;;  %v9542_v7 = vunpack.i.h.bf16 %v14714_v56  ;;  %v9541_v35 = vunpack.i.l.bf16 %v14714_v56 }
 0x749   :  { %v6990_v38 = vpop.f32.mrf.mxu2  ;;  %v9557_v0 = vunpack.i.h.bf16 %v9555_v1  ;;  %v9556_v22 = vunpack.i.l.bf16 %v9555_v1  ;;  %v9546_v3 = vunpack.i.l.bf16 %v14720_v12  ;;  %v9562_v14 = vunpack.i.h.bf16 %v9560_v49 }
 0x74a   :  { %v14734_v33 = vadd.f32 %v6990_v38, %v6822_v45  ;;  %v6823_v21 = vpop.f32.mrf.mxu1  ;;  %7358 = vmatpush.msrb.mxu3 %v7280_v53  ;;  %v9002_v45 = vunpack.i.h.bf16 %v16177_v61  ;;  %v14772_v38 = vpop.permute.xlu2 %9569  ;;  %v3967_v53 = vld [vmem:[#allocation3 + $0x200] sm:$0xff]  ;;  %v6273_v46 = vsel %vm3321_vm8, %v9940_v17, %v9541_v35  ;;  %v9561_v30 = vunpack.i.l.bf16 %v9560_v49  ;;  %v16178_v49 = vld [vmem:[#allocation112_spill] sm:$0xff]  ;;  %v3969_v61 = vld [vmem:[#allocation3 + $0x218] sm:$0xff] }
 0x74b   :  { %v6824_v58 = vadd.f32 %v14704_v60, %v6823_v21  ;;  %v3966_v21 = vld [vmem:[#allocation3 + $0x1f8] sm:$0xff]  ;;  %v9552_v20 = vunpack.i.h.bf16 %v14740_v16  ;;  %v9551_v12 = vunpack.i.l.bf16 %v14740_v16  ;;  %v6337_v40 = vsel %vm6105_vm14, %v6273_v46, %v9546_v3 }
 0x74c   :  { %7359 = vmatpush.msrb.mxu3 %v7279_v62  ;;  %v6080_v43 = vsel %vm3321_vm8, %v3967_v53, %v9002_v45  ;;  %v6079_v11 = vsel %vm3321_vm8, %v3966_v21, %v9001_v27  ;;  %v9939_v62 = vld [vmem:[#allocation3 + $0x219] sm:$0xff]  ;;  %v9567_v5 = vunpack.i.h.bf16 %v14766_v18  ;;  %v9566_v31 = vunpack.i.l.bf16 %v14766_v18 }
 0x74d   :  { %v14779_v34 = vpop.permute.xlu0 %9574  ;;  %v6274_v15 = vsel %vm3321_vm8, %v9939_v62, %v9542_v7  ;;  %v6144_v10 = vsel %vm6105_vm14, %v6079_v11, %v9556_v22  ;;  %v6145_v2 = vsel %vm6105_vm14, %v6080_v43, %v9557_v0  ;;  %v6401_v54 = vsel %vm6170_vm15, %v6337_v40, %v9551_v12 }
 0x74e   :  { %7360 = vmatpush.msrb.mxu3 %v7278_v52  ;;  %v9580_v52 = vpop.permute.xlu1 %9579  ;;  %v6209_v42 = vsel %vm6170_vm15, %v6144_v10, %v9561_v30  ;;  %v6210_v13 = vsel %vm6170_vm15, %v6145_v2, %v9562_v14  ;;  %v6338_v28 = vsel %vm6105_vm14, %v6274_v15, %v9547_v55  ;;  %v9572_v53 = vunpack.i.h.bf16 %v14772_v38 }
 0x74f   :  { %v6402_v39 = vsel %vm6170_vm15, %v6338_v28, %v9552_v20  ;;  %v6484_v16 = vpack.c.bf16 %v6210_v13, %v6209_v42  ;;  %v9582_v26 = vunpack.i.h.bf16 %v9580_v52  ;;  %v9581_v48 = vunpack.i.l.bf16 %v9580_v52  ;;  %v16179_v13 = vld [vmem:[#allocation49_spill] sm:$0xff] }
 0x750   :  { %7361 = vmatpush.msrb.mxu3 %v7277_v4  ;;  %v6485_v59 = vpack.c.bf16 %v6402_v39, %v6401_v54  ;;  %v9571_v0 = vunpack.i.l.bf16 %v14772_v38  ;;  %v9577_v55 = vunpack.i.h.bf16 %v14779_v34  ;;  %v9576_v3 = vunpack.i.l.bf16 %v14779_v34 }
 0x751   :  { %v6992_v50 = vpop.f32.mrf.mxu2  ;;  %v9012_v40 = vunpack.i.h.bf16 %v16179_v13  ;;  %v9011_v39 = vunpack.i.l.bf16 %v16179_v13 }
 0x752   :  { %v14764_v41 = vadd.f32 %v6992_v50, %v6824_v58  ;;  %v6826_v32 = vpop.f32.mrf.mxu1  ;;  %7362 = vmatpush.msrb.mxu3 %v7276_v25  ;;  %v9585_v47 = vpop.permute.xlu2 %9584  ;;  %v9007_v50 = vunpack.i.h.bf16 %v16178_v49  ;;  %v9006_v25 = vunpack.i.l.bf16 %v16178_v49  ;;  %v4226_v49 = vld [vmem:[#allocation3 + $0x241] sm:$0xff] }
 0x753   :  { %v6827_v44 = vadd.f32 %v14704_v60, %v6826_v32  ;;  %v9587_v21 = vunpack.i.h.bf16 %v9585_v47  ;;  %v9586_v43 = vunpack.i.l.bf16 %v9585_v47 }
 0x754   :  { %7363 = vmatpush.msrb.mxu3 %v7275_v51  ;;  %v4224_v51 = vld [vmem:[#allocation3 + $0x229] sm:$0xff]  ;;  %v6082_v7 = vsel %vm3321_vm8, %v3969_v61, %v9007_v50 }
 0x755   :  { %6865 = vmatmul.bf16.gmra.mxu1 %v6481_v23  ;;  %v14798_v58 = vpop.permute.xlu0 %9589  ;;  %v4225_v23 = vld [vmem:[#allocation3 + $0x231] sm:$0xff]  ;;  %v6275_v18 = vsel %vm3321_vm8, %v4224_v51, %v9566_v31  ;;  %v4227_v50 = vld [vmem:[#allocation3 + $0x249] sm:$0xff] }
 0x756   :  { %7034 = vmatmul.bf16.gmra.mxu2 %v6482_v36  ;;  %7364 = vmatpush.msrb.mxu3 %v7274_v63  ;;  %v14804_v37 = vpop.permute.xlu1 %9594  ;;  %v3968_v63 = vld [vmem:[#allocation3 + $0x210] sm:$0xff]  ;;  %v6276_v45 = vsel %vm3321_vm8, %v4225_v23, %v9567_v5  ;;  %v9592_v28 = vunpack.i.h.bf16 %v14798_v58 }
 0x757   :  { %v6081_v35 = vsel %vm3321_vm8, %v3968_v63, %v9006_v25  ;;  %v6340_v11 = vsel %vm6105_vm14, %v6276_v45, %v9572_v53  ;;  %v9597_v47 = vunpack.i.h.bf16 %v14804_v37 }
 0x758   :  { %v6404_v30 = vsel %vm6170_vm15, %v6340_v11, %v9577_v55 }
 0x759   :  { %v6995_v29 = vpop.f32.mrf.mxu2 }
 0x75a   :  { %v6828_v9 = vpop.f32.mrf.mxu1  ;;  %v14781_v56 = vadd.f32 %v6995_v29, %v6827_v44  ;;  %v9600_v22 = vpop.permute.xlu2 %9599  ;;  %v6147_v44 = vsel %vm6105_vm14, %v6082_v7, %v9582_v26  ;;  %v6146_v29 = vsel %vm6105_vm14, %v6081_v35, %v9581_v48  ;;  %v3971_v48 = vld [vmem:[#allocation3 + $0x230] sm:$0xff] }
 0x75b   :  { %v6829_v1 = vadd.f32 %v14704_v60, %v6828_v9  ;;  %v6339_v9 = vsel %vm6105_vm14, %v6275_v18, %v9571_v0  ;;  %v6211_v38 = vsel %vm6170_vm15, %v6146_v29, %v9586_v43  ;;  %v6212_v17 = vsel %vm6170_vm15, %v6147_v44, %v9587_v21 }
 0x75c   :  { %v6403_v14 = vsel %vm6170_vm15, %v6339_v9, %v9576_v3  ;;  %v6487_v12 = vpack.c.bf16 %v6212_v17, %v6211_v38  ;;  %v6084_v23 = vsel %vm3321_vm8, %v3971_v48, %v9012_v40  ;;  %v9602_v18 = vunpack.i.h.bf16 %v9600_v22  ;;  %v16180_v3 = vld [vmem:[#allocation11_spill] sm:$0xff] }
 0x75d   :  { %v9605_v62 = vpop.permute.xlu0 %9604  ;;  %v6488_v52 = vpack.c.bf16 %v6404_v30, %v6403_v14  ;;  %v9601_v7 = vunpack.i.l.bf16 %v9600_v22  ;;  %v9017_v22 = vunpack.i.h.bf16 %v16180_v3 }
 0x75e   :  { %v9610_v20 = vpop.permute.xlu1 %9609  ;;  %v9607_v5 = vunpack.i.h.bf16 %v9605_v62  ;;  %v9606_v31 = vunpack.i.l.bf16 %v9605_v62  ;;  %v9016_v62 = vunpack.i.l.bf16 %v16180_v3 }
 0x75f   :  { %v9612_v25 = vunpack.i.h.bf16 %v9610_v20  ;;  %v9611_v26 = vunpack.i.l.bf16 %v9610_v20  ;;  %v3973_v20 = vld [vmem:[#allocation3 + $0x248] sm:$0xff] }
 0x760   :  { %v6149_v61 = vsel %vm6105_vm14, %v6084_v23, %v9607_v5 }
 0x761   :  { %v6997_v4 = vpop.f32.mrf.mxu2  ;;  %v6214_v0 = vsel %vm6170_vm15, %v6149_v61, %v9612_v25 }
 0x762   :  { %v6831_v6 = vpop.f32.mrf.mxu1  ;;  %v14796_v57 = vadd.f32 %v6997_v4, %v6829_v1  ;;  %v14828_v34 = vpop.permute.xlu2 %9614  ;;  %v9591_v1 = vunpack.i.l.bf16 %v14798_v58  ;;  %v3970_v58 = vld [vmem:[#allocation3 + $0x228] sm:$0xff] }
 0x763   :  { %v6832_v24 = vadd.f32 %v14704_v60, %v6831_v6  ;;  %v9596_v6 = vunpack.i.l.bf16 %v14804_v37  ;;  %v6083_v37 = vsel %vm3321_vm8, %v3970_v58, %v9011_v39  ;;  %v9617_v38 = vunpack.i.h.bf16 %v14828_v34 }
 0x764   :  { %v6148_v45 = vsel %vm6105_vm14, %v6083_v37, %v9606_v31  ;;  %v9616_v17 = vunpack.i.l.bf16 %v14828_v34 }
 0x765   :  { %6870 = vmatmul.bf16.gmra.mxu1 %v6484_v16  ;;  %v14834_v4 = vpop.permute.xlu0 %9619  ;;  %v6213_v53 = vsel %vm6170_vm15, %v6148_v45, %v9611_v26 }
 0x766   :  { %7039 = vmatmul.bf16.gmra.mxu2 %v6485_v59  ;;  %v9625_v51 = vpop.permute.xlu1 %9624  ;;  %v6490_v11 = vpack.c.bf16 %v6214_v0, %v6213_v53  ;;  %v9622_v40 = vunpack.i.h.bf16 %v14834_v4 }
 0x767   :  { %v9626_v25 = vunpack.i.l.bf16 %v9625_v51 }
 0x769   :  { %v7000_v32 = vpop.f32.mrf.mxu2 }
 0x76a   :  { %v6833_v36 = vpop.f32.mrf.mxu1  ;;  %v14809_v27 = vadd.f32 %v7000_v32, %v6832_v24  ;;  %v6278_v24 = vsel %vm3321_vm8, %v4227_v50, %v9592_v28  ;;  %v6277_v32 = vsel %vm3321_vm8, %v4226_v49, %v9591_v1  ;;  %v9630_v35 = vpop.permute.xlu2 %9629  ;;  %v9621_v28 = vunpack.i.l.bf16 %v14834_v4  ;;  %v9941_v1 = vld [vmem:[#allocation3 + $0x261] sm:$0xff] }
 0x76b   :  { %v6834_v15 = vadd.f32 %v14704_v60, %v6833_v36  ;;  %v6342_v36 = vsel %vm6105_vm14, %v6278_v24, %v9597_v47  ;;  %v6341_v63 = vsel %vm6105_vm14, %v6277_v32, %v9596_v6  ;;  %v9631_v14 = vunpack.i.l.bf16 %v9630_v35 }
 0x76c   :  { %v6405_v29 = vsel %vm6170_vm15, %v6341_v63, %v9601_v7  ;;  %v6406_v21 = vsel %vm6170_vm15, %v6342_v36, %v9602_v18  ;;  %v6280_v34 = vsel %vm3321_vm8, %v9941_v1, %v9617_v38  ;;  %v9627_v50 = vunpack.i.h.bf16 %v9625_v51 }
 0x76d   :  { %v9635_v9 = vpop.permute.xlu0 %9634  ;;  %v6491_v55 = vpack.c.bf16 %v6406_v21, %v6405_v29  ;;  %v6344_v48 = vsel %vm6105_vm14, %v6280_v34, %v9622_v40 }
 0x76e   :  { %v9637_v47 = vunpack.i.h.bf16 %v9635_v9  ;;  %v9636_v6 = vunpack.i.l.bf16 %v9635_v9  ;;  %v6408_v37 = vsel %vm6170_vm15, %v6344_v48, %v9627_v50 }
 0x771   :  { %v7002_v46 = vpop.f32.mrf.mxu2 }
 0x772   :  { %v14826_v10 = vadd.f32 %v7002_v46, %v6834_v15  ;;  %v6836_v2 = vpop.f32.mrf.mxu1  ;;  %v9640_v15 = vpop.permute.xlu1 %9639  ;;  %v9632_v46 = vunpack.i.h.bf16 %v9630_v35  ;;  %v16181_v35 = vld [vmem:[#allocation152_spill] sm:$0xff] }
 0x773   :  { %v6837_v42 = vadd.f32 %v14704_v60, %v6836_v2  ;;  %v3972_v2 = vld [vmem:[#allocation3 + $0x240] sm:$0xff]  ;;  %v9642_v18 = vunpack.i.h.bf16 %v9640_v15  ;;  %v9641_v7 = vunpack.i.l.bf16 %v9640_v15  ;;  %v9022_v53 = vunpack.i.h.bf16 %v16181_v35 }
 0x774   :  { %v6085_v13 = vsel %vm3321_vm8, %v3972_v2, %v9016_v62  ;;  %v9021_v0 = vunpack.i.l.bf16 %v16181_v35  ;;  %v3975_v62 = vld [vmem:[#allocation3 + $0x260] sm:$0xff]  ;;  %v4232_v35 = vld [vmem:[#allocation3 + $0x289] sm:$0xff] }
 0x775   :  { %6875 = vmatmul.bf16.gmra.mxu1 %v6487_v12  ;;  %v9645_v12 = vpop.permute.xlu2 %9644  ;;  %v6150_v5 = vsel %vm6105_vm14, %v6085_v13, %v9631_v14  ;;  %v9650_v49 = vpop.permute.xlu0 %9649  ;;  %v6088_v15 = vsel %vm3321_vm8, %v3975_v62, %v9022_v53  ;;  %v4233_v53 = vld [vmem:[#allocation3 + $0x291] sm:$0xff] }
 0x776   :  { %7044 = vmatmul.bf16.gmra.mxu2 %v6488_v52  ;;  %v6215_v26 = vsel %vm6170_vm15, %v6150_v5, %v9636_v6  ;;  %v9647_v2 = vunpack.i.h.bf16 %v9645_v12  ;;  %v3976_v62 = vld [vmem:[#allocation3 + $0x270] sm:$0xff] }
 0x779   :  { %v7005_v54 = vpop.f32.mrf.mxu2 }
 0x77a   :  { %v14839_v16 = vadd.f32 %v7005_v54, %v6837_v42  ;;  %v14841_v59 = vpop.f32.mrf.mxu1  ;;  %v6086_v42 = vsel %vm3321_vm8, %v3973_v20, %v9017_v22  ;;  %v9942_v54 = vld [vmem:[#allocation3 + $0x259] sm:$0xff]  ;;  %v9655_v24 = vpop.permute.xlu1 %9654  ;;  %v9646_v20 = vunpack.i.l.bf16 %v9645_v12 }
 0x77b   :  { %v6279_v39 = vsel %vm3321_vm8, %v9942_v54, %v9616_v17  ;;  %v6151_v31 = vsel %vm6105_vm14, %v6086_v42, %v9632_v46  ;;  %v9657_v29 = vunpack.i.h.bf16 %v9655_v24  ;;  %v9656_v21 = vunpack.i.l.bf16 %v9655_v24  ;;  %v3974_v22 = vld [vmem:[#allocation3 + $0x258] sm:$0xff] }
 0x77c   :  { %v6216_v58 = vsel %vm6170_vm15, %v6151_v31, %v9637_v47  ;;  %v6343_v4 = vsel %vm6105_vm14, %v6279_v39, %v9621_v28  ;;  %v6087_v14 = vsel %vm3321_vm8, %v3974_v22, %v9021_v0  ;;  %v9652_v39 = vunpack.i.h.bf16 %v9650_v49 }
 0x77d   :  { %v6407_v23 = vsel %vm6170_vm15, %v6343_v4, %v9626_v25  ;;  %v6493_v63 = vpack.c.bf16 %v6216_v58, %v6215_v26  ;;  %v9660_v61 = vpop.permute.xlu2 %9659  ;;  %v9665_v45 = vpop.permute.xlu0 %9664  ;;  %v6153_v42 = vsel %vm6105_vm14, %v6088_v15, %v9657_v29  ;;  %v6152_v13 = vsel %vm6105_vm14, %v6087_v14, %v9656_v21  ;;  %v3977_v15 = vld [vmem:[#allocation3 + $0x278] sm:$0xff] }
 0x77e   :  { %v6494_v51 = vpack.c.bf16 %v6408_v37, %v6407_v23  ;;  %v9662_v40 = vunpack.i.h.bf16 %v9660_v61  ;;  %v9661_v28 = vunpack.i.l.bf16 %v9660_v61  ;;  %v9651_v47 = vunpack.i.l.bf16 %v9650_v49  ;;  %v16182_v61 = vld [vmem:[#allocation113_spill] sm:$0xff] }
 0x77f   :  { %v9667_v24 = vunpack.i.h.bf16 %v9665_v45  ;;  %v9666_v23 = vunpack.i.l.bf16 %v9665_v45 }
 0x780   :  { %v6217_v6 = vsel %vm6170_vm15, %v6152_v13, %v9661_v28  ;;  %v6218_v5 = vsel %vm6170_vm15, %v6153_v42, %v9662_v40 }
 0x781   :  { %v14853_v44 = vpop.f32.mrf.mxu2  ;;  %v6496_v58 = vpack.c.bf16 %v6218_v5, %v6217_v6  ;;  %v6284_v21 = vsel %vm3321_vm8, %v4233_v53, %v9667_v24 }
 0x782   :  { %v14857_v43 = vpop.f32.mrf.mxu1  ;;  %v9670_v46 = vpop.permute.xlu1 %9669 }
 0x783   :  { %v9672_v37 = vunpack.i.h.bf16 %v9670_v46  ;;  %v9671_v49 = vunpack.i.l.bf16 %v9670_v46 }
 0x785   :  { %6880 = vmatmul.bf16.gmra.mxu1 %v6490_v11  ;;  %v4230_v11 = vld [vmem:[#allocation3 + $0x271] sm:$0xff]  ;;  %v9675_v1 = vpop.permute.xlu2 %9674  ;;  %v9680_v31 = vpop.permute.xlu0 %9679 }
 0x786   :  { %7049 = vmatmul.bf16.gmra.mxu2 %v6491_v55  ;;  %v4231_v55 = vld [vmem:[#allocation3 + $0x279] sm:$0xff]  ;;  %v6281_v17 = vsel %vm3321_vm8, %v4230_v11, %v9641_v7  ;;  %v9027_v7 = vunpack.i.h.bf16 %v16182_v61  ;;  %v9681_v0 = vunpack.i.l.bf16 %v9680_v31  ;;  %v6283_v11 = vsel %vm3321_vm8, %v4232_v35, %v9666_v23 }
 0x787   :  { %v6282_v38 = vsel %vm3321_vm8, %v4231_v55, %v9642_v18  ;;  %v6345_v34 = vsel %vm6105_vm14, %v6281_v17, %v9646_v20  ;;  %v9682_v55 = vunpack.i.h.bf16 %v9680_v31  ;;  %v6347_v17 = vsel %vm6105_vm14, %v6283_v11, %v9671_v49  ;;  %v16183_v49 = vld [vmem:[#allocation104_spill] sm:$0xff] }
 0x788   :  { %v6346_v54 = vsel %vm6105_vm14, %v6282_v38, %v9647_v2  ;;  %v6409_v12 = vsel %vm6170_vm15, %v6345_v34, %v9651_v47  ;;  %v6348_v38 = vsel %vm6105_vm14, %v6284_v21, %v9672_v37  ;;  %v9677_v2 = vunpack.i.h.bf16 %v9675_v1 }
 0x789   :  { %v14863_v30 = vpop.f32.mrf.mxu2  ;;  %v6410_v25 = vsel %vm6170_vm15, %v6346_v54, %v9652_v39  ;;  %v9676_v20 = vunpack.i.l.bf16 %v9675_v1  ;;  %v6090_v42 = vsel %vm3321_vm8, %v3977_v15, %v9027_v7  ;;  %v16185_v7 = vld [vmem:[#allocation162_spill] sm:$0xff] }
 0x78a   :  { %v14865_v52 = vpop.f32.mrf.mxu1  ;;  %v6497_v4 = vpack.c.bf16 %v6410_v25, %v6409_v12  ;;  %v9685_v48 = vpop.permute.xlu1 %9684  ;;  %v6155_v28 = vsel %vm6105_vm14, %v6090_v42, %v9682_v55  ;;  %v6412_v47 = vsel %vm6170_vm15, %v6348_v38, %v9677_v2  ;;  %v9032_v35 = vunpack.i.h.bf16 %v16185_v7  ;;  %v3979_v38 = vld [vmem:[#allocation3 + $0x290] sm:$0xff] }
 0x78b   :  { %v9686_v45 = vunpack.i.l.bf16 %v9685_v48  ;;  %v9687_v46 = vunpack.i.h.bf16 %v9685_v48  ;;  %v6411_v39 = vsel %vm6170_vm15, %v6347_v17, %v9676_v20  ;;  %v6844_v37 = vadd.f32 %v14704_v60, %v14865_v52  ;;  %v16186_v52 = vld [vmem:[#allocation102_spill] sm:$0xff] }
 0x78c   :  { %v6500_v23 = vpack.c.bf16 %v6412_v47, %v6411_v39  ;;  %v9031_v53 = vunpack.i.l.bf16 %v16185_v7  ;;  %v14956_v47 = vpop.f32.mrf.mxu3 }
 0x78d   :  { %v14909_v22 = vpop.permute.xlu0 %9694  ;;  %v6220_v31 = vsel %vm6170_vm15, %v6155_v28, %v9687_v46  ;;  %v16187_v46 = vld [vmem:[#allocation101_spill] sm:$0xff] }
 0x791   :  { %v14879_v32 = vpop.f32.mrf.mxu2 }
 0x792   :  { %v14883_v36 = vpop.f32.mrf.mxu1  ;;  %v14918_v34 = vpop.permute.xlu1 %9699 }
 0x795   :  { %6885 = vmatmul.bf16.gmra.mxu1 %v6493_v63  ;;  %v14903_v63 = vpop.permute.xlu2 %9689 }
 0x796   :  { %7054 = vmatmul.bf16.gmra.mxu2 %v6494_v51  ;;  %v9026_v51 = vunpack.i.l.bf16 %v16182_v61  ;;  %v9691_v11 = vunpack.i.l.bf16 %v14903_v63 }
 0x798   :  { %v6089_v14 = vsel %vm3321_vm8, %v3976_v62, %v9026_v51  ;;  %v16184_v51 = vld [vmem:[#allocation103_spill] sm:$0xff] }
 0x799   :  { %v14887_v9 = vpop.f32.mrf.mxu2  ;;  %v6154_v13 = vsel %vm6105_vm14, %v6089_v14, %v9681_v0  ;;  %v9710_v0 = vpop.permute.xlu0 %9709  ;;  %v3978_v62 = vld [vmem:[#allocation3 + $0x288] sm:$0xff]  ;;  %v6092_v14 = vsel %vm3321_vm8, %v3979_v38, %v9032_v35 }
 0x79a   :  { %v14889_v3 = vpop.f32.mrf.mxu1  ;;  %v6219_v54 = vsel %vm6170_vm15, %v6154_v13, %v9686_v45  ;;  %v6839_v45 = vadd.f32 %v14704_v60, %v14841_v59  ;;  %v6091_v2 = vsel %vm3321_vm8, %v3978_v62, %v9031_v53  ;;  %v14950_v42 = vpop.permute.xlu1 %9714 }
 0x79b   :  { %v6849_v6 = vadd.f32 %v14704_v60, %v14889_v3  ;;  %v6499_v24 = vpack.c.bf16 %v6220_v31, %v6219_v54  ;;  %v16188_v54 = vld [vmem:[#allocation156_spill] sm:$0xff]  ;;  %v9944_v31 = vld [vmem:[#allocation3 + $0x2a1] sm:$0xff] }
 0x79c   :  { %v7008_v13 = vadd.f32 %v14853_v44, %v6839_v45  ;;  %v16192_v45 = vld [vmem:[#allocation99_spill] sm:$0xff] }
 0x79d   :  { %v9705_v25 = vpop.permute.xlu2 %9704  ;;  %v7172_v62 = vadd.f32 %v16192_v45, %v14826_v10  ;;  %v16200_v45 = vld [vmem:[#allocation32_spill] sm:$0xff] }
 0x79e   :  { %v9706_v55 = vunpack.i.l.bf16 %v9705_v25  ;;  %v9707_v20 = vunpack.i.h.bf16 %v9705_v25  ;;  %v9711_v25 = vunpack.i.l.bf16 %v9710_v0 }
 0x7a0   :  { %v6156_v44 = vsel %vm6105_vm14, %v6091_v2, %v9706_v55  ;;  %v7297_v2 = vmax.f32 %v7172_v62, 0.0  ;;  %v7155_v62 = vadd.f32 %v16200_v45, %v14676_v19 }
 0x7a1   :  { %v7017_v50 = vpop.f32.mrf.mxu2 }
 0x7a2   :  { %v6851_v26 = vpop.f32.mrf.mxu1  ;;  %v9730_v38 = vpop.permute.xlu1 %9729 }
 0x7a3   :  { %v6852_v40 = vadd.f32 %v14704_v60, %v6851_v26  ;;  %v6847_v26 = vadd.f32 %v14704_v60, %v14883_v36  ;;  %v6842_v36 = vadd.f32 %v14704_v60, %v14857_v43 }
 0x7a5   :  { %6890 = vmatmul.bf16.gmra.mxu1 %v6496_v58  ;;  %v7018_v58 = vadd.f32 %v7017_v50, %v6849_v6  ;;  %v7016_v3 = vadd.f32 %v14887_v9, %v6847_v26  ;;  %v7013_v50 = vadd.f32 %v14879_v32, %v6844_v37  ;;  %v9692_v9 = vunpack.i.h.bf16 %v14903_v63 }
 0x7a6   :  { %7059 = vmatmul.bf16.gmra.mxu2 %v6497_v4  ;;  %v7011_v17 = vadd.f32 %v14863_v30, %v6842_v36  ;;  %v9697_v63 = vunpack.i.h.bf16 %v14909_v22  ;;  %v9696_v6 = vunpack.i.l.bf16 %v14909_v22  ;;  %v9712_v26 = vunpack.i.h.bf16 %v9710_v0 }
 0x7a7   :  { %v7187_v21 = vadd.f32 %v16186_v52, %v7018_v58  ;;  %v7185_v15 = vadd.f32 %v16187_v46, %v7016_v3  ;;  %v7182_v39 = vadd.f32 %v16188_v54, %v7013_v50  ;;  %v14962_v58 = vpop.permute.xlu2 %9719  ;;  %v9702_v22 = vunpack.i.h.bf16 %v14918_v34 }
 0x7a8   :  { %v9701_v37 = vunpack.i.l.bf16 %v14918_v34  ;;  %v16191_v34 = vld [vmem:[#allocation100_spill] sm:$0xff] }
 0x7a9   :  { %v7020_v18 = vpop.f32.mrf.mxu2  ;;  %v7303_v28 = vmax.f32 %v7187_v21, 0.0  ;;  %v7301_v3 = vmax.f32 %v7182_v39, 0.0  ;;  %v7175_v50 = vadd.f32 %v16191_v34, %v14839_v16  ;;  %v16193_v16 = vld [vmem:[#allocation98_spill] sm:$0xff]  ;;  %v16196_v39 = vld [vmem:[#allocation95_spill] sm:$0xff]  ;;  %v16199_v34 = vld [vmem:[#allocation33_spill] sm:$0xff] }
 0x7aa   :  { %v6853_v29 = vpop.f32.mrf.mxu1  ;;  %v7021_v1 = vadd.f32 %v7020_v18, %v6852_v40  ;;  %v7170_v46 = vadd.f32 %v16193_v16, %v14809_v27 }
 0x7ab   :  { %v6854_v5 = vadd.f32 %v14704_v60, %v6853_v29 }
 0x7ac   :  { %v7190_v18 = vadd.f32 %v16184_v51, %v7021_v1  ;;  %v9943_v1 = vld [vmem:[#allocation3 + $0x2a9] sm:$0xff]  ;;  %v14969_v51 = vpop.permute.xlu0 %9724  ;;  %v7296_v54 = vmax.f32 %v7170_v46, 0.0 }
 0x7ae   :  { %v7304_v32 = vmax.f32 %v7190_v18, 0.0  ;;  %v6221_v18 = vsel %vm6170_vm15, %v6156_v44, %v9711_v25  ;;  %v16197_v25 = vld [vmem:[#allocation93_spill] sm:$0xff]  ;;  %v3981_v44 = vld [vmem:[#allocation3 + $0x2a8] sm:$0xff] }
 0x7b1   :  { %v7022_v12 = vpop.f32.mrf.mxu2 }
 0x7b2   :  { %v7023_v4 = vadd.f32 %v7022_v12, %v6854_v5  ;;  %v6856_v48 = vpop.f32.mrf.mxu1  ;;  %v6286_v5 = vsel %vm3321_vm8, %v9943_v1, %v9692_v9  ;;  %v6285_v12 = vsel %vm3321_vm8, %v9944_v31, %v9691_v11  ;;  %v3980_v1 = vld [vmem:[#allocation3 + $0x2a0] sm:$0xff]  ;;  %v9732_v31 = vunpack.i.h.bf16 %v9730_v38 }
 0x7b3   :  { %v6857_v43 = vadd.f32 %v14704_v60, %v6856_v48  ;;  %v16189_v48 = vld [vmem:[#allocation43_spill] sm:$0xff]  ;;  %v6349_v7 = vsel %vm6105_vm14, %v6285_v12, %v9696_v6  ;;  %v6350_v35 = vsel %vm6105_vm14, %v6286_v5, %v9697_v63  ;;  %v16194_v63 = vld [vmem:[#allocation96_spill] sm:$0xff]  ;;  %v7165_v6 = vadd.f32 %v16196_v39, %v14781_v56 }
 0x7b4   :  { %v7192_v61 = vadd.f32 %v16183_v49, %v7023_v4  ;;  %v7302_v4 = vmax.f32 %v7185_v15, 0.0  ;;  %v16190_v49 = vld [vmem:[#allocation34_spill] sm:$0xff]  ;;  %v6413_v52 = vsel %vm6170_vm15, %v6349_v7, %v9701_v37  ;;  %v6414_v21 = vsel %vm6170_vm15, %v6350_v35, %v9702_v22  ;;  %v14986_v15 = vpop.f32.mrf.mxu3  ;;  %v14997_v5 = vpop.permute.xlu0 %9739 }
 0x7b5   :  { %6895 = vmatmul.bf16.gmra.mxu1 %v6499_v24  ;;  %v7180_v24 = vadd.f32 %v16189_v48, %v7011_v17  ;;  %v4237_v48 = vld [vmem:[#allocation3 + $0x2c1] sm:$0xff]  ;;  %v9742_v39 = vunpack.i.h.bf16 %v14997_v5 }
 0x7b6   :  { %7064 = vmatmul.bf16.gmra.mxu2 %v6500_v23  ;;  %v7305_v29 = vmax.f32 %v7192_v61, 0.0  ;;  %v6157_v23 = vsel %vm6105_vm14, %v6092_v14, %v9707_v20  ;;  %v7177_v61 = vadd.f32 %v16190_v49, %v7008_v13  ;;  %v9735_v14 = vpop.permute.xlu2 %9734  ;;  %v7167_v20 = vadd.f32 %v16194_v63, %v14796_v57 }
 0x7b7   :  { %v7300_v0 = vmax.f32 %v7180_v24, 0.0  ;;  %v6222_v36 = vsel %vm6170_vm15, %v6157_v23, %v9712_v26  ;;  %v9731_v57 = vunpack.i.l.bf16 %v9730_v38  ;;  %v7162_v26 = vadd.f32 %v16197_v25, %v14764_v41 }
 0x7b8   :  { %7369 = vmatpush.msrb.mxu0 %v7305_v29  ;;  %v7299_v55 = vmax.f32 %v7177_v61, 0.0  ;;  %v6502_v17 = vpack.c.bf16 %v6222_v36, %v6221_v18  ;;  %v7295_v23 = vmax.f32 %v7167_v20, 0.0  ;;  %v9722_v49 = vunpack.i.h.bf16 %v14962_v58  ;;  %v16198_v18 = vld [vmem:[#allocation92_spill] sm:$0xff] }
 0x7b9   :  { %v7025_v59 = vpop.f32.mrf.mxu2  ;;  %v9721_v41 = vunpack.i.l.bf16 %v14962_v58  ;;  %v7294_v61 = vmax.f32 %v7165_v6, 0.0  ;;  %v7160_v7 = vadd.f32 %v16198_v18, %v14734_v33  ;;  %v7293_v36 = vmax.f32 %v7162_v26, 0.0 }
 0x7ba   :  { %v14953_v40 = vadd.f32 %v7025_v59, %v6857_v43  ;;  %v6858_v30 = vpop.f32.mrf.mxu1  ;;  %7370 = vmatpush.msrb.mxu0 %v7304_v32  ;;  %v6503_v43 = vpack.c.bf16 %v6414_v21, %v6413_v52  ;;  %v7298_v32 = vmax.f32 %v7175_v50, 0.0  ;;  %v16195_v59 = vld [vmem:[#allocation161_spill] sm:$0xff]  ;;  %v7157_v50 = vadd.f32 %v16199_v34, %v14710_v8 }
 0x7bb   :  { %v6859_v53 = vadd.f32 %v14704_v60, %v6858_v30  ;;  %v9037_v10 = vunpack.i.h.bf16 %v16195_v59  ;;  %v9036_v13 = vunpack.i.l.bf16 %v16195_v59  ;;  %v9717_v30 = vunpack.i.h.bf16 %v14950_v42  ;;  %v15050_v34 = vld [vmem:[%s15265_s4] ss:$0 sm:$0xff] }
 0x7bc   :  { %7371 = vmatpush.msrb.mxu0 %v7303_v28  ;;  %v9716_v28 = vunpack.i.l.bf16 %v14950_v42  ;;  %v9736_v52 = vunpack.i.l.bf16 %v9735_v14  ;;  %v9727_v33 = vunpack.i.h.bf16 %v14969_v51  ;;  %v7292_v8 = vmax.f32 %v7160_v7, 0.0  ;;  %v9755_v19 = vpop.permute.xlu0 %9754 }
 0x7bd   :  { %v6094_v22 = vsel %vm3321_vm8, %v3981_v44, %v9037_v10  ;;  %v6093_v56 = vsel %vm3321_vm8, %v3980_v1, %v9036_v13  ;;  %v6288_v37 = vsel %vm3321_vm8, %v4237_v48, %v9717_v30  ;;  %v7291_v63 = vmax.f32 %v7157_v50, 0.0 }
 0x7be   :  { %7372 = vmatpush.msrb.mxu0 %v7302_v4  ;;  %v4236_v4 = vld [vmem:[#allocation3 + $0x2b9] sm:$0xff]  ;;  %v6159_v35 = vsel %vm6105_vm14, %v6094_v22, %v9732_v31  ;;  %v6352_v58 = vsel %vm6105_vm14, %v6288_v37, %v9722_v49  ;;  %v9750_v38 = vpop.permute.xlu2 %9749  ;;  %v7290_v10 = vmax.f32 %v7155_v62, 0.0  ;;  %v9741_v6 = vunpack.i.l.bf16 %v14997_v5 }
 0x7bf   :  { %v9756_v48 = vunpack.i.l.bf16 %v9755_v19  ;;  %v3983_v37 = vld [vmem:[#allocation3 + $0x2c0] sm:$0xff] }
 0x7c0   :  { %7373 = vmatpush.msrb.mxu0 %v7301_v3  ;;  %v6287_v3 = vsel %vm3321_vm8, %v4236_v4, %v9716_v28  ;;  %v9757_v4 = vunpack.i.h.bf16 %v9755_v19 }
 0x7c1   :  { %v7027_v29 = vpop.f32.mrf.mxu2  ;;  %v6351_v21 = vsel %vm6105_vm14, %v6287_v3, %v9721_v41 }
 0x7c2   :  { %v14980_v9 = vadd.f32 %v7027_v29, %v6859_v53  ;;  %v6861_v11 = vpop.f32.mrf.mxu1  ;;  %7374 = vmatpush.msrb.mxu0 %v7300_v0  ;;  %v6158_v53 = vsel %vm6105_vm14, %v6093_v56, %v9731_v57  ;;  %v9745_v0 = vpop.permute.xlu1 %9744  ;;  %v9737_v29 = vunpack.i.h.bf16 %v9735_v14  ;;  %v6416_v14 = vsel %vm6170_vm15, %v6352_v58, %v9727_v33  ;;  %v3982_v56 = vld [vmem:[#allocation3 + $0x2b8] sm:$0xff] }
 0x7c3   :  { %v6862_v27 = vadd.f32 %v14704_v60, %v6861_v11  ;;  %v15017_v11 = vpop.f32.mrf.mxu3  ;;  %v9747_v57 = vunpack.i.h.bf16 %v9745_v0 }
 0x7c4   :  { %7375 = vmatpush.msrb.mxu0 %v7299_v55  ;;  %v9726_v55 = vunpack.i.l.bf16 %v14969_v51  ;;  %v9770_v49 = vpop.permute.xlu0 %9769 }
 0x7c5   :  { %6900 = vmatmul.bf16.gmra.mxu1 %v6502_v17 }
 0x7c6   :  { %7069 = vmatmul.bf16.gmra.mxu2 %v6503_v43  ;;  %7376 = vmatpush.msrb.mxu0 %v7298_v32  ;;  %v6223_v43 = vsel %vm6170_vm15, %v6158_v53, %v9736_v52  ;;  %v6224_v32 = vsel %vm6170_vm15, %v6159_v35, %v9737_v29  ;;  %v6415_v46 = vsel %vm6170_vm15, %v6351_v21, %v9726_v55  ;;  %v9765_v25 = vpop.permute.xlu2 %9764 }
 0x7c7   :  { %v6505_v20 = vpack.c.bf16 %v6224_v32, %v6223_v43  ;;  %v6506_v59 = vpack.c.bf16 %v6416_v14, %v6415_v46  ;;  %v16202_v32 = vld [vmem:[#allocation114_spill] sm:$0xff] }
 0x7c8   :  { %7377 = vmatpush.msrb.mxu0 %v7297_v2  ;;  %v9046_v46 = vunpack.i.l.bf16 %v16202_v32 }
 0x7c9   :  { %v7030_v12 = vpop.f32.mrf.mxu2 }
 0x7ca   :  { %v15001_v42 = vadd.f32 %v7030_v12, %v6862_v27  ;;  %v6863_v24 = vpop.f32.mrf.mxu1  ;;  %7378 = vmatpush.msrb.mxu0 %v7296_v54  ;;  %v9760_v13 = vpop.permute.xlu1 %9759  ;;  %v16201_v27 = vld [vmem:[#allocation117_spill] sm:$0xff]  ;;  %v9746_v12 = vunpack.i.l.bf16 %v9745_v0  ;;  %v9752_v0 = vunpack.i.h.bf16 %v9750_v38 }
 0x7cb   :  { %v6864_v17 = vadd.f32 %v14704_v60, %v6863_v24  ;;  %v15031_v28 = vpop.f32.mrf.mxu3  ;;  %v9042_v54 = vunpack.i.h.bf16 %v16201_v27  ;;  %v9041_v31 = vunpack.i.l.bf16 %v16201_v27  ;;  %v4239_v24 = vld [vmem:[#allocation3 + $0x2d9] sm:$0xff]  ;;  %v9761_v22 = vunpack.i.l.bf16 %v9760_v13 }
 0x7cc   :  { %7379 = vmatpush.msrb.mxu0 %v7295_v23  ;;  %v9762_v23 = vunpack.i.h.bf16 %v9760_v13  ;;  %v6290_v3 = vsel %vm3321_vm8, %v4239_v24, %v9742_v39  ;;  %v9785_v14 = vpop.permute.xlu0 %9784  ;;  %v3984_v13 = vld [vmem:[#allocation3 + $0x2d0] sm:$0xff] }
 0x7cd   :  { %v6096_v41 = vsel %vm3321_vm8, %v3983_v37, %v9042_v54  ;;  %v6354_v18 = vsel %vm6105_vm14, %v6290_v3, %v9747_v57 }
 0x7ce   :  { %7380 = vmatpush.msrb.mxu0 %v7294_v61  ;;  %v6095_v61 = vsel %vm3321_vm8, %v3982_v56, %v9041_v31  ;;  %v6161_v35 = vsel %vm6105_vm14, %v6096_v41, %v9757_v4  ;;  %v6418_v55 = vsel %vm6170_vm15, %v6354_v18, %v9752_v0  ;;  %v9771_v31 = vunpack.i.l.bf16 %v9770_v49 }
 0x7cf   :  { %v6160_v53 = vsel %vm6105_vm14, %v6095_v61, %v9756_v48  ;;  %v6226_v52 = vsel %vm6170_vm15, %v6161_v35, %v9762_v23  ;;  %v9787_v48 = vunpack.i.h.bf16 %v9785_v14 }
 0x7d0   :  { %7381 = vmatpush.msrb.mxu0 %v7293_v36  ;;  %v9751_v36 = vunpack.i.l.bf16 %v9750_v38  ;;  %v6225_v29 = vsel %vm6170_vm15, %v6160_v53, %v9761_v22 }
 0x7d1   :  { %v7032_v16 = vpop.f32.mrf.mxu2 }
 0x7d2   :  { %v15028_v2 = vadd.f32 %v7032_v16, %v6864_v17  ;;  %v6866_v51 = vpop.f32.mrf.mxu1  ;;  %7382 = vmatpush.msrb.mxu0 %v7292_v8  ;;  %v9775_v21 = vpop.permute.xlu1 %9774  ;;  %v6508_v17 = vpack.c.bf16 %v6226_v52, %v6225_v29  ;;  %v9047_v16 = vunpack.i.h.bf16 %v16202_v32 }
 0x7d3   :  { %v6867_v30 = vadd.f32 %v14704_v60, %v6866_v51  ;;  %v4238_v60 = vld [vmem:[#allocation3 + $0x2d1] sm:$0xff]  ;;  %v15059_v38 = vpop.f32.mrf.mxu3  ;;  %v9780_v8 = vpop.permute.xlu2 %9779  ;;  %v9767_v51 = vunpack.i.h.bf16 %v9765_v25  ;;  %v9777_v56 = vunpack.i.h.bf16 %v9775_v21  ;;  %v9776_v37 = vunpack.i.l.bf16 %v9775_v21 }
 0x7d4   :  { %7383 = vmatpush.msrb.mxu0 %v7291_v63  ;;  %v6289_v5 = vsel %vm3321_vm8, %v4238_v60, %v9741_v6  ;;  %v9766_v63 = vunpack.i.l.bf16 %v9765_v25  ;;  %v6097_v6 = vsel %vm3321_vm8, %v3984_v13, %v9046_v46  ;;  %v9786_v60 = vunpack.i.l.bf16 %v9785_v14  ;;  %v3987_v14 = vld [vmem:[#allocation3 + $0x2f0] sm:$0xff]  ;;  %v9949_v13 = vld [vmem:[#allocation3 + $0x301] sm:$0xff] }
 0x7d5   :  { %6905 = vmatmul.bf16.gmra.mxu1 %v6505_v20  ;;  %v6353_v7 = vsel %vm6105_vm14, %v6289_v5, %v9746_v12  ;;  %v9782_v20 = vunpack.i.h.bf16 %v9780_v8  ;;  %v9946_v12 = vld [vmem:[#allocation3 + $0x2f1] sm:$0xff] }
 0x7d6   :  { %7074 = vmatmul.bf16.gmra.mxu2 %v6506_v59  ;;  %7384 = vmatpush.msrb.mxu0 %v7290_v10  ;;  %v6417_v33 = vsel %vm6170_vm15, %v6353_v7, %v9751_v36  ;;  %v9781_v59 = vunpack.i.l.bf16 %v9780_v8  ;;  %v6292_v25 = vsel %vm3321_vm8, %v9946_v12, %v9767_v51  ;;  %v9800_v7 = vpop.permute.xlu0 %9799 }
 0x7d7   :  { %v6509_v43 = vpack.c.bf16 %v6418_v55, %v6417_v33  ;;  %v16203_v33 = vld [vmem:[#allocation115_spill] sm:$0xff] }
 0x7d8   :  { %v6162_v23 = vsel %vm6105_vm14, %v6097_v6, %v9781_v59  ;;  %v9052_v55 = vunpack.i.h.bf16 %v16203_v33  ;;  %v9051_v8 = vunpack.i.l.bf16 %v16203_v33  ;;  %v9948_v59 = vld [vmem:[#allocation3 + $0x309] sm:$0xff] }
 0x7d9   :  { %v7035_v1 = vpop.f32.mrf.mxu2  ;;  %v6227_v41 = vsel %vm6170_vm15, %v6162_v23, %v9786_v60  ;;  %v9802_v23 = vunpack.i.h.bf16 %v9800_v7 }
 0x7da   :  { %v15037_v26 = vadd.f32 %v7035_v1, %v6867_v30  ;;  %v6868_v44 = vpop.f32.mrf.mxu1  ;;  %v3985_v30 = vld [vmem:[#allocation3 + $0x2d8] sm:$0xff]  ;;  %v9772_v1 = vunpack.i.h.bf16 %v9770_v49  ;;  %v9790_v57 = vpop.permute.xlu1 %9789 }
 0x7db   :  { %v6869_v50 = vadd.f32 %v15050_v34, %v6868_v44  ;;  %v6098_v39 = vsel %vm3321_vm8, %v3985_v30, %v9047_v16  ;;  %v9947_v44 = vld [vmem:[#allocation3 + $0x2e9] sm:$0xff]  ;;  %v15070_v24 = vpop.f32.mrf.mxu3  ;;  %v9795_v3 = vpop.permute.xlu2 %9794 }
 0x7dc   :  { %v6291_v4 = vsel %vm3321_vm8, %v9947_v44, %v9766_v63  ;;  %v6163_v22 = vsel %vm6105_vm14, %v6098_v39, %v9782_v20  ;;  %v6356_v18 = vsel %vm6105_vm14, %v6292_v25, %v9772_v1  ;;  %v3986_v63 = vld [vmem:[#allocation3 + $0x2e8] sm:$0xff]  ;;  %v4504_v39 = vld [vmem:[#allocation3 + $0x352] sm:$0xff]  ;;  %v9797_v1 = vunpack.i.h.bf16 %v9795_v3 }
 0x7dd   :  { %v6355_v5 = vsel %vm6105_vm14, %v6291_v4, %v9771_v31  ;;  %v6228_v61 = vsel %vm6170_vm15, %v6163_v22, %v9787_v48  ;;  %v6420_v0 = vsel %vm6170_vm15, %v6356_v18, %v9777_v56  ;;  %v6099_v6 = vsel %vm3321_vm8, %v3986_v63, %v9051_v8 }
 0x7de   :  { %v6419_v53 = vsel %vm6170_vm15, %v6355_v5, %v9776_v37  ;;  %v6511_v29 = vpack.c.bf16 %v6228_v61, %v6227_v41  ;;  %v9815_v20 = vpop.permute.xlu0 %9814  ;;  %v9796_v31 = vunpack.i.l.bf16 %v9795_v3  ;;  %v9801_v22 = vunpack.i.l.bf16 %v9800_v7 }
 0x7df   :  { %v6512_v52 = vpack.c.bf16 %v6420_v0, %v6419_v53  ;;  %v9817_v7 = vunpack.i.h.bf16 %v9815_v20 }
 0x7e1   :  { %v7037_v58 = vpop.f32.mrf.mxu2 }
 0x7e2   :  { %v15057_v45 = vadd.f32 %v7037_v58, %v6869_v50  ;;  %v6871_v62 = vpop.f32.mrf.mxu1  ;;  %v9805_v21 = vpop.permute.xlu1 %9804 }
 0x7e3   :  { %v6872_v19 = vadd.f32 %v15050_v34, %v6871_v62  ;;  %v15085_v58 = vpop.f32.mrf.mxu3  ;;  %v9792_v62 = vunpack.i.h.bf16 %v9790_v57  ;;  %v9807_v32 = vunpack.i.h.bf16 %v9805_v21  ;;  %v9806_v16 = vunpack.i.l.bf16 %v9805_v21 }
 0x7e5   :  { %6910 = vmatmul.bf16.gmra.mxu1 %v6508_v17  ;;  %v9791_v17 = vunpack.i.l.bf16 %v9790_v57  ;;  %v6164_v25 = vsel %vm6105_vm14, %v6099_v6, %v9806_v16 }
 0x7e6   :  { %7079 = vmatmul.bf16.gmra.mxu2 %v6509_v43  ;;  %v9810_v43 = vpop.permute.xlu2 %9809 }
 0x7e7   :  { %v6293_v30 = vsel %vm3321_vm8, %v9949_v13, %v9791_v17  ;;  %v9812_v44 = vunpack.i.h.bf16 %v9810_v43  ;;  %v9811_v4 = vunpack.i.l.bf16 %v9810_v43  ;;  %v3988_v13 = vld [vmem:[#allocation3 + $0x300] sm:$0xff] }
 0x7e8   :  { %v6357_v48 = vsel %vm6105_vm14, %v6293_v30, %v9796_v31  ;;  %v9950_v30 = vld [vmem:[#allocation3 + $0x321] sm:$0xff] }
 0x7e9   :  { %v7040_v10 = vpop.f32.mrf.mxu2  ;;  %v6229_v37 = vsel %vm6170_vm15, %v6164_v25, %v9811_v4  ;;  %v6421_v41 = vsel %vm6170_vm15, %v6357_v48, %v9801_v22 }
 0x7ea   :  { %v15064_v27 = vadd.f32 %v7040_v10, %v6872_v19  ;;  %v6873_v54 = vpop.f32.mrf.mxu1  ;;  %v6100_v19 = vsel %vm3321_vm8, %v3987_v14, %v9052_v55  ;;  %v6294_v10 = vsel %vm3321_vm8, %v9948_v59, %v9792_v62  ;;  %v9820_v56 = vpop.permute.xlu1 %9819  ;;  %v16204_v55 = vld [vmem:[#allocation50_spill] sm:$0xff] }
 0x7eb   :  { %v6874_v49 = vadd.f32 %v15050_v34, %v6873_v54  ;;  %v4503_v54 = vld [vmem:[#allocation3 + $0x34a] sm:$0xff]  ;;  %v6165_v12 = vsel %vm6105_vm14, %v6100_v19, %v9807_v32  ;;  %v6358_v60 = vsel %vm6105_vm14, %v6294_v10, %v9797_v1  ;;  %v15104_v5 = vpop.f32.mrf.mxu3  ;;  %v9057_v62 = vunpack.i.h.bf16 %v16204_v55 }
 0x7ec   :  { %v6522_v57 = vpack.c.bf16 %v4504_v39, %v4503_v54  ;;  %v6230_v3 = vsel %vm6170_vm15, %v6165_v12, %v9812_v44  ;;  %v6422_v61 = vsel %vm6170_vm15, %v6358_v60, %v9802_v23  ;;  %v9056_v17 = vunpack.i.l.bf16 %v16204_v55  ;;  %v9951_v39 = vld [vmem:[#allocation3 + $0x319] sm:$0xff] }
 0x7ed   :  { %v6514_v53 = vpack.c.bf16 %v6230_v3, %v6229_v37  ;;  %v6515_v0 = vpack.c.bf16 %v6422_v61, %v6421_v41  ;;  %v9822_v8 = vunpack.i.h.bf16 %v9820_v56  ;;  %v9821_v43 = vunpack.i.l.bf16 %v9820_v56 }
 0x7ee   :  { %7590 = vmatmul.msk.bf16.gmra.mxu3 %vm3321_vm8, %v6522_v57  ;;  %v9825_v18 = vpop.permute.xlu2 %9824  ;;  %v6296_v54 = vsel %vm3321_vm8, %v9950_v30, %v9817_v7  ;;  %v6101_v31 = vsel %vm3321_vm8, %v3988_v13, %v9056_v17  ;;  %v16205_v7 = vld [vmem:[#allocation118_spill] sm:$0xff] }
 0x7ef   :  { %v6360_v57 = vsel %vm6105_vm14, %v6296_v54, %v9822_v8  ;;  %v9827_v4 = vunpack.i.h.bf16 %v9825_v18  ;;  %v9826_v48 = vunpack.i.l.bf16 %v9825_v18  ;;  %v9072_v18 = vunpack.i.h.bf16 %v16205_v7  ;;  %v9952_v13 = vld [vmem:[#allocation3 + $0x318] sm:$0xff]  ;;  %v9953_v30 = vld [vmem:[#allocation3 + $0x320] sm:$0xff] }
 0x7f1   :  { %v7042_v35 = vpop.f32.mrf.mxu2  ;;  %v6424_v3 = vsel %vm6170_vm15, %v6360_v57, %v9827_v4  ;;  %v6104_v54 = vsel %vm3321_vm8, %v9953_v30, %v9072_v18 }
 0x7f2   :  { %v15081_v36 = vadd.f32 %v7042_v35, %v6874_v49  ;;  %v15083_v50 = vpop.f32.mrf.mxu1  ;;  %v9835_v21 = vpop.permute.xlu1 %9834 }
 0x7f3   :  { %v15118_v16 = vpop.f32.mrf.mxu3  ;;  %v9837_v59 = vunpack.i.h.bf16 %v9835_v21  ;;  %v9836_v10 = vunpack.i.l.bf16 %v9835_v21 }
 0x7f5   :  { %6915 = vmatmul.bf16.gmra.mxu1 %v6511_v29  ;;  %v9830_v29 = vpop.permute.xlu0 %9829 }
 0x7f6   :  { %7084 = vmatmul.bf16.gmra.mxu2 %v6512_v52  ;;  %v9816_v52 = vunpack.i.l.bf16 %v9815_v20  ;;  %v9832_v14 = vunpack.i.h.bf16 %v9830_v29  ;;  %v9831_v63 = vunpack.i.l.bf16 %v9830_v29  ;;  %v9840_v19 = vpop.permute.xlu2 %9839  ;;  %v3989_v20 = vld [vmem:[#allocation3 + $0x308] sm:$0xff] }
 0x7f7   :  { %v6102_v1 = vsel %vm3321_vm8, %v3989_v20, %v9057_v62  ;;  %v9842_v21 = vunpack.i.h.bf16 %v9840_v19  ;;  %v9841_v55 = vunpack.i.l.bf16 %v9840_v19 }
 0x7f8   :  { %v6295_v6 = vsel %vm3321_vm8, %v9951_v39, %v9816_v52  ;;  %v6167_v25 = vsel %vm6105_vm14, %v6102_v1, %v9832_v14  ;;  %v6166_v44 = vsel %vm6105_vm14, %v6101_v31, %v9831_v63  ;;  %v9071_v52 = vunpack.i.l.bf16 %v16205_v7  ;;  %v9954_v39 = vld [vmem:[#allocation3 + $0x339] sm:$0xff]  ;;  %v9955_v1 = vld [vmem:[#allocation3 + $0x331] sm:$0xff] }
 0x7f9   :  { %v15089_v46 = vpop.f32.mrf.mxu2  ;;  %v6359_v12 = vsel %vm6105_vm14, %v6295_v6, %v9821_v43  ;;  %v6231_v23 = vsel %vm6170_vm15, %v6166_v44, %v9836_v10  ;;  %v6232_v22 = vsel %vm6170_vm15, %v6167_v25, %v9837_v59  ;;  %v6298_v6 = vsel %vm3321_vm8, %v9954_v39, %v9842_v21 }
 0x7fa   :  { %v15091_v51 = vpop.f32.mrf.mxu1  ;;  %v6423_v37 = vsel %vm6170_vm15, %v6359_v12, %v9826_v48  ;;  %v6517_v61 = vpack.c.bf16 %v6232_v22, %v6231_v23  ;;  %v9850_v14 = vpop.permute.xlu1 %9849  ;;  %v6103_v20 = vsel %vm3321_vm8, %v9952_v13, %v9071_v52  ;;  %v6297_v19 = vsel %vm3321_vm8, %v9955_v1, %v9841_v55 }
 0x7fb   :  { %v9852_v44 = vunpack.i.h.bf16 %v9850_v14  ;;  %v9851_v4 = vunpack.i.l.bf16 %v9850_v14 }
 0x7fd   :  { %v9845_v60 = vpop.permute.xlu0 %9844 }
 0x7fe   :  { %v9855_v29 = vpop.permute.xlu2 %9854  ;;  %v9847_v59 = vunpack.i.h.bf16 %v9845_v60  ;;  %v9846_v10 = vunpack.i.l.bf16 %v9845_v60 }
 0x7ff   :  { %v9857_v17 = vunpack.i.h.bf16 %v9855_v29  ;;  %v9856_v8 = vunpack.i.l.bf16 %v9855_v29 }
 0x800   :  { %v6361_v22 = vsel %vm6105_vm14, %v6297_v19, %v9846_v10 }
 0x801   :  { %v15106_v49 = vpop.f32.mrf.mxu2  ;;  %v6168_v12 = vsel %vm6105_vm14, %v6103_v20, %v9856_v8  ;;  %v6169_v25 = vsel %vm6105_vm14, %v6104_v54, %v9857_v17 }
 0x802   :  { %v15110_v35 = vpop.f32.mrf.mxu1 }
 0x805   :  { %6920 = vmatmul.bf16.gmra.mxu1 %v6514_v53  ;;  %v6518_v53 = vpack.c.bf16 %v6424_v3, %v6423_v37  ;;  %v9860_v62 = vpop.permute.xlu0 %9859  ;;  %v6362_v37 = vsel %vm6105_vm14, %v6298_v6, %v9847_v59 }
 0x806   :  { %7089 = vmatmul.bf16.gmra.mxu2 %v6515_v0  ;;  %v7231_v0 = vpop.f32.mrf.mxu3  ;;  %v9862_v31 = vunpack.i.h.bf16 %v9860_v62  ;;  %v9861_v57 = vunpack.i.l.bf16 %v9860_v62 }
 0x808   :  { %v6233_v60 = vsel %vm6170_vm15, %v6168_v12, %v9861_v57  ;;  %v6234_v23 = vsel %vm6170_vm15, %v6169_v25, %v9862_v31  ;;  %v6879_v12 = vadd.f32 %v15050_v34, %v15091_v51 }
 0x809   :  { %v15112_v33 = vpop.f32.mrf.mxu2  ;;  %v6520_v7 = vpack.c.bf16 %v6234_v23, %v6233_v60 }
 0x80a   :  { %v15116_v32 = vpop.f32.mrf.mxu1 }
 0x80b   :  { %v6884_v39 = vadd.f32 %v15050_v34, %v15116_v32 }
 0x80e   :  { %v15142_v48 = vpop.f32.mrf.mxu3 }
 0x811   :  { %v15130_v56 = vpop.f32.mrf.mxu2 }
 0x812   :  { %v6886_v41 = vpop.f32.mrf.mxu1  ;;  %v7053_v31 = vadd.f32 %v15130_v56, %v6884_v39  ;;  %v7048_v56 = vadd.f32 %v15106_v49, %v6879_v12 }
 0x813   :  { %v6887_v10 = vadd.f32 %v15050_v34, %v6886_v41 }
 0x814   :  { %v7222_v51 = vadd.f32 %v15070_v24, %v7053_v31 }
 0x815   :  { %6925 = vmatmul.bf16.gmra.mxu1 %v6517_v61  ;;  %v6425_v61 = vsel %vm6170_vm15, %v6361_v22, %v9851_v4  ;;  %v7217_v22 = vadd.f32 %v15031_v28, %v7048_v56  ;;  %v7210_v28 = vadd.f32 %v14956_v47, %v15064_v27  ;;  %v16208_v27 = vld [vmem:[#allocation107_spill] sm:$0xff] }
 0x816   :  { %7094 = vmatmul.bf16.gmra.mxu2 %v6518_v53  ;;  %v6426_v53 = vsel %vm6170_vm15, %v6362_v37, %v9852_v44  ;;  %v15150_v52 = vpop.f32.mrf.mxu3 }
 0x817   :  { %v6521_v18 = vpack.c.bf16 %v6426_v53, %v6425_v61  ;;  %v7315_v53 = vmax.f32 %v7217_v22, 0.0 }
 0x819   :  { %v7055_v43 = vpop.f32.mrf.mxu2 }
 0x81a   :  { %v6888_v63 = vpop.f32.mrf.mxu1  ;;  %v7056_v6 = vadd.f32 %v7055_v43, %v6887_v10  ;;  %v16209_v10 = vld [vmem:[#allocation157_spill] sm:$0xff] }
 0x81b   :  { %v6889_v17 = vadd.f32 %v15050_v34, %v6888_v63  ;;  %v6882_v63 = vadd.f32 %v15050_v34, %v15110_v35 }
 0x81d   :  { %v7051_v25 = vadd.f32 %v15112_v33, %v6882_v63 }
 0x81e   :  { %v15156_v54 = vpop.f32.mrf.mxu3 }
 0x81f   :  { %v7220_v23 = vadd.f32 %v15059_v38, %v7051_v25  ;;  %v7212_v38 = vadd.f32 %v14986_v15, %v15081_v36 }
 0x821   :  { %v7057_v3 = vpop.f32.mrf.mxu2  ;;  %v7316_v37 = vmax.f32 %v7220_v23, 0.0 }
 0x822   :  { %v6891_v29 = vpop.f32.mrf.mxu1  ;;  %v7058_v13 = vadd.f32 %v7057_v3, %v6889_v17  ;;  %v16207_v17 = vld [vmem:[#allocation41_spill] sm:$0xff] }
 0x823   :  { %v6892_v62 = vadd.f32 %v15050_v34, %v6891_v29 }
 0x824   :  { %v7227_v41 = vadd.f32 %v15104_v5, %v7058_v13  ;;  %v7200_v13 = vadd.f32 %v16209_v10, %v15001_v42 }
 0x825   :  { %6930 = vmatmul.bf16.gmra.mxu1 %v6520_v7  ;;  %v7313_v7 = vmax.f32 %v7212_v38, 0.0 }
 0x826   :  { %7099 = vmatmul.bf16.gmra.mxu2 %v6521_v18  ;;  %v7319_v4 = vmax.f32 %v7227_v41, 0.0  ;;  %v16206_v18 = vld [vmem:[#allocation42_spill] sm:$0xff] }
 0x829   :  { %v7060_v21 = vpop.f32.mrf.mxu2 }
 0x82a   :  { %v6893_v55 = vpop.f32.mrf.mxu1  ;;  %v7061_v8 = vadd.f32 %v7060_v21, %v6892_v62  ;;  %v7207_v21 = vadd.f32 %v16206_v18, %v15057_v45  ;;  %v7312_v62 = vmax.f32 %v7210_v28, 0.0 }
 0x82b   :  { %v6894_v14 = vadd.f32 %v15050_v34, %v6893_v55 }
 0x82c   :  { %v7230_v19 = vadd.f32 %v15118_v16, %v7061_v8  ;;  %v6877_v16 = vadd.f32 %v15050_v34, %v15083_v50  ;;  %v7317_v50 = vmax.f32 %v7222_v51, 0.0  ;;  %v7205_v8 = vadd.f32 %v16207_v17, %v15037_v26 }
 0x82d   :  { %v7311_v47 = vmax.f32 %v7207_v21, 0.0 }
 0x82e   :  { %v7320_v32 = vmax.f32 %v7230_v19, 0.0  ;;  %v7046_v33 = vadd.f32 %v15089_v46, %v6877_v16  ;;  %v7310_v45 = vmax.f32 %v7205_v8, 0.0 }
 0x830   :  { %v7215_v3 = vadd.f32 %v15017_v11, %v7046_v33 }
 0x831   :  { %v7062_v59 = vpop.f32.mrf.mxu2 }
 0x832   :  { %v7063_v20 = vadd.f32 %v7062_v59, %v6894_v14  ;;  %v6896_v30 = vpop.f32.mrf.mxu1  ;;  %v7314_v29 = vmax.f32 %v7215_v3, 0.0  ;;  %v7202_v59 = vadd.f32 %v16208_v27, %v15028_v2 }
 0x833   :  { %v6897_v44 = vadd.f32 %v15050_v34, %v6896_v30  ;;  %v16210_v30 = vld [vmem:[#allocation105_spill] sm:$0xff] }
 0x834   :  { %v7232_v1 = vadd.f32 %v7231_v0, %v7063_v20  ;;  %v7225_v0 = vadd.f32 %v15085_v58, %v7056_v6  ;;  %v15178_v58 = vpop.f32.mrf.mxu3  ;;  %v7309_v20 = vmax.f32 %v7202_v59, 0.0  ;;  %v7197_v39 = vadd.f32 %v16210_v30, %v14980_v9 }
 0x835   :  { %v7308_v6 = vmax.f32 %v7200_v13, 0.0 }
 0x836   :  { %v7321_v57 = vmax.f32 %v7232_v1, 0.0  ;;  %v7318_v60 = vmax.f32 %v7225_v0, 0.0  ;;  %v16211_v1 = vld [vmem:[#allocation106_spill] sm:$0xff]  ;;  %v7307_v42 = vmax.f32 %v7197_v39, 0.0 }
 0x837   :  { %v7195_v19 = vadd.f32 %v16211_v1, %v14953_v40 }
 0x838   :  { %7389 = vmatpush.msrb.mxu1 %v7321_v57 }
 0x839   :  { %v7065_v35 = vpop.f32.mrf.mxu2  ;;  %v7306_v41 = vmax.f32 %v7195_v19, 0.0 }
 0x83a   :  { %v15173_v43 = vadd.f32 %v7065_v35, %v6897_v44  ;;  %v6898_v5 = vpop.f32.mrf.mxu1  ;;  %7390 = vmatpush.msrb.mxu1 %v7320_v32 }
 0x83b   :  { %v6899_v49 = vadd.f32 %v15050_v34, %v6898_v5 }
 0x83c   :  { %7391 = vmatpush.msrb.mxu1 %v7319_v4  ;;  %v15191_v11 = vpop.f32.mrf.mxu3 }
 0x83e   :  { %7392 = vmatpush.msrb.mxu1 %v7318_v60 }
 0x840   :  { %7393 = vmatpush.msrb.mxu1 %v7317_v50 }
 0x841   :  { %v7067_v61 = vpop.f32.mrf.mxu2 }
 0x842   :  { %v15183_v24 = vadd.f32 %v7067_v61, %v6899_v49  ;;  %v6901_v46 = vpop.f32.mrf.mxu1  ;;  %7394 = vmatpush.msrb.mxu1 %v7316_v37 }
 0x843   :  { %v6902_v55 = vadd.f32 %v15050_v34, %v6901_v46 }
 0x844   :  { %7395 = vmatpush.msrb.mxu1 %v7315_v53  ;;  %v15207_v63 = vpop.f32.mrf.mxu3 }
 0x846   :  { %7396 = vmatpush.msrb.mxu1 %v7314_v29 }
 0x848   :  { %7397 = vmatpush.msrb.mxu1 %v7313_v7 }
 0x849   :  { %v7070_v15 = vpop.f32.mrf.mxu2 }
 0x84a   :  { %v15196_v36 = vadd.f32 %v7070_v15, %v6902_v55  ;;  %v6903_v14 = vpop.f32.mrf.mxu1  ;;  %7398 = vmatpush.msrb.mxu1 %v7312_v62 }
 0x84b   :  { %v6904_v26 = vadd.f32 %v15050_v34, %v6903_v14 }
 0x84c   :  { %7399 = vmatpush.msrb.mxu1 %v7311_v47  ;;  %v15214_v32 = vpop.f32.mrf.mxu3 }
 0x84e   :  { %7400 = vmatpush.msrb.mxu1 %v7310_v45 }
 0x850   :  { %7401 = vmatpush.msrb.mxu1 %v7309_v20  ;;  %v7338_v20 = vld [vmem:[%s15266_s5] sm:$0xff]  ;;  %s9993_s5 = smov [#allocation4]  }
 0x851   :  { %v7072_v2 = vpop.f32.mrf.mxu2  ;;  %7340 = vst [vmem:[#allocation1] ss:$4 sm:$0xff] %v7338_v20  ;;  %s7436_s17 = sshll.u32 %s9993_s5, 4  ;;  %s7437_s17 = int_to_ptr.vmem [resolvable:$true] %s7436_s17 }
 0x852   :  { %v15209_v31 = vadd.f32 %v7072_v2, %v6904_v26  ;;  %v6906_v57 = vpop.f32.mrf.mxu1  ;;  %7402 = vmatpush.msrb.mxu1 %v7308_v6 }
 0x853   :  { %v6907_v9 = vadd.f32 %v15050_v34, %v6906_v57 }
 0x854   :  { %7403 = vmatpush.msrb.mxu1 %v7307_v42  ;;  %v15219_v56 = vpop.f32.mrf.mxu3 }
 0x856   :  { %7404 = vmatpush.msrb.mxu1 %v7306_v41 }
 0x859   :  { %v7075_v12 = vpop.f32.mrf.mxu2 }
 0x85a   :  { %v15212_v25 = vadd.f32 %v7075_v12, %v6907_v9  ;;  %v6908_v44 = vpop.f32.mrf.mxu1 }
 0x85b   :  { %v6909_v40 = vadd.f32 %v15050_v34, %v6908_v44 }
 0x85c   :  { %v7254_v60 = vpop.f32.mrf.mxu3 }
 0x861   :  { %v7077_v0 = vpop.f32.mrf.mxu2 }
 0x862   :  { %v15217_v16 = vadd.f32 %v7077_v0, %v6909_v40  ;;  %v6911_v35 = vpop.f32.mrf.mxu1  ;;  %v7341_v40 = vld.sshfl [vmem:[#allocation1] sm:$0xff pattern:$0x73625140] }
 0x863   :  { %v6912_v5 = vadd.f32 %v15050_v34, %v6911_v35  ;;  %7365 = vmatmul.f32.vlgmr.msrb.gmra.mxu3 %v7341_v40 }
 0x864   :  { %v7256_v3 = vpop.f32.mrf.mxu3 }
 0x869   :  { %v7080_v4 = vpop.f32.mrf.mxu2 }
 0x86a   :  { %v15222_v51 = vadd.f32 %v7080_v4, %v6912_v5  ;;  %v6913_v33 = vpop.f32.mrf.mxu1 }
 0x86b   :  { %v6914_v23 = vadd.f32 %v15050_v34, %v6913_v33  ;;  %v7342_v33 = vld.sshfl [vmem:[#allocation1 + $0x8] sm:$0xff pattern:$0x73625140] }
 0x86c   :  { %v7259_v7 = vpop.f32.mrf.mxu3  ;;  %7385 = vmatmul.f32.vlgmr.msrb.gmra.mxu0 %v7342_v33 }
 0x871   :  { %v7082_v50 = vpop.f32.mrf.mxu2 }
 0x872   :  { %v15225_v22 = vadd.f32 %v7082_v50, %v6914_v23  ;;  %v6916_v49 = vpop.f32.mrf.mxu1 }
 0x873   :  { %v6917_v37 = vadd.f32 %v15050_v34, %v6916_v49 }
 0x874   :  { %v7261_v55 = vpop.f32.mrf.mxu3 }
 0x879   :  { %v7085_v61 = vpop.f32.mrf.mxu2 }
 0x87a   :  { %v7086_v46 = vadd.f32 %v7085_v61, %v6917_v37  ;;  %v6918_v53 = vpop.f32.mrf.mxu1 }
 0x87b   :  { %v6919_v23 = vadd.f32 %v15050_v34, %v6918_v53  ;;  %v7252_v53 = vadd.f32 %v15219_v56, %v15225_v22  ;;  %v7242_v56 = vadd.f32 %v15178_v58, %v15209_v31  ;;  %v7344_v58 = vld.sshfl [vmem:[#allocation1 + $0x18] sm:$0xff pattern:$0x73625140] }
 0x87c   :  { %v15228_v38 = vadd.f32 %v7254_v60, %v7086_v46  ;;  %v7264_v8 = vpop.f32.mrf.mxu3  ;;  %v7343_v60 = vld.sshfl [vmem:[#allocation1 + $0x10] sm:$0xff pattern:$0x73625140] }
 0x87d   :  { %7405 = vmatmul.f32.vlgmr.msrb.gmra.mxu1 %v7343_v60 }
 0x881   :  { %v7087_v29 = vpop.f32.mrf.mxu2 }
 0x882   :  { %v6921_v28 = vpop.f32.mrf.mxu1  ;;  %v7088_v61 = vadd.f32 %v7087_v29, %v6919_v23  ;;  %v7250_v29 = vadd.f32 %v15214_v32, %v15222_v51  ;;  %v7240_v32 = vadd.f32 %v15156_v54, %v15196_v36  ;;  %v7325_v51 = vmax.f32 %v7242_v56, 0.0 }
 0x883   :  { %v6922_v0 = vadd.f32 %v15050_v34, %v6921_v28 }
 0x884   :  { %v7266_v47 = vpop.f32.mrf.mxu3 }
 0x889   :  { %v7090_v18 = vpop.f32.mrf.mxu2 }
 0x88a   :  { %v6923_v21 = vpop.f32.mrf.mxu1  ;;  %v7091_v50 = vadd.f32 %v7090_v18, %v6922_v0  ;;  %v7330_v18 = vmax.f32 %v15228_v38, 0.0 }
 0x88b   :  { %v6924_v41 = vadd.f32 %v15050_v34, %v6923_v21 }
 0x88c   :  { %v7269_v45 = vpop.f32.mrf.mxu3 }
 0x891   :  { %v7092_v62 = vpop.f32.mrf.mxu2 }
 0x892   :  { %v6926_v17 = vpop.f32.mrf.mxu1  ;;  %v7093_v35 = vadd.f32 %v7092_v62, %v6924_v41  ;;  %v7260_v62 = vadd.f32 %v7259_v7, %v7091_v50  ;;  %v7247_v7 = vadd.f32 %v15207_v63, %v15217_v16  ;;  %v7237_v63 = vadd.f32 %v15150_v52, %v15183_v24 }
 0x893   :  { %v6927_v19 = vadd.f32 %v15050_v34, %v6926_v17  ;;  %v7324_v16 = vmax.f32 %v7240_v32, 0.0 }
 0x894   :  { %v7271_v42 = vpop.f32.mrf.mxu3  ;;  %v7262_v21 = vadd.f32 %v7261_v55, %v7093_v35  ;;  %v7329_v55 = vmax.f32 %v7252_v53, 0.0 }
 0x896   :  { %v7333_v17 = vmax.f32 %v7262_v21, 0.0 }
 0x899   :  { %v7095_v15 = vpop.f32.mrf.mxu2 }
 0x89a   :  { %v6928_v14 = vpop.f32.mrf.mxu1  ;;  %v7096_v9 = vadd.f32 %v7095_v15, %v6927_v19  ;;  %v7257_v15 = vadd.f32 %v7256_v3, %v7088_v61  ;;  %v7328_v3 = vmax.f32 %v7250_v29, 0.0 }
 0x89b   :  { %v6929_v39 = vadd.f32 %v15050_v34, %v6928_v14  ;;  %v7332_v14 = vmax.f32 %v7260_v62, 0.0 }
 0x89c   :  { %v7265_v37 = vadd.f32 %v7264_v8, %v7096_v9  ;;  %v7245_v8 = vadd.f32 %v15191_v11, %v15212_v25  ;;  %v7235_v11 = vadd.f32 %v15142_v48, %v15173_v43  ;;  %v7323_v25 = vmax.f32 %v7237_v63, 0.0 }
 0x89e   :  { %v7334_v28 = vmax.f32 %v7265_v37, 0.0  ;;  %v7326_v22 = vmax.f32 %v7245_v8, 0.0  ;;  %v7322_v38 = vmax.f32 %v7235_v11, 0.0 }
 0x8a1   :  { %v7097_v27 = vpop.f32.mrf.mxu2 }
 0x8a2   :  { %v6931_v59 = vpop.f32.mrf.mxu1  ;;  %v7098_v2 = vadd.f32 %v7097_v27, %v6929_v39 }
 0x8a3   :  { %v6932_v30 = vadd.f32 %v15050_v34, %v6931_v59 }
 0x8a4   :  { %v7267_v4 = vadd.f32 %v7266_v47, %v7098_v2  ;;  %v7327_v47 = vmax.f32 %v7247_v7, 0.0 }
 0x8a6   :  { %v7335_v46 = vmax.f32 %v7267_v4, 0.0 }
 0x8a9   :  { %v7100_v10 = vpop.f32.mrf.mxu2 }
 0x8aa   :  { %v6933_v13 = vpop.f32.mrf.mxu1  ;;  %v7101_v26 = vadd.f32 %v7100_v10, %v6932_v30 }
 0x8ab   :  { %v6934_v6 = vadd.f32 %v15050_v34, %v6933_v13  ;;  %v7331_v34 = vmax.f32 %v7257_v15, 0.0 }
 0x8ac   :  { %v7270_v44 = vadd.f32 %v7269_v45, %v7101_v26 }
 0x8ae   :  { %v7336_v49 = vmax.f32 %v7270_v44, 0.0 }
 0x8b1   :  { %v7102_v1 = vpop.f32.mrf.mxu2 }
 0x8b2   :  { %v7103_v57 = vadd.f32 %v7102_v1, %v6934_v6 }
 0x8b4   :  { %v7272_v12 = vadd.f32 %v7271_v42, %v7103_v57 }
 0x8b6   :  { %v7337_v5 = vmax.f32 %v7272_v12, 0.0 }
 0x8b8   :  { %7409 = vmatpush.msrb.mxu2 %v7337_v5 }
 0x8ba   :  { %7410 = vmatpush.msrb.mxu2 %v7336_v49 }
 0x8bc   :  { %7411 = vmatpush.msrb.mxu2 %v7335_v46 }
 0x8be   :  { %7412 = vmatpush.msrb.mxu2 %v7334_v28 }
 0x8c0   :  { %7413 = vmatpush.msrb.mxu2 %v7333_v17 }
 0x8c2   :  { %7414 = vmatpush.msrb.mxu2 %v7332_v14 }
 0x8c4   :  { %7415 = vmatpush.msrb.mxu2 %v7331_v34 }
 0x8c6   :  { %7416 = vmatpush.msrb.mxu2 %v7330_v18 }
 0x8c8   :  { %7417 = vmatpush.msrb.mxu2 %v7329_v55 }
 0x8ca   :  { %7418 = vmatpush.msrb.mxu2 %v7328_v3 }
 0x8cc   :  { %7419 = vmatpush.msrb.mxu2 %v7327_v47 }
 0x8ce   :  { %7420 = vmatpush.msrb.mxu2 %v7326_v22 }
 0x8d0   :  { %7421 = vmatpush.msrb.mxu2 %v7325_v51 }
 0x8d2   :  { %7422 = vmatpush.msrb.mxu2 %v7324_v16 }
 0x8d4   :  { %7423 = vmatpush.msrb.mxu2 %v7323_v25 }
 0x8d6   :  { %7424 = vmatpush.msrb.mxu2 %v7322_v38 }
 0x8d7   :  { %7425 = vmatmul.f32.vlgmr.msrb.gmra.mxu2 %v7344_v58 }
 0x8e6   :  { %v7366_v31 = vpop.f32.mrf.mxu3 }
 0x8e9   :  { %v7386_v27 = vpop.f32.mrf.mxu0 }
 0x8ea   :  { %v7387_v54 = vadd.f32 %v7386_v27, %v7366_v31 }
 0x8fa   :  { %v7406_v36 = vpop.f32.mrf.mxu1 }
 0x8fb   :  { %v7407_v59 = vadd.f32 %v7406_v36, %v7387_v54 }
 0x95a   :  { %v7426_v45 = vpop.f32.mrf.mxu2 }
 0x95b   :  { %v7427_v48 = vadd.f32 %v7426_v45, %v7407_v59 }
 0x95d   :  { %v7429_v52 = vmul.f32 0.00390625, %v7427_v48 }
 0x95f   :  { %7430 = vst.msk [vmem:[#allocation4] sm:$0x3] %vm3778_vm13, %v7429_v52 }
 0x960   :  { %7441 = dma.vmem_to_hbm [thread:$0]  %s7437_s17, 32, %s7439_s20, [#allocation5]  }
 0x961   :  { %9980 = dma.done.wait [#allocation5], 32  }
 0x962   :  { %9981 = vsyncadd [#allocation5], 4294967264 }
 0x963   :  { %7446 = vsyncpa [#allocation5], 1 }

</bundles_post_ra>
